<compile_context>
chip_gen: v7x
topology: tpu7x:2x2x1
jax: 0.10.0
libtpu: 0.0.40
codegen_flags: <defaults>
</compile_context>

<pallas_src>
import functools

import jax
import jax.numpy as jnp
import numpy as np
from jax.experimental import pallas as pl
from jax.experimental.pallas import tpu as pltpu

EPS = 1e-5


# --------------------------------------------------------------------------
# Kernels
# --------------------------------------------------------------------------
def _conv3x3_stats_kernel(xpad_ref, w_ref, y_ref, stats_ref, *, H, W, Cin, Cout):
    """conv3x3 (pad=1) on one zero-padded image via 9 shifted matmuls.

    Also emits per-image BN partial statistics (sum, sum of squares) computed
    from the f32 accumulator (single pass: var = E[y^2] - mean^2 later).
    """
    acc = jnp.zeros((H * W, Cout), jnp.float32)
    for kh in range(3):
        for kw in range(3):
            patch = xpad_ref[:, kh:kh + H, kw:kw + W, :].reshape(H * W, Cin)
            tap = (kh * 3 + kw) * Cin
            acc += jnp.dot(patch, w_ref[tap:tap + Cin, :],
                           preferred_element_type=jnp.float32)
    ssum = jnp.sum(acc, axis=0, keepdims=True)           # (1, Cout)
    ssq = jnp.sum(acc * acc, axis=0, keepdims=True)      # (1, Cout)
    stats_ref[...] = jnp.concatenate([ssum, ssq], axis=0).reshape(1, 2, Cout)
    y_ref[...] = acc.reshape(1, H, W, Cout).astype(y_ref.dtype)


def _bn_relu_conv3x3_stats_kernel(y1_ref, scale_ref, shift_ref, w_ref,
                                  y2_ref, stats_ref, act_pad, *, H, W, P):
    """Apply folded bn1 + relu to one image, then conv3x3 (pad=1) + stats.

    The bn1+relu'd activation is written into a zero-initialized VMEM halo
    scratch so conv padding is applied in activation space (post-relu zeros).
    """
    a = y1_ref[...].astype(jnp.float32)                       # (1, H, W, P)
    a = jnp.maximum(a * scale_ref[...] + shift_ref[...], 0.0)
    act_pad[...] = jnp.zeros_like(act_pad)
    act_pad[1:H + 1, 1:W + 1, :] = a.reshape(H, W, P).astype(act_pad.dtype)

    acc = jnp.zeros((H * W, P), jnp.float32)
    for kh in range(3):
        for kw in range(3):
            patch = act_pad[kh:kh + H, kw:kw + W, :].reshape(H * W, P)
            tap = (kh * 3 + kw) * P
            acc += jnp.dot(patch, w_ref[tap:tap + P, :],
                           preferred_element_type=jnp.float32)
    ssum = jnp.sum(acc, axis=0, keepdims=True)
    ssq = jnp.sum(acc * acc, axis=0, keepdims=True)
    stats_ref[...] = jnp.concatenate([ssum, ssq], axis=0).reshape(1, 2, P)
    y2_ref[...] = acc.reshape(1, H, W, P).astype(y2_ref.dtype)


def _bn_add_relu_kernel(y2_ref, res_ref, scale_ref, shift_ref, o_ref):
    """Row-tiled, lane-dense epilogue: bn2 (folded) + residual add + relu."""
    y = y2_ref[...] * scale_ref[...] + shift_ref[...] + res_ref[...]
    o_ref[...] = jnp.maximum(y, 0.0).astype(o_ref.dtype)


# --------------------------------------------------------------------------
# Small host-side helpers
# --------------------------------------------------------------------------
def _fold_bn(stats, gamma, beta, count):
    """Fold batch stats + affine into per-channel scale/shift (f32)."""
    s = jnp.sum(stats, axis=0)                                # (2, C)
    mean = s[0] / count
    var = jnp.maximum(s[1] / count - mean * mean, 0.0)
    scale = gamma.astype(jnp.float32) * jax.lax.rsqrt(var + EPS)
    shift = beta.astype(jnp.float32) - mean * scale
    return scale, shift


def _lane_fold(rows_spatial, channels):
    """Fold spatial positions into the lane axis so the epilogue's last dim is a
    multiple of 128 lanes (lane-dense stores)."""
    for target in (1024, 512, 256, 128):
        if target % channels == 0:
            f = target // channels
            if f >= 1 and rows_spatial % f == 0 and (rows_spatial // f) >= 8:
                return f
    return 1


def _row_tile(rows):
    for cand in (512, 256, 128, 64, 32, 16, 8):
        if rows % cand == 0:
            return cand
    return rows


def _vmem_limit(est_bytes):
    # >= 16 MiB slack for the tiny test shapes, <= 48 MiB so the request stays
    # well inside v7x's 64 MiB physical VMEM (v5e/v6e have 128 MiB).
    return int(min(max(est_bytes + (8 << 20), 16 << 20), 48 << 20))


# --------------------------------------------------------------------------
# Forward pass
# --------------------------------------------------------------------------
@functools.partial(jax.jit, static_argnames=("mm_dtype",))
def basic_block_forward(x_nchw, params, *, mm_dtype=jnp.bfloat16):
    w1, g1, b1 = params["w1"], params["g1"], params["b1"]
    w2, g2, b2 = params["w2"], params["g2"], params["b2"]

    N, C, H, W = x_nchw.shape
    P = w1.shape[0]                              # planes (torch OIHW)
    assert w1.shape == (P, C, 3, 3) and w2.shape == (P, P, 3, 3)
    # BasicBlock (expansion=1) with downsample=None needs inplanes == planes.
    assert P == C

    x_nhwc = jnp.transpose(x_nchw, (0, 2, 3, 1)).astype(jnp.float32)
    x_pad = jnp.pad(x_nhwc, ((0, 0), (1, 1), (1, 1), (0, 0))).astype(mm_dtype)

    # weights as (tap*Cin, Cout) matrices, tap-major then cin.
    w1m = jnp.transpose(w1, (2, 3, 1, 0)).reshape(9 * C, P).astype(mm_dtype)
    w2m = jnp.transpose(w2, (2, 3, 1, 0)).reshape(9 * P, P).astype(mm_dtype)

    bpe = jnp.dtype(mm_dtype).itemsize
    cnt = float(N * H * W)

    # ---- pass 1: conv1 (3x3) + per-image bn1 partial stats ---------------
    est1 = (2 * ((H + 2) * (W + 2) * C + 2 * H * W * P) * bpe
            + 9 * C * P * bpe + H * W * P * 4)
    y1_raw, stats1 = pl.pallas_call(
        functools.partial(_conv3x3_stats_kernel, H=H, W=W, Cin=C, Cout=P),
        out_shape=(jax.ShapeDtypeStruct((N, H, W, P), mm_dtype),
                   jax.ShapeDtypeStruct((N, 2, P), jnp.float32)),
        grid=(N,),
        in_specs=[
            pl.BlockSpec((1, H + 2, W + 2, C), lambda n: (n, 0, 0, 0)),
            pl.BlockSpec((9 * C, P), lambda n: (0, 0)),
        ],
        out_specs=(
            pl.BlockSpec((1, H, W, P), lambda n: (n, 0, 0, 0)),
            pl.BlockSpec((1, 2, P), lambda n: (n, 0, 0)),
        ),
        compiler_params=pltpu.CompilerParams(
            dimension_semantics=("parallel",),
            vmem_limit_bytes=_vmem_limit(est1)),
    )(x_pad, w1m)

    scale1, shift1 = _fold_bn(stats1, g1, b1, cnt)

    # ---- pass 2: bn1+relu (folded) + conv2 (3x3) + bn2 partial stats ------
    est2 = (2 * (H * W * P * bpe + 2 * H * W * P * 4)
            + (H + 2) * (W + 2) * P * bpe + 9 * P * P * bpe)
    y2_raw, stats2 = pl.pallas_call(
        functools.partial(_bn_relu_conv3x3_stats_kernel, H=H, W=W, P=P),
        out_shape=(jax.ShapeDtypeStruct((N, H, W, P), jnp.float32),
                   jax.ShapeDtypeStruct((N, 2, P), jnp.float32)),
        grid=(N,),
        in_specs=[
            pl.BlockSpec((1, H, W, P), lambda n: (n, 0, 0, 0)),
            pl.BlockSpec((1, P), lambda n: (0, 0)),
            pl.BlockSpec((1, P), lambda n: (0, 0)),
            pl.BlockSpec((9 * P, P), lambda n: (0, 0)),
        ],
        out_specs=(
            pl.BlockSpec((1, H, W, P), lambda n: (n, 0, 0, 0)),
            pl.BlockSpec((1, 2, P), lambda n: (n, 0, 0)),
        ),
        scratch_shapes=[pltpu.VMEM((H + 2, W + 2, P), mm_dtype)],
        compiler_params=pltpu.CompilerParams(
            dimension_semantics=("parallel",),
            vmem_limit_bytes=_vmem_limit(est2)),
    )(y1_raw, scale1.reshape(1, P), shift1.reshape(1, P), w2m)

    scale2, shift2 = _fold_bn(stats2, g2, b2, cnt)

    # ---- pass 3: bn2 (folded) + residual + relu, row-tiled & lane-dense ---
    R = N * H * W
    fold = _lane_fold(R, P)
    L = fold * P                              # lane-dense last dim
    rows = R // fold
    tm = _row_tile(rows)

    y2_flat = y2_raw.reshape(rows, L)
    res_flat = x_nhwc.reshape(rows, L)
    scale2_t = jnp.tile(scale2.reshape(1, P), (1, fold))
    shift2_t = jnp.tile(shift2.reshape(1, P), (1, fold))

    est3 = 2 * 3 * tm * L * 4 + 2 * L * 4
    out_flat = pl.pallas_call(
        _bn_add_relu_kernel,
        out_shape=jax.ShapeDtypeStruct((rows, L), jnp.float32),
        grid=(rows // tm,),
        in_specs=[
            pl.BlockSpec((tm, L), lambda i: (i, 0)),
            pl.BlockSpec((tm, L), lambda i: (i, 0)),
            pl.BlockSpec((1, L), lambda i: (0, 0)),
            pl.BlockSpec((1, L), lambda i: (0, 0)),
        ],
        out_specs=pl.BlockSpec((tm, L), lambda i: (i, 0)),
        compiler_params=pltpu.CompilerParams(
            dimension_semantics=("parallel",),
            vmem_limit_bytes=_vmem_limit(est3)),
    )(y2_flat, res_flat, scale2_t, shift2_t)

    out = out_flat.reshape(N, H, W, P)
    # NOTE: if the consumer accepts NHWC, this transpose (and the input one)
    # can be dropped to save one full HBM read+write of the activations.
    return jnp.transpose(out, (0, 3, 1, 2))


# --------------------------------------------------------------------------
# Pure-JAX/XLA reference (mirrors the PyTorch module, NCHW, f32)
# --------------------------------------------------------------------------
def reference_forward(x, params):
    def conv(x, w):
        return jax.lax.conv_general_dilated(
            x, w, (1, 1), [(1, 1), (1, 1)],
            dimension_numbers=("NCHW", "OIHW", "NCHW"),
            precision=jax.lax.Precision.HIGHEST)

    def bn(x, g, b):
        mean = jnp.mean(x, axis=(0, 2, 3), keepdims=True)
        var = jnp.mean((x - mean) ** 2, axis=(0, 2, 3), keepdims=True)
        return ((x - mean) * jax.lax.rsqrt(var + EPS)
                * g.reshape(1, -1, 1, 1) + b.reshape(1, -1, 1, 1))

    out = jnp.maximum(bn(conv(x, params["w1"]), params["g1"], params["b1"]), 0.0)
    out = bn(conv(out, params["w2"]), params["g2"], params["b2"])
    return jnp.maximum(out + x, 0.0)


if __name__ == "__main__":
    key = jax.random.PRNGKey(0)
    ks = jax.random.split(key, 7)

    N, H, W = 2, 16, 16
    planes = 16
    inplanes = planes            # BasicBlock expansion=1, downsample=None

    x = jax.random.normal(ks[0], (N, inplanes, H, W), dtype=jnp.float32)
    params = dict(
        w1=0.2 * jax.random.normal(ks[1], (planes, inplanes, 3, 3), jnp.float32),
        g1=1.0 + 0.1 * jax.random.normal(ks[2], (planes,), jnp.float32),
        b1=0.1 * jax.random.normal(ks[3], (planes,), jnp.float32),
        w2=0.2 * jax.random.normal(ks[4], (planes, planes, 3, 3), jnp.float32),
        g2=1.0 + 0.1 * jax.random.normal(ks[5], (planes,), jnp.float32),
        b2=0.1 * jax.random.normal(ks[6], (planes,), jnp.float32),
    )

    ref = jax.block_until_ready(reference_forward(x, params))

    # bf16 MXU operands (the perf-recommended config) => bf16-level tolerance,
    # amplified slightly by the batch-norm normalizations; logic bugs would
    # produce O(1) errors and still fail this check.
    out_bf16 = jax.block_until_ready(
        basic_block_forward(x, params, mm_dtype=jnp.bfloat16))
    assert out_bf16.shape == (N, planes, H, W) and out_bf16.dtype == jnp.float32
    np.testing.assert_allclose(np.asarray(out_bf16), np.asarray(ref),
                               rtol=5e-2, atol=5e-2)

    # f32 matmul path (same kernels, mm_dtype knob) for extra coverage.
    out_f32 = jax.block_until_ready(
        basic_block_forward(x, params, mm_dtype=jnp.float32))
    np.testing.assert_allclose(np.asarray(out_f32), np.asarray(ref),
                               rtol=5e-2, atol=5e-2)

    print("KERNEL_OK")
</pallas_src>

<mosaic_0001>
module attributes {stable_mosaic.version = 11 : i64} {
  func.func @_conv3x3_stats_kernel(%arg0: i32, %arg1: memref<1x18x18x16xbf16, #tpu.memory_space<vmem>>, %arg2: memref<144x16xbf16, #tpu.memory_space<vmem>>, %arg3: memref<1x16x16x16xbf16, #tpu.memory_space<vmem>>, %arg4: memref<1x2x16xf32, #tpu.memory_space<vmem>>) attributes {dimension_semantics = [#tpu.dimension_semantics<parallel>], iteration_bounds = array<i64: 2>, scalar_prefetch = 0 : i64, scratch_operands = 0 : i64, tpu.core_type = #tpu.core_type<tc>, window_params = [{transform_indices = @transform_0, window_bounds = array<i64: 1, 18, 18, 16>}, {pipeline_mode = #tpu.pipeline_mode<synchronous>, transform_indices = @transform_1, window_bounds = array<i64: 144, 16>}, {transform_indices = @transform_2, window_bounds = array<i64: 1, 16, 16, 16>}, {transform_indices = @transform_3, window_bounds = array<i64: 1, 2, 16>}]} {
    %cst = arith.constant 0.000000e+00 : f32
    %0 = vector.broadcast %cst : f32 to vector<256x16xf32>
    %c0 = arith.constant 0 : index
    %c0_0 = arith.constant 0 : index
    %c0_1 = arith.constant 0 : index
    %c0_2 = arith.constant 0 : index
    %1 = vector.load %arg1[%c0, %c0_0, %c0_1, %c0_2] : memref<1x18x18x16xbf16, #tpu.memory_space<vmem>>, vector<1x16x16x16xbf16>
    %2 = vector.shape_cast %1 : vector<1x16x16x16xbf16> to vector<256x16xbf16>
    %c0_3 = arith.constant 0 : index
    %c0_4 = arith.constant 0 : index
    %3 = vector.load %arg2[%c0_3, %c0_4] : memref<144x16xbf16, #tpu.memory_space<vmem>>, vector<16x16xbf16>
    %cst_5 = arith.constant dense<0.000000e+00> : vector<256x16xf32>
    %4 = tpu.matmul %2, %3, %cst_5 {dimension_numbers = #tpu.dot_dimension_numbers<[1], [0], [0], [1], [0, 0, 1, 1], [], []>} : vector<256x16xbf16>, vector<16x16xbf16>, vector<256x16xf32> -> vector<256x16xf32>
    %5 = arith.addf %0, %4 : vector<256x16xf32>
    %c0_6 = arith.constant 0 : index
    %c0_7 = arith.constant 0 : index
    %c1 = arith.constant 1 : index
    %c0_8 = arith.constant 0 : index
    %6 = vector.load %arg1[%c0_6, %c0_7, %c1, %c0_8] : memref<1x18x18x16xbf16, #tpu.memory_space<vmem>>, vector<1x16x16x16xbf16>
    %7 = vector.shape_cast %6 : vector<1x16x16x16xbf16> to vector<256x16xbf16>
    %c16 = arith.constant 16 : index
    %c0_9 = arith.constant 0 : index
    %8 = vector.load %arg2[%c16, %c0_9] : memref<144x16xbf16, #tpu.memory_space<vmem>>, vector<16x16xbf16>
    %cst_10 = arith.constant dense<0.000000e+00> : vector<256x16xf32>
    %9 = tpu.matmul %7, %8, %cst_10 {dimension_numbers = #tpu.dot_dimension_numbers<[1], [0], [0], [1], [0, 0, 1, 1], [], []>} : vector<256x16xbf16>, vector<16x16xbf16>, vector<256x16xf32> -> vector<256x16xf32>
    %10 = arith.addf %5, %9 : vector<256x16xf32>
    %c0_11 = arith.constant 0 : index
    %c0_12 = arith.constant 0 : index
    %c2 = arith.constant 2 : index
    %c0_13 = arith.constant 0 : index
    %11 = vector.load %arg1[%c0_11, %c0_12, %c2, %c0_13] : memref<1x18x18x16xbf16, #tpu.memory_space<vmem>>, vector<1x16x16x16xbf16>
    %12 = vector.shape_cast %11 : vector<1x16x16x16xbf16> to vector<256x16xbf16>
    %c32 = arith.constant 32 : index
    %c0_14 = arith.constant 0 : index
    %13 = vector.load %arg2[%c32, %c0_14] : memref<144x16xbf16, #tpu.memory_space<vmem>>, vector<16x16xbf16>
    %cst_15 = arith.constant dense<0.000000e+00> : vector<256x16xf32>
    %14 = tpu.matmul %12, %13, %cst_15 {dimension_numbers = #tpu.dot_dimension_numbers<[1], [0], [0], [1], [0, 0, 1, 1], [], []>} : vector<256x16xbf16>, vector<16x16xbf16>, vector<256x16xf32> -> vector<256x16xf32>
    %15 = arith.addf %10, %14 : vector<256x16xf32>
    %c0_16 = arith.constant 0 : index
    %c1_17 = arith.constant 1 : index
    %c0_18 = arith.constant 0 : index
    %c0_19 = arith.constant 0 : index
    %16 = vector.load %arg1[%c0_16, %c1_17, %c0_18, %c0_19] : memref<1x18x18x16xbf16, #tpu.memory_space<vmem>>, vector<1x16x16x16xbf16>
    %17 = vector.shape_cast %16 : vector<1x16x16x16xbf16> to vector<256x16xbf16>
    %c48 = arith.constant 48 : index
    %c0_20 = arith.constant 0 : index
    %18 = vector.load %arg2[%c48, %c0_20] : memref<144x16xbf16, #tpu.memory_space<vmem>>, vector<16x16xbf16>
    %cst_21 = arith.constant dense<0.000000e+00> : vector<256x16xf32>
    %19 = tpu.matmul %17, %18, %cst_21 {dimension_numbers = #tpu.dot_dimension_numbers<[1], [0], [0], [1], [0, 0, 1, 1], [], []>} : vector<256x16xbf16>, vector<16x16xbf16>, vector<256x16xf32> -> vector<256x16xf32>
    %20 = arith.addf %15, %19 : vector<256x16xf32>
    %c0_22 = arith.constant 0 : index
    %c1_23 = arith.constant 1 : index
    %c1_24 = arith.constant 1 : index
    %c0_25 = arith.constant 0 : index
    %21 = vector.load %arg1[%c0_22, %c1_23, %c1_24, %c0_25] : memref<1x18x18x16xbf16, #tpu.memory_space<vmem>>, vector<1x16x16x16xbf16>
    %22 = vector.shape_cast %21 : vector<1x16x16x16xbf16> to vector<256x16xbf16>
    %c64 = arith.constant 64 : index
    %c0_26 = arith.constant 0 : index
    %23 = vector.load %arg2[%c64, %c0_26] : memref<144x16xbf16, #tpu.memory_space<vmem>>, vector<16x16xbf16>
    %cst_27 = arith.constant dense<0.000000e+00> : vector<256x16xf32>
    %24 = tpu.matmul %22, %23, %cst_27 {dimension_numbers = #tpu.dot_dimension_numbers<[1], [0], [0], [1], [0, 0, 1, 1], [], []>} : vector<256x16xbf16>, vector<16x16xbf16>, vector<256x16xf32> -> vector<256x16xf32>
    %25 = arith.addf %20, %24 : vector<256x16xf32>
    %c0_28 = arith.constant 0 : index
    %c1_29 = arith.constant 1 : index
    %c2_30 = arith.constant 2 : index
    %c0_31 = arith.constant 0 : index
    %26 = vector.load %arg1[%c0_28, %c1_29, %c2_30, %c0_31] : memref<1x18x18x16xbf16, #tpu.memory_space<vmem>>, vector<1x16x16x16xbf16>
    %27 = vector.shape_cast %26 : vector<1x16x16x16xbf16> to vector<256x16xbf16>
    %c80 = arith.constant 80 : index
    %c0_32 = arith.constant 0 : index
    %28 = vector.load %arg2[%c80, %c0_32] : memref<144x16xbf16, #tpu.memory_space<vmem>>, vector<16x16xbf16>
    %cst_33 = arith.constant dense<0.000000e+00> : vector<256x16xf32>
    %29 = tpu.matmul %27, %28, %cst_33 {dimension_numbers = #tpu.dot_dimension_numbers<[1], [0], [0], [1], [0, 0, 1, 1], [], []>} : vector<256x16xbf16>, vector<16x16xbf16>, vector<256x16xf32> -> vector<256x16xf32>
    %30 = arith.addf %25, %29 : vector<256x16xf32>
    %c0_34 = arith.constant 0 : index
    %c2_35 = arith.constant 2 : index
    %c0_36 = arith.constant 0 : index
    %c0_37 = arith.constant 0 : index
    %31 = vector.load %arg1[%c0_34, %c2_35, %c0_36, %c0_37] : memref<1x18x18x16xbf16, #tpu.memory_space<vmem>>, vector<1x16x16x16xbf16>
    %32 = vector.shape_cast %31 : vector<1x16x16x16xbf16> to vector<256x16xbf16>
    %c96 = arith.constant 96 : index
    %c0_38 = arith.constant 0 : index
    %33 = vector.load %arg2[%c96, %c0_38] : memref<144x16xbf16, #tpu.memory_space<vmem>>, vector<16x16xbf16>
    %cst_39 = arith.constant dense<0.000000e+00> : vector<256x16xf32>
    %34 = tpu.matmul %32, %33, %cst_39 {dimension_numbers = #tpu.dot_dimension_numbers<[1], [0], [0], [1], [0, 0, 1, 1], [], []>} : vector<256x16xbf16>, vector<16x16xbf16>, vector<256x16xf32> -> vector<256x16xf32>
    %35 = arith.addf %30, %34 : vector<256x16xf32>
    %c0_40 = arith.constant 0 : index
    %c2_41 = arith.constant 2 : index
    %c1_42 = arith.constant 1 : index
    %c0_43 = arith.constant 0 : index
    %36 = vector.load %arg1[%c0_40, %c2_41, %c1_42, %c0_43] : memref<1x18x18x16xbf16, #tpu.memory_space<vmem>>, vector<1x16x16x16xbf16>
    %37 = vector.shape_cast %36 : vector<1x16x16x16xbf16> to vector<256x16xbf16>
    %c112 = arith.constant 112 : index
    %c0_44 = arith.constant 0 : index
    %38 = vector.load %arg2[%c112, %c0_44] : memref<144x16xbf16, #tpu.memory_space<vmem>>, vector<16x16xbf16>
    %cst_45 = arith.constant dense<0.000000e+00> : vector<256x16xf32>
    %39 = tpu.matmul %37, %38, %cst_45 {dimension_numbers = #tpu.dot_dimension_numbers<[1], [0], [0], [1], [0, 0, 1, 1], [], []>} : vector<256x16xbf16>, vector<16x16xbf16>, vector<256x16xf32> -> vector<256x16xf32>
    %40 = arith.addf %35, %39 : vector<256x16xf32>
    %c0_46 = arith.constant 0 : index
    %c2_47 = arith.constant 2 : index
    %c2_48 = arith.constant 2 : index
    %c0_49 = arith.constant 0 : index
    %41 = vector.load %arg1[%c0_46, %c2_47, %c2_48, %c0_49] : memref<1x18x18x16xbf16, #tpu.memory_space<vmem>>, vector<1x16x16x16xbf16>
    %42 = vector.shape_cast %41 : vector<1x16x16x16xbf16> to vector<256x16xbf16>
    %c128 = arith.constant 128 : index
    %c0_50 = arith.constant 0 : index
    %43 = vector.load %arg2[%c128, %c0_50] : memref<144x16xbf16, #tpu.memory_space<vmem>>, vector<16x16xbf16>
    %cst_51 = arith.constant dense<0.000000e+00> : vector<256x16xf32>
    %44 = tpu.matmul %42, %43, %cst_51 {dimension_numbers = #tpu.dot_dimension_numbers<[1], [0], [0], [1], [0, 0, 1, 1], [], []>} : vector<256x16xbf16>, vector<16x16xbf16>, vector<256x16xf32> -> vector<256x16xf32>
    %45 = arith.addf %40, %44 : vector<256x16xf32>
    %cst_52 = arith.constant dense<0.000000e+00> : vector<16xf32>
    %46 = vector.multi_reduction <add>, %45, %cst_52 [0] : vector<256x16xf32> to vector<16xf32>
    %47 = vector.shape_cast %46 : vector<16xf32> to vector<1x16xf32>
    %48 = arith.mulf %45, %45 : vector<256x16xf32>
    %cst_53 = arith.constant dense<0.000000e+00> : vector<16xf32>
    %49 = vector.multi_reduction <add>, %48, %cst_53 [0] : vector<256x16xf32> to vector<16xf32>
    %50 = vector.shape_cast %49 : vector<16xf32> to vector<1x16xf32>
    %51 = tpu.concatenate %47, %50 in 0 : vector<1x16xf32>, vector<1x16xf32> -> vector<2x16xf32>
    %52 = vector.shape_cast %51 : vector<2x16xf32> to vector<1x2x16xf32>
    %c0_54 = arith.constant 0 : index
    %c0_55 = arith.constant 0 : index
    %c0_56 = arith.constant 0 : index
    %53 = vector.load %arg4[%c0_54, %c0_55, %c0_56] : memref<1x2x16xf32, #tpu.memory_space<vmem>>, vector<1x2x16xf32>
    tpu.vector_store %arg4[%c0_54, %c0_55, %c0_56], %52 {strides = array<i32>} : memref<1x2x16xf32, #tpu.memory_space<vmem>>, vector<1x2x16xf32>,
    %54 = vector.shape_cast %45 : vector<256x16xf32> to vector<1x16x16x16xf32>
    %55 = arith.truncf %54 : vector<1x16x16x16xf32> to vector<1x16x16x16xbf16>
    %c0_57 = arith.constant 0 : index
    %c0_58 = arith.constant 0 : index
    %c0_59 = arith.constant 0 : index
    %c0_60 = arith.constant 0 : index
    %56 = vector.load %arg3[%c0_57, %c0_58, %c0_59, %c0_60] : memref<1x16x16x16xbf16, #tpu.memory_space<vmem>>, vector<1x16x16x16xbf16>
    tpu.vector_store %arg3[%c0_57, %c0_58, %c0_59, %c0_60], %55 {strides = array<i32>} : memref<1x16x16x16xbf16, #tpu.memory_space<vmem>>, vector<1x16x16x16xbf16>,
    return
  }
  func.func @transform_0(%arg0: i32) -> (i32, i32, i32, i32) {
    %c0_i32 = arith.constant 0 : i32
    %c0_i32_0 = arith.constant 0 : i32
    %c0_i32_1 = arith.constant 0 : i32
    %c0_i32_2 = arith.constant 0 : i32
    return %arg0, %c0_i32, %c0_i32_0, %c0_i32_1 : i32, i32, i32, i32
  }
  func.func @transform_1(%arg0: i32) -> (i32, i32) {
    %c0_i32 = arith.constant 0 : i32
    %c0_i32_0 = arith.constant 0 : i32
    %c0_i32_1 = arith.constant 0 : i32
    return %c0_i32, %c0_i32_0 : i32, i32
  }
  func.func @transform_2(%arg0: i32) -> (i32, i32, i32, i32) {
    %c0_i32 = arith.constant 0 : i32
    %c0_i32_0 = arith.constant 0 : i32
    %c0_i32_1 = arith.constant 0 : i32
    %c0_i32_2 = arith.constant 0 : i32
    return %arg0, %c0_i32, %c0_i32_0, %c0_i32_1 : i32, i32, i32, i32
  }
  func.func @transform_3(%arg0: i32) -> (i32, i32, i32) {
    %c0_i32 = arith.constant 0 : i32
    %c0_i32_0 = arith.constant 0 : i32
    %c0_i32_1 = arith.constant 0 : i32
    return %arg0, %c0_i32, %c0_i32_0 : i32, i32, i32
  }
}

module attributes {stable_mosaic.version = 11 : i64} {
  func.func @_bn_relu_conv3x3_stats_kernel(%arg0: i32, %arg1: memref<1x16x16x16xbf16, #tpu.memory_space<vmem>>, %arg2: memref<1x16xf32, #tpu.memory_space<vmem>>, %arg3: memref<1x16xf32, #tpu.memory_space<vmem>>, %arg4: memref<144x16xbf16, #tpu.memory_space<vmem>>, %arg5: memref<1x16x16x16xf32, #tpu.memory_space<vmem>>, %arg6: memref<1x2x16xf32, #tpu.memory_space<vmem>>, %arg7: memref<18x18x16xbf16, #tpu.memory_space<vmem>>) attributes {dimension_semantics = [#tpu.dimension_semantics<parallel>], iteration_bounds = array<i64: 2>, scalar_prefetch = 0 : i64, scratch_operands = 1 : i64, tpu.core_type = #tpu.core_type<tc>, window_params = [{transform_indices = @transform_0, window_bounds = array<i64: 1, 16, 16, 16>}, {pipeline_mode = #tpu.pipeline_mode<synchronous>, transform_indices = @transform_1, window_bounds = array<i64: 1, 16>}, {pipeline_mode = #tpu.pipeline_mode<synchronous>, transform_indices = @transform_2, window_bounds = array<i64: 1, 16>}, {pipeline_mode = #tpu.pipeline_mode<synchronous>, transform_indices = @transform_3, window_bounds = array<i64: 144, 16>}, {transform_indices = @transform_4, window_bounds = array<i64: 1, 16, 16, 16>}, {transform_indices = @transform_5, window_bounds = array<i64: 1, 2, 16>}]} {
    %c0 = arith.constant 0 : index
    %c0_0 = arith.constant 0 : index
    %c0_1 = arith.constant 0 : index
    %c0_2 = arith.constant 0 : index
    %0 = vector.load %arg1[%c0, %c0_0, %c0_1, %c0_2] : memref<1x16x16x16xbf16, #tpu.memory_space<vmem>>, vector<1x16x16x16xbf16>
    %1 = arith.extf %0 : vector<1x16x16x16xbf16> to vector<1x16x16x16xf32>
    %c0_3 = arith.constant 0 : index
    %c0_4 = arith.constant 0 : index
    %2 = vector.load %arg2[%c0_3, %c0_4] : memref<1x16xf32, #tpu.memory_space<vmem>>, vector<1x16xf32>
    %3 = vector.shape_cast %2 : vector<1x16xf32> to vector<1x1x1x16xf32>
    %4 = vector.broadcast %3 : vector<1x1x1x16xf32> to vector<1x16x16x16xf32>
    %5 = arith.mulf %1, %4 : vector<1x16x16x16xf32>
    %c0_5 = arith.constant 0 : index
    %c0_6 = arith.constant 0 : index
    %6 = vector.load %arg3[%c0_5, %c0_6] : memref<1x16xf32, #tpu.memory_space<vmem>>, vector<1x16xf32>
    %7 = vector.shape_cast %6 : vector<1x16xf32> to vector<1x1x1x16xf32>
    %8 = vector.broadcast %7 : vector<1x1x1x16xf32> to vector<1x16x16x16xf32>
    %9 = arith.addf %5, %8 : vector<1x16x16x16xf32>
    %cst = arith.constant 0.000000e+00 : f32
    %10 = vector.broadcast %cst : f32 to vector<1x16x16x16xf32>
    %11 = arith.maximumf %9, %10 : vector<1x16x16x16xf32>
    %cst_7 = arith.constant 0.000000e+00 : bf16
    %12 = vector.broadcast %cst_7 : bf16 to vector<18x18x16xbf16>
    %c0_8 = arith.constant 0 : index
    %c0_9 = arith.constant 0 : index
    %c0_10 = arith.constant 0 : index
    %13 = vector.load %arg7[%c0_8, %c0_9, %c0_10] : memref<18x18x16xbf16, #tpu.memory_space<vmem>>, vector<18x18x16xbf16>
    tpu.vector_store %arg7[%c0_8, %c0_9, %c0_10], %12 {strides = array<i32>} : memref<18x18x16xbf16, #tpu.memory_space<vmem>>, vector<18x18x16xbf16>,
    %14 = vector.shape_cast %11 : vector<1x16x16x16xf32> to vector<16x16x16xf32>
    %15 = arith.truncf %14 : vector<16x16x16xf32> to vector<16x16x16xbf16>
    %c1 = arith.constant 1 : index
    %c1_11 = arith.constant 1 : index
    %c0_12 = arith.constant 0 : index
    %16 = vector.load %arg7[%c1, %c1_11, %c0_12] : memref<18x18x16xbf16, #tpu.memory_space<vmem>>, vector<16x16x16xbf16>
    tpu.vector_store %arg7[%c1, %c1_11, %c0_12], %15 {strides = array<i32>} : memref<18x18x16xbf16, #tpu.memory_space<vmem>>, vector<16x16x16xbf16>,
    %cst_13 = arith.constant 0.000000e+00 : f32
    %17 = vector.broadcast %cst_13 : f32 to vector<256x16xf32>
    %c0_14 = arith.constant 0 : index
    %c0_15 = arith.constant 0 : index
    %c0_16 = arith.constant 0 : index
    %18 = vector.load %arg7[%c0_14, %c0_15, %c0_16] : memref<18x18x16xbf16, #tpu.memory_space<vmem>>, vector<16x16x16xbf16>
    %19 = vector.shape_cast %18 : vector<16x16x16xbf16> to vector<256x16xbf16>
    %c0_17 = arith.constant 0 : index
    %c0_18 = arith.constant 0 : index
    %20 = vector.load %arg4[%c0_17, %c0_18] : memref<144x16xbf16, #tpu.memory_space<vmem>>, vector<16x16xbf16>
    %cst_19 = arith.constant dense<0.000000e+00> : vector<256x16xf32>
    %21 = tpu.matmul %19, %20, %cst_19 {dimension_numbers = #tpu.dot_dimension_numbers<[1], [0], [0], [1], [0, 0, 1, 1], [], []>} : vector<256x16xbf16>, vector<16x16xbf16>, vector<256x16xf32> -> vector<256x16xf32>
    %22 = arith.addf %17, %21 : vector<256x16xf32>
    %c0_20 = arith.constant 0 : index
    %c1_21 = arith.constant 1 : index
    %c0_22 = arith.constant 0 : index
    %23 = vector.load %arg7[%c0_20, %c1_21, %c0_22] : memref<18x18x16xbf16, #tpu.memory_space<vmem>>, vector<16x16x16xbf16>
    %24 = vector.shape_cast %23 : vector<16x16x16xbf16> to vector<256x16xbf16>
    %c16 = arith.constant 16 : index
    %c0_23 = arith.constant 0 : index
    %25 = vector.load %arg4[%c16, %c0_23] : memref<144x16xbf16, #tpu.memory_space<vmem>>, vector<16x16xbf16>
    %cst_24 = arith.constant dense<0.000000e+00> : vector<256x16xf32>
    %26 = tpu.matmul %24, %25, %cst_24 {dimension_numbers = #tpu.dot_dimension_numbers<[1], [0], [0], [1], [0, 0, 1, 1], [], []>} : vector<256x16xbf16>, vector<16x16xbf16>, vector<256x16xf32> -> vector<256x16xf32>
    %27 = arith.addf %22, %26 : vector<256x16xf32>
    %c0_25 = arith.constant 0 : index
    %c2 = arith.constant 2 : index
    %c0_26 = arith.constant 0 : index
    %28 = vector.load %arg7[%c0_25, %c2, %c0_26] : memref<18x18x16xbf16, #tpu.memory_space<vmem>>, vector<16x16x16xbf16>
    %29 = vector.shape_cast %28 : vector<16x16x16xbf16> to vector<256x16xbf16>
    %c32 = arith.constant 32 : index
    %c0_27 = arith.constant 0 : index
    %30 = vector.load %arg4[%c32, %c0_27] : memref<144x16xbf16, #tpu.memory_space<vmem>>, vector<16x16xbf16>
    %cst_28 = arith.constant dense<0.000000e+00> : vector<256x16xf32>
    %31 = tpu.matmul %29, %30, %cst_28 {dimension_numbers = #tpu.dot_dimension_numbers<[1], [0], [0], [1], [0, 0, 1, 1], [], []>} : vector<256x16xbf16>, vector<16x16xbf16>, vector<256x16xf32> -> vector<256x16xf32>
    %32 = arith.addf %27, %31 : vector<256x16xf32>
    %c1_29 = arith.constant 1 : index
    %c0_30 = arith.constant 0 : index
    %c0_31 = arith.constant 0 : index
    %33 = vector.load %arg7[%c1_29, %c0_30, %c0_31] : memref<18x18x16xbf16, #tpu.memory_space<vmem>>, vector<16x16x16xbf16>
    %34 = vector.shape_cast %33 : vector<16x16x16xbf16> to vector<256x16xbf16>
    %c48 = arith.constant 48 : index
    %c0_32 = arith.constant 0 : index
    %35 = vector.load %arg4[%c48, %c0_32] : memref<144x16xbf16, #tpu.memory_space<vmem>>, vector<16x16xbf16>
    %cst_33 = arith.constant dense<0.000000e+00> : vector<256x16xf32>
    %36 = tpu.matmul %34, %35, %cst_33 {dimension_numbers = #tpu.dot_dimension_numbers<[1], [0], [0], [1], [0, 0, 1, 1], [], []>} : vector<256x16xbf16>, vector<16x16xbf16>, vector<256x16xf32> -> vector<256x16xf32>
    %37 = arith.addf %32, %36 : vector<256x16xf32>
    %c1_34 = arith.constant 1 : index
    %c1_35 = arith.constant 1 : index
    %c0_36 = arith.constant 0 : index
    %38 = vector.load %arg7[%c1_34, %c1_35, %c0_36] : memref<18x18x16xbf16, #tpu.memory_space<vmem>>, vector<16x16x16xbf16>
    %39 = vector.shape_cast %38 : vector<16x16x16xbf16> to vector<256x16xbf16>
    %c64 = arith.constant 64 : index
    %c0_37 = arith.constant 0 : index
    %40 = vector.load %arg4[%c64, %c0_37] : memref<144x16xbf16, #tpu.memory_space<vmem>>, vector<16x16xbf16>
    %cst_38 = arith.constant dense<0.000000e+00> : vector<256x16xf32>
    %41 = tpu.matmul %39, %40, %cst_38 {dimension_numbers = #tpu.dot_dimension_numbers<[1], [0], [0], [1], [0, 0, 1, 1], [], []>} : vector<256x16xbf16>, vector<16x16xbf16>, vector<256x16xf32> -> vector<256x16xf32>
    %42 = arith.addf %37, %41 : vector<256x16xf32>
    %c1_39 = arith.constant 1 : index
    %c2_40 = arith.constant 2 : index
    %c0_41 = arith.constant 0 : index
    %43 = vector.load %arg7[%c1_39, %c2_40, %c0_41] : memref<18x18x16xbf16, #tpu.memory_space<vmem>>, vector<16x16x16xbf16>
    %44 = vector.shape_cast %43 : vector<16x16x16xbf16> to vector<256x16xbf16>
    %c80 = arith.constant 80 : index
    %c0_42 = arith.constant 0 : index
    %45 = vector.load %arg4[%c80, %c0_42] : memref<144x16xbf16, #tpu.memory_space<vmem>>, vector<16x16xbf16>
    %cst_43 = arith.constant dense<0.000000e+00> : vector<256x16xf32>
    %46 = tpu.matmul %44, %45, %cst_43 {dimension_numbers = #tpu.dot_dimension_numbers<[1], [0], [0], [1], [0, 0, 1, 1], [], []>} : vector<256x16xbf16>, vector<16x16xbf16>, vector<256x16xf32> -> vector<256x16xf32>
    %47 = arith.addf %42, %46 : vector<256x16xf32>
    %c2_44 = arith.constant 2 : index
    %c0_45 = arith.constant 0 : index
    %c0_46 = arith.constant 0 : index
    %48 = vector.load %arg7[%c2_44, %c0_45, %c0_46] : memref<18x18x16xbf16, #tpu.memory_space<vmem>>, vector<16x16x16xbf16>
    %49 = vector.shape_cast %48 : vector<16x16x16xbf16> to vector<256x16xbf16>
    %c96 = arith.constant 96 : index
    %c0_47 = arith.constant 0 : index
    %50 = vector.load %arg4[%c96, %c0_47] : memref<144x16xbf16, #tpu.memory_space<vmem>>, vector<16x16xbf16>
    %cst_48 = arith.constant dense<0.000000e+00> : vector<256x16xf32>
    %51 = tpu.matmul %49, %50, %cst_48 {dimension_numbers = #tpu.dot_dimension_numbers<[1], [0], [0], [1], [0, 0, 1, 1], [], []>} : vector<256x16xbf16>, vector<16x16xbf16>, vector<256x16xf32> -> vector<256x16xf32>
    %52 = arith.addf %47, %51 : vector<256x16xf32>
    %c2_49 = arith.constant 2 : index
    %c1_50 = arith.constant 1 : index
    %c0_51 = arith.constant 0 : index
    %53 = vector.load %arg7[%c2_49, %c1_50, %c0_51] : memref<18x18x16xbf16, #tpu.memory_space<vmem>>, vector<16x16x16xbf16>
    %54 = vector.shape_cast %53 : vector<16x16x16xbf16> to vector<256x16xbf16>
    %c112 = arith.constant 112 : index
    %c0_52 = arith.constant 0 : index
    %55 = vector.load %arg4[%c112, %c0_52] : memref<144x16xbf16, #tpu.memory_space<vmem>>, vector<16x16xbf16>
    %cst_53 = arith.constant dense<0.000000e+00> : vector<256x16xf32>
    %56 = tpu.matmul %54, %55, %cst_53 {dimension_numbers = #tpu.dot_dimension_numbers<[1], [0], [0], [1], [0, 0, 1, 1], [], []>} : vector<256x16xbf16>, vector<16x16xbf16>, vector<256x16xf32> -> vector<256x16xf32>
    %57 = arith.addf %52, %56 : vector<256x16xf32>
    %c2_54 = arith.constant 2 : index
    %c2_55 = arith.constant 2 : index
    %c0_56 = arith.constant 0 : index
    %58 = vector.load %arg7[%c2_54, %c2_55, %c0_56] : memref<18x18x16xbf16, #tpu.memory_space<vmem>>, vector<16x16x16xbf16>
    %59 = vector.shape_cast %58 : vector<16x16x16xbf16> to vector<256x16xbf16>
    %c128 = arith.constant 128 : index
    %c0_57 = arith.constant 0 : index
    %60 = vector.load %arg4[%c128, %c0_57] : memref<144x16xbf16, #tpu.memory_space<vmem>>, vector<16x16xbf16>
    %cst_58 = arith.constant dense<0.000000e+00> : vector<256x16xf32>
    %61 = tpu.matmul %59, %60, %cst_58 {dimension_numbers = #tpu.dot_dimension_numbers<[1], [0], [0], [1], [0, 0, 1, 1], [], []>} : vector<256x16xbf16>, vector<16x16xbf16>, vector<256x16xf32> -> vector<256x16xf32>
    %62 = arith.addf %57, %61 : vector<256x16xf32>
    %cst_59 = arith.constant dense<0.000000e+00> : vector<16xf32>
    %63 = vector.multi_reduction <add>, %62, %cst_59 [0] : vector<256x16xf32> to vector<16xf32>
    %64 = vector.shape_cast %63 : vector<16xf32> to vector<1x16xf32>
    %65 = arith.mulf %62, %62 : vector<256x16xf32>
    %cst_60 = arith.constant dense<0.000000e+00> : vector<16xf32>
    %66 = vector.multi_reduction <add>, %65, %cst_60 [0] : vector<256x16xf32> to vector<16xf32>
    %67 = vector.shape_cast %66 : vector<16xf32> to vector<1x16xf32>
    %68 = tpu.concatenate %64, %67 in 0 : vector<1x16xf32>, vector<1x16xf32> -> vector<2x16xf32>
    %69 = vector.shape_cast %68 : vector<2x16xf32> to vector<1x2x16xf32>
    %c0_61 = arith.constant 0 : index
    %c0_62 = arith.constant 0 : index
    %c0_63 = arith.constant 0 : index
    %70 = vector.load %arg6[%c0_61, %c0_62, %c0_63] : memref<1x2x16xf32, #tpu.memory_space<vmem>>, vector<1x2x16xf32>
    tpu.vector_store %arg6[%c0_61, %c0_62, %c0_63], %69 {strides = array<i32>} : memref<1x2x16xf32, #tpu.memory_space<vmem>>, vector<1x2x16xf32>,
    %71 = vector.shape_cast %62 : vector<256x16xf32> to vector<1x16x16x16xf32>
    %c0_64 = arith.constant 0 : index
    %c0_65 = arith.constant 0 : index
    %c0_66 = arith.constant 0 : index
    %c0_67 = arith.constant 0 : index
    %72 = vector.load %arg5[%c0_64, %c0_65, %c0_66, %c0_67] : memref<1x16x16x16xf32, #tpu.memory_space<vmem>>, vector<1x16x16x16xf32>
    tpu.vector_store %arg5[%c0_64, %c0_65, %c0_66, %c0_67], %71 {strides = array<i32>} : memref<1x16x16x16xf32, #tpu.memory_space<vmem>>, vector<1x16x16x16xf32>,
    return
  }
  func.func @transform_0(%arg0: i32) -> (i32, i32, i32, i32) {
    %c0_i32 = arith.constant 0 : i32
    %c0_i32_0 = arith.constant 0 : i32
    %c0_i32_1 = arith.constant 0 : i32
    %c0_i32_2 = arith.constant 0 : i32
    return %arg0, %c0_i32, %c0_i32_0, %c0_i32_1 : i32, i32, i32, i32
  }
  func.func @transform_1(%arg0: i32) -> (i32, i32) {
    %c0_i32 = arith.constant 0 : i32
    %c0_i32_0 = arith.constant 0 : i32
    %c0_i32_1 = arith.constant 0 : i32
    return %c0_i32, %c0_i32_0 : i32, i32
  }
  func.func @transform_2(%arg0: i32) -> (i32, i32) {
    %c0_i32 = arith.constant 0 : i32
    %c0_i32_0 = arith.constant 0 : i32
    %c0_i32_1 = arith.constant 0 : i32
    return %c0_i32, %c0_i32_0 : i32, i32
  }
  func.func @transform_3(%arg0: i32) -> (i32, i32) {
    %c0_i32 = arith.constant 0 : i32
    %c0_i32_0 = arith.constant 0 : i32
    %c0_i32_1 = arith.constant 0 : i32
    return %c0_i32, %c0_i32_0 : i32, i32
  }
  func.func @transform_4(%arg0: i32) -> (i32, i32, i32, i32) {
    %c0_i32 = arith.constant 0 : i32
    %c0_i32_0 = arith.constant 0 : i32
    %c0_i32_1 = arith.constant 0 : i32
    %c0_i32_2 = arith.constant 0 : i32
    return %arg0, %c0_i32, %c0_i32_0, %c0_i32_1 : i32, i32, i32, i32
  }
  func.func @transform_5(%arg0: i32) -> (i32, i32, i32) {
    %c0_i32 = arith.constant 0 : i32
    %c0_i32_0 = arith.constant 0 : i32
    %c0_i32_1 = arith.constant 0 : i32
    return %arg0, %c0_i32, %c0_i32_0 : i32, i32, i32
  }
}

module attributes {stable_mosaic.version = 11 : i64} {
  func.func @_bn_add_relu_kernel(%arg0: i32, %arg1: memref<8x1024xf32, #tpu.memory_space<vmem>>, %arg2: memref<8x1024xf32, #tpu.memory_space<vmem>>, %arg3: memref<1x1024xf32, #tpu.memory_space<vmem>>, %arg4: memref<1x1024xf32, #tpu.memory_space<vmem>>, %arg5: memref<8x1024xf32, #tpu.memory_space<vmem>>) attributes {dimension_semantics = [#tpu.dimension_semantics<parallel>], iteration_bounds = array<i64: 1>, scalar_prefetch = 0 : i64, scratch_operands = 0 : i64, tpu.core_type = #tpu.core_type<tc>, window_params = [{transform_indices = @transform_0, window_bounds = array<i64: 8, 1024>}, {transform_indices = @transform_1, window_bounds = array<i64: 8, 1024>}, {pipeline_mode = #tpu.pipeline_mode<synchronous>, transform_indices = @transform_2, window_bounds = array<i64: 1, 1024>}, {pipeline_mode = #tpu.pipeline_mode<synchronous>, transform_indices = @transform_3, window_bounds = array<i64: 1, 1024>}, {transform_indices = @transform_4, window_bounds = array<i64: 8, 1024>}]} {
    %c0 = arith.constant 0 : index
    %c0_0 = arith.constant 0 : index
    %0 = vector.load %arg1[%c0, %c0_0] : memref<8x1024xf32, #tpu.memory_space<vmem>>, vector<8x1024xf32>
    %c0_1 = arith.constant 0 : index
    %c0_2 = arith.constant 0 : index
    %1 = vector.load %arg3[%c0_1, %c0_2] : memref<1x1024xf32, #tpu.memory_space<vmem>>, vector<1x1024xf32>
    %2 = vector.broadcast %1 : vector<1x1024xf32> to vector<8x1024xf32>
    %3 = arith.mulf %0, %2 : vector<8x1024xf32>
    %c0_3 = arith.constant 0 : index
    %c0_4 = arith.constant 0 : index
    %4 = vector.load %arg4[%c0_3, %c0_4] : memref<1x1024xf32, #tpu.memory_space<vmem>>, vector<1x1024xf32>
    %5 = vector.broadcast %4 : vector<1x1024xf32> to vector<8x1024xf32>
    %6 = arith.addf %3, %5 : vector<8x1024xf32>
    %c0_5 = arith.constant 0 : index
    %c0_6 = arith.constant 0 : index
    %7 = vector.load %arg2[%c0_5, %c0_6] : memref<8x1024xf32, #tpu.memory_space<vmem>>, vector<8x1024xf32>
    %8 = arith.addf %6, %7 : vector<8x1024xf32>
    %cst = arith.constant 0.000000e+00 : f32
    %9 = vector.broadcast %cst : f32 to vector<8x1024xf32>
    %10 = arith.maximumf %8, %9 : vector<8x1024xf32>
    %c0_7 = arith.constant 0 : index
    %c0_8 = arith.constant 0 : index
    %11 = vector.load %arg5[%c0_7, %c0_8] : memref<8x1024xf32, #tpu.memory_space<vmem>>, vector<8x1024xf32>
    tpu.vector_store %arg5[%c0_7, %c0_8], %10 {strides = array<i32>} : memref<8x1024xf32, #tpu.memory_space<vmem>>, vector<8x1024xf32>,
    return
  }
  func.func @transform_0(%arg0: i32) -> (i32, i32) {
    %c0_i32 = arith.constant 0 : i32
    %c0_i32_0 = arith.constant 0 : i32
    return %arg0, %c0_i32 : i32, i32
  }
  func.func @transform_1(%arg0: i32) -> (i32, i32) {
    %c0_i32 = arith.constant 0 : i32
    %c0_i32_0 = arith.constant 0 : i32
    return %arg0, %c0_i32 : i32, i32
  }
  func.func @transform_2(%arg0: i32) -> (i32, i32) {
    %c0_i32 = arith.constant 0 : i32
    %c0_i32_0 = arith.constant 0 : i32
    %c0_i32_1 = arith.constant 0 : i32
    return %c0_i32, %c0_i32_0 : i32, i32
  }
  func.func @transform_3(%arg0: i32) -> (i32, i32) {
    %c0_i32 = arith.constant 0 : i32
    %c0_i32_0 = arith.constant 0 : i32
    %c0_i32_1 = arith.constant 0 : i32
    return %c0_i32, %c0_i32_0 : i32, i32
  }
  func.func @transform_4(%arg0: i32) -> (i32, i32) {
    %c0_i32 = arith.constant 0 : i32
    %c0_i32_0 = arith.constant 0 : i32
    return %arg0, %c0_i32 : i32, i32
  }
}

</mosaic_0001>

<bundles_post_ra>
// kernel: basic_block_forward.5
= control target key start
LH: loop header
LB: loop body
LE: loop exit
PB: predicated region body
PF: predicated region fallthrough
CT: control target
= control target key end

     0   :  { %v27_v0 = vlaneseq  ;;  %s294_s2 = inlined_call_operand.vmem [shape: f32[1,1024], index: 2, kind: input, shape index: {}]   ;;  %s295_s3 = inlined_call_operand.vmem [shape: f32[1,1024], index: 3, kind: input, shape index: {}]   ;;  %s296_s0 = inlined_call_operand.vmem [shape: f32[8,1024], index: 0, kind: input, shape index: {}]   ;;  %s297_s1 = inlined_call_operand.vmem [shape: f32[8,1024], index: 1, kind: input, shape index: {}]   ;;  %s298_s4 = inlined_call_operand.vmem [shape: f32[8,1024], index: 4, kind: output, shape index: {}]  }
   0x1   :  { %v191_v2 = vld [vmem:[%s294_s2] sm:$0xff]  ;;  %v18_v9 = vld [vmem:[%s296_s0 + $0x8] sm:$0xff]  ;;  %v19_v17 = vld [vmem:[%s296_s0 + $0x10] sm:$0xff] }
   0x2   :  { %v186_v1 = vshrl.u32 %v27_v0, 7  ;;  %v196_v3 = vld [vmem:[%s295_s3] sm:$0xff]  ;;  %v20_v18 = vld [vmem:[%s296_s0 + $0x18] sm:$0xff]  ;;  %v22_v28 = vld [vmem:[%s296_s0 + $0x28] sm:$0xff] }
   0x3   :  { %v17_v8 = vld [vmem:[%s296_s0] sm:$0xff]  ;;  %v126_v30 = vld [vmem:[%s297_s1 + $0x8] sm:$0xff]  ;;  %v23_v35 = vld [vmem:[%s296_s0 + $0x30] sm:$0xff] }
   0x4   :  { %v29_v4 = vsub.s32 0, %v186_v1  ;;  %v33_v5 = vsub.s32 1, %v186_v1  ;;  %v37_v6 = vsub.s32 2, %v186_v1  ;;  %v41_v7 = vsub.s32 3, %v186_v1  ;;  %v21_v23 = vld [vmem:[%s296_s0 + $0x20] sm:$0xff]  ;;  %v127_v38 = vld [vmem:[%s297_s1 + $0x10] sm:$0xff] }
   0x5   :  { %v45_v10 = vsub.s32 4, %v186_v1  ;;  %v49_v11 = vsub.s32 5, %v186_v1  ;;  %v53_v12 = vsub.s32 6, %v186_v1  ;;  %v125_v29 = vld [vmem:[%s297_s1] sm:$0xff]  ;;  %v128_v39 = vld [vmem:[%s297_s1 + $0x18] sm:$0xff]  ;;  %v130_v50 = vld [vmem:[%s297_s1 + $0x28] sm:$0xff] }
   0x6   :  { %v30_v13 = vrot.slane %v191_v2, %v29_v4  ;;  %v80_v14 = vrot.slane %v196_v3, %v29_v4  ;;  %v34_v15 = vrot.slane %v191_v2, %v33_v5  ;;  %v84_v16 = vrot.slane %v196_v3, %v33_v5  ;;  %v129_v44 = vld [vmem:[%s297_s1 + $0x20] sm:$0xff]  ;;  %v131_v55 = vld [vmem:[%s297_s1 + $0x30] sm:$0xff]  ;;  %v24_v61 = vld [vmem:[%s296_s0 + $0x38] sm:$0xff] }
   0x7   :  { %v38_v19 = vrot.slane %v191_v2, %v37_v6  ;;  %v88_v20 = vrot.slane %v196_v3, %v37_v6  ;;  %v42_v21 = vrot.slane %v191_v2, %v41_v7  ;;  %v92_v22 = vrot.slane %v196_v3, %v41_v7 }
   0x8   :  { %v67_v24 = vmul.f32 %v30_v13, %v17_v8  ;;  %v68_v25 = vmul.f32 %v34_v15, %v18_v9  ;;  %v46_v26 = vrot.slane %v191_v2, %v45_v10  ;;  %v96_v27 = vrot.slane %v196_v3, %v45_v10  ;;  %v132_v9 = vld [vmem:[%s297_s1 + $0x38] sm:$0xff] }
   0x9   :  { %v69_v31 = vmul.f32 %v38_v19, %v19_v17  ;;  %v70_v32 = vmul.f32 %v42_v21, %v20_v18  ;;  %v50_v33 = vrot.slane %v191_v2, %v49_v11  ;;  %v100_v34 = vrot.slane %v196_v3, %v49_v11 }
   0xa   :  { %v117_v36 = vadd.f32 %v80_v14, %v67_v24  ;;  %v118_v37 = vadd.f32 %v84_v16, %v68_v25  ;;  %v71_v40 = vmul.f32 %v46_v26, %v21_v23  ;;  %v54_v41 = vrot.slane %v191_v2, %v53_v12 }
   0xb   :  { %v119_v42 = vadd.f32 %v88_v20, %v69_v31  ;;  %v120_v43 = vadd.f32 %v92_v22, %v70_v32  ;;  %v72_v45 = vmul.f32 %v50_v33, %v22_v28  ;;  %v104_v46 = vrot.slane %v196_v3, %v53_v12 }
   0xc   :  { %v133_v47 = vadd.f32 %v125_v29, %v117_v36  ;;  %v134_v48 = vadd.f32 %v126_v30, %v118_v37  ;;  %v121_v49 = vadd.f32 %v96_v27, %v71_v40  ;;  %v73_v51 = vmul.f32 %v54_v41, %v23_v35 }
   0xd   :  { %v135_v52 = vadd.f32 %v127_v38, %v119_v42  ;;  %v136_v53 = vadd.f32 %v128_v39, %v120_v43  ;;  %v122_v54 = vadd.f32 %v100_v34, %v72_v45  ;;  %v57_v56 = vsub.s32 7, %v186_v1 }
   0xe   :  { %v141_v57 = vmax.f32 %v133_v47, 0.0  ;;  %v142_v58 = vmax.f32 %v134_v48, 0.0  ;;  %v137_v59 = vadd.f32 %v129_v44, %v121_v49  ;;  %v123_v60 = vadd.f32 %v104_v46, %v73_v51 }
   0xf   :  { %v143_v62 = vmax.f32 %v135_v52, 0.0  ;;  %v144_v63 = vmax.f32 %v136_v53, 0.0  ;;  %v138_v0 = vadd.f32 %v130_v50, %v122_v54  ;;  %v58_v4 = vrot.slane %v191_v2, %v57_v56 }
  0x10   :  { %149 = vst [vmem:[%s298_s4] sm:$0xff] %v141_v57  ;;  %150 = vst [vmem:[%s298_s4 + $0x8] sm:$0xff] %v142_v58  ;;  %v145_v1 = vmax.f32 %v137_v59, 0.0  ;;  %v139_v5 = vadd.f32 %v131_v55, %v123_v60  ;;  %v108_v6 = vrot.slane %v196_v3, %v57_v56 }
  0x11   :  { %151 = vst [vmem:[%s298_s4 + $0x10] sm:$0xff] %v143_v62  ;;  %152 = vst [vmem:[%s298_s4 + $0x18] sm:$0xff] %v144_v63  ;;  %v146_v2 = vmax.f32 %v138_v0, 0.0  ;;  %v74_v7 = vmul.f32 %v58_v4, %v24_v61 }
  0x12   :  { %153 = vst [vmem:[%s298_s4 + $0x20] sm:$0xff] %v145_v1  ;;  %v147_v8 = vmax.f32 %v139_v5, 0.0 }
  0x13   :  { %154 = vst [vmem:[%s298_s4 + $0x28] sm:$0xff] %v146_v2  ;;  %v124_v3 = vadd.f32 %v108_v6, %v74_v7 }
  0x14   :  { %155 = vst [vmem:[%s298_s4 + $0x30] sm:$0xff] %v147_v8 }
  0x15   :  { %v140_v10 = vadd.f32 %v132_v9, %v124_v3 }
  0x17   :  { %v148_v11 = vmax.f32 %v140_v10, 0.0 }
  0x19   :  { %156 = vst [vmem:[%s298_s4 + $0x38] sm:$0xff] %v148_v11 }

// kernel: basic_block_forward.3
= control target key start
LH: loop header
LB: loop body
LE: loop exit
PB: predicated region body
PF: predicated region fallthrough
CT: control target
= control target key end

     0   :  { %s6673_s12 = smov 0   ;;  %s8528_s0 = inlined_call_operand.vmem [shape: bf16[2,18,18,16], index: 0, kind: input, shape index: {}]   ;;  %s8529_s1 = inlined_call_operand.vmem [shape: bf16[144,16], index: 1, kind: input, shape index: {}]   ;;  %s8530_s2 = inlined_call_operand.vmem [shape: bf16[2,16,16,16], index: 2, kind: output, shape index: {0}]   ;;  %s8531_s3 = inlined_call_operand.vmem [shape: f32[2,2,16], index: 3, kind: output, shape index: {1}]  }
   0x1 LB: > { %s5190_s13 = sadd.s32 4294967295, %s6651_s12   ;;  %p5194_p0 = scmp.ge.s32.totalorder %s6651_s12, 1  ;;  %s6651_s12 = sphi %s6673_s12, %s14_s12  }
   0x2   : > { %p140_p1 = scmp.lt.s32.totalorder %s6651_s12, 3 }
   0x4   : > { %p141_p2 = pnand %p5194_p0, %p140_p1 }
   0x6   : > { %144 = sbr.rel (%p141_p2) target bundleno = 607 (0x25f), region = 28 }
   0xd   : > { %v6529_v0 = vld [vmem:[%s8529_s1 + $0x8] sm:$0xff]   ;;  %p168_p3 = scmp.lt.s32.totalorder %s5190_s13, 1  ;;  %v6530_v1 = vld [vmem:[%s8529_s1 + $0x20] sm:$0xff]   ;;  %vm233_vm0 = vsmask.f32 3328  ;;  %vm676_vm3 = vcmask 130048  }
   0xe   : > { %5956 = vmatprep.subr.bf16.mxu1 %v6529_v0  ;;  %v6692_v2 = vld [vmem:[%s8529_s1] sm:$0xff]   ;;  %6092 = vmatprep.subr.bf16.mxu0 %v6530_v1  ;;  %v6699_v3 = vld [vmem:[%s8529_s1 + $0x28] sm:$0xff]   ;;  %vm234_vm1 = vsmask.f32 7440  ;;  %vm1229_vm4 = vcmask 1042432   ;;  %vm1230_vm5 = vcmask 1046532  }
   0xf   : > { %s8597_s13 = smov (!%p168_p3, %s5190_s13), 1  ;;  %5957 = vmatpush3.bf16.msra.mxu1 %v6529_v0  ;;  %6093 = vmatpush3.bf16.msra.mxu0 %v6530_v1  ;;  %vm6723_vm2 = vmor %vm233_vm0, %vm234_vm1  ;;  %vm5071_vm7 = vcmask 125952   ;;  %vm4939_vm8 = vcmask 1040384   ;;  %vm4941_vm9 = vcmask 123904  }
  0x10   : > { %s6520_s20 = smul.u32 216, %s8597_s13  ;;  %5990 = vmatprep.subr.bf16.mxu1 %v6692_v2  ;;  %6126 = vmatprep.subr.bf16.mxu0 %v6699_v3  ;;  %vm6945_vm6 = vmor %vm1229_vm4, %vm1230_vm5  ;;  %s5770_s15 = sshll.u32 %s8597_s13, 7 }
  0x11   : > { %s8383_s18 = scalar_lea.vmem %s8530_s2, %s5770_s15  ;;  %s5198_s19 = sshll.u32 %s8597_s13, 1 }
  0x12   : > { %s6704_s25 = scalar_lea.vmem %s8528_s0, %s6520_s20  ;;  %s181_s22 = scalar_lea.vmem %s8531_s3, %s5198_s19 }
  0x13   : > { %v183_v4 = vld [vmem:[%s6704_s25] sm:$0xf]  ;;  %v184_v5 = vld [vmem:[%s6704_s25 + $0x4] sm:$0xf]  ;;  %v217_v6 = vld [vmem:[%s6704_s25 + $0x8] sm:$0x1] }
  0x14   : > { %v237_v7 = vshrl.u32 %v183_v4, 16  ;;  %v240_v8 = vshll.u32 %v183_v4, 16  ;;  %v246_v9 = vshll.u32 %v184_v5, 16  ;;  %v250_v10 = vshrl.u32 %v184_v5, 16  ;;  %v5379_v11 = vld [vmem:[%s6704_s25 + $0xc] sm:$0xf] }
  0x15   : > { %v256_v12 = vshll.u32 %v217_v6, 16  ;;  %v6712_v13 = vld [vmem:[%s6704_s25 + $0x10] sm:$0xf]  ;;  %v6715_v14 = vld [vmem:[%s6704_s25 + $0x14] sm:$0x1]  ;;  %v2052_v20 = vshrl.u32 %v5379_v11, 16 }
  0x16   : > { %v239_v15 = vrot.slane %v237_v7, 4  ;;  %v242_v16 = vrot.slane %v240_v8, 5  ;;  %v248_v17 = vrot.slane %v246_v9, 5  ;;  %v252_v18 = vrot.slane %v250_v10, 4  ;;  %v185_v27 = vld [vmem:[%s6704_s25 + $0xc] sm:$0xf] }
  0x17   : > { %v258_v19 = vrot.slane %v256_v12, 5  ;;  %v2055_v21 = vshll.u32 %v5379_v11, 16  ;;  %v2061_v22 = vshll.u32 %v6712_v13, 16  ;;  %v2065_v25 = vshrl.u32 %v6712_v13, 16  ;;  %v186_v32 = vld [vmem:[%s6704_s25 + $0x10] sm:$0xf] }
  0x18   : > { %v243_v23 = vor.u32 %v242_v16, %v239_v15  ;;  %v253_v24 = vor.u32 %v252_v18, %v248_v17  ;;  %v2071_v26 = vshll.u32 %v6715_v14, 16  ;;  %v2054_v29 = vrot.slane %v2052_v20, 4  ;;  %v218_v38 = vld [vmem:[%s6704_s25 + $0x14] sm:$0x1]  ;;  %v5382_v49 = vld [vmem:[%s6704_s25 + $0x18] sm:$0xf] }
  0x19   : > { %v2057_v30 = vrot.slane %v2055_v21, 5  ;;  %v2063_v31 = vrot.slane %v2061_v22, 5  ;;  %v2067_v35 = vrot.slane %v2065_v25, 4  ;;  %v261_v39 = vshrl.u32 %v185_v27, 16  ;;  %v6735_v54 = vld [vmem:[%s6704_s25 + $0x1c] sm:$0xf] }
  0x1a   : > { %v244_v33 = vrot.slane %v243_v23, 4  ;;  %v254_v34 = vrot.slane %v253_v24, 4  ;;  %v2073_v37 = vrot.slane %v2071_v26, 5  ;;  %v264_v40 = vshll.u32 %v185_v27, 16  ;;  %v6743_v59 = vld [vmem:[%s6704_s25 + $0x20] sm:$0x1] }
  0x1b   : > { %v2058_v36 = vor.u32 %v2057_v30, %v2054_v29  ;;  %v2068_v43 = vor.u32 %v2067_v35, %v2063_v31  ;;  %v270_v44 = vshll.u32 %v186_v32, 16  ;;  %v263_v47 = vrot.slane %v261_v39, 4  ;;  %v187_v10 = vld [vmem:[%s6704_s25 + $0x18] sm:$0xf]  ;;  %v219_v24 = vld [vmem:[%s6704_s25 + $0x20] sm:$0x1] }
  0x1c   : > { %v249_v41 = vsel %vm6723_vm2, %v244_v33, %v248_v17  ;;  %v259_v42 = vsel %vm6723_vm2, %v254_v34, %v258_v19  ;;  %v266_v48 = vrot.slane %v264_v40, 5  ;;  %v274_v52 = vshrl.u32 %v186_v32, 16  ;;  %v188_v17 = vld [vmem:[%s6704_s25 + $0x1c] sm:$0xf]  ;;  %v5385_v32 = vld [vmem:[%s6704_s25 + $0x24] sm:$0xf] }
  0x1d   : > { %v5199_v45 = vcombine.low %v249_v41, %v259_v42  ;;  %v2059_v46 = vrot.slane %v2058_v36, 4  ;;  %v2069_v50 = vrot.slane %v2068_v43, 4  ;;  %v272_v51 = vrot.slane %v270_v44, 5 }
  0x1e   : > { %v280_v53 = vshll.u32 %v218_v38, 16  ;;  %v2798_v56 = vrot.slane %v6712_v13, 5  ;;  %v2801_v57 = vrot.slane %v6715_v14, 5  ;;  %v267_v58 = vor.u32 %v266_v48, %v263_v47  ;;  %v6535_v38 = vld [vmem:[%s8529_s1 + $0x10] sm:$0xff]   ;;  %v6978_v14 = vld [vmem:[%s6704_s25 + $0x7c] sm:$0xf] }
  0x1f   : > { %5958 = vmatprep.mubr.msk.bf16.mxu1 %vm676_vm3, %v5199_v45  ;;  %v2064_v55 = vsel %vm6723_vm2, %v2059_v46, %v2063_v31  ;;  %v2074_v60 = vsel %vm6723_vm2, %v2069_v50, %v2073_v37  ;;  %v276_v61 = vrot.slane %v274_v52, 4  ;;  %v2076_v63 = vshrl.u32 %v5382_v49, 16  ;;  %v6766_v37 = vld [vmem:[%s6704_s25 + $0x28] sm:$0xf]  ;;  %v6775_v45 = vld [vmem:[%s6704_s25 + $0x2c] sm:$0x1] }
  0x20   : > { %v282_v62 = vrot.slane %v280_v53, 5  ;;  %v5427_v0 = vcombine.low %v2064_v55, %v2074_v60  ;;  %v268_v1 = vrot.slane %v267_v58, 4  ;;  %v2079_v4 = vshll.u32 %v5382_v49, 16  ;;  %v189_v52 = vld [vmem:[%s6704_s25 + $0x24] sm:$0xf] }
  0x21   : > { %v2085_v5 = vshll.u32 %v6735_v54, 16  ;;  %v277_v6 = vor.u32 %v276_v61, %v272_v51  ;;  %v2078_v7 = vrot.slane %v2076_v63, 4  ;;  %v2089_v8 = vshrl.u32 %v6735_v54, 16  ;;  %v190_v61 = vld [vmem:[%s6704_s25 + $0x28] sm:$0xf] }
  0x22   : > { %v2095_v9 = vshll.u32 %v6743_v59, 16  ;;  %6094 = vmatprep.mubr.msk.bf16.mxu0 %vm676_vm3, %v5427_v0  ;;  %v273_v11 = vsel %vm6723_vm2, %v268_v1, %v272_v51  ;;  %v2081_v12 = vrot.slane %v2079_v4, 5  ;;  %v2805_v16 = vrot.slane %v6735_v54, 5 }
  0x23   : > { %v2087_v15 = vrot.slane %v2085_v5, 5  ;;  %v278_v18 = vrot.slane %v277_v6, 4  ;;  %v2091_v19 = vrot.slane %v2089_v8, 4  ;;  %v2808_v21 = vrot.slane %v6743_v59, 5  ;;  %v220_v6 = vld [vmem:[%s6704_s25 + $0x2c] sm:$0x1] }
  0x24   : > { %v2097_v20 = vrot.slane %v2095_v9, 5  ;;  %v2082_v22 = vor.u32 %v2081_v12, %v2078_v7  ;;  %v6759_v23 = vrot.slane %v2805_v16, 4  ;;  %v285_v25 = vshrl.u32 %v187_v10, 16 }
  0x25   : > { %v288_v26 = vshll.u32 %v187_v10, 16  ;;  %v283_v27 = vsel %vm6723_vm2, %v278_v18, %v282_v62  ;;  %v2092_v29 = vor.u32 %v2091_v19, %v2087_v15  ;;  %v294_v30 = vshll.u32 %v188_v17, 16  ;;  %v6786_v62 = vld [vmem:[%s8529_s1 + $0x30] sm:$0xff]  }
  0x26   : > { %v298_v31 = vshrl.u32 %v188_v17, 16  ;;  %v5200_v33 = vcombine.low %v273_v11, %v283_v27  ;;  %v2083_v34 = vrot.slane %v2082_v22, 4  ;;  %v287_v35 = vrot.slane %v285_v25, 4  ;;  %v6799_v22 = vld [vmem:[%s6704_s25 + $0x34] sm:$0xf] }
  0x27   : > { %v290_v36 = vrot.slane %v288_v26, 5  ;;  %v2093_v39 = vrot.slane %v2092_v29, 4  ;;  %v296_v40 = vrot.slane %v294_v30, 5  ;;  %v304_v42 = vshll.u32 %v219_v24, 16  ;;  %v6806_v30 = vld [vmem:[%s6704_s25 + $0x38] sm:$0x1] }
  0x28   : > { %v300_v41 = vrot.slane %v298_v31, 4  ;;  %5959 = vmatmul.mubr.msk.bf16.vlgmr.msra.gmra.mrb[0].mxu1 %vm676_vm3, %v5200_v33  ;;  %v2088_v43 = vsel %vm6723_vm2, %v2083_v34, %v2087_v15  ;;  %v2100_v46 = vshrl.u32 %v5385_v32, 16  ;;  %v2103_v47 = vshll.u32 %v5385_v32, 16  ;;  %v5388_v15 = vld [vmem:[%s6704_s25 + $0x30] sm:$0xf] }
  0x29   : > { %v291_v44 = vor.u32 %v290_v36, %v287_v35  ;;  %5991 = vmatpush3.bf16.msra.mxu1 %v6692_v2  ;;  %v2098_v48 = vsel %vm6723_vm2, %v2093_v39, %v2097_v20  ;;  %v306_v50 = vrot.slane %v304_v42, 5  ;;  %v2109_v51 = vshll.u32 %v6766_v37, 16  ;;  %v191_v42 = vld [vmem:[%s6704_s25 + $0x30] sm:$0xf] }
  0x2a   : > { %v301_v49 = vor.u32 %v300_v41, %v296_v40  ;;  %v5428_v53 = vcombine.low %v2088_v43, %v2098_v48  ;;  %v2102_v58 = vrot.slane %v2100_v46, 4  ;;  %v2105_v60 = vrot.slane %v2103_v47, 5  ;;  %6024 = vmatprep.subr.bf16.mxu1 %v6535_v38  ;;  %v192_v48 = vld [vmem:[%s6704_s25 + $0x34] sm:$0xf] }
  0x2b   : > { %v292_v55 = vrot.slane %v291_v44, 4  ;;  %v2111_v63 = vrot.slane %v2109_v51, 5  ;;  %v2113_v0 = vshrl.u32 %v6766_v37, 16  ;;  %v2119_v1 = vshll.u32 %v6775_v45, 16 }
  0x2c   : > { %v302_v2 = vrot.slane %v301_v49, 4  ;;  %6095 = vmatmul.mubr.msk.bf16.vlgmr.msra.gmra.mrb[0].mxu0 %vm676_vm3, %v5428_v53  ;;  %v2106_v5 = vor.u32 %v2105_v60, %v2102_v58  ;;  %v309_v7 = vshrl.u32 %v189_v52, 16  ;;  %v312_v8 = vshll.u32 %v189_v52, 16  ;;  %v221_v53 = vld [vmem:[%s6704_s25 + $0x38] sm:$0x1] }
  0x2d   : > { %v297_v4 = vsel %vm6723_vm2, %v292_v55, %v296_v40  ;;  %6127 = vmatpush3.bf16.msra.mxu0 %v6699_v3  ;;  %v2115_v10 = vrot.slane %v2113_v0, 4  ;;  %v2121_v11 = vrot.slane %v2119_v1, 5  ;;  %v318_v12 = vshll.u32 %v190_v61, 16 }
  0x2e   : > { %v307_v9 = vsel %vm6723_vm2, %v302_v2, %v306_v50  ;;  %v2107_v18 = vrot.slane %v2106_v5, 4  ;;  %v311_v19 = vrot.slane %v309_v7, 4  ;;  %v314_v20 = vrot.slane %v312_v8, 5  ;;  %6160 = vmatprep.subr.bf16.mxu0 %v6786_v62 }
  0x2f   : > { %v5201_v17 = vcombine.low %v297_v4, %v307_v9  ;;  %v2116_v24 = vor.u32 %v2115_v10, %v2111_v63  ;;  %v320_v25 = vrot.slane %v318_v12, 5  ;;  %v322_v26 = vshrl.u32 %v190_v61, 16  ;;  %v5391_v4 = vld [vmem:[%s6704_s25 + $0x3c] sm:$0xf]  ;;  %v6823_v9 = vld [vmem:[%s6704_s25 + $0x40] sm:$0xf] }
  0x30   : > { %v328_v3 = vshll.u32 %v220_v6, 16  ;;  %v2112_v27 = vsel %vm6723_vm2, %v2107_v18, %v2111_v63  ;;  %v315_v29 = vor.u32 %v314_v20, %v311_v19  ;;  %v2124_v31 = vshrl.u32 %v5388_v15, 16  ;;  %v6828_v20 = vld [vmem:[%s6704_s25 + $0x44] sm:$0x1] }
  0x31   : > { %5962 = vmatprep.mubr.msk.bf16.mxu1 %vm676_vm3, %v5201_v17  ;;  %v2127_v32 = vshll.u32 %v5388_v15, 16  ;;  %v2117_v33 = vrot.slane %v2116_v24, 4  ;;  %v324_v34 = vrot.slane %v322_v26, 4  ;;  %v2133_v36 = vshll.u32 %v6799_v22, 16 }
  0x32   : > { %v330_v35 = vrot.slane %v328_v3, 5  ;;  %v316_v38 = vrot.slane %v315_v29, 4  ;;  %v2126_v39 = vrot.slane %v2124_v31, 4  ;;  %v2137_v41 = vshrl.u32 %v6799_v22, 16  ;;  %v193_v29 = vld [vmem:[%s6704_s25 + $0x3c] sm:$0xf] }
  0x33   : > { %v2129_v40 = vrot.slane %v2127_v32, 5  ;;  %v2122_v43 = vsel %vm6723_vm2, %v2117_v33, %v2121_v11  ;;  %v325_v44 = vor.u32 %v324_v34, %v320_v25  ;;  %v2135_v46 = vrot.slane %v2133_v36, 5 }
  0x34   : > { %v2143_v47 = vshll.u32 %v6806_v30, 16  ;;  %v5429_v49 = vcombine.low %v2112_v27, %v2122_v43  ;;  %v321_v50 = vsel %vm6723_vm2, %v316_v38, %v320_v25  ;;  %v2139_v52 = vrot.slane %v2137_v41, 4 }
  0x35   : > { %v2130_v51 = vor.u32 %v2129_v40, %v2126_v39  ;;  %v326_v55 = vrot.slane %v325_v44, 4  ;;  %v333_v60 = vshrl.u32 %v191_v42, 16  ;;  %v336_v61 = vshll.u32 %v191_v42, 16 }
  0x36   : > { %v2145_v58 = vrot.slane %v2143_v47, 5  ;;  %6098 = vmatprep.mubr.msk.bf16.mxu0 %vm676_vm3, %v5429_v49  ;;  %v2140_v63 = vor.u32 %v2139_v52, %v2135_v46  ;;  %v342_v0 = vshll.u32 %v192_v48, 16  ;;  %v346_v1 = vshrl.u32 %v192_v48, 16  ;;  %v222_v49 = vld [vmem:[%s6704_s25 + $0x44] sm:$0x1] }
  0x37   : > { %v2131_v2 = vrot.slane %v2130_v51, 4  ;;  %v331_v5 = vsel %vm6723_vm2, %v326_v55, %v330_v35  ;;  %v335_v6 = vrot.slane %v333_v60, 4  ;;  %v338_v7 = vrot.slane %v336_v61, 5  ;;  %v194_v35 = vld [vmem:[%s6704_s25 + $0x40] sm:$0xf] }
  0x38   : > { %v352_v8 = vshll.u32 %v221_v53, 16  ;;  %v5202_v10 = vcombine.low %v321_v50, %v331_v5  ;;  %v2141_v12 = vrot.slane %v2140_v63, 4  ;;  %v344_v15 = vrot.slane %v342_v0, 5  ;;  %v5394_v51 = vld [vmem:[%s6704_s25 + $0x48] sm:$0xf] }
  0x39   : > { %v2136_v11 = vsel %vm6723_vm2, %v2131_v2, %v2135_v46  ;;  %v339_v17 = vor.u32 %v338_v7, %v335_v6  ;;  %v348_v18 = vrot.slane %v346_v1, 4  ;;  %v2148_v24 = vshrl.u32 %v5391_v4, 16  ;;  %v6846_v60 = vld [vmem:[%s6704_s25 + $0x4c] sm:$0xf] }
  0x3a   : > { %v354_v19 = vrot.slane %v352_v8, 5  ;;  %5963 = vmatmul.mubr.msk.bf16.gmra.mrb[4].mxu1 %vm676_vm3, %v5202_v10  ;;  %v2146_v25 = vsel %vm6723_vm2, %v2141_v12, %v2145_v58  ;;  %v2151_v26 = vshll.u32 %v5391_v4, 16  ;;  %v2157_v3 = vshll.u32 %v6823_v9, 16  ;;  %v6854_v10 = vld [vmem:[%s6704_s25 + $0x50] sm:$0x1] }
  0x3b   : > { %v2161_v27 = vshrl.u32 %v6823_v9, 16  ;;  %v5430_v31 = vcombine.low %v2136_v11, %v2146_v25  ;;  %v340_v32 = vrot.slane %v339_v17, 4  ;;  %v349_v33 = vor.u32 %v348_v18, %v344_v15  ;;  %v6861_v25 = vld [vmem:[%s6704_s25 + $0x4c] sm:$0xf] }
  0x3c   : > { %v2150_v34 = vrot.slane %v2148_v24, 4  ;;  %v2153_v36 = vrot.slane %v2151_v26, 5  ;;  %v2159_v38 = vrot.slane %v2157_v3, 5  ;;  %v2167_v40 = vshll.u32 %v6828_v20, 16 }
  0x3d   : > { %v2163_v39 = vrot.slane %v2161_v27, 4  ;;  %6099 = vmatmul.mubr.msk.bf16.gmra.mrb[4].mxu0 %vm676_vm3, %v5430_v31  ;;  %v345_v41 = vsel %vm6723_vm2, %v340_v32, %v344_v15  ;;  %v350_v42 = vrot.slane %v349_v33, 4  ;;  %v357_v43 = vshrl.u32 %v193_v29, 16  ;;  %v6858_v15 = vld [vmem:[%s6704_s25 + $0x48] sm:$0xf] }
  0x3e   : > { %v360_v44 = vshll.u32 %v193_v29, 16  ;;  %v2154_v46 = vor.u32 %v2153_v36, %v2150_v34  ;;  %v2169_v48 = vrot.slane %v2167_v40, 5  ;;  %v366_v50 = vshll.u32 %v194_v35, 16  ;;  %v223_v34 = vld [vmem:[%s6704_s25 + $0x50] sm:$0x1] }
  0x3f   : > { %v2164_v47 = vor.u32 %v2163_v39, %v2159_v38  ;;  %v355_v52 = vsel %vm6723_vm2, %v350_v42, %v354_v19  ;;  %v359_v53 = vrot.slane %v357_v43, 4  ;;  %v370_v58 = vshrl.u32 %v194_v35, 16 }
  0x40   : > { %v362_v55 = vrot.slane %v360_v44, 5  ;;  %v5203_v61 = vcombine.low %v345_v41, %v355_v52  ;;  %v2155_v2 = vrot.slane %v2154_v46, 4  ;;  %v368_v0 = vrot.slane %v366_v50, 5  ;;  %v5397_v41 = vld [vmem:[%s6704_s25 + $0x54] sm:$0xf] }
  0x41   : > { %v2165_v63 = vrot.slane %v2164_v47, 4  ;;  %v372_v4 = vrot.slane %v370_v58, 4  ;;  %v376_v5 = vshll.u32 %v222_v49, 16  ;;  %v2172_v6 = vshrl.u32 %v5394_v51, 16 }
  0x42   : > { %v363_v1 = vor.u32 %v362_v55, %v359_v53  ;;  %5966 = vmatprep.mubr.msk.bf16.mxu1 %vm676_vm3, %v5203_v61  ;;  %v2160_v7 = vsel %vm6723_vm2, %v2155_v2, %v2159_v38  ;;  %v2175_v11 = vshll.u32 %v5394_v51, 16  ;;  %v2181_v12 = vshll.u32 %v6846_v60, 16  ;;  %v6877_v51 = vld [vmem:[%s6704_s25 + $0x58] sm:$0xf] }
  0x43   : > { %v2170_v8 = vsel %vm6723_vm2, %v2165_v63, %v2169_v48  ;;  %v373_v19 = vor.u32 %v372_v4, %v368_v0  ;;  %v378_v24 = vrot.slane %v376_v5, 5  ;;  %v2174_v26 = vrot.slane %v2172_v6, 4 }
  0x44   : > { %v5431_v17 = vcombine.low %v2160_v7, %v2170_v8  ;;  %v364_v18 = vrot.slane %v363_v1, 4  ;;  %v2177_v3 = vrot.slane %v2175_v11, 5  ;;  %v2183_v27 = vrot.slane %v2181_v12, 5  ;;  %v6887_v8 = vld [vmem:[%s6704_s25 + $0x54] sm:$0xf] }
  0x45   : > { %v2185_v29 = vshrl.u32 %v6846_v60, 16  ;;  %v374_v32 = vrot.slane %v373_v19, 4  ;;  %v2191_v33 = vshll.u32 %v6854_v10, 16  ;;  %v381_v35 = vshrl.u32 %v6858_v15, 16  ;;  %v6893_v19 = vld [vmem:[%s6704_s25 + $0x58] sm:$0xf] }
  0x46   : > { %6102 = vmatprep.mubr.msk.bf16.mxu0 %vm676_vm3, %v5431_v17  ;;  %v369_v31 = vsel %vm6723_vm2, %v364_v18, %v368_v0  ;;  %v2178_v36 = vor.u32 %v2177_v3, %v2174_v26  ;;  %v384_v39 = vshll.u32 %v6858_v15, 16  ;;  %v390_v40 = vshll.u32 %v6861_v25, 16  ;;  %v6883_v0 = vld [vmem:[%s6704_s25 + $0x5c] sm:$0x1] }
  0x47   : > { %v2187_v38 = vrot.slane %v2185_v29, 4  ;;  %v379_v42 = vsel %vm6723_vm2, %v374_v32, %v378_v24  ;;  %v2193_v43 = vrot.slane %v2191_v33, 5  ;;  %v383_v44 = vrot.slane %v381_v35, 4  ;;  %v224_v33 = vld [vmem:[%s6704_s25 + $0x5c] sm:$0x1] }
  0x48   : > { %v394_v46 = vshrl.u32 %v6861_v25, 16  ;;  %v5204_v47 = vcombine.low %v369_v31, %v379_v42  ;;  %v2179_v48 = vrot.slane %v2178_v36, 4  ;;  %v386_v50 = vrot.slane %v384_v39, 5 }
  0x49   : > { %v2188_v49 = vor.u32 %v2187_v38, %v2183_v27  ;;  %v392_v52 = vrot.slane %v390_v40, 5  ;;  %v400_v55 = vshll.u32 %v223_v34, 16  ;;  %v2196_v58 = vshrl.u32 %v5397_v41, 16  ;;  %v5400_v40 = vld [vmem:[%s6704_s25 + $0x60] sm:$0xf] }
  0x4a   : > { %v396_v53 = vrot.slane %v394_v46, 4  ;;  %5967 = vmatmul.mubr.msk.bf16.gmra.mrb[8].mxu1 %vm676_vm3, %v5204_v47  ;;  %v2184_v61 = vsel %vm6723_vm2, %v2179_v48, %v2183_v27  ;;  %v387_v63 = vor.u32 %v386_v50, %v383_v44  ;;  %v2199_v1 = vshll.u32 %v5397_v41, 16  ;;  %v6907_v46 = vld [vmem:[%s6704_s25 + $0x64] sm:$0xf] }
  0x4b   : > { %v2189_v2 = vrot.slane %v2188_v49, 4  ;;  %v402_v5 = vrot.slane %v400_v55, 5  ;;  %v2198_v6 = vrot.slane %v2196_v58, 4  ;;  %v2205_v7 = vshll.u32 %v6877_v51, 16  ;;  %v6914_v55 = vld [vmem:[%s6704_s25 + $0x68] sm:$0x1] }
  0x4c   : > { %v397_v4 = vor.u32 %v396_v53, %v392_v52  ;;  %v388_v12 = vrot.slane %v387_v63, 4  ;;  %v2201_v17 = vrot.slane %v2199_v1, 5  ;;  %v2209_v18 = vshrl.u32 %v6877_v51, 16 }
  0x4d   : > { %v2194_v11 = vsel %vm6723_vm2, %v2189_v2, %v2193_v43  ;;  %v2207_v3 = vrot.slane %v2205_v7, 5  ;;  %v2215_v27 = vshll.u32 %v6883_v0, 16  ;;  %v405_v34 = vshrl.u32 %v6887_v8, 16 }
  0x4e   : > { %v5432_v24 = vcombine.low %v2184_v61, %v2194_v11  ;;  %v398_v26 = vrot.slane %v397_v4, 4  ;;  %v393_v29 = vsel %vm6723_vm2, %v388_v12, %v392_v52  ;;  %v2202_v31 = vor.u32 %v2201_v17, %v2198_v6  ;;  %v6924_v17 = vld [vmem:[%s6704_s25 + $0x64] sm:$0xf] }
  0x4f   : > { %v2211_v32 = vrot.slane %v2209_v18, 4  ;;  %v2217_v36 = vrot.slane %v2215_v27, 5  ;;  %v408_v38 = vshll.u32 %v6887_v8, 16  ;;  %v414_v39 = vshll.u32 %v6893_v19, 16 }
  0x50   : > { %6103 = vmatmul.mubr.msk.bf16.gmra.mrb[8].mxu0 %vm676_vm3, %v5432_v24  ;;  %v403_v35 = vsel %vm6723_vm2, %v398_v26, %v402_v5  ;;  %v2203_v42 = vrot.slane %v2202_v31, 4  ;;  %v407_v44 = vrot.slane %v405_v34, 4  ;;  %v418_v49 = vshrl.u32 %v6893_v19, 16  ;;  %v6918_v5 = vld [vmem:[%s6704_s25 + $0x60] sm:$0xf] }
  0x51   : > { %v5205_v41 = vcombine.low %v393_v29, %v403_v35  ;;  %v2212_v43 = vor.u32 %v2211_v32, %v2207_v3  ;;  %v410_v47 = vrot.slane %v408_v38, 5  ;;  %v416_v48 = vrot.slane %v414_v39, 5  ;;  %v225_v35 = vld [vmem:[%s6704_s25 + $0x68] sm:$0x1] }
  0x52   : > { %v424_v50 = vshll.u32 %v224_v33, 16  ;;  %v2208_v52 = vsel %vm6723_vm2, %v2203_v42, %v2207_v3  ;;  %v2220_v58 = vshrl.u32 %v5400_v40, 16  ;;  %v2223_v61 = vshll.u32 %v5400_v40, 16 }
  0x53   : > { %5970 = vmatprep.mubr.msk.bf16.mxu1 %vm676_vm3, %v5205_v41  ;;  %v2213_v53 = vrot.slane %v2212_v43, 4  ;;  %v411_v2 = vor.u32 %v410_v47, %v407_v44  ;;  %v420_v63 = vrot.slane %v418_v49, 4  ;;  %v2229_v4 = vshll.u32 %v6907_v46, 16  ;;  %v5460_v43 = vld [vmem:[%s6704_s25 + $0xc] sm:$0xe] }
  0x54   : > { %v426_v1 = vrot.slane %v424_v50, 5  ;;  %v2222_v7 = vrot.slane %v2220_v58, 4  ;;  %v2225_v11 = vrot.slane %v2223_v61, 5  ;;  %v2233_v12 = vshrl.u32 %v6907_v46, 16 }
  0x55   : > { %v2218_v6 = vsel %vm6723_vm2, %v2213_v53, %v2217_v36  ;;  %v412_v24 = vrot.slane %v411_v2, 4  ;;  %v421_v26 = vor.u32 %v420_v63, %v416_v48  ;;  %v2231_v3 = vrot.slane %v2229_v4, 5 }
  0x56   : > { %v5433_v18 = vcombine.low %v2208_v52, %v2218_v6  ;;  %v2226_v27 = vor.u32 %v2225_v11, %v2222_v7  ;;  %v2235_v29 = vrot.slane %v2233_v12, 4  ;;  %v2239_v31 = vshll.u32 %v6914_v55, 16  ;;  %v6952_v7 = vld [vmem:[%s6704_s25 + $0x70] sm:$0xf] }
  0x57   : > { %v429_v32 = vshrl.u32 %v6918_v5, 16  ;;  %v417_v33 = vsel %vm6723_vm2, %v412_v24, %v416_v48  ;;  %v422_v34 = vrot.slane %v421_v26, 4  ;;  %v432_v36 = vshll.u32 %v6918_v5, 16  ;;  %v6939_v48 = vld [vmem:[%s6704_s25 + $0x6c] sm:$0xf] }
  0x58   : > { %6106 = vmatprep.mubr.msk.bf16.mxu0 %vm676_vm3, %v5433_v18  ;;  %v438_v38 = vshll.u32 %v6924_v17, 16  ;;  %v2227_v39 = vrot.slane %v2226_v27, 4  ;;  %v2236_v40 = vor.u32 %v2235_v29, %v2231_v3  ;;  %v2241_v41 = vrot.slane %v2239_v31, 5  ;;  %v226_v31 = vld [vmem:[%s6704_s25 + $0x74] sm:$0x1] }
  0x59   : > { %v431_v42 = vrot.slane %v429_v32, 4  ;;  %v427_v44 = vsel %vm6723_vm2, %v422_v34, %v426_v1  ;;  %v434_v47 = vrot.slane %v432_v36, 5  ;;  %v442_v50 = vshrl.u32 %v6924_v17, 16  ;;  %v5461_v32 = vld [vmem:[%s6704_s25 + $0x18] sm:$0xe] }
  0x5a   : > { %v440_v49 = vrot.slane %v438_v38, 5  ;;  %v5206_v52 = vcombine.low %v417_v33, %v427_v44  ;;  %v2232_v53 = vsel %vm6723_vm2, %v2227_v39, %v2231_v3  ;;  %v2237_v58 = vrot.slane %v2236_v40, 4  ;;  %v6971_v38 = vld [vmem:[%s6704_s25 + $0x78] sm:$0xf] }
  0x5b   : > { %v448_v61 = vshll.u32 %v225_v35, 16  ;;  %v435_v63 = vor.u32 %v434_v47, %v431_v42  ;;  %v444_v1 = vrot.slane %v442_v50, 4  ;;  %v5476_v4 = vrot.slane %v5460_v43, 9  ;;  %v5462_v47 = vld [vmem:[%s6704_s25 + $0x24] sm:$0xe] }
  0x5c   : > { %v2800_v6 = vrot.slane %v2798_v56, 4  ;;  %5971 = vmatmul.mubr.msk.bf16.gmra.mrb[12].mxu1 %vm676_vm3, %v5206_v52  ;;  %v2242_v11 = vsel %vm6723_vm2, %v2237_v58, %v2241_v41  ;;  %v453_v18 = vshrl.u32 %v6939_v48, 16  ;;  %v456_v24 = vshll.u32 %v6939_v48, 16  ;;  %v227_v41 = vld [vmem:[%s6704_s25 + $0x80] sm:$0x1] }
  0x5d   : > { %v450_v12 = vrot.slane %v448_v61, 5  ;;  %v5434_v26 = vcombine.low %v2232_v53, %v2242_v11  ;;  %v436_v3 = vrot.slane %v435_v63, 4  ;;  %v445_v27 = vor.u32 %v444_v1, %v440_v49 }
  0x5e   : > { %v2799_v29 = vsel %vm6945_vm6, %v5476_v4, %v2798_v56  ;;  %v2802_v33 = vsel %vm6945_vm6, %v2800_v6, %v2801_v57  ;;  %v455_v34 = vrot.slane %v453_v18, 4  ;;  %v458_v35 = vrot.slane %v456_v24, 5  ;;  %v7005_v24 = vld [vmem:[%s6704_s25 + $0x88] sm:$0xf] }
  0x5f   : > { %v462_v36 = vshll.u32 %v6952_v7, 16  ;;  %6107 = vmatmul.mubr.msk.bf16.gmra.mrb[12].mxu0 %vm676_vm3, %v5434_v26  ;;  %v441_v13 = vsel %vm6723_vm2, %v436_v3, %v440_v49  ;;  %v446_v56 = vrot.slane %v445_v27, 4  ;;  %v5492_v39 = vcombine.low %v2799_v29, %v2802_v33 }
  0x60   : > { %v466_v40 = vshrl.u32 %v6952_v7, 16  ;;  %v459_v57 = vor.u32 %v458_v35, %v455_v34  ;;  %v472_v43 = vshll.u32 %v226_v31, 16  ;;  %v5477_v44 = vrot.slane %v5461_v32, 9  ;;  %v228_v35 = vld [vmem:[%s6704_s25 + $0x8c] sm:$0x1] }
  0x61   : > { %v464_v42 = vrot.slane %v462_v36, 5  ;;  %v451_v50 = vsel %vm6723_vm2, %v446_v56, %v450_v12  ;;  %6128 = vmatprep.mubr.msk.bf16.mxu0 %vm676_vm3, %v5492_v39  ;;  %v2809_v49 = vsel %vm6945_vm6, %v6759_v23, %v2808_v21  ;;  %v477_v53 = vshrl.u32 %v6971_v38, 16  ;;  %v6997_v12 = vld [vmem:[%s6704_s25 + $0x84] sm:$0xf] }
  0x62   : > { %v468_v52 = vrot.slane %v466_v40, 4  ;;  %v5207_v58 = vcombine.low %v441_v13, %v451_v50  ;;  %v460_v61 = vrot.slane %v459_v57, 4  ;;  %v474_v63 = vrot.slane %v472_v43, 5  ;;  %v5463_v40 = vld [vmem:[%s6704_s25 + $0x30] sm:$0xe] }
  0x63   : > { %v2806_v1 = vsel %vm6945_vm6, %v5477_v44, %v2805_v16  ;;  %v479_v11 = vrot.slane %v477_v53, 4  ;;  %v480_v59 = vshll.u32 %v6971_v38, 16  ;;  %v486_v23 = vshll.u32 %v6978_v14, 16  ;;  %v7010_v16 = vld [vmem:[%s8529_s1 + $0x38] sm:$0xff]   ;;  %v7029_v50 = vld [vmem:[%s6704_s25 + $0x90] sm:$0xf] }
  0x64   : > { %v469_v4 = vor.u32 %v468_v52, %v464_v42  ;;  %v5493_v6 = vcombine.low %v2806_v1, %v2809_v49  ;;  %5974 = vmatprep.mubr.msk.bf16.mxu1 %vm676_vm3, %v5207_v58  ;;  %v465_v21 = vsel %vm6723_vm2, %v460_v61, %v464_v42  ;;  %v490_v54 = vshrl.u32 %v6978_v14, 16  ;;  %v7034_v58 = vld [vmem:[%s6704_s25 + $0x94] sm:$0xf] }
  0x65   : > { %v496_v18 = vshll.u32 %v227_v41, 16  ;;  %v482_v3 = vrot.slane %v480_v59, 5  ;;  %v5478_v27 = vrot.slane %v5462_v47, 9  ;;  %v2812_v29 = vrot.slane %v6766_v37, 5 }
  0x66   : > { %v470_v26 = vrot.slane %v469_v4, 4  ;;  %v488_v31 = vrot.slane %v486_v23, 5  ;;  %v492_v32 = vrot.slane %v490_v54, 4  ;;  %v2815_v34 = vrot.slane %v6775_v45, 5  ;;  %v229_v23 = vld [vmem:[%s6704_s25 + $0x98] sm:$0x1] }
  0x67   : > { %v498_v33 = vrot.slane %v496_v18, 5  ;;  %6129 = vmatmul.mubr.msk.bf16.vlgmr.msra.gmra.mrb[0].mxu0 %vm676_vm3, %v5493_v6  ;;  %v483_v13 = vor.u32 %v482_v3, %v479_v11  ;;  %v2813_v56 = vsel %vm6945_vm6, %v5478_v27, %v2812_v29  ;;  %v2814_v39 = vrot.slane %v2812_v29, 4  ;;  %v5464_v27 = vld [vmem:[%s6704_s25 + $0x3c] sm:$0xe] }
  0x68   : > { %v475_v36 = vsel %vm6723_vm2, %v470_v26, %v474_v63  ;;  %6161 = vmatpush3.bf16.msra.mxu0 %v6786_v62  ;;  %v493_v37 = vor.u32 %v492_v32, %v488_v31  ;;  %v501_v45 = vshrl.u32 %v6997_v12, 16  ;;  %v504_v57 = vshll.u32 %v6997_v12, 16 }
  0x69   : > { %v5208_v41 = vcombine.low %v465_v21, %v475_v36  ;;  %v484_v42 = vrot.slane %v483_v13, 4  ;;  %v2816_v43 = vsel %vm6945_vm6, %v2814_v39, %v2815_v34  ;;  %v510_v44 = vshll.u32 %v7005_v24, 16  ;;  %6194 = vmatprep.subr.bf16.mxu0 %v7010_v16 }
  0x6a   : > { %v514_v47 = vshrl.u32 %v7005_v24, 16  ;;  %v494_v62 = vrot.slane %v493_v37, 4  ;;  %v5494_v52 = vcombine.low %v2813_v56, %v2816_v43  ;;  %v503_v49 = vrot.slane %v501_v45, 4 }
  0x6b   : > { %5975 = vmatmul.mubr.msk.bf16.gmra.mrb[16].mxu1 %vm676_vm3, %v5208_v41  ;;  %v506_v53 = vrot.slane %v504_v57, 5  ;;  %v489_v61 = vsel %vm6723_vm2, %v484_v42, %v488_v31  ;;  %v512_v63 = vrot.slane %v510_v44, 5  ;;  %v520_v4 = vshll.u32 %v228_v35, 16  ;;  %v7062_v42 = vld [vmem:[%s6704_s25 + $0xa0] sm:$0xf] }
  0x6c   : > { %v516_v1 = vrot.slane %v514_v47, 4  ;;  %v499_v6 = vsel %vm6723_vm2, %v494_v62, %v498_v33  ;;  %6132 = vmatprep.mubr.msk.bf16.mxu0 %vm676_vm3, %v5494_v52  ;;  %v5479_v59 = vrot.slane %v5463_v40, 9  ;;  %v2819_v21 = vrot.slane %v6799_v22, 5  ;;  %v7057_v40 = vld [vmem:[%s6704_s25 + $0x9c] sm:$0xf] }
  0x6d   : > { %v507_v11 = vor.u32 %v506_v53, %v503_v49  ;;  %v5209_v54 = vcombine.low %v489_v61, %v499_v6  ;;  %v522_v26 = vrot.slane %v520_v4, 5  ;;  %v2822_v3 = vrot.slane %v6806_v30, 5  ;;  %v230_v52 = vld [vmem:[%s6704_s25 + $0xa4] sm:$0x1] }
  0x6e   : > { %v517_v18 = vor.u32 %v516_v1, %v512_v63  ;;  %v2820_v31 = vsel %vm6945_vm6, %v5479_v59, %v2819_v21  ;;  %v2821_v32 = vrot.slane %v2819_v21, 4  ;;  %v525_v33 = vshrl.u32 %v7029_v50, 16  ;;  %v5465_v59 = vld [vmem:[%s6704_s25 + $0x48] sm:$0xe] }
  0x6f   : > { %v508_v29 = vrot.slane %v507_v11, 4  ;;  %5978 = vmatprep.mubr.msk.bf16.mxu1 %vm676_vm3, %v5209_v54  ;;  %v528_v22 = vshll.u32 %v7029_v50, 16  ;;  %v534_v35 = vshll.u32 %v7034_v58, 16  ;;  %v538_v36 = vshrl.u32 %v7034_v58, 16 }
  0x70   : > { %v518_v34 = vrot.slane %v517_v18, 4  ;;  %v2823_v13 = vsel %vm6945_vm6, %v2821_v32, %v2822_v3  ;;  %v527_v56 = vrot.slane %v525_v33, 4  ;;  %v544_v39 = vshll.u32 %v229_v23, 16  ;;  %v7081_v33 = vld [vmem:[%s6704_s25 + $0xa8] sm:$0xf] }
  0x71   : > { %v513_v30 = vsel %vm6723_vm2, %v508_v29, %v512_v63  ;;  %v5495_v37 = vcombine.low %v2820_v31, %v2823_v13  ;;  %v530_v45 = vrot.slane %v528_v22, 5  ;;  %v536_v57 = vrot.slane %v534_v35, 5 }
  0x72   : > { %v523_v41 = vsel %vm6723_vm2, %v518_v34, %v522_v26  ;;  %v540_v44 = vrot.slane %v538_v36, 4  ;;  %v546_v47 = vrot.slane %v544_v39, 5  ;;  %v5480_v62 = vrot.slane %v5464_v27, 9 }
  0x73   : > { %v5210_v43 = vcombine.low %v513_v30, %v523_v41  ;;  %6133 = vmatmul.mubr.msk.bf16.gmra.mrb[4].mxu0 %vm676_vm3, %v5495_v37  ;;  %v531_v49 = vor.u32 %v530_v45, %v527_v56  ;;  %v2826_v53 = vrot.slane %v6823_v9, 5  ;;  %v2829_v61 = vrot.slane %v6828_v20, 5  ;;  %v7086_v30 = vld [vmem:[%s6704_s25 + $0xac] sm:$0xf]  ;;  %v231_v37 = vld [vmem:[%s6704_s25 + $0xb0] sm:$0x1] }
  0x74   : > { %v549_v63 = vshrl.u32 %v7057_v40, 16  ;;  %v541_v1 = vor.u32 %v540_v44, %v536_v57  ;;  %v552_v4 = vshll.u32 %v7057_v40, 16  ;;  %v558_v6 = vshll.u32 %v7062_v42, 16  ;;  %v5466_v45 = vld [vmem:[%s6704_s25 + $0x54] sm:$0xe] }
  0x75   : > { %5979 = vmatmul.mubr.msk.bf16.gmra.mrb[20].mxu1 %vm676_vm3, %v5210_v43  ;;  %v562_v11 = vshrl.u32 %v7062_v42, 16  ;;  %v532_v21 = vrot.slane %v531_v49, 4  ;;  %v2827_v23 = vsel %vm6945_vm6, %v5480_v62, %v2826_v53  ;;  %v2828_v9 = vrot.slane %v2826_v53, 4  ;;  %v7096_v62 = vld [vmem:[%s6704_s25 + $0xb4] sm:$0xf] }
  0x76   : > { %v551_v20 = vrot.slane %v549_v63, 4  ;;  %v542_v54 = vrot.slane %v541_v1, 4  ;;  %v554_v18 = vrot.slane %v552_v4, 5  ;;  %v560_v26 = vrot.slane %v558_v6, 5  ;;  %v7108_v4 = vld [vmem:[%s6704_s25 + $0xb8] sm:$0xf] }
  0x77   : > { %v564_v3 = vrot.slane %v562_v11, 4  ;;  %v537_v27 = vsel %vm6723_vm2, %v532_v21, %v536_v57  ;;  %v2830_v29 = vsel %vm6945_vm6, %v2828_v9, %v2829_v61  ;;  %v568_v31 = vshll.u32 %v230_v52, 16 }
  0x78   : > { %v5481_v32 = vrot.slane %v5465_v59, 9  ;;  %v547_v34 = vsel %vm6723_vm2, %v542_v54, %v546_v47  ;;  %v5496_v22 = vcombine.low %v2827_v23, %v2830_v29  ;;  %v555_v35 = vor.u32 %v554_v18, %v551_v20  ;;  %v232_v18 = vld [vmem:[%s6704_s25 + $0xbc] sm:$0x1] }
  0x79   : > { %v565_v36 = vor.u32 %v564_v3, %v560_v26  ;;  %v5211_v13 = vcombine.low %v537_v27, %v547_v34  ;;  %v570_v56 = vrot.slane %v568_v31, 5  ;;  %v2833_v39 = vrot.slane %v6846_v60, 5  ;;  %v5467_v31 = vld [vmem:[%s6704_s25 + $0x60] sm:$0xe] }
  0x7a   : > { %v2836_v41 = vrot.slane %v6854_v10, 5  ;;  %6136 = vmatprep.mubr.msk.bf16.mxu0 %vm676_vm3, %v5496_v22  ;;  %v556_v57 = vrot.slane %v555_v35, 4  ;;  %v573_v44 = vshrl.u32 %v7081_v33, 16  ;;  %v576_v47 = vshll.u32 %v7081_v33, 16 }
  0x7b   : > { %v566_v43 = vrot.slane %v565_v36, 4  ;;  %5982 = vmatprep.mubr.msk.bf16.mxu1 %vm676_vm3, %v5211_v13  ;;  %v2834_v60 = vsel %vm6945_vm6, %v5481_v32, %v2833_v39  ;;  %v2835_v52 = vrot.slane %v2833_v39, 4  ;;  %v582_v10 = vshll.u32 %v7086_v30, 16  ;;  %v5468_v36 = vld [vmem:[%s6704_s25 + $0x6c] sm:$0xe] }
  0x7c   : > { %v586_v49 = vshrl.u32 %v7086_v30, 16  ;;  %v561_v53 = vsel %vm6723_vm2, %v556_v57, %v560_v26  ;;  %v575_v63 = vrot.slane %v573_v44, 4  ;;  %v578_v1 = vrot.slane %v576_v47, 5 }
  0x7d   : > { %v571_v61 = vsel %vm6723_vm2, %v566_v43, %v570_v56  ;;  %v2837_v11 = vsel %vm6945_vm6, %v2835_v52, %v2836_v41  ;;  %v584_v59 = vrot.slane %v582_v10, 5  ;;  %v592_v20 = vshll.u32 %v231_v37, 16  ;;  %v5405_v52 = vld [vmem:[%s6704_s25 + $0x74] sm:$0x1] }
  0x7e   : > { %v5212_v6 = vcombine.low %v561_v53, %v571_v61  ;;  %v588_v21 = vrot.slane %v586_v49, 4  ;;  %v5497_v23 = vcombine.low %v2834_v60, %v2837_v11  ;;  %v579_v9 = vor.u32 %v578_v1, %v575_v63  ;;  %v5404_v60 = vld [vmem:[%s6704_s25 + $0x70] sm:$0xf] }
  0x7f   : > { %v5482_v54 = vrot.slane %v5466_v45, 9  ;;  %v2840_v3 = vrot.slane %v6877_v51, 5  ;;  %v2843_v27 = vrot.slane %v6883_v0, 5  ;;  %v597_v29 = vshrl.u32 %v7096_v62, 16 }
  0x80   : > { %5983 = vmatmul.mubr.msk.bf16.gmra.mrb[24].mxu1 %vm676_vm3, %v5212_v6  ;;  %v589_v26 = vor.u32 %v588_v21, %v584_v59  ;;  %6137 = vmatmul.mubr.msk.bf16.gmra.mrb[8].mxu0 %vm676_vm3, %v5497_v23  ;;  %v580_v32 = vrot.slane %v579_v9, 4  ;;  %v594_v34 = vrot.slane %v592_v20, 5  ;;  %v600_v22 = vshll.u32 %v7096_v62, 16 }
  0x81   : > { %v606_v35 = vshll.u32 %v7108_v4, 16  ;;  %v2841_v51 = vsel %vm6945_vm6, %v5482_v54, %v2840_v3  ;;  %v2842_v56 = vrot.slane %v2840_v3, 4  ;;  %v599_v0 = vrot.slane %v597_v29, 4  ;;  %v5469_v54 = vld [vmem:[%s6704_s25 + $0x78] sm:$0xe] }
  0x82   : > { %v590_v13 = vrot.slane %v589_v26, 4  ;;  %v585_v39 = vsel %vm6723_vm2, %v580_v32, %v584_v59  ;;  %v602_v41 = vrot.slane %v600_v22, 5  ;;  %v610_v45 = vshrl.u32 %v7108_v4, 16  ;;  %v6586_v29 = vld [vmem:[%s6704_s25] sm:$0xf] }
  0x83   : > { %v608_v37 = vrot.slane %v606_v35, 5  ;;  %v2844_v43 = vsel %vm6945_vm6, %v2842_v56, %v2843_v27  ;;  %v616_v44 = vshll.u32 %v232_v18, 16  ;;  %v5483_v47 = vrot.slane %v5467_v31, 9  ;;  %v7148_v31 = vld [vmem:[%s6704_s25 + $0x4] sm:$0xf] }
  0x84   : > { %v595_v57 = vsel %vm6723_vm2, %v590_v13, %v594_v34  ;;  %v5498_v49 = vcombine.low %v2841_v51, %v2844_v43  ;;  %v603_v53 = vor.u32 %v602_v41, %v599_v0  ;;  %v612_v61 = vrot.slane %v610_v45, 4  ;;  %v7152_v34 = vld [vmem:[%s6704_s25 + $0x7c] sm:$0xf]  ;;  %v7155_v22 = vld [vmem:[%s6704_s25 + $0x80] sm:$0x1] }
  0x85   : > { %v5213_v10 = vcombine.low %v585_v39, %v595_v57  ;;  %v618_v63 = vrot.slane %v616_v44, 5  ;;  %v2847_v1 = vrot.slane %v6907_v46, 5  ;;  %v2850_v6 = vrot.slane %v6914_v55, 5  ;;  %v5470_v35 = vld [vmem:[%s6704_s25 + $0x84] sm:$0xe] }
  0x86   : > { %v5484_v11 = vrot.slane %v5468_v36, 9  ;;  %6140 = vmatprep.mubr.msk.bf16.mxu0 %vm676_vm3, %v5498_v49  ;;  %v604_v59 = vrot.slane %v603_v53, 4  ;;  %v613_v21 = vor.u32 %v612_v61, %v608_v37  ;;  %v2854_v23 = vrot.slane %v5404_v60, 5  ;;  %v5410_v0 = vld [vmem:[%s6704_s25 + $0x88] sm:$0xf] }
  0x87   : > { %5986 = vmatprep.mubr.msk.bf16.mxu1 %vm676_vm3, %v5213_v10  ;;  %v2857_v9 = vrot.slane %v5405_v52, 5  ;;  %v2848_v20 = vsel %vm6945_vm6, %v5483_v47, %v2847_v1  ;;  %v2849_v46 = vrot.slane %v2847_v1, 4  ;;  %v5232_v32 = vcombine.low %v6586_v29, %v7148_v31  ;;  %v5411_v39 = vld [vmem:[%s6704_s25 + $0x8c] sm:$0x1]  ;;  %v5413_v45 = vld [vmem:[%s6704_s25 + $0x94] sm:$0xf] }
  0x88   : > { %v609_v55 = vsel %vm6723_vm2, %v604_v59, %v608_v37  ;;  %v614_v18 = vrot.slane %v613_v21, 4  ;;  %v2855_v26 = vsel %vm6945_vm6, %v5484_v11, %v2854_v23  ;;  %v2856_v3 = vrot.slane %v2854_v23, 4  ;;  %v5414_v52 = vld [vmem:[%s6704_s25 + $0x98] sm:$0x1]  ;;  %v5471_v10 = vld [vmem:[%s6704_s25 + $0x90] sm:$0xe] }
  0x89   : > { %v2851_v27 = vsel %vm6945_vm6, %v2849_v46, %v2850_v6  ;;  %v5485_v56 = vrot.slane %v5469_v54, 9  ;;  %v2861_v57 = vrot.slane %v7152_v34, 5  ;;  %v2864_v43 = vrot.slane %v7155_v22, 5  ;;  %v5417_v11 = vld [vmem:[%s6704_s25 + $0xa4] sm:$0x1] }
  0x8a   : > { %v619_v36 = vsel %vm6723_vm2, %v614_v18, %v618_v63  ;;  %v5499_v13 = vcombine.low %v2848_v20, %v2851_v27  ;;  %v2858_v51 = vsel %vm6945_vm6, %v2856_v3, %v2857_v9  ;;  %v5486_v44 = vrot.slane %v5470_v35, 9  ;;  %v5416_v63 = vld [vmem:[%s6704_s25 + $0xa0] sm:$0xf]  ;;  %v5472_v59 = vld [vmem:[%s6704_s25 + $0x9c] sm:$0xe] }
  0x8b   : > { %v5214_v41 = vcombine.low %v609_v55, %v619_v36  ;;  %v5500_v37 = vcombine.low %v2855_v26, %v2858_v51  ;;  %v2868_v47 = vrot.slane %v5410_v0, 5  ;;  %v2871_v60 = vrot.slane %v5411_v39, 5  ;;  %v6588_v21 = vld [vmem:[%s6704_s25 + $0xc] sm:$0xf]  ;;  %v7182_v23 = vld [vmem:[%s6704_s25 + $0x10] sm:$0xf] }
  0x8c   : > { %6141 = vmatmul.mubr.msk.bf16.gmra.mrb[12].mxu0 %vm676_vm3, %v5499_v13  ;;  %v2862_v49 = vsel %vm6945_vm6, %v5485_v56, %v2861_v57  ;;  %v2863_v53 = vrot.slane %v2861_v57, 4  ;;  %v2875_v61 = vrot.slane %v5413_v45, 5  ;;  %v5233_v9 = vcombine.low %v6588_v21, %v7182_v23  ;;  %v6590_v27 = vld [vmem:[%s6704_s25 + $0x18] sm:$0xf]  ;;  %v7191_v29 = vld [vmem:[%s6704_s25 + $0x1c] sm:$0xf] }
  0x8d   : > { %5987 = vmatmul.mubr.msk.bf16.gmra.mrb[28].mxu1 %vm676_vm3, %v5214_v41  ;;  %6144 = vmatprep.mubr.msk.bf16.mxu0 %vm676_vm3, %v5500_v37  ;;  %v2869_v1 = vsel %vm6945_vm6, %v5486_v44, %v2868_v47  ;;  %v2870_v6 = vrot.slane %v2868_v47, 4  ;;  %v5487_v46 = vrot.slane %v5471_v10, 9  ;;  %v2878_v54 = vrot.slane %v5414_v52, 5  ;;  %v5419_v51 = vld [vmem:[%s6704_s25 + $0xac] sm:$0xf]  ;;  %v7199_v39 = vld [vmem:[%s8529_s1 + $0x18] sm:$0xff]  }
  0x8e   : > { %5992 = vmatprep.mubr.msk.bf16.mxu1 %vm676_vm3, %v5232_v32  ;;  %v2865_v20 = vsel %vm6945_vm6, %v2863_v53, %v2864_v43  ;;  %v2877_v26 = vrot.slane %v2875_v61, 4  ;;  %v2882_v3 = vrot.slane %v5416_v63, 5  ;;  %v5234_v32 = vcombine.low %v6590_v27, %v7191_v29  ;;  %v5422_v0 = vld [vmem:[%s6704_s25 + $0xb8] sm:$0xf]  ;;  %v6592_v57 = vld [vmem:[%s8529_s1 + $0x10] sm:$0xff]  }
  0x8f   : > { %v5501_v55 = vcombine.low %v2862_v49, %v2865_v20  ;;  %v2872_v18 = vsel %vm6945_vm6, %v2870_v6, %v2871_v60  ;;  %v5488_v36 = vrot.slane %v5472_v59, 9  ;;  %v2885_v13 = vrot.slane %v5417_v11, 5  ;;  %v5420_v47 = vld [vmem:[%s6704_s25 + $0xb0] sm:$0x1]  ;;  %v5473_v60 = vld [vmem:[%s6704_s25 + $0xa8] sm:$0xe] }
  0x90   : > { %v5502_v35 = vcombine.low %v2869_v1, %v2872_v18  ;;  %v2884_v56 = vrot.slane %v2882_v3, 4  ;;  %v2876_v41 = vsel %vm6945_vm6, %v5487_v46, %v2875_v61  ;;  %v2879_v37 = vsel %vm6945_vm6, %v2877_v26, %v2878_v54  ;;  %v5423_v10 = vld [vmem:[%s6704_s25 + $0xbc] sm:$0x1]  ;;  %v5474_v49 = vld [vmem:[%s6704_s25 + $0xb4] sm:$0xe] }
  0x91   : > { %v2889_v45 = vrot.slane %v5419_v51, 5  ;;  %v2883_v43 = vsel %vm6945_vm6, %v5488_v36, %v2882_v3  ;;  %v2896_v52 = vrot.slane %v5422_v0, 5  ;;  %v6593_v53 = vld [vmem:[%s6704_s25 + $0x24] sm:$0xf]  ;;  %v7223_v61 = vld [vmem:[%s6704_s25 + $0x28] sm:$0xf]  ;;  %v5503_v1 = vcombine.low %v2876_v41, %v2879_v37 }
  0x92   : > { %v2886_v44 = vsel %vm6945_vm6, %v2884_v56, %v2885_v13  ;;  %v5235_v63 = vcombine.low %v6593_v53, %v7223_v61  ;;  %v5425_v6 = vld [vmem:[%s6704_s25 + $0xc4] sm:$0xf]  ;;  %v5489_v59 = vrot.slane %v5473_v60, 9  ;;  %v6595_v20 = vld [vmem:[%s6704_s25 + $0x30] sm:$0xf]  ;;  %v2899_v26 = vrot.slane %v5423_v10, 5 }
  0x93   : > { %v5504_v11 = vcombine.low %v2883_v43, %v2886_v44  ;;  %v2891_v21 = vrot.slane %v2889_v45, 4  ;;  %v7229_v46 = vld [vmem:[%s6704_s25 + $0x34] sm:$0xf]  ;;  %v2898_v18 = vrot.slane %v2896_v52, 4  ;;  %v5426_v13 = vld [vmem:[%s6704_s25 + $0xc8] sm:$0x1] }
  0x94   : > { %6145 = vmatmul.mubr.msk.bf16.gmra.mrb[16].mxu0 %vm676_vm3, %v5501_v55  ;;  %v5236_v54 = vcombine.low %v6595_v20, %v7229_v46  ;;  %v5490_v55 = vrot.slane %v5474_v49, 9  ;;  %v2890_v3 = vsel %vm6945_vm6, %v5489_v59, %v2889_v45  ;;  %v5475_v51 = vld [vmem:[%s6704_s25 + $0xc0] sm:$0xe]  ;;  %v6597_v56 = vld [vmem:[%s6704_s25 + $0x3c] sm:$0xf]  ;;  %v2906_v44 = vrot.slane %v5426_v13, 5 }
  0x95   : > { %5993 = vmatmul.mubr.msk.bf16.vlgmr.msra.gmra.mrb[0].mxu1 %vm676_vm3, %v5233_v9  ;;  %6148 = vmatprep.mubr.msk.bf16.mxu0 %vm676_vm3, %v5502_v35  ;;  %v2892_v9 = vrot.slane %v5420_v47, 5  ;;  %v2900_v36 = vsel %vm6945_vm6, %v2898_v18, %v2899_v26  ;;  %v7248_v0 = vld [vmem:[%s6704_s25 + $0x40] sm:$0xf]  ;;  %v5238_v47 = vcombine.low %v6858_v15, %v6861_v25  ;;  %v2277_v10 = vshll.u32 %v7152_v34, 16  ;;  %v6544_v53 = vld [vmem:[%s6704_s25 + $0x18] sm:$0xff]  }
  0x96   : > { %6025 = vmatpush3.bf16.msra.mxu1 %v6592_v57  ;;  %5996 = vmatprep.mubr.msk.bf16.mxu1 %vm676_vm3, %v5234_v32  ;;  %v2903_v32 = vrot.slane %v5425_v6, 5  ;;  %v2897_v35 = vsel %vm6945_vm6, %v5490_v55, %v2896_v52  ;;  %v5237_v41 = vcombine.low %v6597_v56, %v7248_v0  ;;  %v5491_v57 = vrot.slane %v5475_v51, 9 }
  0x97   : > { %6058 = vmatprep.subr.bf16.mxu1 %v7199_v39  ;;  %v2893_v27 = vsel %vm6945_vm6, %v2891_v21, %v2892_v9  ;;  %v5506_v45 = vcombine.low %v2897_v35, %v2900_v36  ;;  %v2281_v15 = vshrl.u32 %v7152_v34, 16  ;;  %v5239_v49 = vcombine.low %v6887_v8, %v6893_v19  ;;  %v1181_v8 = vld [vmem:[%s6704_s25] sm:$0xe]  ;;  %v1182_v19 = vld [vmem:[%s6704_s25 + $0xc] sm:$0xe] }
  0x98   : > { %v5505_v37 = vcombine.low %v2890_v3, %v2893_v27  ;;  %v2905_v43 = vrot.slane %v2903_v32, 4  ;;  %v2904_v60 = vsel %vm6945_vm6, %v5491_v57, %v2903_v32  ;;  %v1241_v21 = vrot.slane %v7182_v23, 5  ;;  %v1183_v34 = vld [vmem:[%s6704_s25 + $0x18] sm:$0xe]  ;;  %v6547_v27 = vld [vmem:[%s6704_s25 + $0x24] sm:$0xff]   ;;  %v6549_v32 = vld [vmem:[%s6704_s25 + $0x30] sm:$0xff]  }
  0x99   : > { %v2283_v6 = vrot.slane %v2281_v15, 4  ;;  %v2287_v9 = vshll.u32 %v7155_v22, 16  ;;  %v1234_v23 = vrot.slane %v7148_v31, 5  ;;  %v1248_v20 = vrot.slane %v7191_v29, 5  ;;  %v1185_v36 = vld [vmem:[%s6704_s25 + $0x30] sm:$0xe] }
  0x9a   : > { %v2907_v52 = vsel %vm6945_vm6, %v2905_v43, %v2906_v44  ;;  %v5241_v18 = vcombine.low %v6939_v48, %v6952_v7  ;;  %v1255_v26 = vrot.slane %v7223_v61, 5  ;;  %v1262_v3 = vrot.slane %v7229_v46, 5  ;;  %v6601_v48 = vld [vmem:[%s6704_s25 + $0x20] sm:$0x1]  ;;  %v6602_v57 = vld [vmem:[%s6704_s25 + $0x2c] sm:$0x1] }
  0x9b   : > { %v5507_v25 = vcombine.low %v2904_v60, %v2907_v52  ;;  %v5242_v22 = vcombine.low %v6971_v38, %v6978_v14  ;;  %v5243_v31 = vcombine.low %v6997_v12, %v7005_v24  ;;  %v5265_v29 = vrot.slane %v1181_v8, 9  ;;  %v7300_v46 = vld [vmem:[%s8529_s1 + $0x40] sm:$0xff]  }
  0x9c   : > { %6149 = vmatmul.mubr.msk.bf16.gmra.mrb[20].mxu0 %vm676_vm3, %v5503_v1  ;;  %v7268_v1 = vrot.slane %v2277_v10, 5  ;;  %v5266_v35 = vrot.slane %v1182_v19, 9  ;;  %v1243_v13 = vrot.slane %v1241_v21, 4  ;;  %v5267_v51 = vrot.slane %v1183_v34, 9  ;;  %v6603_v10 = vld [vmem:[%s6704_s25 + $0x38] sm:$0x1] }
  0x9d   : > { %5997 = vmatmul.mubr.msk.bf16.gmra.mrb[4].mxu1 %vm676_vm3, %v5235_v63  ;;  %6152 = vmatprep.mubr.msk.bf16.mxu0 %vm676_vm3, %v5504_v11  ;;  %v5240_v63 = vcombine.low %v6918_v5, %v6924_v17  ;;  %v6599_v11 = vld [vmem:[%s6704_s25 + $0x8] sm:$0x1]  ;;  %v6600_v5 = vld [vmem:[%s6704_s25 + $0x14] sm:$0x1]  ;;  %v1251_v7 = vrot.slane %v6601_v48, 5  ;;  %v5244_v38 = vcombine.low %v7029_v50, %v7034_v58  ;;  %v5245_v14 = vcombine.low %v7057_v40, %v7062_v42 }
  0x9e   : > { %6000 = vmatprep.mubr.msk.bf16.mxu1 %vm676_vm3, %v5236_v54  ;;  %8548 = vst [vmem:[#allocation2_spill] sm:$0xff] %v7268_v1  ;;  %v1237_v59 = vrot.slane %v6599_v11, 5  ;;  %v1244_v17 = vrot.slane %v6600_v5, 5  ;;  %v1184_v54 = vld [vmem:[%s6704_s25 + $0x24] sm:$0xe]  ;;  %v2284_v55 = vor.u32 %v2283_v6, %v7268_v1  ;;  %v1236_v56 = vrot.slane %v1234_v23, 4 }
  0x9f   : > { %v5268_v61 = vrot.slane %v1184_v54, 9  ;;  %v1258_v43 = vrot.slane %v6602_v57, 5  ;;  %v5269_v44 = vrot.slane %v1185_v36, 9  ;;  %v5246_v60 = vcombine.low %v7081_v33, %v7086_v30  ;;  %v1187_v6 = vld [vmem:[%s6704_s25 + $0x48] sm:$0xe]  ;;  %v6555_v58 = vld [vmem:[%s6704_s25 + $0x54] sm:$0xff]  }
  0xa0   : > { %v7313_v52 = vsel %vm6945_vm6, %v5265_v29, %v1234_v23  ;;  %v1265_v15 = vrot.slane %v6603_v10, 5  ;;  %v7334_v11 = vrot.slane %v2284_v55, 4  ;;  %v5590_v34 = vld [vmem:[%s6704_s25 + $0x18] sm:$0xf]  ;;  %v6553_v5 = vld [vmem:[%s6704_s25 + $0x48] sm:$0xff]  }
  0xa1   : > { %v7349_v19 = vsel %vm6945_vm6, %v5268_v61, %v1255_v26  ;;  %v6604_v23 = vld [vmem:[%s6704_s25 + $0x44] sm:$0x1]  ;;  %v1188_v55 = vld [vmem:[%s6704_s25 + $0x54] sm:$0xe]  ;;  %v3619_v48 = vshll.u32 %v5590_v34, 16 }
  0xa2   : > { %8550 = vst [vmem:[#allocation4_spill] sm:$0xff] %v7334_v11  ;;  %v5272_v10 = vrot.slane %v1188_v55, 9  ;;  %v5596_v55 = vld [vmem:[%s6704_s25 + $0x30] sm:$0xf]  ;;  %v5597_v50 = vld [vmem:[%s6704_s25 + $0x34] sm:$0xf] }
  0xa3   : > { %v3621_v24 = vrot.slane %v3619_v48, 5 }
  0xa4   : > { %6153 = vmatmul.mubr.msk.bf16.gmra.mrb[24].mxu0 %vm676_vm3, %v5505_v37  ;;  %v1186_v37 = vld [vmem:[%s6704_s25 + $0x3c] sm:$0xe] }
  0xa5   : > { %6001 = vmatmul.mubr.msk.bf16.gmra.mrb[8].mxu1 %vm676_vm3, %v5237_v41  ;;  %6156 = vmatprep.mubr.msk.bf16.mxu0 %vm676_vm3, %v5506_v45  ;;  %v1250_v41 = vrot.slane %v1248_v20, 4  ;;  %v1257_v45 = vrot.slane %v1255_v26, 4 }
  0xa6   : > { %6004 = vmatprep.mubr.msk.bf16.mxu1 %vm676_vm3, %v5238_v47  ;;  %v1264_v47 = vrot.slane %v1262_v3, 4 }
  0xa7   : > { %v7345_v8 = vsel %vm6945_vm6, %v1250_v41, %v1251_v7  ;;  %v7364_v26 = vsel %vm6945_vm6, %v1257_v45, %v1258_v43  ;;  %v6606_v45 = vld [vmem:[%s6704_s25 + $0x50] sm:$0x1]  ;;  %v3673_v41 = vshll.u32 %v5597_v50, 16 }
  0xa8   : > { %v1279_v57 = vrot.slane %v6606_v45, 5  ;;  %v8558_v11 = vcombine.low %v7349_v19, %v7364_v26 }
  0xac   : > { %6157 = vmatmul.mubr.msk.bf16.gmra.mrb[28].mxu0 %vm676_vm3, %v5507_v25  ;;  %v1269_v25 = vrot.slane %v7248_v0, 5  ;;  %v7331_v0 = vsel %vm6945_vm6, %v5267_v51, %v1248_v20  ;;  %v1272_v20 = vrot.slane %v6604_v23, 5  ;;  %v3616_v51 = vshrl.u32 %v5590_v34, 16  ;;  %v7408_v34 = vld [vmem:[%s6704_s25 + $0x5c] sm:$0x1] }
  0xad   : > { %6005 = vmatmul.mubr.msk.bf16.gmra.mrb[12].mxu1 %vm676_vm3, %v5239_v49  ;;  %6162 = vmatprep.mubr.msk.bf16.mxu0 %vm676_vm3, %v6544_v53  ;;  %v7317_v49 = vrot.slane %v2287_v9, 5  ;;  %v7323_v53 = vsel %vm6945_vm6, %v5266_v35, %v1241_v21  ;;  %v7341_v21 = vsel %vm6945_vm6, %v1236_v56, %v1237_v59  ;;  %v5270_v9 = vrot.slane %v1186_v37, 9  ;;  %v6605_v59 = vld [vmem:[%s6704_s25 + $0x4c] sm:$0xf] }
  0xae   : > { %6008 = vmatprep.mubr.msk.bf16.mxu1 %vm676_vm3, %v5240_v63  ;;  %v7327_v63 = vsel %vm6945_vm6, %v1243_v13, %v1244_v17  ;;  %v7355_v17 = vsel %vm6945_vm6, %v5269_v44, %v1262_v3  ;;  %v1276_v54 = vrot.slane %v6605_v59, 5  ;;  %v1271_v3 = vrot.slane %v1269_v25, 4  ;;  %v7379_v13 = vld [vmem:[%s6704_s25 + $0x60] sm:$0xe] }
  0xaf   : > { %8549 = vst [vmem:[#allocation3_spill] sm:$0xff] %v7317_v49  ;;  %v7389_v43 = vsel %vm6945_vm6, %v5270_v9, %v1269_v25  ;;  %v6607_v25 = vld [vmem:[%s6704_s25 + $0x58] sm:$0xf]  ;;  %v1286_v9 = vrot.slane %v7408_v34, 5  ;;  %v5273_v23 = vrot.slane %v7379_v13, 9  ;;  %v3618_v12 = vrot.slane %v3616_v51, 4 }
  0xb0   : > { %v1278_v37 = vrot.slane %v1276_v54, 4  ;;  %v7393_v44 = vsel %vm6945_vm6, %v1271_v3, %v1272_v20  ;;  %v6609_v20 = vld [vmem:[%s6704_s25 + $0x64] sm:$0xf]  ;;  %v6610_v34 = vld [vmem:[%s6704_s25 + $0x70] sm:$0xf]  ;;  %v3677_v56 = vshrl.u32 %v5597_v50, 16 }
  0xb1   : > { %v1290_v59 = vrot.slane %v6609_v20, 5  ;;  %v1297_v20 = vrot.slane %v6610_v34, 5  ;;  %v5595_v34 = vld [vmem:[%s6704_s25 + $0x2c] sm:$0x1] }
  0xb2   : > { %v7425_v3 = vsel %vm6945_vm6, %v1278_v37, %v1279_v57  ;;  %v3664_v37 = vshrl.u32 %v5596_v55, 16  ;;  %v3667_v57 = vshll.u32 %v5596_v55, 16 }
  0xb3   : > { %v1292_v36 = vrot.slane %v1290_v59, 4 }
  0xb4   : > { %6163 = vmatmul.mubr.msk.bf16.vlgmr.msra.gmra.mrb[0].mxu0 %vm676_vm3, %v6547_v27  ;;  %v7368_v27 = vsel %vm6945_vm6, %v1264_v47, %v1265_v15  ;;  %v5592_v15 = vld [vmem:[%s6704_s25 + $0x20] sm:$0x1]  ;;  %v3669_v50 = vrot.slane %v3667_v57, 5  ;;  %v6561_v57 = vld [vmem:[%s6704_s25 + $0x78] sm:$0xff]  }
  0xb5   : > { %6009 = vmatmul.mubr.msk.bf16.gmra.mrb[16].mxu1 %vm676_vm3, %v5241_v18  ;;  %6195 = vmatpush3.bf16.msra.mxu0 %v7010_v16  ;;  %v6551_v16 = vld [vmem:[%s6704_s25 + $0x3c] sm:$0xff]   ;;  %v3635_v48 = vshll.u32 %v5592_v15, 16 }
  0xb6   : > { %6012 = vmatprep.mubr.msk.bf16.mxu1 %vm676_vm3, %v5242_v22  ;;  %6166 = vmatprep.mubr.msk.bf16.mxu0 %vm676_vm3, %v6549_v32  ;;  %v5591_v18 = vld [vmem:[%s6704_s25 + $0x1c] sm:$0xf]  ;;  %v5271_v22 = vrot.slane %v1187_v6, 9  ;;  %v5593_v6 = vld [vmem:[%s6704_s25 + $0x24] sm:$0xf] }
  0xb7   : > { %6228 = vmatprep.subr.bf16.mxu0 %v7300_v46  ;;  %v3625_v7 = vshll.u32 %v5591_v18, 16  ;;  %v3629_v61 = vshrl.u32 %v5591_v18, 16  ;;  %v3643_v13 = vshll.u32 %v5593_v6, 16  ;;  %v3622_v18 = vor.u32 %v3621_v24, %v3618_v12 }
  0xb8   : > { %v7397_v47 = vsel %vm6945_vm6, %v5271_v22, %v1276_v54  ;;  %v5594_v54 = vld [vmem:[%s6704_s25 + $0x28] sm:$0xf]  ;;  %v3640_v22 = vshrl.u32 %v5593_v6, 16  ;;  %v1299_v24 = vrot.slane %v1297_v20, 4 }
  0xb9   : > { %v3645_v29 = vrot.slane %v3643_v13, 5  ;;  %v3666_v13 = vrot.slane %v3664_v37, 4  ;;  %v3623_v40 = vrot.slane %v3622_v18, 4 }
  0xba   : > { %v3642_v15 = vrot.slane %v3640_v22, 4  ;;  %v5598_v22 = vld [vmem:[%s6704_s25 + $0x38] sm:$0x1] }
  0xbb   : > { %v3683_v37 = vshll.u32 %v5598_v22, 16 }
  0xbc   : > { %6167 = vmatmul.mubr.msk.bf16.gmra.mrb[4].mxu0 %vm676_vm3, %v6551_v16  ;;  %v1283_v16 = vrot.slane %v6607_v25, 5  ;;  %v1190_v25 = vld [vmem:[%s6704_s25 + $0x6c] sm:$0xe] }
  0xbd   : > { %6013 = vmatmul.mubr.msk.bf16.gmra.mrb[20].mxu1 %vm676_vm3, %v5243_v31  ;;  %6170 = vmatprep.mubr.msk.bf16.mxu0 %vm676_vm3, %v6553_v5  ;;  %v7418_v31 = vrot.slane %v3625_v7, 5  ;;  %v3631_v5 = vrot.slane %v3629_v61, 4  ;;  %v3649_v7 = vshll.u32 %v5594_v54, 16  ;;  %v3653_v61 = vshrl.u32 %v5594_v54, 16 }
  0xbe   : > { %6016 = vmatprep.mubr.msk.bf16.mxu1 %vm676_vm3, %v5244_v38  ;;  %v6557_v38 = vld [vmem:[%s6704_s25 + $0x60] sm:$0xff]   ;;  %v7432_v51 = vsel %vm6945_vm6, %v5272_v10, %v1283_v16  ;;  %v1285_v45 = vrot.slane %v1283_v16, 4  ;;  %v6611_v10 = vld [vmem:[%s6704_s25 + $0x68] sm:$0x1]  ;;  %v7439_v16 = vrot.slane %v3635_v48, 5  ;;  %v5274_v54 = vrot.slane %v1190_v25, 9 }
  0xbf   : > { %v3632_v6 = vor.u32 %v3631_v5, %v7418_v31  ;;  %v1293_v35 = vrot.slane %v6611_v10, 5  ;;  %v7442_v32 = vrot.slane %v3649_v7, 5  ;;  %v3655_v12 = vrot.slane %v3653_v61, 4  ;;  %v6612_v5 = vld [vmem:[%s6704_s25 + $0x74] sm:$0x1]  ;;  %v6559_v25 = vld [vmem:[%s6704_s25 + $0x6c] sm:$0xff]  }
  0xc0   : > { %v1300_v55 = vrot.slane %v6612_v5, 5  ;;  %v7461_v48 = vsel %vm6945_vm6, %v5273_v23, %v1290_v59  ;;  %v3646_v7 = vor.u32 %v3645_v29, %v3642_v15  ;;  %v3659_v61 = vshll.u32 %v5595_v34, 16  ;;  %v6614_v10 = vld [vmem:[%s6704_s25 + $0x88] sm:$0xf] }
  0xc1   : > { %v3633_v42 = vrot.slane %v3632_v6, 4  ;;  %v7466_v33 = vsel %vm6945_vm6, %v1285_v45, %v1286_v9  ;;  %v7474_v23 = vsel %vm6945_vm6, %v1292_v36, %v1293_v35  ;;  %v7478_v29 = vsel %vm6945_vm6, %v5274_v54, %v1297_v20  ;;  %v1192_v45 = vld [vmem:[%s6704_s25 + $0x84] sm:$0xe]  ;;  %v5599_v20 = vld [vmem:[%s6704_s25 + $0x3c] sm:$0xf] }
  0xc2   : > { %v7482_v9 = vsel %vm6945_vm6, %v1299_v24, %v1300_v55  ;;  %v3670_v59 = vor.u32 %v3669_v50, %v3666_v13  ;;  %v3628_v6 = vsel %vm6723_vm2, %v3623_v40, %v7418_v31  ;;  %v1311_v15 = vrot.slane %v6614_v10, 5  ;;  %v6615_v24 = vld [vmem:[%s6704_s25 + $0x80] sm:$0x1] }
  0xc3   : > { %v3638_v35 = vsel %vm6723_vm2, %v3633_v42, %v7439_v16  ;;  %v3647_v54 = vrot.slane %v3646_v7, 4  ;;  %v3661_v34 = vrot.slane %v3659_v61, 5  ;;  %v1307_v5 = vrot.slane %v6615_v24, 5  ;;  %v7496_v55 = vld [vmem:[%s6704_s25 + $0x40] sm:$0xf] }
  0xc4   : > { %6171 = vmatmul.mubr.msk.bf16.gmra.mrb[8].mxu0 %vm676_vm3, %v6555_v58  ;;  %v3679_v58 = vrot.slane %v3677_v56, 4  ;;  %v1191_v56 = vld [vmem:[%s6704_s25 + $0x78] sm:$0xe]  ;;  %8551 = vst [vmem:[#allocation5_spill] sm:$0xff] %v7496_v55  ;;  %v3685_v13 = vrot.slane %v3683_v37, 5  ;;  %v5276_v16 = vrot.slane %v1192_v45, 9  ;;  %v8552_v50 = vcombine.low %v7096_v62, %v7108_v4 }
  0xc5   : > { %6017 = vmatmul.mubr.msk.bf16.gmra.mrb[24].mxu1 %vm676_vm3, %v5245_v14  ;;  %6174 = vmatprep.mubr.msk.bf16.mxu0 %vm676_vm3, %v6557_v38  ;;  %v7455_v14 = vrot.slane %v3673_v41, 5  ;;  %v6613_v41 = vld [vmem:[%s6704_s25 + $0x7c] sm:$0xf]  ;;  %v3671_v40 = vrot.slane %v3670_v59, 4  ;;  %v6616_v42 = vld [vmem:[%s6704_s25 + $0x8c] sm:$0x1]  ;;  %v3652_v45 = vsel %vm6723_vm2, %v3647_v54, %v7442_v32 }
  0xc6   : > { %6020 = vmatprep.mubr.msk.bf16.mxu1 %vm676_vm3, %v5246_v60  ;;  %v3656_v60 = vor.u32 %v3655_v12, %v7442_v32  ;;  %v1304_v18 = vrot.slane %v6613_v41, 5  ;;  %v5275_v12 = vrot.slane %v1191_v56, 9  ;;  %v3688_v7 = vshrl.u32 %v5599_v20, 16  ;;  %v6562_v41 = vld [vmem:[%s6704_s25 + $0x84] sm:$0xff]   ;;  %v6563_v59 = vld [vmem:[%s6704_s25 + $0x90] sm:$0xff]  }
  0xc7   : > { %v3680_v36 = vor.u32 %v3679_v58, %v7455_v14  ;;  %v1314_v58 = vrot.slane %v6616_v42, 5  ;;  %v3691_v61 = vshll.u32 %v5599_v20, 16  ;;  %v1313_v56 = vrot.slane %v1311_v15, 4  ;;  %v7536_v20 = vld [vmem:[%s6704_s25 + $0x4c] sm:$0xf] }
  0xc8   : > { %v3657_v31 = vrot.slane %v3656_v60, 4  ;;  %v1306_v22 = vrot.slane %v1304_v18, 4  ;;  %v3697_v62 = vshll.u32 %v7496_v55, 16  ;;  %v3701_v4 = vshrl.u32 %v7496_v55, 16  ;;  %v7614_v37 = vld [vmem:[%s6704_s25 + $0x5c] sm:$0x1] }
  0xc9   : > { %v3681_v60 = vrot.slane %v3680_v36, 4  ;;  %v7528_v10 = vsel %vm6945_vm6, %v5275_v12, %v1304_v18  ;;  %v3676_v24 = vsel %vm6723_vm2, %v3671_v40, %v7455_v14  ;;  %v7543_v32 = vsel %vm6945_vm6, %v5276_v16, %v1311_v15  ;;  %v7547_v18 = vld [vmem:[%s6704_s25 + $0x58] sm:$0xf]  ;;  %v7561_v40 = vld [vmem:[%s6704_s25 + $0x90] sm:$0xe] }
  0xca   : > { %v3662_v36 = vsel %vm6723_vm2, %v3657_v31, %v3661_v34  ;;  %v3690_v54 = vrot.slane %v3688_v7, 4  ;;  %v3693_v34 = vrot.slane %v3691_v61, 5  ;;  %v5605_v31 = vld [vmem:[%s6704_s25 + $0x54] sm:$0xf]  ;;  %v3703_v14 = vrot.slane %v3701_v4, 4 }
  0xcb   : > { %v3686_v12 = vsel %vm6723_vm2, %v3681_v60, %v3685_v13  ;;  %v3721_v42 = vshll.u32 %v7536_v20, 16  ;;  %v3725_v7 = vshrl.u32 %v7536_v20, 16  ;;  %v3736_v13 = vshrl.u32 %v5605_v31, 16  ;;  %v1194_v38 = vld [vmem:[%s6704_s25 + $0x9c] sm:$0xe] }
  0xcc   : > { %6175 = vmatmul.mubr.msk.bf16.gmra.mrb[12].mxu0 %vm676_vm3, %v6559_v25  ;;  %v8553_v25 = vcombine.low %v7313_v52, %v7341_v21  ;;  %v7516_v52 = vcombine.low %v3628_v6, %v3638_v35  ;;  %v7532_v6 = vsel %vm6945_vm6, %v1306_v22, %v1307_v5  ;;  %v5602_v35 = vld [vmem:[%s6704_s25 + $0x48] sm:$0xf]  ;;  %v7553_v5 = vsel %vm6945_vm6, %v1313_v56, %v1314_v58  ;;  %v7556_v22 = vld [vmem:[%s6704_s25 + $0x44] sm:$0x1] }
  0xcd   : > { %6021 = vmatmul.mubr.msk.bf16.gmra.mrb[28].mxu1 %vm676_vm3, %v8552_v50  ;;  %6178 = vmatprep.mubr.msk.bf16.mxu0 %vm676_vm3, %v6561_v57  ;;  %8554 = vst [vmem:[#allocation6_spill] sm:$0xff] %v7556_v22  ;;  %v7558_v50 = vrot.slane %v3697_v62, 5  ;;  %v3712_v15 = vshrl.u32 %v5602_v35, 16  ;;  %v3715_v16 = vshll.u32 %v5602_v35, 16  ;;  %v3739_v61 = vshll.u32 %v5605_v31, 16 }
  0xce   : > { %6026 = vmatprep.mubr.msk.bf16.mxu1 %vm676_vm3, %v8553_v25  ;;  %v3745_v58 = vshll.u32 %v7547_v18, 16  ;;  %v3749_v25 = vshrl.u32 %v7547_v18, 16  ;;  %v8555_v60 = vcombine.low %v7323_v53, %v7327_v63  ;;  %v7573_v56 = vcombine.low %v3652_v45, %v3662_v36  ;;  %v7590_v35 = vld [vmem:[%s6704_s25 + $0x50] sm:$0x1]  ;;  %v6619_v62 = vld [vmem:[%s6704_s25 + $0x98] sm:$0x1] }
  0xcf   : > { %v7577_v4 = vcombine.low %v3676_v24, %v3686_v12  ;;  %v8556_v53 = vcombine.low %v7331_v0, %v7345_v8  ;;  %v3704_v45 = vor.u32 %v3703_v14, %v7558_v50  ;;  %v5608_v24 = vld [vmem:[%s6704_s25 + $0x60] sm:$0xf]  ;;  %v3714_v31 = vrot.slane %v3712_v15, 4  ;;  %v7596_v8 = vld [vmem:[%s6704_s25 + $0x64] sm:$0xf]  ;;  %v6565_v14 = vld [vmem:[%s6704_s25 + $0xa8] sm:$0xff]  }
  0xd0   : > { %v7593_v12 = vrot.slane %v3721_v42, 5  ;;  %v3727_v0 = vrot.slane %v3725_v7, 4  ;;  %v3741_v15 = vrot.slane %v3739_v61, 5  ;;  %v6618_v7 = vld [vmem:[%s6704_s25 + $0x94] sm:$0xf]  ;;  %v1321_v21 = vrot.slane %v6619_v62, 5 }
  0xd1   : > { %v1318_v63 = vrot.slane %v6618_v7, 5  ;;  %v3731_v57 = vshll.u32 %v7590_v35, 16  ;;  %v3760_v36 = vshrl.u32 %v5608_v24, 16  ;;  %v3773_v61 = vshrl.u32 %v7596_v8, 16  ;;  %v6620_v7 = vld [vmem:[%s6704_s25 + $0xa0] sm:$0xf] }
  0xd2   : > { %v1325_v55 = vrot.slane %v6620_v7, 5  ;;  %v3705_v62 = vrot.slane %v3704_v45, 4  ;;  %v1332_v45 = vrot.slane %v7086_v30, 5  ;;  %v7641_v7 = vld [vmem:[%s6704_s25 + $0x68] sm:$0x1]  ;;  %v6566_v30 = vld [vmem:[%s6704_s25 + $0xb4] sm:$0xff]  }
  0xd3   : > { %v3762_v19 = vrot.slane %v3760_v36, 4  ;;  %8560 = vst [vmem:[#allocation8_spill] sm:$0xff] %v7641_v7  ;;  %v6567_v36 = vld [vmem:[%s6704_s25 + $0xc0] sm:$0xff]  }
  0xd4   : > { %6179 = vmatmul.mubr.msk.bf16.gmra.mrb[16].mxu0 %vm676_vm3, %v6562_v41  ;;  %v3707_v41 = vshll.u32 %v7556_v22, 16  ;;  %v3763_v22 = vshll.u32 %v5608_v24, 16  ;;  %v3755_v24 = vshll.u32 %v7614_v37, 16 }
  0xd5   : > { %6027 = vmatmul.mubr.msk.bf16.vlgmr.msra.gmra.mrb[0].mxu1 %vm676_vm3, %v8555_v60  ;;  %6182 = vmatprep.mubr.msk.bf16.mxu0 %vm676_vm3, %v6563_v59  ;;  %v3694_v59 = vor.u32 %v3693_v34, %v3690_v54  ;;  %v7601_v54 = vld [vmem:[%s8529_s1 + $0x20] sm:$0xff]   ;;  %v3738_v60 = vrot.slane %v3736_v13, 4  ;;  %v3769_v13 = vshll.u32 %v7596_v8, 16 }
  0xd6   : > { %6059 = vmatpush3.bf16.msra.mxu1 %v7199_v39  ;;  %6030 = vmatprep.mubr.msk.bf16.mxu1 %vm676_vm3, %v8556_v53  ;;  %v3717_v39 = vrot.slane %v3715_v16, 5  ;;  %8557 = vst [vmem:[#allocation7_spill] sm:$0xff] %v7601_v54  ;;  %v6564_v34 = vld [vmem:[%s6704_s25 + $0x9c] sm:$0xff]   ;;  %v7606_v53 = vrot.slane %v3745_v58, 5  ;;  %v3751_v16 = vrot.slane %v3749_v25, 4  ;;  %v7608_v42 = vrot.slane %v3707_v41, 5 }
  0xd7   : > { %6262 = vmatprep.subr.bf16.mxu1 %v7601_v54  ;;  %v7619_v58 = vrot.slane %v3694_v59, 4  ;;  %v3728_v41 = vor.u32 %v3727_v0, %v7593_v12  ;;  %v3742_v54 = vor.u32 %v3741_v15, %v3738_v60  ;;  %v1320_v59 = vrot.slane %v1318_v63, 4  ;;  %v1195_v0 = vld [vmem:[%s6704_s25 + $0xa8] sm:$0xe] }
  0xd8   : > { %v3718_v25 = vor.u32 %v3717_v39, %v3714_v31  ;;  %v3752_v1 = vor.u32 %v3751_v16, %v7606_v53  ;;  %v3733_v31 = vrot.slane %v3731_v57, 5  ;;  %v5278_v39 = vrot.slane %v1194_v38, 9  ;;  %v6621_v57 = vld [vmem:[%s6704_s25 + $0xa4] sm:$0x1] }
  0xd9   : > { %v3765_v26 = vrot.slane %v3763_v22, 5  ;;  %v7637_v60 = vrot.slane %v3769_v13, 5  ;;  %v3729_v15 = vrot.slane %v3728_v41, 4  ;;  %v1327_v16 = vrot.slane %v1325_v55, 4  ;;  %v6622_v41 = vld [vmem:[%s6704_s25 + $0xb0] sm:$0x1] }
  0xda   : > { %v1328_v38 = vrot.slane %v6621_v57, 5  ;;  %v5279_v49 = vrot.slane %v1195_v0, 9  ;;  %v3700_v22 = vsel %vm6723_vm2, %v7619_v58, %v7558_v50  ;;  %v8561_v13 = vrot.slane %v7561_v40, 9  ;;  %v1196_v50 = vld [vmem:[%s6704_s25 + $0xb4] sm:$0xe] }
  0xdb   : > { %v1335_v57 = vrot.slane %v6622_v41, 5  ;;  %v3779_v0 = vshll.u32 %v7641_v7, 16  ;;  %v5611_v58 = vld [vmem:[%s6704_s25 + $0x6c] sm:$0xf]  ;;  %v7665_v40 = vsel %vm6945_vm6, %v1320_v59, %v1321_v21  ;;  %v8563_v59 = vcombine.low %v7389_v43, %v7393_v44 }
  0xdc   : > { %6183 = vmatmul.mubr.msk.bf16.gmra.mrb[20].mxu0 %vm676_vm3, %v6564_v34  ;;  %v8559_v34 = vcombine.low %v7355_v17, %v7368_v27  ;;  %v3743_v17 = vrot.slane %v3742_v54, 4  ;;  %v3753_v27 = vrot.slane %v3752_v1, 4  ;;  %v3710_v1 = vsel %vm6723_vm2, %v3705_v62, %v7608_v42 }
  0xdd   : > { %6031 = vmatmul.mubr.msk.bf16.gmra.mrb[4].mxu1 %vm676_vm3, %v8558_v11  ;;  %6186 = vmatprep.mubr.msk.bf16.mxu0 %vm676_vm3, %v6565_v14  ;;  %v3775_v11 = vrot.slane %v3773_v61, 4  ;;  %v3719_v14 = vrot.slane %v3718_v25, 4  ;;  %v7653_v61 = vsel %vm6945_vm6, %v8561_v13, %v1318_v63  ;;  %v1334_v25 = vrot.slane %v1332_v45, 4 }
  0xde   : > { %6034 = vmatprep.mubr.msk.bf16.mxu1 %vm676_vm3, %v8559_v34  ;;  %v3757_v34 = vrot.slane %v3755_v24, 5  ;;  %v3766_v54 = vor.u32 %v3765_v26, %v3762_v19  ;;  %v7672_v42 = vsel %vm6945_vm6, %v5278_v39, %v1325_v55  ;;  %v7676_v62 = vsel %vm6945_vm6, %v1327_v16, %v1328_v38  ;;  %v6623_v39 = vld [vmem:[%s6704_s25 + $0xb8] sm:$0xf] }
  0xdf   : > { %v3776_v24 = vor.u32 %v3775_v11, %v7637_v60  ;;  %v3724_v63 = vsel %vm6723_vm2, %v3719_v14, %v7593_v12  ;;  %v3734_v19 = vsel %vm6723_vm2, %v3729_v15, %v3733_v31  ;;  %v3748_v21 = vsel %vm6723_vm2, %v3743_v17, %v7606_v53  ;;  %v7725_v17 = vld [vmem:[%s6704_s25 + $0x7c] sm:$0xf] }
  0xe0   : > { %v3758_v12 = vsel %vm6723_vm2, %v3753_v27, %v3757_v34  ;;  %v7688_v55 = vsel %vm6945_vm6, %v5279_v49, %v1332_v45  ;;  %v7697_v31 = vsel %vm6945_vm6, %v1334_v25, %v1335_v57  ;;  %v5280_v53 = vrot.slane %v1196_v50, 9  ;;  %v7701_v49 = vld [vmem:[%s6704_s25 + $0x70] sm:$0xf]  ;;  %8567 = vst [vmem:[#allocation12_spill] sm:$0xff] %v7725_v17  ;;  %v5617_v27 = vld [vmem:[%s6704_s25 + $0x84] sm:$0xf] }
  0xe1   : > { %8562 = vst [vmem:[#allocation9_spill] sm:$0xff] %v7688_v55  ;;  %8564 = vst [vmem:[#allocation10_spill] sm:$0xff] %v7697_v31  ;;  %v1339_v26 = vrot.slane %v6623_v39, 5  ;;  %v3784_v45 = vshrl.u32 %v5611_v58, 16  ;;  %v8566_v43 = vcombine.low %v7397_v47, %v7425_v3  ;;  %v7707_v44 = vcombine.low %v3700_v22, %v3710_v1  ;;  %v5614_v3 = vld [vmem:[%s6704_s25 + $0x78] sm:$0xf] }
  0xe2   : > { %8565 = vst [vmem:[#allocation11_spill] sm:$0xff] %v7701_v49  ;;  %v7709_v11 = vrot.slane %v3766_v54, 4  ;;  %v7711_v14 = vrot.slane %v3776_v24, 4  ;;  %v7713_v15 = vrot.slane %v3779_v0, 5  ;;  %v7717_v38 = vcombine.low %v3724_v63, %v3734_v19  ;;  %v6568_v34 = vld [vmem:[%s6704_s25 + $0xcc] sm:$0xff]  }
  0xe3   : > { %v7721_v47 = vcombine.low %v3748_v21, %v3758_v12  ;;  %v7732_v22 = vld [vmem:[%s6704_s25 + $0xbc] sm:$0x1]  ;;  %v3787_v25 = vshll.u32 %v5611_v58, 16  ;;  %v3793_v41 = vshll.u32 %v7701_v49, 16  ;;  %v7737_v57 = vld [vmem:[%s6704_s25 + $0x88] sm:$0xf]  ;;  %v7741_v1 = vsel %vm6945_vm6, %v5280_v53, %v1339_v26 }
  0xe4   : > { %6187 = vmatmul.mubr.msk.bf16.gmra.mrb[24].mxu0 %vm676_vm3, %v6566_v30  ;;  %8568 = vst [vmem:[#allocation13_spill] sm:$0xff] %v7737_v57  ;;  %v7743_v54 = vrot.slane %v1339_v26, 4  ;;  %v7745_v24 = vrot.slane %v3784_v45, 4  ;;  %v3797_v0 = vshrl.u32 %v7701_v49, 16  ;;  %v5620_v50 = vld [vmem:[%s6704_s25 + $0x90] sm:$0xf]  ;;  %v8571_v58 = vcombine.low %v7432_v51, %v7466_v33 }
  0xe5   : > { %6035 = vmatmul.mubr.msk.bf16.gmra.mrb[8].mxu1 %vm676_vm3, %v8563_v59  ;;  %6190 = vmatprep.mubr.msk.bf16.mxu0 %vm676_vm3, %v6567_v36  ;;  %v3808_v19 = vshrl.u32 %v5614_v3, 16  ;;  %v3811_v21 = vshll.u32 %v5614_v3, 16  ;;  %v7758_v12 = vld [vmem:[%s6704_s25 + $0x94] sm:$0xf]  ;;  %v3817_v53 = vshll.u32 %v7725_v17, 16  ;;  %v3821_v39 = vshrl.u32 %v7725_v17, 16 }
  0xe6   : > { %6038 = vmatprep.mubr.msk.bf16.mxu1 %vm676_vm3, %v8566_v43  ;;  %8569 = vst [vmem:[#allocation14_spill] sm:$0xff] %v7758_v12  ;;  %v7761_v59 = vld [vmem:[%s6704_s25 + $0x74] sm:$0x1]  ;;  %v3832_v26 = vshrl.u32 %v5617_v27, 16  ;;  %v3835_v45 = vshll.u32 %v5617_v27, 16  ;;  %v3841_v43 = vshll.u32 %v7737_v57, 16 }
  0xe7   : > { %8570 = vst [vmem:[#allocation15_spill] sm:$0xff] %v7761_v59  ;;  %v3845_v36 = vshrl.u32 %v7737_v57, 16  ;;  %v3856_v30 = vshrl.u32 %v5620_v50, 16  ;;  %v3859_v3 = vshll.u32 %v5620_v50, 16  ;;  %v3789_v63 = vrot.slane %v3787_v25, 5 }
  0xe8   : > { %v7774_v27 = vrot.slane %v3793_v41, 5  ;;  %v3865_v16 = vshll.u32 %v7758_v12, 16  ;;  %v3869_v13 = vshrl.u32 %v7758_v12, 16  ;;  %v8572_v50 = vcombine.low %v7461_v48, %v7474_v23  ;;  %v5623_v41 = vld [vmem:[%s6704_s25 + $0x9c] sm:$0xf] }
  0xe9   : > { %v3799_v51 = vrot.slane %v3797_v0, 4  ;;  %v3803_v33 = vshll.u32 %v7761_v59, 16  ;;  %v3813_v25 = vrot.slane %v3811_v21, 5  ;;  %v3823_v57 = vrot.slane %v3821_v39, 4  ;;  %v7790_v17 = vld [vmem:[%s6704_s25 + $0x8c] sm:$0x1] }
  0xea   : > { %v3834_v49 = vrot.slane %v3832_v26, 4  ;;  %v3837_v12 = vrot.slane %v3835_v45, 5  ;;  %v7792_v31 = vrot.slane %v3841_v43, 5  ;;  %v3847_v48 = vrot.slane %v3845_v36, 4  ;;  %v7798_v0 = vld [vmem:[%s6704_s25 + $0x98] sm:$0x1] }
  0xeb   : > { %v3858_v23 = vrot.slane %v3856_v30, 4  ;;  %v3861_v55 = vrot.slane %v3859_v3, 5  ;;  %v7800_v59 = vrot.slane %v3865_v16, 5  ;;  %v3880_v21 = vshrl.u32 %v5623_v41, 16 }
  0xec   : > { %6191 = vmatmul.mubr.msk.bf16.gmra.mrb[28].mxu0 %vm676_vm3, %v6568_v34  ;;  %v7777_v34 = vld [vmem:[%s6704_s25 + $0x80] sm:$0x1]  ;;  %v3790_v39 = vor.u32 %v3789_v63, %v7745_v24  ;;  %v3800_v7 = vor.u32 %v3799_v51, %v7774_v27  ;;  %v3838_v30 = vor.u32 %v3837_v12, %v3834_v49  ;;  %v3848_v16 = vor.u32 %v3847_v48, %v7792_v31 }
  0xed   : > { %6039 = vmatmul.mubr.msk.bf16.gmra.mrb[12].mxu1 %vm676_vm3, %v8571_v58  ;;  %6196 = vmatprep.mubr.msk.bf16.mxu0 %vm676_vm3, %v7516_v52  ;;  %v3810_v52 = vrot.slane %v3808_v19, 4  ;;  %v7787_v58 = vrot.slane %v3817_v53, 5  ;;  %v3871_v19 = vrot.slane %v3869_v13, 4  ;;  %v3883_v53 = vshll.u32 %v5623_v41, 16 }
  0xee   : > { %6042 = vmatprep.mubr.msk.bf16.mxu1 %vm676_vm3, %v8572_v50  ;;  %v7795_v50 = vld [vmem:[%s6704_s25 + $0xa0] sm:$0xf]  ;;  %v3827_v45 = vshll.u32 %v7777_v34, 16  ;;  %v3851_v13 = vshll.u32 %v7790_v17, 16  ;;  %v3862_v24 = vor.u32 %v3861_v55, %v3858_v23  ;;  %v3875_v63 = vshll.u32 %v7798_v0, 16 }
  0xef   : > { %v3814_v26 = vor.u32 %v3813_v25, %v3810_v52  ;;  %v3824_v36 = vor.u32 %v3823_v57, %v7787_v58  ;;  %v3889_v43 = vshll.u32 %v7795_v50, 16  ;;  %v3893_v3 = vshrl.u32 %v7795_v50, 16 }
  0xf0   : > { %v8573_v51 = vcombine.low %v7478_v29, %v7482_v9  ;;  %v3805_v49 = vrot.slane %v3803_v33, 5  ;;  %v3872_v57 = vor.u32 %v3871_v19, %v7800_v59  ;;  %v3882_v12 = vrot.slane %v3880_v21, 4 }
  0xf1   : > { %v8574_v52 = vcombine.low %v7528_v10, %v7532_v6  ;;  %v3791_v55 = vrot.slane %v3790_v39, 4  ;;  %v3801_v29 = vrot.slane %v3800_v7, 4  ;;  %v3815_v9 = vrot.slane %v3814_v26, 4 }
  0xf2   : > { %v3829_v25 = vrot.slane %v3827_v45, 5  ;;  %v3825_v33 = vrot.slane %v3824_v36, 4  ;;  %v3839_v41 = vrot.slane %v3838_v30, 4  ;;  %v7826_v48 = vrot.slane %v3889_v43, 5 }
  0xf3   : > { %v3895_v23 = vrot.slane %v3893_v3, 4  ;;  %v3849_v19 = vrot.slane %v3848_v16, 4  ;;  %v3853_v21 = vrot.slane %v3851_v13, 5  ;;  %v3863_v10 = vrot.slane %v3862_v24, 4 }
  0xf4   : > { %6197 = vmatmul.mubr.msk.bf16.vlgmr.msra.gmra.mrb[0].mxu0 %vm676_vm3, %v7573_v56  ;;  %v3885_v56 = vrot.slane %v3883_v53, 5  ;;  %v3877_v6 = vrot.slane %v3875_v63, 5  ;;  %v7829_v53 = vld [vmem:[%s6704_s25 + $0xa4] sm:$0x1]  ;;  %v8575_v26 = vrot.slane %v7732_v22, 5  ;;  %v3796_v36 = vsel %vm6723_vm2, %v3791_v55, %v7774_v27 }
  0xf5   : > { %6043 = vmatmul.mubr.msk.bf16.gmra.mrb[16].mxu1 %vm676_vm3, %v8573_v51  ;;  %6229 = vmatpush3.bf16.msra.mxu0 %v7300_v46  ;;  %v5626_v46 = vld [vmem:[%s6704_s25 + $0xa8] sm:$0xf]  ;;  %v3873_v51 = vrot.slane %v3872_v57, 4  ;;  %v3806_v30 = vsel %vm6723_vm2, %v3801_v29, %v3805_v49  ;;  %v3820_v43 = vsel %vm6723_vm2, %v3815_v9, %v7787_v58  ;;  %v3830_v22 = vsel %vm6723_vm2, %v3825_v33, %v3829_v25 }
  0xf6   : > { %6046 = vmatprep.mubr.msk.bf16.mxu1 %vm676_vm3, %v8574_v52  ;;  %6200 = vmatprep.mubr.msk.bf16.mxu0 %vm676_vm3, %v7577_v4  ;;  %v3886_v52 = vor.u32 %v3885_v56, %v3882_v12  ;;  %v7832_v4 = vld [vmem:[%s6704_s25 + $0xac] sm:$0xf]  ;;  %v3904_v7 = vshrl.u32 %v5626_v46, 16  ;;  %v3907_v39 = vshll.u32 %v5626_v46, 16  ;;  %v7839_v45 = vsel %vm6945_vm6, %v7743_v54, %v8575_v26 }
  0xf7   : > { %v3844_v54 = vsel %vm6723_vm2, %v3839_v41, %v7792_v31  ;;  %v3896_v3 = vor.u32 %v3895_v23, %v7826_v48  ;;  %v3899_v16 = vshll.u32 %v7829_v53, 16  ;;  %v3854_v27 = vsel %vm6723_vm2, %v3849_v19, %v3853_v21  ;;  %v5675_v31 = vld [vmem:[%s6704_s25 + $0x48] sm:$0xe]  ;;  %v5678_v26 = vld [vmem:[%s6704_s25 + $0x6c] sm:$0xe] }
  0xf8   : > { %v3868_v58 = vsel %vm6723_vm2, %v3863_v10, %v7800_v59  ;;  %v3913_v13 = vshll.u32 %v7832_v4, 16  ;;  %v3917_v24 = vshrl.u32 %v7832_v4, 16  ;;  %v8576_v63 = vcombine.low %v7543_v32, %v7553_v5  ;;  %v7875_v59 = vld [vmem:[%s6704_s25 + $0xb0] sm:$0x1] }
  0xf9   : > { %v3887_v49 = vrot.slane %v3886_v52, 4  ;;  %v3906_v57 = vrot.slane %v3904_v7, 4  ;;  %v3909_v12 = vrot.slane %v3907_v39, 5  ;;  %v8577_v56 = vcombine.low %v7653_v61, %v7665_v40  ;;  %v5629_v40 = vld [vmem:[%s6704_s25 + $0xb4] sm:$0xf] }
  0xfa   : > { %v8578_v32 = vsel %vm6723_vm2, %v7711_v14, %v7713_v15  ;;  %v8579_v5 = vsel %vm6723_vm2, %v7709_v11, %v7637_v60  ;;  %v5296_v55 = vcombine.low %v7741_v1, %v7839_v45  ;;  %v7893_v29 = vcombine.low %v3796_v36, %v3806_v30  ;;  %v5676_v15 = vld [vmem:[%s6704_s25 + $0x54] sm:$0xe] }
  0xfb   : > { %v7895_v61 = vcombine.low %v3820_v43, %v3830_v22  ;;  %v7898_v9 = vcombine.low %v3844_v54, %v3854_v27  ;;  %v3897_v25 = vrot.slane %v3896_v3, 4  ;;  %v3901_v46 = vrot.slane %v3899_v16, 5  ;;  %v8581_v16 = vld [vmem:[#allocation8_spill] sm:$0xff] }
  0xfc   : > { %6201 = vmatmul.mubr.msk.bf16.gmra.mrb[4].mxu0 %vm676_vm3, %v7707_v44  ;;  %v3878_v44 = vsel %vm6723_vm2, %v3873_v51, %v3877_v6  ;;  %v5691_v14 = vrot.slane %v5675_v31, 9  ;;  %v7903_v60 = vrot.slane %v3913_v13, 5  ;;  %v3919_v11 = vrot.slane %v3917_v24, 4  ;;  %v5677_v6 = vld [vmem:[%s6704_s25 + $0x60] sm:$0xe]  ;;  %v8582_v13 = vld [vmem:[#allocation9_spill] sm:$0xff] }
  0xfd   : > { %6047 = vmatmul.mubr.msk.bf16.gmra.mrb[20].mxu1 %vm676_vm3, %v8576_v63  ;;  %6204 = vmatprep.mubr.msk.bf16.mxu0 %vm676_vm3, %v7717_v38  ;;  %v5644_v38 = vcombine.low %v8579_v5, %v8578_v32  ;;  %v7901_v33 = vcombine.low %v3868_v58, %v3878_v44  ;;  %v3923_v41 = vshll.u32 %v7875_v59, 16  ;;  %v3892_v23 = vsel %vm6723_vm2, %v3887_v49, %v7826_v48  ;;  %v8583_v24 = vld [vmem:[#allocation10_spill] sm:$0xff]  ;;  %v8585_v63 = vld [vmem:[#allocation11_spill] sm:$0xff] }
  0xfe   : > { %6050 = vmatprep.mubr.msk.bf16.mxu1 %vm676_vm3, %v8577_v56  ;;  %v3910_v19 = vor.u32 %v3909_v12, %v3906_v57  ;;  %v4390_v21 = vrot.slane %v7536_v20, 5  ;;  %v4393_v10 = vrot.slane %v7590_v35, 5  ;;  %v3928_v51 = vshrl.u32 %v5629_v40, 16  ;;  %v7925_v35 = vld [vmem:[%s6704_s25 + $0xb8] sm:$0xf]  ;;  %v8586_v49 = vld [vmem:[#allocation15_spill] sm:$0xff] }
  0xff   : > { %v5692_v52 = vrot.slane %v5676_v15, 9  ;;  %v4397_v7 = vrot.slane %v7547_v18, 5  ;;  %v4400_v39 = vrot.slane %v7614_v37, 5  ;;  %v3902_v36 = vsel %vm6723_vm2, %v3897_v25, %v3901_v46  ;;  %v5632_v12 = vld [vmem:[%s6704_s25 + $0xc0] sm:$0xf] }
 0x100   : > { %v3931_v30 = vshll.u32 %v5629_v40, 16  ;;  %v7919_v48 = vsel %vm6945_vm6, %v5691_v14, %v4390_v21  ;;  %v4392_v43 = vrot.slane %v4390_v21, 4  ;;  %v3920_v20 = vor.u32 %v3919_v11, %v7903_v60  ;;  %v5679_v14 = vld [vmem:[%s6704_s25 + $0x78] sm:$0xe] }
 0x101   : > { %v7929_v37 = vsel %vm6945_vm6, %v5692_v52, %v4397_v7  ;;  %v4399_v18 = vrot.slane %v4397_v7, 4  ;;  %v5693_v22 = vrot.slane %v5677_v6, 9  ;;  %v8580_v54 = vcombine.low %v7672_v42, %v7676_v62  ;;  %v6570_v6 = vld [vmem:[%s6704_s25 + $0xc] sm:$0xff]  }
 0x102   : > { %v4404_v3 = vrot.slane %v7596_v8, 5  ;;  %v4407_v27 = vrot.slane %v8581_v16, 5  ;;  %v5694_v58 = vrot.slane %v5678_v26, 9  ;;  %v8584_v31 = vcombine.low %v8582_v13, %v8583_v24  ;;  %v8588_v13 = vld [vmem:[#allocation3_spill] sm:$0xff]  ;;  %v8589_v24 = vld [vmem:[#allocation4_spill] sm:$0xff] }
 0x103   : > { %v7950_v62 = vsel %vm6945_vm6, %v4399_v18, %v4400_v39  ;;  %v4411_v44 = vrot.slane %v8585_v63, 5  ;;  %v4414_v8 = vrot.slane %v8586_v49, 5  ;;  %v3937_v57 = vshll.u32 %v7925_v35, 16  ;;  %v7987_v39 = vld [vmem:[%s6704_s25 + $0xc4] sm:$0xf]  ;;  %v8590_v49 = vld [vmem:[#allocation13_spill] sm:$0xff] }
 0x104   : > { %6205 = vmatmul.mubr.msk.bf16.gmra.mrb[8].mxu0 %vm676_vm3, %v7721_v47  ;;  %v7938_v47 = vsel %vm6945_vm6, %v4392_v43, %v4393_v10  ;;  %v5708_v56 = vcombine.low %v7929_v37, %v7950_v62  ;;  %v7960_v32 = vsel %vm6945_vm6, %v5693_v22, %v4404_v3  ;;  %v4406_v5 = vrot.slane %v4404_v3, 4  ;;  %v5406_v10 = vld [vmem:[%s6704_s25 + $0x78] sm:$0xf]  ;;  %v8587_v22 = vld [vmem:[#allocation12_spill] sm:$0xff]  ;;  %v6635_v62 = vld [vmem:[%s6704_s25 + $0xa0] sm:$0xf] }
 0x105   : > { %6051 = vmatmul.mubr.msk.bf16.gmra.mrb[24].mxu1 %vm676_vm3, %v8580_v54  ;;  %6208 = vmatprep.mubr.msk.bf16.mxu0 %vm676_vm3, %v5644_v38  ;;  %v5707_v42 = vcombine.low %v7919_v48, %v7938_v47  ;;  %v7962_v38 = vrot.slane %v3923_v41, 5  ;;  %v3941_v40 = vshrl.u32 %v7925_v35, 16  ;;  %v7967_v25 = vsel %vm6945_vm6, %v5694_v58, %v4411_v44 }
 0x106   : > { %6054 = vmatprep.mubr.msk.bf16.mxu1 %vm676_vm3, %v8584_v31  ;;  %v4413_v46 = vrot.slane %v4411_v44, 4  ;;  %v7970_v15 = vcombine.low %v3892_v23, %v3902_v36  ;;  %v7972_v11 = vrot.slane %v3910_v19, 4  ;;  %v7974_v21 = vrot.slane %v3928_v51, 4 }
 0x107   : > { %v7978_v41 = vsel %vm6945_vm6, %v4406_v5, %v4407_v27  ;;  %v7982_v52 = vrot.slane %v3920_v20, 4  ;;  %v7984_v7 = vrot.slane %v3931_v30, 5  ;;  %v7995_v51 = vrot.slane %v3937_v57, 5  ;;  %v5680_v20 = vld [vmem:[%s6704_s25 + $0x84] sm:$0xe] }
 0x108   : > { %v5709_v23 = vcombine.low %v7960_v32, %v7978_v41  ;;  %v7993_v19 = vsel %vm6945_vm6, %v4413_v46, %v4414_v8  ;;  %v3952_v26 = vshrl.u32 %v5632_v12, 16  ;;  %v5695_v43 = vrot.slane %v5679_v14, 9  ;;  %v8003_v30 = vld [vmem:[%s6704_s25 + $0xbc] sm:$0x1]  ;;  %v5635_v5 = vld [vmem:[%s6704_s25 + $0xcc] sm:$0xf] }
 0x109   : > { %v5710_v36 = vcombine.low %v7967_v25, %v7993_v19  ;;  %v3955_v18 = vshll.u32 %v5632_v12, 16  ;;  %v4418_v54 = vrot.slane %v8587_v22, 5  ;;  %v4421_v3 = vrot.slane %v7777_v34, 5  ;;  %v6571_v14 = vld [vmem:[%s6704_s25 + $0x18] sm:$0xff]   ;;  %v5681_v22 = vld [vmem:[%s6704_s25 + $0x90] sm:$0xe] }
 0x10a   : > { %v2268_v16 = vshrl.u32 %v5406_v10, 16  ;;  %v3961_v27 = vshll.u32 %v7987_v39, 16  ;;  %v2271_v58 = vshll.u32 %v5406_v10, 16  ;;  %v2290_v34 = vsel %vm6723_vm2, %v8589_v24, %v8588_v13  ;;  %v8591_v24 = vld [vmem:[#allocation14_spill] sm:$0xff]  ;;  %v6639_v19 = vld [vmem:[%s6704_s25 + $0xac] sm:$0xf] }
 0x10b   : > { %v8022_v1 = vsel %vm6945_vm6, %v5695_v43, %v4418_v54  ;;  %v4420_v45 = vrot.slane %v4418_v54, 4  ;;  %v3943_v31 = vrot.slane %v3941_v40, 4  ;;  %v3947_v63 = vshll.u32 %v8003_v30, 16 }
 0x10c   : > { %6209 = vmatmul.mubr.msk.bf16.gmra.mrb[12].mxu0 %vm676_vm3, %v7893_v29  ;;  %v3965_v29 = vshrl.u32 %v7987_v39, 16  ;;  %v2273_v44 = vrot.slane %v2271_v58, 5  ;;  %v4425_v8 = vrot.slane %v8590_v49, 5  ;;  %v3916_v57 = vsel %vm6723_vm2, %v7972_v11, %v7903_v60  ;;  %v6572_v60 = vld [vmem:[%s6704_s25 + $0x24] sm:$0xff]  }
 0x10d   : > { %6055 = vmatmul.mubr.msk.bf16.gmra.mrb[28].mxu1 %vm676_vm3, %v5296_v55  ;;  %6212 = vmatprep.mubr.msk.bf16.mxu0 %vm676_vm3, %v7895_v61  ;;  %v2270_v55 = vrot.slane %v2268_v16, 4  ;;  %v5696_v61 = vrot.slane %v5680_v20, 9  ;;  %v3934_v12 = vor.u32 %v7984_v7, %v7974_v21  ;;  %v8035_v46 = vsel %vm6945_vm6, %v4420_v45, %v4421_v3  ;;  %v8046_v7 = vld [vmem:[%s6704_s25 + $0xd0] sm:$0xf] }
 0x10e   : > { %6060 = vmatprep.mubr.msk.bf16.mxu1 %vm676_vm3, %v6570_v6  ;;  %v4428_v40 = vrot.slane %v7790_v17, 5  ;;  %v3954_v10 = vrot.slane %v3952_v26, 4  ;;  %v3957_v6 = vrot.slane %v3955_v18, 5  ;;  %v5711_v43 = vcombine.low %v8022_v1, %v8035_v46  ;;  %v8058_v18 = vld [vmem:[%s6704_s25 + $0xc8] sm:$0x1] }
 0x10f   : > { %v2274_v20 = vor.u32 %v2273_v44, %v2270_v55  ;;  %v8043_v11 = vrot.slane %v3961_v27, 5  ;;  %v3967_v21 = vrot.slane %v3965_v29, 4  ;;  %v8050_v54 = vsel %vm6945_vm6, %v5696_v61, %v4425_v8  ;;  %v8592_v55 = vld [vmem:[#allocation2_spill] sm:$0xff] }
 0x110   : > { %v4427_v3 = vrot.slane %v4425_v8, 4  ;;  %v3926_v17 = vsel %vm6723_vm2, %v7982_v52, %v7962_v38  ;;  %v3944_v26 = vor.u32 %v3943_v31, %v7995_v51  ;;  %v3976_v16 = vshrl.u32 %v5635_v5, 16  ;;  %v8593_v31 = vld [vmem:[#allocation7_spill] sm:$0xff] }
 0x111   : > { %v2275_v27 = vrot.slane %v2274_v20, 4  ;;  %v3979_v29 = vshll.u32 %v5635_v5, 16  ;;  %v5697_v13 = vrot.slane %v5681_v22, 9  ;;  %v4432_v45 = vrot.slane %v8591_v24, 5 }
 0x112   : > { %v8064_v58 = vsel %vm6945_vm6, %v4427_v3, %v4428_v40  ;;  %v3985_v38 = vshll.u32 %v8046_v7, 16  ;;  %v3989_v52 = vshrl.u32 %v8046_v7, 16  ;;  %v3958_v44 = vor.u32 %v3957_v6, %v3954_v10  ;;  %v5682_v10 = vld [vmem:[%s6704_s25 + $0x9c] sm:$0xe]  ;;  %v6573_v6 = vld [vmem:[%s6704_s25 + $0x30] sm:$0xff]  }
 0x113   : > { %v5712_v61 = vcombine.low %v8050_v54, %v8064_v58  ;;  %v3971_v49 = vshll.u32 %v8058_v18, 16  ;;  %v3949_v5 = vrot.slane %v3947_v63, 5  ;;  %v8085_v40 = vsel %vm6945_vm6, %v5697_v13, %v4432_v45  ;;  %v6574_v13 = vld [vmem:[%s6704_s25 + $0x3c] sm:$0xff]  }
 0x114   : > { %6213 = vmatmul.mubr.msk.bf16.gmra.mrb[16].mxu0 %vm676_vm3, %v7898_v9  ;;  %v2280_v9 = vsel %vm6723_vm2, %v2275_v27, %v8592_v55  ;;  %v4435_v20 = vrot.slane %v7798_v0, 5  ;;  %v5650_v22 = vcombine.low %v3916_v57, %v3926_v17  ;;  %v3935_v3 = vrot.slane %v3934_v12, 4 }
 0x115   : > { %6061 = vmatmul.mubr.msk.bf16.vlgmr.msra.gmra.mrb[0].mxu1 %vm676_vm3, %v6571_v14  ;;  %6216 = vmatprep.mubr.msk.bf16.mxu0 %vm676_vm3, %v7901_v33  ;;  %v3968_v33 = vor.u32 %v3967_v21, %v8043_v11  ;;  %v8081_v8 = vcombine.low %v2280_v9, %v2290_v34  ;;  %v4434_v14 = vrot.slane %v4432_v45, 4  ;;  %v3945_v27 = vrot.slane %v3944_v26, 4  ;;  %v8091_v21 = vld [vmem:[%s6704_s25 + $0xd4] sm:$0x1]  ;;  %v5671_v9 = vld [vmem:[%s6704_s25 + $0x18] sm:$0xe] }
 0x116   : > { %6263 = vmatpush3.bf16.msra.mxu1 %v8593_v31  ;;  %6064 = vmatprep.mubr.msk.bf16.mxu1 %vm676_vm3, %v6572_v60  ;;  %v3978_v60 = vrot.slane %v3976_v16, 4  ;;  %v3981_v24 = vrot.slane %v3979_v29, 5  ;;  %v8093_v34 = vrot.slane %v3985_v38, 5  ;;  %v3991_v55 = vrot.slane %v3989_v52, 4 }
 0x117   : > { %v8097_v63 = vsel %vm6945_vm6, %v4434_v14, %v4435_v20  ;;  %v3959_v45 = vrot.slane %v3958_v44, 4  ;;  %v3969_v0 = vrot.slane %v3968_v33, 4  ;;  %v3973_v57 = vrot.slane %v3971_v49, 5  ;;  %v6625_v33 = vld [vmem:[%s6704_s25 + $0x1c] sm:$0xf] }
 0x118   : > { %v5713_v12 = vcombine.low %v8085_v40, %v8097_v63  ;;  %v5698_v17 = vrot.slane %v5682_v10, 9  ;;  %v4439_v26 = vrot.slane %v7795_v50, 5  ;;  %v3940_v16 = vsel %vm6723_vm2, %v3935_v3, %v7995_v51  ;;  %v5683_v14 = vld [vmem:[%s6704_s25 + $0xa8] sm:$0xe] }
 0x119   : > { %v3950_v29 = vsel %vm6723_vm2, %v3945_v27, %v3949_v5  ;;  %v3995_v38 = vshll.u32 %v8091_v21, 16  ;;  %v4442_v52 = vrot.slane %v7829_v53, 5  ;;  %v3982_v50 = vor.u32 %v3981_v24, %v3978_v60  ;;  %v6575_v60 = vld [vmem:[%s6704_s25 + $0x48] sm:$0xff]   ;;  %v6626_v24 = vld [vmem:[%s6704_s25 + $0x20] sm:$0x1] }
 0x11a   : > { %v8118_v51 = vsel %vm6945_vm6, %v5698_v17, %v4439_v26  ;;  %v4441_v31 = vrot.slane %v4439_v26, 4  ;;  %v3964_v53 = vsel %vm6723_vm2, %v3959_v45, %v8043_v11  ;;  %v3974_v44 = vsel %vm6723_vm2, %v3969_v0, %v3973_v57  ;;  %v5684_v26 = vld [vmem:[%s6704_s25 + $0xb4] sm:$0xe] }
 0x11b   : > { %v4362_v49 = vrot.slane %v6625_v33, 5  ;;  %v5651_v20 = vcombine.low %v3940_v16, %v3950_v29  ;;  %v5687_v3 = vrot.slane %v5671_v9, 9  ;;  %v5652_v11 = vcombine.low %v3964_v53, %v3974_v44  ;;  %v5673_v33 = vld [vmem:[%s6704_s25 + $0x30] sm:$0xe] }
 0x11c   : > { %6217 = vmatmul.mubr.msk.bf16.gmra.mrb[20].mxu0 %vm676_vm3, %v7970_v15  ;;  %v3992_v15 = vor.u32 %v3991_v55, %v8093_v34  ;;  %v8129_v5 = vsel %vm6945_vm6, %v4441_v31, %v4442_v52  ;;  %v3983_v10 = vrot.slane %v3982_v50, 4  ;;  %v4365_v55 = vrot.slane %v6626_v24, 5  ;;  %v5672_v52 = vld [vmem:[%s6704_s25 + $0x24] sm:$0xe]  ;;  %v6627_v50 = vld [vmem:[%s6704_s25 + $0x28] sm:$0xf] }
 0x11d   : > { %6065 = vmatmul.mubr.msk.bf16.gmra.mrb[4].mxu1 %vm676_vm3, %v6573_v6  ;;  %6220 = vmatprep.mubr.msk.bf16.mxu0 %vm676_vm3, %v5650_v22  ;;  %v3997_v22 = vrot.slane %v3995_v38, 5  ;;  %v5714_v27 = vcombine.low %v8118_v51, %v8129_v5  ;;  %v4364_v45 = vrot.slane %v4362_v49, 4  ;;  %v5699_v0 = vrot.slane %v5683_v14, 9  ;;  %v6628_v31 = vld [vmem:[%s6704_s25 + $0x34] sm:$0xf] }
 0x11e   : > { %6068 = vmatprep.mubr.msk.bf16.mxu1 %vm676_vm3, %v6574_v13  ;;  %v3993_v6 = vrot.slane %v3992_v15, 4  ;;  %v6576_v13 = vld [vmem:[%s6704_s25 + $0x54] sm:$0xff]   ;;  %v4446_v57 = vrot.slane %v7832_v4, 5  ;;  %v4449_v17 = vrot.slane %v7875_v59, 5  ;;  %v3988_v4 = vsel %vm6723_vm2, %v3983_v10, %v8093_v34  ;;  %v6577_v10 = vld [vmem:[%s6704_s25 + $0x60] sm:$0xff]  }
 0x11f   : > { %v4363_v38 = vsel %vm6945_vm6, %v5687_v3, %v4362_v49  ;;  %v4369_v15 = vrot.slane %v6627_v50, 5  ;;  %v4366_v9 = vsel %vm6945_vm6, %v4364_v45, %v4365_v55  ;;  %v4376_v53 = vrot.slane %v6628_v31, 5  ;;  %v6629_v3 = vld [vmem:[%s6704_s25 + $0x2c] sm:$0x1]  ;;  %v6644_v51 = vld [vmem:[%s6704_s25 + $0xc8] sm:$0x1] }
 0x120   : > { %v8143_v16 = vsel %vm6945_vm6, %v5699_v0, %v4446_v57  ;;  %v4448_v29 = vrot.slane %v4446_v57, 4  ;;  %v3998_v59 = vsel %vm6723_vm2, %v3993_v6, %v3997_v22  ;;  %v5700_v44 = vrot.slane %v5684_v26, 9  ;;  %v6578_v45 = vld [vmem:[%s6704_s25 + $0x6c] sm:$0xff]   ;;  %v5685_v26 = vld [vmem:[%s6704_s25 + $0xc0] sm:$0xe] }
 0x121   : > { %v4453_v14 = vrot.slane %v7925_v35, 5  ;;  %v5688_v22 = vrot.slane %v5672_v52, 9  ;;  %v5703_v6 = vcombine.low %v4363_v38, %v4366_v9  ;;  %v4371_v24 = vrot.slane %v4369_v15, 4  ;;  %v6630_v35 = vld [vmem:[%s6704_s25 + $0x38] sm:$0x1] }
 0x122   : > { %v8162_v34 = vsel %vm6945_vm6, %v4448_v29, %v4449_v17  ;;  %v5689_v0 = vrot.slane %v5673_v33, 9  ;;  %v4378_v57 = vrot.slane %v4376_v53, 4  ;;  %v4379_v17 = vrot.slane %v6630_v35, 5  ;;  %v8594_v38 = vld [vmem:[#allocation5_spill] sm:$0xff] }
 0x123   : > { %v5715_v49 = vcombine.low %v8143_v16, %v8162_v34  ;;  %v8173_v55 = vsel %vm6945_vm6, %v5700_v44, %v4453_v14  ;;  %v4383_v52 = vrot.slane %v8594_v38, 5  ;;  %v5701_v50 = vrot.slane %v5685_v26, 9  ;;  %v5674_v44 = vld [vmem:[%s6704_s25 + $0x3c] sm:$0xe]  ;;  %v6631_v38 = vld [vmem:[%s6704_s25 + $0x70] sm:$0xf] }
 0x124   : > { %6221 = vmatmul.mubr.msk.bf16.gmra.mrb[24].mxu0 %vm676_vm3, %v5651_v20  ;;  %v5653_v20 = vcombine.low %v3988_v4, %v3998_v59  ;;  %v4370_v4 = vsel %vm6945_vm6, %v5688_v22, %v4369_v15  ;;  %v4377_v9 = vsel %vm6945_vm6, %v5689_v0, %v4376_v53  ;;  %v4380_v31 = vsel %vm6945_vm6, %v4378_v57, %v4379_v17  ;;  %v5403_v22 = vld [vmem:[%s6704_s25 + $0x6c] sm:$0xf] }
 0x125   : > { %6069 = vmatmul.mubr.msk.bf16.gmra.mrb[8].mxu1 %vm676_vm3, %v6575_v60  ;;  %6224 = vmatprep.mubr.msk.bf16.mxu0 %vm676_vm3, %v5652_v11  ;;  %v4372_v60 = vrot.slane %v6629_v3, 5  ;;  %v4456_v11 = vrot.slane %v8003_v30, 5  ;;  %v4460_v33 = vrot.slane %v7987_v39, 5  ;;  %v4463_v15 = vrot.slane %v8058_v18, 5 }
 0x126   : > { %6072 = vmatprep.mubr.msk.bf16.mxu1 %vm676_vm3, %v6576_v13  ;;  %v4455_v13 = vrot.slane %v4453_v14, 4  ;;  %v5686_v14 = vld [vmem:[%s6704_s25 + $0xcc] sm:$0xe]  ;;  %v4385_v53 = vrot.slane %v4383_v52, 4  ;;  %v2244_v0 = vshrl.u32 %v5403_v22, 16  ;;  %v2247_v57 = vshll.u32 %v5403_v22, 16 }
 0x127   : > { %v4373_v59 = vsel %vm6945_vm6, %v4371_v24, %v4372_v60  ;;  %v8204_v3 = vsel %vm6945_vm6, %v5701_v50, %v4460_v33  ;;  %v4462_v60 = vrot.slane %v4460_v33, 4  ;;  %v8595_v24 = vld [vmem:[#allocation6_spill] sm:$0xff]  ;;  %v5702_v18 = vrot.slane %v5686_v14, 9 }
 0x128   : > { %v8180_v29 = vsel %vm6945_vm6, %v4455_v13, %v4456_v11  ;;  %v6579_v11 = vld [vmem:[%s6704_s25 + $0x78] sm:$0xff]   ;;  %v4386_v13 = vrot.slane %v8595_v24, 5  ;;  %v4467_v17 = vrot.slane %v8046_v7, 5  ;;  %v4470_v26 = vrot.slane %v8091_v21, 5 }
 0x129   : > { %v5716_v30 = vcombine.low %v8173_v55, %v8180_v29  ;;  %v8211_v39 = vsel %vm6945_vm6, %v4462_v60, %v4463_v15  ;;  %v2253_v50 = vshll.u32 %v6631_v38, 16  ;;  %v6581_v15 = vld [vmem:[%s6704_s25 + $0x90] sm:$0xff]   ;;  %v6582_v60 = vld [vmem:[%s6704_s25 + $0x9c] sm:$0xff]   ;;  %v2431_v5 = vshll.u32 %v6644_v51, 16 }
 0x12a   : > { %v5717_v35 = vcombine.low %v8204_v3, %v8211_v39  ;;  %v8228_v7 = vsel %vm6945_vm6, %v5702_v18, %v4467_v17  ;;  %v4469_v21 = vrot.slane %v4467_v17, 4  ;;  %v5412_v17 = vld [vmem:[%s6704_s25 + $0x90] sm:$0xf] }
 0x12b   : > { %v2255_v14 = vrot.slane %v2253_v50, 5 }
 0x12c   : > { %6225 = vmatmul.mubr.msk.bf16.gmra.mrb[28].mxu0 %vm676_vm3, %v5653_v20  ;;  %v5704_v20 = vcombine.low %v4370_v4, %v4373_v59  ;;  %v4387_v59 = vsel %vm6945_vm6, %v4385_v53, %v4386_v13 }
 0x12d   : > { %6073 = vmatmul.mubr.msk.bf16.gmra.mrb[12].mxu1 %vm676_vm3, %v6577_v10  ;;  %6230 = vmatprep.mubr.msk.bf16.mxu0 %vm676_vm3, %v5703_v6  ;;  %v5705_v10 = vcombine.low %v4377_v9, %v4380_v31  ;;  %v5690_v6 = vrot.slane %v5674_v44, 9  ;;  %v2257_v9 = vshrl.u32 %v6631_v38, 16  ;;  %v2246_v31 = vrot.slane %v2244_v0, 4  ;;  %v6584_v38 = vld [vmem:[%s6704_s25 + $0xb4] sm:$0xff]  }
 0x12e   : > { %6076 = vmatprep.mubr.msk.bf16.mxu1 %vm676_vm3, %v6578_v45  ;;  %v6580_v45 = vld [vmem:[%s6704_s25 + $0x84] sm:$0xff]   ;;  %v2249_v44 = vrot.slane %v2247_v57, 5 }
 0x12f   : > { %v4384_v4 = vsel %vm6945_vm6, %v5690_v6, %v4383_v52  ;;  %v8232_v52 = vsel %vm6945_vm6, %v4469_v21, %v4470_v26  ;;  %v6632_v6 = vld [vmem:[%s6704_s25 + $0x74] sm:$0x1]  ;;  %v6583_v26 = vld [vmem:[%s6704_s25 + $0xa8] sm:$0xff]   ;;  %v2316_v21 = vshrl.u32 %v5412_v17, 16 }
 0x130   : > { %v5706_v33 = vcombine.low %v4384_v4, %v4387_v59  ;;  %v5718_v22 = vcombine.low %v8228_v7, %v8232_v52  ;;  %v2263_v53 = vshll.u32 %v6632_v6, 16  ;;  %v5415_v59 = vld [vmem:[%s6704_s25 + $0x9c] sm:$0xf]  ;;  %v6636_v6 = vld [vmem:[%s6704_s25 + $0x8c] sm:$0x1] }
 0x132   : > { %v2265_v48 = vrot.slane %v2263_v53, 5  ;;  %v2311_v53 = vshll.u32 %v6636_v6, 16 }
 0x134   : > { %6231 = vmatmul.mubr.msk.bf16.vlgmr.msra.gmra.mrb[0].mxu0 %vm676_vm3, %v5704_v20  ;;  %v2259_v20 = vrot.slane %v2257_v9, 4 }
 0x135   : > { %6077 = vmatmul.mubr.msk.bf16.gmra.mrb[16].mxu1 %vm676_vm3, %v6579_v11  ;;  %6234 = vmatprep.mubr.msk.bf16.mxu0 %vm676_vm3, %v5705_v10  ;;  %v5409_v11 = vld [vmem:[%s6704_s25 + $0x84] sm:$0xf]  ;;  %v2250_v10 = vor.u32 %v2249_v44, %v2246_v31  ;;  %v2319_v31 = vshll.u32 %v5412_v17, 16 }
 0x136   : > { %6080 = vmatprep.mubr.msk.bf16.mxu1 %vm676_vm3, %v6580_v45  ;;  %v2260_v2 = vor.u32 %v2259_v20, %v2255_v14  ;;  %v2292_v24 = vshrl.u32 %v5409_v11, 16  ;;  %v2295_v13 = vshll.u32 %v5409_v11, 16  ;;  %v6633_v45 = vld [vmem:[%s6704_s25 + $0x88] sm:$0xf]  ;;  %v2343_v11 = vshll.u32 %v5415_v59, 16 }
 0x137   : > { %v2301_v18 = vshll.u32 %v6633_v45, 16  ;;  %v2305_v0 = vshrl.u32 %v6633_v45, 16  ;;  %v2251_v57 = vrot.slane %v2250_v10, 4  ;;  %v2349_v10 = vshll.u32 %v6635_v62, 16 }
 0x138   : > { %v2261_v4 = vrot.slane %v2260_v2, 4  ;;  %v2294_v47 = vrot.slane %v2292_v24, 4  ;;  %v2318_v24 = vrot.slane %v2316_v21, 4  ;;  %v2321_v32 = vrot.slane %v2319_v31, 5  ;;  %v6638_v31 = vld [vmem:[%s6704_s25 + $0xa4] sm:$0x1] }
 0x139   : > { %v8252_v50 = vrot.slane %v2301_v18, 5  ;;  %v2307_v9 = vrot.slane %v2305_v0, 4  ;;  %v2256_v44 = vsel %vm6723_vm2, %v2251_v57, %v2255_v14  ;;  %v2345_v45 = vrot.slane %v2343_v11, 5  ;;  %v6585_v18 = vld [vmem:[%s6704_s25 + $0xc0] sm:$0xff]  }
 0x13a   : > { %v2266_v14 = vsel %vm6723_vm2, %v2261_v4, %v2265_v48  ;;  %v8275_v17 = vrot.slane %v2349_v10, 5  ;;  %v5418_v4 = vld [vmem:[%s6704_s25 + $0xa8] sm:$0xf] }
 0x13b   : > { %v2308_v2 = vor.u32 %v2307_v9, %v8252_v50  ;;  %v5435_v0 = vcombine.low %v2256_v44, %v2266_v14  ;;  %v2359_v44 = vshll.u32 %v6638_v31, 16  ;;  %v2367_v25 = vshll.u32 %v5418_v4, 16 }
 0x13c   : > { %6235 = vmatmul.mubr.msk.bf16.gmra.mrb[4].mxu0 %vm676_vm3, %v5706_v33  ;;  %v6634_v33 = vld [vmem:[%s6704_s25 + $0x94] sm:$0xf] }
 0x13d   : > { %6081 = vmatmul.mubr.msk.bf16.gmra.mrb[20].mxu1 %vm676_vm3, %v6581_v15  ;;  %6238 = vmatprep.mubr.msk.bf16.mxu0 %vm676_vm3, %v5707_v42  ;;  %v2297_v42 = vrot.slane %v2295_v13, 5  ;;  %v2325_v15 = vshll.u32 %v6634_v33, 16  ;;  %v2329_v20 = vshrl.u32 %v6634_v33, 16  ;;  %v2309_v48 = vrot.slane %v2308_v2, 4 }
 0x13e   : > { %6084 = vmatprep.mubr.msk.bf16.mxu1 %vm676_vm3, %v6582_v60  ;;  %v2340_v60 = vshrl.u32 %v5415_v59, 16  ;;  %v6637_v59 = vld [vmem:[%s6704_s25 + $0x98] sm:$0x1]  ;;  %v2364_v33 = vshrl.u32 %v5418_v4, 16  ;;  %v5424_v4 = vld [vmem:[%s6704_s25 + $0xc0] sm:$0xf] }
 0x13f   : > { %v2298_v37 = vor.u32 %v2297_v42, %v2294_v47  ;;  %v8272_v41 = vrot.slane %v2325_v15, 5  ;;  %v2313_v47 = vrot.slane %v2311_v53, 5  ;;  %v2322_v42 = vor.u32 %v2321_v32, %v2318_v24  ;;  %v5421_v15 = vld [vmem:[%s6704_s25 + $0xb4] sm:$0xf] }
 0x140   : > { %v2342_v13 = vrot.slane %v2340_v60, 4  ;;  %v2377_v60 = vshrl.u32 %v6639_v19, 16  ;;  %v2388_v1 = vshrl.u32 %v5421_v15, 16  ;;  %v2391_v46 = vshll.u32 %v5421_v15, 16 }
 0x141   : > { %v2299_v57 = vrot.slane %v2298_v37, 4  ;;  %v2314_v14 = vsel %vm6723_vm2, %v2309_v48, %v2313_v47  ;;  %v2323_v37 = vrot.slane %v2322_v42, 4  ;;  %v2361_v53 = vrot.slane %v2359_v44, 5 }
 0x142   : > { %v2346_v21 = vor.u32 %v2345_v45, %v2342_v13  ;;  %v2366_v24 = vrot.slane %v2364_v33, 4  ;;  %v2379_v45 = vrot.slane %v2377_v60, 4  ;;  %v6643_v33 = vld [vmem:[%s6704_s25 + $0xbc] sm:$0x1] }
 0x143   : > { %v2304_v11 = vsel %vm6723_vm2, %v2299_v57, %v8252_v50  ;;  %v2328_v48 = vsel %vm6723_vm2, %v2323_v37, %v8272_v41  ;;  %v2407_v40 = vshll.u32 %v6643_v33, 16 }
 0x144   : > { %6239 = vmatmul.mubr.msk.bf16.gmra.mrb[8].mxu0 %vm676_vm3, %v5708_v56  ;;  %v2353_v56 = vshrl.u32 %v6635_v62, 16  ;;  %v2347_v6 = vrot.slane %v2346_v21, 4  ;;  %v5437_v50 = vcombine.low %v2304_v11, %v2314_v14 }
 0x145   : > { %6085 = vmatmul.mubr.msk.bf16.gmra.mrb[24].mxu1 %vm676_vm3, %v6583_v26  ;;  %6242 = vmatprep.mubr.msk.bf16.mxu0 %vm676_vm3, %v5709_v23  ;;  %v2331_v23 = vrot.slane %v2329_v20, 4 }
 0x146   : > { %6088 = vmatprep.mubr.msk.bf16.mxu1 %vm676_vm3, %v6584_v38  ;;  %v2355_v26 = vrot.slane %v2353_v56, 4  ;;  %v2335_v38 = vshll.u32 %v6637_v59, 16  ;;  %v2352_v42 = vsel %vm6723_vm2, %v2347_v6, %v8275_v17  ;;  %v2433_v6 = vrot.slane %v2431_v5, 5 }
 0x147   : > { %v2332_v9 = vor.u32 %v2331_v23, %v8272_v41  ;;  %v2369_v23 = vrot.slane %v2367_v25, 5  ;;  %v6641_v41 = vld [vmem:[%s6704_s25 + $0xb0] sm:$0x1] }
 0x148   : > { %v2356_v20 = vor.u32 %v2355_v26, %v8275_v17  ;;  %v2337_v62 = vrot.slane %v2335_v38, 5  ;;  %v2383_v59 = vshll.u32 %v6641_v41, 16  ;;  %v2412_v38 = vshrl.u32 %v5424_v4, 16 }
 0x149   : > { %v2333_v2 = vrot.slane %v2332_v9, 4  ;;  %v2370_v58 = vor.u32 %v2369_v23, %v2366_v24  ;;  %v2415_v17 = vshll.u32 %v5424_v4, 16  ;;  %v6642_v9 = vld [vmem:[%s6704_s25 + $0xc4] sm:$0xf] }
 0x14a   : > { %v2357_v32 = vrot.slane %v2356_v20, 4  ;;  %v2421_v21 = vshll.u32 %v6642_v9, 16  ;;  %v2425_v31 = vshrl.u32 %v6642_v9, 16  ;;  %v2385_v25 = vrot.slane %v2383_v59, 5 }
 0x14b   : > { %v2338_v47 = vsel %vm6723_vm2, %v2333_v2, %v2337_v62  ;;  %v2371_v15 = vrot.slane %v2370_v58, 4  ;;  %v2409_v62 = vrot.slane %v2407_v40, 5 }
 0x14c   : > { %6243 = vmatmul.mubr.msk.bf16.gmra.mrb[12].mxu0 %vm676_vm3, %v5710_v36  ;;  %v2373_v36 = vshll.u32 %v6639_v19, 16  ;;  %v2362_v54 = vsel %vm6723_vm2, %v2357_v32, %v2361_v53  ;;  %v5438_v63 = vcombine.low %v2328_v48, %v2338_v47  ;;  %v2414_v19 = vrot.slane %v2412_v38, 4 }
 0x14d   : > { %6089 = vmatmul.mubr.msk.bf16.gmra.mrb[28].mxu1 %vm676_vm3, %v6585_v18  ;;  %6246 = vmatprep.mubr.msk.bf16.mxu0 %vm676_vm3, %v5711_v43  ;;  %v6640_v43 = vld [vmem:[%s6704_s25 + $0xb8] sm:$0xf]  ;;  %v2390_v18 = vrot.slane %v2388_v1, 4  ;;  %v2423_v60 = vrot.slane %v2421_v21, 5  ;;  %v2427_v11 = vrot.slane %v2425_v31, 4 }
 0x14e   : > { %6110 = vmatprep.mubr.msk.bf16.mxu1 %vm676_vm3, %v5435_v0  ;;  %v2397_v10 = vshll.u32 %v6640_v43, 16  ;;  %v2401_v56 = vshrl.u32 %v6640_v43, 16  ;;  %v2375_v13 = vrot.slane %v2373_v36, 5  ;;  %v2393_v0 = vrot.slane %v2391_v46, 5 }
 0x14f   : > { %v2417_v36 = vrot.slane %v2415_v17, 5 }
 0x150   : > { %v2399_v57 = vrot.slane %v2397_v10, 5  ;;  %v2403_v26 = vrot.slane %v2401_v56, 4  ;;  %v2376_v1 = vsel %vm6723_vm2, %v2371_v15, %v2375_v13  ;;  %v2428_v10 = vor.u32 %v2427_v11, %v2423_v60 }
 0x151   : > { %v2418_v43 = vor.u32 %v2417_v36, %v2414_v19 }
 0x152   : > { %v2404_v44 = vor.u32 %v2403_v26, %v2399_v57  ;;  %v2429_v2 = vrot.slane %v2428_v10, 4 }
 0x153   : > { %v2419_v56 = vrot.slane %v2418_v43, 4 }
 0x154   : > { %6247 = vmatmul.mubr.msk.bf16.gmra.mrb[16].mxu0 %vm676_vm3, %v5712_v61  ;;  %v2380_v61 = vor.u32 %v2379_v45, %v2375_v13  ;;  %v2405_v37 = vrot.slane %v2404_v44, 4  ;;  %v2434_v24 = vsel %vm6723_vm2, %v2429_v2, %v2433_v6 }
 0x155   : > { %6111 = vmatmul.mubr.msk.bf16.vlgmr.msra.gmra.mrb[16].mxu1 %vm676_vm3, %v8081_v8  ;;  %6250 = vmatprep.mubr.msk.bf16.mxu0 %vm676_vm3, %v5713_v12  ;;  %v2394_v8 = vor.u32 %v2393_v0, %v2390_v18  ;;  %v5439_v12 = vcombine.low %v2352_v42, %v2362_v54  ;;  %v2424_v53 = vsel %vm6723_vm2, %v2419_v56, %v2423_v60 }
 0x156   : > { %6114 = vmatprep.mubr.msk.bf16.mxu1 %vm676_vm3, %v5437_v50  ;;  %v2381_v20 = vrot.slane %v2380_v61, 4  ;;  %v2410_v16 = vsel %vm6723_vm2, %v2405_v37, %v2409_v62  ;;  %v5442_v32 = vcombine.low %v2424_v53, %v2434_v24 }
 0x157   : > { %v2395_v14 = vrot.slane %v2394_v8, 4 }
 0x158   : > { %v2386_v46 = vsel %vm6723_vm2, %v2381_v20, %v2385_v25 }
 0x159   : > { %v5440_v34 = vcombine.low %v2376_v1, %v2386_v46 }
 0x15c   : > { %6251 = vmatmul.mubr.msk.bf16.gmra.mrb[20].mxu0 %vm676_vm3, %v5714_v27  ;;  %v2400_v27 = vsel %vm6723_vm2, %v2395_v14, %v2399_v57 }
 0x15d   : > { %6115 = vmatmul.mubr.msk.bf16.gmra.mrb[20].mxu1 %vm676_vm3, %v5438_v63  ;;  %6254 = vmatprep.mubr.msk.bf16.mxu0 %vm676_vm3, %v5715_v49  ;;  %v5441_v49 = vcombine.low %v2400_v27, %v2410_v16 }
 0x15e   : > { %6118 = vmatprep.mubr.msk.bf16.mxu1 %vm676_vm3, %v5439_v12 }
 0x164   : > { %6255 = vmatmul.mubr.msk.bf16.gmra.mrb[24].mxu0 %vm676_vm3, %v5716_v30 }
 0x165   : > { %6119 = vmatmul.mubr.msk.bf16.gmra.mrb[24].mxu1 %vm676_vm3, %v5440_v34  ;;  %6258 = vmatprep.mubr.msk.bf16.mxu0 %vm676_vm3, %v5717_v35 }
 0x166   : > { %6122 = vmatprep.mubr.msk.bf16.mxu1 %vm676_vm3, %v5441_v49 }
 0x16c   : > { %6259 = vmatmul.mubr.msk.bf16.gmra.mrb[28].mxu0 %vm676_vm3, %v5718_v22 }
 0x16d   : > { %6123 = vmatmul.mubr.msk.bf16.gmra.mrb[28].mxu1 %vm676_vm3, %v5442_v32 }
 0x1e8   : > { %v6062_v55 = vpop.f32.mrb[0].mxu1 }
 0x1e9   : > { %v1844_v29 = vpop.f32.mrb[1].mxu1 }
 0x1ea   : > { %v6063_v30 = vpop.f32.mrb[2].mxu1 }
 0x1eb   : > { %v1847_v3 = vpop.f32.mrb[3].mxu1 }
 0x1f0   : > { %v6066_v39 = vpop.f32.mrb[4].mxu1 }
 0x1f1   : > { %v1860_v35 = vpop.f32.mrb[5].mxu1 }
 0x1f2   : > { %v6067_v23 = vpop.f32.mrb[6].mxu1 }
 0x1f3   : > { %v1863_v13 = vpop.f32.mrb[7].mxu1 }
 0x1f8   : > { %v8363_v45 = vpop.f32.mrb[8].mxu1 }
 0x1f9   : > { %v8365_v28 = vpop.f32.mrb[9].mxu1 }
 0x1fa   : > { %v8367_v50 = vpop.f32.mrb[10].mxu1 }
 0x1fb   : > { %v8369_v7 = vpop.f32.mrb[11].mxu1 }
 0x200   : > { %v8371_v52 = vpop.f32.mrb[12].mxu1 }
 0x201   : > { %v8373_v22 = vpop.f32.mrb[13].mxu1 }
 0x202   : > { %v8375_v18 = vpop.f32.mrb[14].mxu1 }
 0x203   : > { %v8377_v0 = vpop.f32.mrb[15].mxu1 }
 0x207   : > { %v6232_v57 = vpop.f32.mrb[0].mxu0 }
 0x208   : > { %v6264_v26 = vadd.f32 %v6232_v57, %v6062_v55  ;;  %v4610_v4 = vpop.f32.mrb[1].mxu0 }
 0x209   : > { %v6265_v48 = vadd.f32 %v4610_v4, %v1844_v29  ;;  %v6233_v47 = vpop.f32.mrb[2].mxu0 }
 0x20a   : > { %v5773_v42 = vpack.c.bf16 %v6264_v26, %v6264_v26  ;;  %v6266_v54 = vadd.f32 %v6233_v47, %v6063_v30  ;;  %v4613_v58 = vpop.f32.mrb[3].mxu0  ;;  %v4840_v38 = vmul.f32 %v6264_v26, %v6264_v26  ;;  %v4772_v40 = vsel %vm676_vm3, %v6264_v26, 0.0 }
 0x20b   : > { %v4838_v61 = vmul.f32 %v6265_v48, %v6265_v48  ;;  %v5771_v41 = vpack.c.bf16 %v6265_v48, %v6265_v48  ;;  %v6267_v59 = vadd.f32 %v4613_v58, %v1847_v3  ;;  %v4769_v9 = vsel %vm676_vm3, %v6265_v48, 0.0 }
 0x20c   : > { %5074 = vst.msk [vmem:[%s8383_s18 + $0x8] sm:$0xf] %vm5071_vm7, %v5773_v42  ;;  %v5774_v17 = vpack.c.bf16 %v6266_v54, %v6266_v54  ;;  %v4841_v44 = vmul.f32 %v6266_v54, %v6266_v54  ;;  %v4873_v60 = vsel %vm676_vm3, %v4840_v38, 0.0  ;;  %v4774_v37 = vsel %vm676_vm3, %v6266_v54, 0.0 }
 0x20d   : > { %5072 = vst.msk [vmem:[%s8383_s18] sm:$0xf] %vm5071_vm7, %v5771_v41  ;;  %v4770_v21 = vsel %vm676_vm3, %v6267_v59, 0.0  ;;  %v4839_v31 = vmul.f32 %v6267_v59, %v6267_v59  ;;  %v5772_v8 = vpack.c.bf16 %v6267_v59, %v6267_v59  ;;  %v4870_v63 = vsel %vm676_vm3, %v4838_v61, 0.0 }
 0x20e   : > { %5075 = vst.msk [vmem:[%s8383_s18 + $0xc] sm:$0xf] %vm5071_vm7, %v5774_v17  ;;  %v4771_v33 = vadd.f32 %v4770_v21, %v4769_v9  ;;  %v4875_v62 = vsel %vm676_vm3, %v4841_v44, 0.0 }
 0x20f   : > { %v4871_v12 = vsel %vm676_vm3, %v4839_v31, 0.0  ;;  %5073 = vst.msk [vmem:[%s8383_s18 + $0x4] sm:$0xf] %vm5071_vm7, %v5772_v8  ;;  %v6236_v15 = vpop.f32.mrb[4].mxu0 }
 0x210   : > { %v4773_v20 = vadd.f32 %v4772_v40, %v4771_v33  ;;  %v4872_v25 = vadd.f32 %v4871_v12, %v4870_v63  ;;  %v6268_v19 = vadd.f32 %v6236_v15, %v6066_v39  ;;  %v4626_v36 = vpop.f32.mrb[5].mxu0 }
 0x211   : > { %v6269_v11 = vadd.f32 %v4626_v36, %v1860_v35  ;;  %v6237_v14 = vpop.f32.mrb[6].mxu0 }
 0x212   : > { %v4874_v1 = vadd.f32 %v4873_v60, %v4872_v25  ;;  %v5777_v46 = vpack.c.bf16 %v6268_v19, %v6268_v19  ;;  %v4629_v43 = vpop.f32.mrb[7].mxu0  ;;  %v4775_v10 = vadd.f32 %v4774_v37, %v4773_v20  ;;  %v6270_v34 = vadd.f32 %v6237_v14, %v6067_v23 }
 0x213   : > { %v4776_v51 = vsel %vm676_vm3, %v6269_v11, 0.0  ;;  %v4842_v5 = vmul.f32 %v6269_v11, %v6269_v11  ;;  %v5775_v27 = vpack.c.bf16 %v6269_v11, %v6269_v11  ;;  %v6271_v49 = vadd.f32 %v4629_v43, %v1863_v13 }
 0x214   : > { %5078 = vst.msk [vmem:[%s8383_s18 + $0x18] sm:$0xf] %vm5071_vm7, %v5777_v46  ;;  %v4876_v16 = vadd.f32 %v4875_v62, %v4874_v1  ;;  %v4777_v56 = vadd.f32 %v4776_v51, %v4775_v10  ;;  %v4844_v6 = vmul.f32 %v6268_v19, %v6268_v19  ;;  %v5778_v24 = vpack.c.bf16 %v6270_v34, %v6270_v34 }
 0x215   : > { %v4877_v2 = vsel %vm676_vm3, %v4842_v5, 0.0  ;;  %5076 = vst.msk [vmem:[%s8383_s18 + $0x10] sm:$0xf] %vm5071_vm7, %v5775_v27  ;;  %v4778_v32 = vsel %vm676_vm3, %v6271_v49, 0.0  ;;  %v4843_v55 = vmul.f32 %v6271_v49, %v6271_v49  ;;  %v5776_v29 = vpack.c.bf16 %v6271_v49, %v6271_v49 }
 0x216   : > { %v4878_v53 = vadd.f32 %v4877_v2, %v4876_v16  ;;  %5079 = vst.msk [vmem:[%s8383_s18 + $0x1c] sm:$0xf] %vm5071_vm7, %v5778_v24  ;;  %v4779_v3 = vadd.f32 %v4778_v32, %v4777_v56  ;;  %v4780_v23 = vsel %vm676_vm3, %v6268_v19, 0.0  ;;  %v4845_v13 = vmul.f32 %v6270_v34, %v6270_v34 }
 0x217   : > { %v6240_v30 = vpop.f32.mrb[8].mxu0  ;;  %v4879_v57 = vsel %vm676_vm3, %v4843_v55, 0.0  ;;  %5077 = vst.msk [vmem:[%s8383_s18 + $0x14] sm:$0xf] %vm5071_vm7, %v5776_v29  ;;  %v4881_v48 = vsel %vm676_vm3, %v4844_v6, 0.0  ;;  %v4782_v47 = vsel %vm676_vm3, %v6270_v34, 0.0 }
 0x218   : > { %v6272_v39 = vadd.f32 %v6240_v30, %v8363_v45  ;;  %v4642_v35 = vpop.f32.mrb[9].mxu0  ;;  %v4781_v42 = vadd.f32 %v4780_v23, %v4779_v3  ;;  %v4880_v54 = vadd.f32 %v4879_v57, %v4878_v53 }
 0x219   : > { %v6273_v26 = vadd.f32 %v4642_v35, %v8365_v28  ;;  %v6241_v4 = vpop.f32.mrb[10].mxu0  ;;  %v4883_v28 = vsel %vm676_vm3, %v4845_v13, 0.0 }
 0x21a   : > { %v4645_v45 = vpop.f32.mrb[11].mxu0  ;;  %v5781_v58 = vpack.c.bf16 %v6272_v39, %v6272_v39  ;;  %v4882_v38 = vadd.f32 %v4881_v48, %v4880_v54  ;;  %v4783_v17 = vadd.f32 %v4782_v47, %v4781_v42  ;;  %v6274_v9 = vadd.f32 %v6241_v4, %v8367_v50 }
 0x21b   : > { %v4784_v61 = vsel %vm676_vm3, %v6273_v26, 0.0  ;;  %v4846_v41 = vmul.f32 %v6273_v26, %v6273_v26  ;;  %v5779_v59 = vpack.c.bf16 %v6273_v26, %v6273_v26  ;;  %v6275_v31 = vadd.f32 %v4645_v45, %v8369_v7 }
 0x21c   : > { %5082 = vst.msk [vmem:[%s8383_s18 + $0x28] sm:$0xf] %vm5071_vm7, %v5781_v58  ;;  %v4848_v8 = vmul.f32 %v6272_v39, %v6272_v39  ;;  %v4785_v44 = vadd.f32 %v4784_v61, %v4783_v17  ;;  %v4884_v33 = vadd.f32 %v4883_v28, %v4882_v38  ;;  %v5782_v40 = vpack.c.bf16 %v6274_v9, %v6274_v9 }
 0x21d   : > { %v4885_v21 = vsel %vm676_vm3, %v4846_v41, 0.0  ;;  %5080 = vst.msk [vmem:[%s8383_s18 + $0x20] sm:$0xf] %vm5071_vm7, %v5779_v59  ;;  %v4786_v63 = vsel %vm676_vm3, %v6275_v31, 0.0  ;;  %v4847_v12 = vmul.f32 %v6275_v31, %v6275_v31  ;;  %v5780_v50 = vpack.c.bf16 %v6275_v31, %v6275_v31 }
 0x21e   : > { %v4886_v20 = vadd.f32 %v4885_v21, %v4884_v33  ;;  %v4787_v25 = vadd.f32 %v4786_v63, %v4785_v44  ;;  %v4788_v60 = vsel %vm676_vm3, %v6272_v39, 0.0  ;;  %v4849_v11 = vmul.f32 %v6274_v9, %v6274_v9  ;;  %5083 = vst.msk [vmem:[%s8383_s18 + $0x2c] sm:$0xf] %vm5071_vm7, %v5782_v40 }
 0x21f   : > { %v6244_v15 = vpop.f32.mrb[12].mxu0  ;;  %v4887_v7 = vsel %vm676_vm3, %v4847_v12, 0.0  ;;  %5081 = vst.msk [vmem:[%s8383_s18 + $0x24] sm:$0xf] %vm5071_vm7, %v5780_v50  ;;  %v4889_v62 = vsel %vm676_vm3, %v4848_v8, 0.0  ;;  %v4790_v1 = vsel %vm676_vm3, %v6274_v9, 0.0 }
 0x220   : > { %v6276_v19 = vadd.f32 %v6244_v15, %v8371_v52  ;;  %v4658_v36 = vpop.f32.mrb[13].mxu0  ;;  %v4789_v52 = vadd.f32 %v4788_v60, %v4787_v25  ;;  %v4888_v46 = vadd.f32 %v4887_v7, %v4886_v20 }
 0x221   : > { %v6277_v14 = vadd.f32 %v4658_v36, %v8373_v22  ;;  %v6245_v37 = vpop.f32.mrb[14].mxu0  ;;  %v4891_v22 = vsel %vm676_vm3, %v4849_v11, 0.0 }
 0x222   : > { %v4661_v43 = vpop.f32.mrb[15].mxu0  ;;  %v5785_v10 = vpack.c.bf16 %v6276_v19, %v6276_v19  ;;  %v4890_v16 = vadd.f32 %v4889_v62, %v4888_v46  ;;  %v4791_v34 = vadd.f32 %v4790_v1, %v4789_v52  ;;  %v6278_v49 = vadd.f32 %v6245_v37, %v8375_v18 }
 0x223   : > { %v4792_v51 = vsel %vm676_vm3, %v6277_v14, 0.0  ;;  %v4850_v5 = vmul.f32 %v6277_v14, %v6277_v14  ;;  %v5783_v27 = vpack.c.bf16 %v6277_v14, %v6277_v14  ;;  %v6279_v2 = vadd.f32 %v4661_v43, %v8377_v0 }
 0x224   : > { %5086 = vst.msk [vmem:[%s8383_s18 + $0x38] sm:$0xf] %vm5071_vm7, %v5785_v10  ;;  %v4852_v6 = vmul.f32 %v6276_v19, %v6276_v19  ;;  %v4793_v53 = vadd.f32 %v4792_v51, %v4791_v34  ;;  %v4892_v24 = vadd.f32 %v4891_v22, %v4890_v16  ;;  %v5786_v32 = vpack.c.bf16 %v6278_v49, %v6278_v49 }
 0x225   : > { %v4893_v56 = vsel %vm676_vm3, %v4850_v5, 0.0  ;;  %5084 = vst.msk [vmem:[%s8383_s18 + $0x30] sm:$0xf] %vm5071_vm7, %v5783_v27  ;;  %v4794_v55 = vsel %vm676_vm3, %v6279_v2, 0.0  ;;  %v4851_v29 = vmul.f32 %v6279_v2, %v6279_v2  ;;  %v5784_v18 = vpack.c.bf16 %v6279_v2, %v6279_v2 }
 0x226   : > { %v4894_v3 = vadd.f32 %v4893_v56, %v4892_v24  ;;  %v4795_v39 = vadd.f32 %v4794_v55, %v4793_v53  ;;  %v4796_v13 = vsel %vm676_vm3, %v6276_v19, 0.0  ;;  %v4853_v57 = vmul.f32 %v6278_v49, %v6278_v49  ;;  %5087 = vst.msk [vmem:[%s8383_s18 + $0x3c] sm:$0xf] %vm5071_vm7, %v5786_v32 }
 0x227   : > { %v6248_v30 = vpop.f32.mrb[16].mxu0  ;;  %v4895_v0 = vsel %vm676_vm3, %v4851_v29, 0.0  ;;  %5085 = vst.msk [vmem:[%s8383_s18 + $0x34] sm:$0xf] %vm5071_vm7, %v5784_v18  ;;  %v4897_v61 = vsel %vm676_vm3, %v4852_v6, 0.0  ;;  %v4798_v41 = vsel %vm676_vm3, %v6278_v49, 0.0 }
 0x228   : > { %v6112_v35 = vpop.f32.mrb[16].mxu1  ;;  %v4674_v23 = vpop.f32.mrb[17].mxu0  ;;  %v4797_v47 = vadd.f32 %v4796_v13, %v4795_v39  ;;  %v4896_v42 = vadd.f32 %v4895_v0, %v4894_v3  ;;  %v4899_v8 = vsel %vm676_vm3, %v4853_v57, 0.0 }
 0x229   : > { %v6280_v26 = vadd.f32 %v6248_v30, %v6112_v35  ;;  %v2637_v4 = vpop.f32.mrb[17].mxu1  ;;  %v6249_v48 = vpop.f32.mrb[18].mxu0 }
 0x22a   : > { %v6281_v54 = vadd.f32 %v4674_v23, %v2637_v4  ;;  %v6113_v45 = vpop.f32.mrb[18].mxu1  ;;  %v4677_v58 = vpop.f32.mrb[19].mxu0  ;;  %v4898_v9 = vadd.f32 %v4897_v61, %v4896_v42  ;;  %v4799_v28 = vadd.f32 %v4798_v41, %v4797_v47 }
 0x22b   : > { %v5789_v59 = vpack.c.bf16 %v6280_v26, %v6280_v26  ;;  %v6282_v38 = vadd.f32 %v6249_v48, %v6113_v45  ;;  %v2640_v17 = vpop.f32.mrb[19].mxu1  ;;  %v4856_v50 = vmul.f32 %v6280_v26, %v6280_v26  ;;  %v4804_v1 = vsel %vm676_vm3, %v6280_v26, 0.0 }
 0x22c   : > { %v4800_v21 = vsel %vm676_vm3, %v6281_v54, 0.0  ;;  %v4854_v31 = vmul.f32 %v6281_v54, %v6281_v54  ;;  %v5787_v44 = vpack.c.bf16 %v6281_v54, %v6281_v54  ;;  %v4900_v40 = vadd.f32 %v4899_v8, %v4898_v9 }
 0x22d   : > { %5090 = vst.msk [vmem:[%s8383_s18 + $0x48] sm:$0xf] %vm5071_vm7, %v5789_v59  ;;  %v4801_v33 = vadd.f32 %v4800_v21, %v4799_v28  ;;  %v5790_v12 = vpack.c.bf16 %v6282_v38, %v6282_v38  ;;  %v6283_v15 = vadd.f32 %v4677_v58, %v2640_v17  ;;  %v4905_v51 = vsel %vm676_vm3, %v4856_v50, 0.0 }
 0x22e   : > { %v4901_v63 = vsel %vm676_vm3, %v4854_v31, 0.0  ;;  %5088 = vst.msk [vmem:[%s8383_s18 + $0x40] sm:$0xf] %vm5071_vm7, %v5787_v44  ;;  %v4857_v5 = vmul.f32 %v6282_v38, %v6282_v38  ;;  %v4806_v49 = vsel %vm676_vm3, %v6282_v38, 0.0 }
 0x22f   : > { %v6252_v20 = vpop.f32.mrb[20].mxu0  ;;  %v4902_v25 = vadd.f32 %v4901_v63, %v4900_v40  ;;  %5091 = vst.msk [vmem:[%s8383_s18 + $0x4c] sm:$0xf] %vm5071_vm7, %v5790_v12  ;;  %v4802_v60 = vsel %vm676_vm3, %v6283_v15, 0.0  ;;  %v4855_v11 = vmul.f32 %v6283_v15, %v6283_v15  ;;  %v5788_v7 = vpack.c.bf16 %v6283_v15, %v6283_v15 }
 0x230   : > { %v6116_v19 = vpop.f32.mrb[20].mxu1  ;;  %v4690_v36 = vpop.f32.mrb[21].mxu0  ;;  %v4803_v52 = vadd.f32 %v4802_v60, %v4801_v33  ;;  %v4907_v18 = vsel %vm676_vm3, %v4857_v5, 0.0 }
 0x231   : > { %v6284_v14 = vadd.f32 %v6252_v20, %v6116_v19  ;;  %v2653_v37 = vpop.f32.mrb[21].mxu1  ;;  %v6253_v62 = vpop.f32.mrb[22].mxu0  ;;  %v4903_v27 = vsel %vm676_vm3, %v4855_v11, 0.0  ;;  %5089 = vst.msk [vmem:[%s8383_s18 + $0x44] sm:$0xf] %vm5071_vm7, %v5788_v7 }
 0x232   : > { %v6285_v46 = vadd.f32 %v4690_v36, %v2653_v37  ;;  %v6117_v43 = vpop.f32.mrb[22].mxu1  ;;  %v4693_v10 = vpop.f32.mrb[23].mxu0  ;;  %v4805_v22 = vadd.f32 %v4804_v1, %v4803_v52  ;;  %v4904_v56 = vadd.f32 %v4903_v27, %v4902_v25 }
 0x233   : > { %v5793_v16 = vpack.c.bf16 %v6284_v14, %v6284_v14  ;;  %v2656_v34 = vpop.f32.mrb[23].mxu1  ;;  %v6286_v24 = vadd.f32 %v6253_v62, %v6117_v43  ;;  %v4860_v48 = vmul.f32 %v6284_v14, %v6284_v14  ;;  %v4812_v17 = vsel %vm676_vm3, %v6284_v14, 0.0 }
 0x234   : > { %v4858_v2 = vmul.f32 %v6285_v46, %v6285_v46  ;;  %v4808_v6 = vsel %vm676_vm3, %v6285_v46, 0.0  ;;  %v5791_v53 = vpack.c.bf16 %v6285_v46, %v6285_v46  ;;  %v6287_v32 = vadd.f32 %v4693_v10, %v2656_v34 }
 0x235   : > { %5094 = vst.msk [vmem:[%s8383_s18 + $0x58] sm:$0xf] %vm5071_vm7, %v5793_v16  ;;  %v4906_v55 = vadd.f32 %v4905_v51, %v4904_v56  ;;  %v4807_v29 = vadd.f32 %v4806_v49, %v4805_v22  ;;  %v5794_v3 = vpack.c.bf16 %v6286_v24, %v6286_v24  ;;  %v4861_v9 = vmul.f32 %v6286_v24, %v6286_v24 }
 0x236   : > { %v4909_v30 = vsel %vm676_vm3, %v4858_v2, 0.0  ;;  %5092 = vst.msk [vmem:[%s8383_s18 + $0x50] sm:$0xf] %vm5071_vm7, %v5791_v53  ;;  %v4810_v39 = vsel %vm676_vm3, %v6287_v32, 0.0  ;;  %v4859_v57 = vmul.f32 %v6287_v32, %v6287_v32  ;;  %v5792_v0 = vpack.c.bf16 %v6287_v32, %v6287_v32 }
 0x237   : > { %v6256_v35 = vpop.f32.mrb[24].mxu0  ;;  %v4809_v23 = vadd.f32 %v4808_v6, %v4807_v29  ;;  %v4908_v13 = vadd.f32 %v4907_v18, %v4906_v55  ;;  %5095 = vst.msk [vmem:[%s8383_s18 + $0x5c] sm:$0xf] %vm5071_vm7, %v5794_v3  ;;  %v4913_v40 = vsel %vm676_vm3, %v4860_v48, 0.0  ;;  %v4814_v63 = vsel %vm676_vm3, %v6286_v24, 0.0 }
 0x238   : > { %v6120_v26 = vpop.f32.mrb[24].mxu1  ;;  %v4706_v4 = vpop.f32.mrb[25].mxu0  ;;  %v4911_v61 = vsel %vm676_vm3, %v4859_v57, 0.0  ;;  %5093 = vst.msk [vmem:[%s8383_s18 + $0x54] sm:$0xf] %vm5071_vm7, %v5792_v0  ;;  %v4915_v19 = vsel %vm676_vm3, %v4861_v9, 0.0 }
 0x239   : > { %v6288_v47 = vadd.f32 %v6256_v35, %v6120_v26  ;;  %v2669_v42 = vpop.f32.mrb[25].mxu1  ;;  %v6257_v54 = vpop.f32.mrb[26].mxu0  ;;  %v4910_v45 = vadd.f32 %v4909_v30, %v4908_v13  ;;  %v4811_v58 = vadd.f32 %v4810_v39, %v4809_v23 }
 0x23a   : > { %v6289_v41 = vadd.f32 %v4706_v4, %v2669_v42  ;;  %v6121_v59 = vpop.f32.mrb[26].mxu1  ;;  %v4709_v38 = vpop.f32.mrb[27].mxu0 }
 0x23b   : > { %v5797_v28 = vpack.c.bf16 %v6288_v47, %v6288_v47  ;;  %v6290_v21 = vadd.f32 %v6257_v54, %v6121_v59  ;;  %v2672_v31 = vpop.f32.mrb[27].mxu1  ;;  %v4813_v8 = vadd.f32 %v4812_v17, %v4811_v58  ;;  %v4912_v44 = vadd.f32 %v4911_v61, %v4910_v45 }
 0x23c   : > { %v4862_v33 = vmul.f32 %v6289_v41, %v6289_v41  ;;  %v4816_v12 = vsel %vm676_vm3, %v6289_v41, 0.0  ;;  %v5795_v50 = vpack.c.bf16 %v6289_v41, %v6289_v41  ;;  %v4864_v36 = vmul.f32 %v6288_v47, %v6288_v47 }
 0x23d   : > { %5098 = vst.msk [vmem:[%s8383_s18 + $0x68] sm:$0xf] %vm5071_vm7, %v5797_v28  ;;  %v4914_v15 = vadd.f32 %v4913_v40, %v4912_v44  ;;  %v4815_v20 = vadd.f32 %v4814_v63, %v4813_v8  ;;  %v5798_v25 = vpack.c.bf16 %v6290_v21, %v6290_v21  ;;  %v6291_v11 = vadd.f32 %v4709_v38, %v2672_v31 }
 0x23e   : > { %v4917_v60 = vsel %vm676_vm3, %v4862_v33, 0.0  ;;  %5096 = vst.msk [vmem:[%s8383_s18 + $0x60] sm:$0xf] %vm5071_vm7, %v5795_v50  ;;  %v4820_v27 = vsel %vm676_vm3, %v6288_v47, 0.0  ;;  %v4921_v2 = vsel %vm676_vm3, %v4864_v36, 0.0  ;;  %v4865_v6 = vmul.f32 %v6290_v21, %v6290_v21 }
 0x23f   : > { %v6260_v7 = vpop.f32.mrb[28].mxu0  ;;  %v4817_v14 = vadd.f32 %v4816_v12, %v4815_v20  ;;  %v4916_v37 = vadd.f32 %v4915_v19, %v4914_v15  ;;  %5099 = vst.msk [vmem:[%s8383_s18 + $0x6c] sm:$0xf] %vm5071_vm7, %v5798_v25  ;;  %v4818_v52 = vsel %vm676_vm3, %v6291_v11, 0.0  ;;  %v4863_v46 = vmul.f32 %v6291_v11, %v6291_v11 }
 0x240   : > { %v6124_v62 = vpop.f32.mrb[28].mxu1  ;;  %v4722_v1 = vpop.f32.mrb[29].mxu0  ;;  %v5796_v43 = vpack.c.bf16 %v6291_v11, %v6291_v11  ;;  %v4822_v55 = vsel %vm676_vm3, %v6290_v21, 0.0  ;;  %v4923_v0 = vsel %vm676_vm3, %v4865_v6, 0.0 }
 0x241   : > { %v6292_v10 = vadd.f32 %v6260_v7, %v6124_v62  ;;  %v2685_v51 = vpop.f32.mrb[29].mxu1  ;;  %v6261_v5 = vpop.f32.mrb[30].mxu0  ;;  %v4918_v16 = vadd.f32 %v4917_v60, %v4916_v37  ;;  %v4819_v34 = vadd.f32 %v4818_v52, %v4817_v14  ;;  %v4919_v53 = vsel %vm676_vm3, %v4863_v46, 0.0 }
 0x242   : > { %v6293_v49 = vadd.f32 %v4722_v1, %v2685_v51  ;;  %v6125_v22 = vpop.f32.mrb[30].mxu1  ;;  %v4725_v56 = vpop.f32.mrb[31].mxu0  ;;  %5097 = vst.msk [vmem:[%s8383_s18 + $0x64] sm:$0xf] %vm5071_vm7, %v5796_v43 }
 0x243   : > { %v5801_v24 = vpack.c.bf16 %v6292_v10, %v6292_v10  ;;  %v2688_v32 = vpop.f32.mrb[31].mxu1  ;;  %v4821_v29 = vadd.f32 %v4820_v27, %v4819_v34  ;;  %v4920_v18 = vadd.f32 %v4919_v53, %v4918_v16  ;;  %v6294_v35 = vadd.f32 %v6261_v5, %v6125_v22 }
 0x244   : > { %v4866_v30 = vmul.f32 %v6293_v49, %v6293_v49  ;;  %v4824_v3 = vsel %vm676_vm3, %v6293_v49, 0.0  ;;  %v5799_v39 = vpack.c.bf16 %v6293_v49, %v6293_v49  ;;  %v6295_v23 = vadd.f32 %v4725_v56, %v2688_v32 }
 0x245   : > { %5102 = vst.msk [vmem:[%s8383_s18 + $0x78] sm:$0xf] %vm5071_vm7, %v5801_v24  ;;  %v4922_v13 = vadd.f32 %v4921_v2, %v4920_v18  ;;  %v4823_v57 = vadd.f32 %v4822_v55, %v4821_v29  ;;  %v5802_v4 = vpack.c.bf16 %v6294_v35, %v6294_v35  ;;  %v4868_v58 = vmul.f32 %v6292_v10, %v6292_v10 }
 0x246   : > { %v4925_v26 = vsel %vm676_vm3, %v4866_v30, 0.0  ;;  %5100 = vst.msk [vmem:[%s8383_s18 + $0x70] sm:$0xf] %vm5071_vm7, %v5799_v39  ;;  %v4826_v48 = vsel %vm676_vm3, %v6295_v23, 0.0  ;;  %v4867_v54 = vmul.f32 %v6295_v23, %v6295_v23  ;;  %v5800_v45 = vpack.c.bf16 %v6295_v23, %v6295_v23 }
 0x247   : > { %v4825_v47 = vadd.f32 %v4824_v3, %v4823_v57  ;;  %v4924_v42 = vadd.f32 %v4923_v0, %v4922_v13  ;;  %5103 = vst.msk [vmem:[%s8383_s18 + $0x7c] sm:$0xf] %vm5071_vm7, %v5802_v4  ;;  %v4828_v38 = vsel %vm676_vm3, %v6292_v10, 0.0  ;;  %v4869_v17 = vmul.f32 %v6294_v35, %v6294_v35 }
 0x248   : > { %v4927_v59 = vsel %vm676_vm3, %v4867_v54, 0.0  ;;  %5101 = vst.msk [vmem:[%s8383_s18 + $0x74] sm:$0xf] %vm5071_vm7, %v5800_v45  ;;  %v4929_v21 = vsel %vm676_vm3, %v4868_v58, 0.0  ;;  %v4830_v31 = vsel %vm676_vm3, %v6294_v35, 0.0 }
 0x249   : > { %v4926_v61 = vadd.f32 %v4925_v26, %v4924_v42  ;;  %v4827_v41 = vadd.f32 %v4826_v48, %v4825_v47  ;;  %v4931_v33 = vsel %vm676_vm3, %v4869_v17, 0.0 }
 0x24b   : > { %v4829_v9 = vadd.f32 %v4828_v38, %v4827_v41  ;;  %v4928_v28 = vadd.f32 %v4927_v59, %v4926_v61 }
 0x24d   : > { %v4831_v8 = vadd.f32 %v4830_v31, %v4829_v9  ;;  %v4930_v44 = vadd.f32 %v4929_v21, %v4928_v28 }
 0x24f   : > { %v4832_v40 = vrot.slane %v4831_v8, 4  ;;  %v4932_v63 = vadd.f32 %v4931_v33, %v4930_v44 }
 0x251   : > { %v4833_v12 = vadd.f32 %v4832_v40, %v4831_v8  ;;  %v4933_v50 = vrot.slane %v4932_v63, 4 }
 0x253   : > { %v4834_v15 = vrot.slane %v4833_v12, 2  ;;  %v4934_v20 = vadd.f32 %v4933_v50, %v4932_v63 }
 0x255   : > { %v4835_v25 = vadd.f32 %v4834_v15, %v4833_v12  ;;  %v4935_v19 = vrot.slane %v4934_v20, 2 }
 0x257   : > { %v4836_v36 = vrot.slane %v4835_v25, 1  ;;  %v4936_v60 = vadd.f32 %v4935_v19, %v4934_v20 }
 0x259   : > { %v4937_v11 = vrot.slane %v4936_v60, 1  ;;  %v4837_v7 = vadd.f32 %v4836_v36, %v4835_v25 }
 0x25b   : > { %v4938_v14 = vadd.f32 %v4937_v11, %v4936_v60 }
 0x25d   : > { %v4940_v37 = vsel %vm4939_vm8, %v4837_v7, %v4938_v14 }
 0x25e   : > { %4942 = vst.msk [vmem:[%s181_s22] sm:$0x3] %vm4941_vm9, %v4940_v37 }
 0x25f PF: > { %s14_s12 = sadd.s32 1, %s6651_s12  }
 0x260   : > { %p11_p4 = scmp.ge.s32.totalorder %s14_s12, 4  }
 0x262   :  { %13 = sbr.rel (!%p11_p4) target bundleno = 1 (0x1), region = 72 }

// kernel: basic_block_forward.4
= control target key start
LH: loop header
LB: loop body
LE: loop exit
PB: predicated region body
PF: predicated region fallthrough
CT: control target
= control target key end

     0   :  { %s7254_s18 = smov 0   ;;  %s9209_s0 = inlined_call_operand.vmem [shape: bf16[2,16,16,16], index: 0, kind: input, shape index: {}]   ;;  %s9210_s1 = inlined_call_operand.vmem [shape: f32[1,16], index: 1, kind: input, shape index: {}]   ;;  %s9211_s2 = inlined_call_operand.vmem [shape: f32[1,16], index: 2, kind: input, shape index: {}]   ;;  %s9212_s3 = inlined_call_operand.vmem [shape: bf16[144,16], index: 3, kind: input, shape index: {}]   ;;  %s9213_s4 = inlined_call_operand.vmem [shape: f32[2,16,16,16], index: 4, kind: output, shape index: {0}]   ;;  %s9214_s5 = inlined_call_operand.vmem [shape: f32[2,2,16], index: 5, kind: output, shape index: {1}]  }
   0x1 LB: > { %s5881_s19 = sadd.s32 4294967295, %s7221_s18   ;;  %p5885_p0 = scmp.ge.s32.totalorder %s7221_s18, 1  ;;  %s7221_s18 = sphi %s7254_s18, %s16_s18  }
   0x2   : > { %p190_p1 = scmp.lt.s32.totalorder %s7221_s18, 3 }
   0x4   : > { %p191_p2 = pnand %p5885_p0, %p190_p1 }
   0x6   : > { %194 = sbr.rel (%p191_p2) target bundleno = 710 (0x2c6), region = 36 }
   0xd   : > { %v7111_v0 = vld [vmem:[%s9212_s3 + $0x8] sm:$0xff]   ;;  %vm411_vm0 = vcmask 125952   ;;  %v7112_v1 = vld [vmem:[%s9212_s3 + $0x20] sm:$0xff]   ;;  %v7223_v2 = vmov 0   ;;  %vm414_vm1 = vcmask 122880   ;;  %p222_p3 = scmp.lt.s32.totalorder %s5881_s19, 1 }
   0xe   : > { %6538 = vmatprep.subr.bf16.mxu1 %v7111_v0  ;;  %412 = vst.msk [vmem:[#allocation2] sm:$0xf] %vm411_vm0, %v7223_v2  ;;  %413 = vst.msk [vmem:[#allocation2 + $0x4] sm:$0xf] %vm411_vm0, %v7223_v2  ;;  %6674 = vmatprep.subr.bf16.mxu0 %v7112_v1  ;;  %vm1054_vm2 = vsmask.f32 3328 }
   0xf   : > { %416 = vst.msk [vmem:[#allocation2 + $0xc] sm:$0xf] %vm411_vm0, %v7223_v2  ;;  %417 = vst.msk [vmem:[#allocation2 + $0x10] sm:$0xf] %vm411_vm0, %v7223_v2  ;;  %6539 = vmatpush3.bf16.msra.mxu1 %v7111_v0  ;;  %6675 = vmatpush3.bf16.msra.mxu0 %v7112_v1  ;;  %s9294_s19 = smov (!%p222_p3, %s5881_s19), 1  ;;  %v7331_v3 = vld [vmem:[%s9212_s3] sm:$0xff]  }
  0x10   : > { %419 = vst.msk [vmem:[#allocation2 + $0x18] sm:$0xf] %vm411_vm0, %v7223_v2  ;;  %420 = vst.msk [vmem:[#allocation2 + $0x1c] sm:$0xf] %vm411_vm0, %v7223_v2  ;;  %vm1055_vm3 = vsmask.f32 7440  ;;  %6572 = vmatprep.subr.bf16.mxu1 %v7331_v3 }
  0x11   : > { %422 = vst.msk [vmem:[#allocation2 + $0x24] sm:$0xf] %vm411_vm0, %v7223_v2  ;;  %423 = vst.msk [vmem:[#allocation2 + $0x28] sm:$0xf] %vm411_vm0, %v7223_v2  ;;  %s6272_s26 = sshll.u32 %s9294_s19, 7  ;;  %v7337_v4 = vld [vmem:[%s9212_s3 + $0x28] sm:$0xff]  }
  0x12   : > { %425 = vst.msk [vmem:[#allocation2 + $0x30] sm:$0xf] %vm411_vm0, %v7223_v2  ;;  %426 = vst.msk [vmem:[#allocation2 + $0x34] sm:$0xf] %vm411_vm0, %v7223_v2  ;;  %s7342_s6 = scalar_lea.vmem %s9209_s0, %s6272_s26  ;;  %v7347_v5 = vld [vmem:[%s9210_s1] ss:$0 sm:$0xff]  ;;  %6708 = vmatprep.subr.bf16.mxu0 %v7337_v4 }
  0x13   : > { %428 = vst.msk [vmem:[#allocation2 + $0x3c] sm:$0xf] %vm411_vm0, %v7223_v2  ;;  %429 = vst.msk [vmem:[#allocation2 + $0x40] sm:$0xf] %vm411_vm0, %v7223_v2  ;;  %v6307_v8 = vld [vmem:[%s7342_s6] sm:$0xff]   ;;  %vm1497_vm4 = vcmask 130048  }
  0x14   : > { %431 = vst.msk [vmem:[#allocation2 + $0x48] sm:$0xf] %vm411_vm0, %v7223_v2  ;;  %432 = vst.msk [vmem:[#allocation2 + $0x4c] sm:$0xf] %vm411_vm0, %v7223_v2  ;;  %v6308_v15 = vunpack.c.l.bf16 %v6307_v8  ;;  %v6309_v16 = vunpack.c.h.bf16 %v6307_v8  ;;  %v7355_v17 = vld [vmem:[%s9211_s2] ss:$0 sm:$0xff] }
  0x15   : > { %434 = vst.msk [vmem:[#allocation2 + $0x54] sm:$0xf] %vm411_vm0, %v7223_v2  ;;  %435 = vst.msk [vmem:[#allocation2 + $0x58] sm:$0xf] %vm411_vm0, %v7223_v2  ;;  %v1004_v6 = vld [vmem:[#allocation2] sm:$0xf] }
  0x16   : > { %437 = vst.msk [vmem:[#allocation2 + $0x60] sm:$0xf] %vm411_vm0, %v7223_v2  ;;  %438 = vst.msk [vmem:[#allocation2 + $0x64] sm:$0xf] %vm411_vm0, %v7223_v2  ;;  %v1005_v7 = vld [vmem:[#allocation2 + $0x4] sm:$0xf]  ;;  %v308_v25 = vmul.f32 %v6308_v15, %v7347_v5  ;;  %v309_v26 = vmul.f32 %v6309_v16, %v7347_v5 }
  0x17   : > { %440 = vst.msk [vmem:[#allocation2 + $0x6c] sm:$0xf] %vm411_vm0, %v7223_v2  ;;  %441 = vst.msk [vmem:[#allocation2 + $0x70] sm:$0xf] %vm411_vm0, %v7223_v2  ;;  %v1058_v10 = vshrl.u32 %v1004_v6, 16  ;;  %v1061_v11 = vshll.u32 %v1004_v6, 16 }
  0x18   : > { %443 = vst.msk [vmem:[#allocation2 + $0x78] sm:$0xf] %vm411_vm0, %v7223_v2  ;;  %444 = vst.msk [vmem:[#allocation2 + $0x7c] sm:$0xf] %vm411_vm0, %v7223_v2  ;;  %v1067_v12 = vshll.u32 %v1005_v7, 16  ;;  %v1071_v13 = vshrl.u32 %v1005_v7, 16  ;;  %v347_v33 = vadd.f32 %v7355_v17, %v308_v25  ;;  %v348_v34 = vadd.f32 %v7355_v17, %v309_v26 }
  0x19   : > { %446 = vst.msk [vmem:[#allocation2 + $0x84] sm:$0xf] %vm411_vm0, %v7223_v2  ;;  %447 = vst.msk [vmem:[#allocation2 + $0x88] sm:$0xf] %vm411_vm0, %v7223_v2  ;;  %vm563_vm5 = vsmask.f32 256 }
  0x1a   : > { %449 = vst.msk [vmem:[#allocation2 + $0x90] sm:$0xf] %vm411_vm0, %v7223_v2  ;;  %450 = vst.msk [vmem:[#allocation2 + $0x94] sm:$0xf] %vm411_vm0, %v7223_v2  ;;  %vm564_vm6 = vsmask.f32 4368 }
  0x1b   : > { %452 = vst.msk [vmem:[#allocation2 + $0x9c] sm:$0xf] %vm411_vm0, %v7223_v2  ;;  %453 = vst.msk [vmem:[#allocation2 + $0xa0] sm:$0xf] %vm411_vm0, %v7223_v2  ;;  %v1060_v18 = vrot.slane %v1058_v10, 4  ;;  %v1063_v19 = vrot.slane %v1061_v11, 5 }
  0x1c   : > { %455 = vst.msk [vmem:[#allocation2 + $0xa8] sm:$0xf] %vm411_vm0, %v7223_v2  ;;  %456 = vst.msk [vmem:[#allocation2 + $0xac] sm:$0xf] %vm411_vm0, %v7223_v2  ;;  %v1069_v20 = vrot.slane %v1067_v12, 5  ;;  %v1073_v21 = vrot.slane %v1071_v13, 4 }
  0x1d   : > { %458 = vst.msk [vmem:[#allocation2 + $0xb4] sm:$0xf] %vm411_vm0, %v7223_v2  ;;  %459 = vst.msk [vmem:[#allocation2 + $0xb8] sm:$0xf] %vm411_vm0, %v7223_v2  ;;  %vm888_vm7 = vsmask.f32 7938  ;;  %v1064_v28 = vor.u32 %v1063_v19, %v1060_v18 }
  0x1e   : > { %461 = vst.msk [vmem:[#allocation2 + $0xc0] sm:$0xf] %vm411_vm0, %v7223_v2  ;;  %462 = vst.msk [vmem:[#allocation2 + $0xc4] sm:$0xf] %vm411_vm0, %v7223_v2  ;;  %v6370_v22 = vld [vmem:[%s7342_s6 + $0x8] sm:$0xff]   ;;  %v6371_v23 = vld [vmem:[%s7342_s6 + $0x10] sm:$0xff]   ;;  %v1074_v29 = vor.u32 %v1073_v21, %v1069_v20 }
  0x1f   : > { %464 = vst.msk [vmem:[#allocation2 + $0xcc] sm:$0xf] %vm411_vm0, %v7223_v2  ;;  %465 = vst.msk [vmem:[#allocation2 + $0xd0] sm:$0xf] %vm411_vm0, %v7223_v2  ;;  %v6312_v27 = vunpack.c.l.bf16 %v6370_v22  ;;  %v6313_v30 = vunpack.c.h.bf16 %v6370_v22  ;;  %v6316_v31 = vunpack.c.l.bf16 %v6371_v23  ;;  %v6317_v36 = vunpack.c.h.bf16 %v6371_v23  ;;  %v6372_v45 = vld [vmem:[%s7342_s6 + $0x18] sm:$0xff]   ;;  %s6273_s14 = sshll.u32 %s9294_s19, 8 }
  0x20   : > { %415 = vst.msk [vmem:[#allocation2 + $0x8] sm:$0x1] %vm414_vm1, %v7223_v2  ;;  %418 = vst.msk [vmem:[#allocation2 + $0x14] sm:$0x1] %vm414_vm1, %v7223_v2  ;;  %v1065_v37 = vrot.slane %v1064_v28, 4  ;;  %v1075_v38 = vrot.slane %v1074_v29, 4  ;;  %v6320_v57 = vunpack.c.l.bf16 %v6372_v45  ;;  %v6321_v11 = vunpack.c.h.bf16 %v6372_v45  ;;  %s9064_s17 = scalar_lea.vmem %s9213_s4, %s6273_s14 }
  0x21   : > { %421 = vst.msk [vmem:[#allocation2 + $0x20] sm:$0x1] %vm414_vm1, %v7223_v2  ;;  %424 = vst.msk [vmem:[#allocation2 + $0x2c] sm:$0x1] %vm414_vm1, %v7223_v2  ;;  %v310_v35 = vmul.f32 %v6312_v27, %v7347_v5  ;;  %v311_v39 = vmul.f32 %v6313_v30, %v7347_v5  ;;  %v312_v40 = vmul.f32 %v6316_v31, %v7347_v5  ;;  %v379_v41 = vmax.f32 %v347_v33, 0.0  ;;  %s5890_s20 = sshll.u32 %s9294_s19, 1 }
  0x22   : > { %427 = vst.msk [vmem:[#allocation2 + $0x38] sm:$0x1] %vm414_vm1, %v7223_v2  ;;  %430 = vst.msk [vmem:[#allocation2 + $0x44] sm:$0x1] %vm414_vm1, %v7223_v2  ;;  %v380_v42 = vmax.f32 %v348_v34, 0.0  ;;  %v313_v44 = vmul.f32 %v6317_v36, %v7347_v5  ;;  %v314_v12 = vmul.f32 %v6320_v57, %v7347_v5  ;;  %vm2050_vm12 = vcmask 1042432   ;;  %s235_s23 = scalar_lea.vmem %s9214_s5, %s5890_s20 }
  0x23   : > { %433 = vst.msk [vmem:[#allocation2 + $0x50] sm:$0x1] %vm414_vm1, %v7223_v2  ;;  %436 = vst.msk [vmem:[#allocation2 + $0x5c] sm:$0x1] %vm414_vm1, %v7223_v2  ;;  %v349_v43 = vadd.f32 %v7355_v17, %v310_v35  ;;  %v350_v48 = vadd.f32 %v7355_v17, %v311_v39  ;;  %v351_v49 = vadd.f32 %v7355_v17, %v312_v40  ;;  %v890_v63 = vld [vmem:[#allocation2 + $0xc] sm:$0xf] }
  0x24   : > { %439 = vst.msk [vmem:[#allocation2 + $0x68] sm:$0x1] %vm414_vm1, %v7223_v2  ;;  %442 = vst.msk [vmem:[#allocation2 + $0x74] sm:$0x1] %vm414_vm1, %v7223_v2  ;;  %v6274_v51 = vpack.c.bf16 %v379_v41, %v379_v41  ;;  %v6275_v52 = vpack.c.bf16 %v380_v42, %v380_v42  ;;  %v352_v55 = vadd.f32 %v7355_v17, %v313_v44  ;;  %v899_v23 = vld [vmem:[#allocation2 + $0x18] sm:$0xf] }
  0x25   : > { %445 = vst.msk [vmem:[#allocation2 + $0x80] sm:$0x1] %vm414_vm1, %v7223_v2  ;;  %448 = vst.msk [vmem:[#allocation2 + $0x8c] sm:$0x1] %vm414_vm1, %v7223_v2  ;;  %v381_v53 = vmax.f32 %v349_v43, 0.0  ;;  %v382_v54 = vmax.f32 %v350_v48, 0.0  ;;  %v315_v41 = vmul.f32 %v6321_v11, %v7347_v5  ;;  %v353_v48 = vadd.f32 %v7355_v17, %v314_v12 }
  0x26   : > { %451 = vst.msk [vmem:[#allocation2 + $0x98] sm:$0x1] %vm414_vm1, %v7223_v2  ;;  %454 = vst.msk [vmem:[#allocation2 + $0xa4] sm:$0x1] %vm414_vm1, %v7223_v2  ;;  %v383_v56 = vmax.f32 %v351_v49, 0.0  ;;  %v567_v58 = vshrl.u32 %v6274_v51, 16 }
  0x27   : > { %457 = vst.msk [vmem:[#allocation2 + $0xb0] sm:$0x1] %vm414_vm1, %v7223_v2  ;;  %460 = vst.msk [vmem:[#allocation2 + $0xbc] sm:$0x1] %vm414_vm1, %v7223_v2  ;;  %v1038_v9 = vld [vmem:[#allocation2 + $0x8] sm:$0x1]  ;;  %v6276_v1 = vpack.c.bf16 %v381_v53, %v381_v53 }
  0x28   : > { %463 = vst.msk [vmem:[#allocation2 + $0xc8] sm:$0x1] %vm414_vm1, %v7223_v2  ;;  %466 = vst.msk [vmem:[#allocation2 + $0xd4] sm:$0x1] %vm414_vm1, %v7223_v2  ;;  %v1077_v14 = vshll.u32 %v1038_v9, 16  ;;  %v570_v59 = vshll.u32 %v6274_v51, 16  ;;  %v6277_v2 = vpack.c.bf16 %v382_v54, %v382_v54  ;;  %v6278_v7 = vpack.c.bf16 %v383_v56, %v383_v56 }
  0x29   : > { %vm7363_vm8 = vmor %vm1054_vm2, %vm1055_vm3  ;;  %v575_v60 = vshrl.u32 %v6275_v52, 16  ;;  %v578_v61 = vshll.u32 %v6275_v52, 16  ;;  %v896_v0 = vld [vmem:[#allocation2 + $0x14] sm:$0x1]  ;;  %v384_v6 = vmax.f32 %v352_v55, 0.0  ;;  %v569_v8 = vrot.slane %v567_v58, 7 }
  0x2a   : > { %v1079_v24 = vrot.slane %v1077_v14, 5  ;;  %v1070_v46 = vsel %vm7363_vm8, %v1065_v37, %v1069_v20  ;;  %vm7385_vm9 = vmor %vm563_vm5, %vm564_vm6  ;;  %v584_v14 = vshrl.u32 %v6276_v1, 16  ;;  %v587_v15 = vshll.u32 %v6276_v1, 16  ;;  %v903_v26 = vld [vmem:[#allocation2 + $0x20] sm:$0x1]  ;;  %v7412_v43 = vld [vmem:[%s7342_s6 + $0x28] sm:$0xff]  }
  0x2b   : > { %v577_v9 = vrot.slane %v575_v60, 7  ;;  %vm7391_vm10 = vmand %vm411_vm0, %vm888_vm7  ;;  %v592_v16 = vshrl.u32 %v6277_v2, 16  ;;  %v595_v18 = vshll.u32 %v6277_v2, 16  ;;  %v572_v19 = vor.u32 %v570_v59, %v569_v8  ;;  %v6373_v42 = vld [vmem:[%s7342_s6 + $0x20] sm:$0xff]   ;;  %v910_v53 = vld [vmem:[#allocation2 + $0x2c] sm:$0x1] }
  0x2c   : > { %v1080_v47 = vsel %vm7363_vm8, %v1075_v38, %v1079_v24  ;;  %vm7398_vm11 = vmand %vm414_vm1, %vm563_vm5  ;;  %v573_v20 = vrot.slane %v569_v8, 4  ;;  %v586_v24 = vrot.slane %v584_v14, 7  ;;  %v6279_v27 = vpack.c.bf16 %v384_v6, %v384_v6 }
  0x2d   : > { %v5925_v50 = vcombine.low %v1070_v46, %v1080_v47  ;;  %v580_v21 = vor.u32 %v578_v61, %v577_v9  ;;  %v582_v22 = vrot.slane %v577_v9, 4  ;;  %v594_v25 = vrot.slane %v592_v16, 7  ;;  %v906_v47 = vld [vmem:[#allocation2 + $0x24] sm:$0xf] }
  0x2e   : > { %v601_v28 = vshrl.u32 %v6278_v7, 16  ;;  %v891_v30 = vsel %vm7391_vm10, %v572_v19, %v890_v63  ;;  %v604_v33 = vshll.u32 %v6278_v7, 16  ;;  %v589_v34 = vor.u32 %v587_v15, %v586_v24 }
  0x2f   : > { %6540 = vmatprep.mubr.msk.bf16.mxu1 %vm1497_vm4, %v5925_v50  ;;  %v581_v29 = vsel %vm7385_vm9, %v573_v20, %v580_v21  ;;  %v897_v31 = vsel %vm7398_vm11, %v582_v22, %v896_v0  ;;  %892 = vst [vmem:[#allocation2 + $0xc] sm:$0xf] %v891_v30  ;;  %v590_v35 = vrot.slane %v586_v24, 4  ;;  %v597_v36 = vor.u32 %v595_v18, %v594_v25 }
  0x30   : > { %893 = vst.msk [vmem:[#allocation2 + $0x10] sm:$0xf] %vm411_vm0, %v581_v29  ;;  %898 = vst [vmem:[#allocation2 + $0x14] sm:$0x1] %v897_v31  ;;  %v599_v37 = vrot.slane %v594_v25, 4  ;;  %v603_v38 = vrot.slane %v601_v28, 7  ;;  %v900_v45 = vsel %vm7391_vm10, %v589_v34, %v899_v23  ;;  %v354_v52 = vadd.f32 %v7355_v17, %v315_v41 }
  0x31   : > { %v609_v39 = vshrl.u32 %v6279_v27, 16  ;;  %v612_v40 = vshll.u32 %v6279_v27, 16  ;;  %v598_v44 = vsel %vm7385_vm9, %v590_v35, %v597_v36  ;;  %901 = vst [vmem:[#allocation2 + $0x18] sm:$0xf] %v900_v45  ;;  %v385_v54 = vmax.f32 %v353_v48, 0.0 }
  0x32   : > { %v904_v46 = vsel %vm7398_vm11, %v599_v37, %v903_v26  ;;  %902 = vst.msk [vmem:[#allocation2 + $0x1c] sm:$0xf] %vm411_vm0, %v598_v44  ;;  %v606_v49 = vor.u32 %v604_v33, %v603_v38  ;;  %v607_v50 = vrot.slane %v603_v38, 4  ;;  %v6324_v55 = vunpack.c.l.bf16 %v6373_v42 }
  0x33   : > { %905 = vst [vmem:[#allocation2 + $0x20] sm:$0x1] %v904_v46  ;;  %v611_v51 = vrot.slane %v609_v39, 7  ;;  %v6325_v56 = vunpack.c.h.bf16 %v6373_v42  ;;  %v6328_v57 = vunpack.c.l.bf16 %v7412_v43  ;;  %v386_v61 = vmax.f32 %v354_v52, 0.0 }
  0x34   : > { %v907_v60 = vsel %vm7391_vm10, %v606_v49, %v906_v47  ;;  %v7426_v63 = vpack.c.bf16 %v385_v54, %v385_v54  ;;  %v7429_v0 = vmul.f32 %v6324_v55, %v7347_v5  ;;  %v6329_v11 = vunpack.c.h.bf16 %v7412_v43  ;;  %v6375_v43 = vld [vmem:[%s7342_s6 + $0x30] sm:$0xff]  }
  0x35   : > { %v614_v58 = vor.u32 %v612_v40, %v611_v51  ;;  %v616_v59 = vrot.slane %v611_v51, 4  ;;  %908 = vst [vmem:[#allocation2 + $0x24] sm:$0xf] %v907_v60  ;;  %v7436_v9 = vmul.f32 %v6325_v56, %v7347_v5  ;;  %v7442_v22 = vpack.c.bf16 %v386_v61, %v386_v61 }
  0x36   : > { %v1006_v1 = vld [vmem:[#allocation2 + $0xc] sm:$0xf]  ;;  %v7445_v23 = vmul.f32 %v6328_v57, %v7347_v5  ;;  %vm2051_vm13 = vcmask 1046532   ;;  %vm5759_vm15 = vcmask 1040384  }
  0x37   : > { %v1007_v2 = vld [vmem:[#allocation2 + $0x10] sm:$0xf]  ;;  %v1039_v6 = vld [vmem:[#allocation2 + $0x14] sm:$0x1]  ;;  %v615_v7 = vsel %vm7385_vm9, %v607_v50, %v614_v58  ;;  %v911_v8 = vsel %vm7398_vm11, %v616_v59, %v910_v53  ;;  %v1082_v12 = vshrl.u32 %v1006_v1, 16  ;;  %v1085_v14 = vshll.u32 %v1006_v1, 16  ;;  %vm7661_vm14 = vmor %vm2050_vm12, %vm2051_vm13 }
  0x38   : > { %v1091_v15 = vshll.u32 %v1007_v2, 16  ;;  %v1095_v16 = vshrl.u32 %v1007_v2, 16  ;;  %v2823_v18 = vld [vmem:[#allocation2 + $0xc] sm:$0xf]  ;;  %909 = vst.msk [vmem:[#allocation2 + $0x28] sm:$0xf] %vm411_vm0, %v615_v7 }
  0x39   : > { %912 = vst [vmem:[#allocation2 + $0x2c] sm:$0x1] %v911_v8  ;;  %v1101_v19 = vshll.u32 %v1039_v6, 16  ;;  %v7440_v20 = vld [vmem:[#allocation2 + $0x10] sm:$0xf]  ;;  %v2872_v21 = vshrl.u32 %v2823_v18, 16 }
  0x3a   : > { %v1084_v24 = vrot.slane %v1082_v12, 4  ;;  %v1087_v25 = vrot.slane %v1085_v14, 5  ;;  %v1093_v26 = vrot.slane %v1091_v15, 5  ;;  %v1097_v27 = vrot.slane %v1095_v16, 4  ;;  %v7447_v28 = vld [vmem:[#allocation2 + $0x14] sm:$0x1] }
  0x3b   : > { %v1103_v29 = vrot.slane %v1101_v19, 5  ;;  %v2874_v30 = vrot.slane %v2872_v21, 4  ;;  %v2875_v31 = vshll.u32 %v2823_v18, 16  ;;  %v2881_v33 = vshll.u32 %v7440_v20, 16  ;;  %v2826_v38 = vld [vmem:[#allocation2 + $0x18] sm:$0xf] }
  0x3c   : > { %v1088_v34 = vor.u32 %v1087_v25, %v1084_v24  ;;  %v1098_v35 = vor.u32 %v1097_v27, %v1093_v26  ;;  %v2885_v36 = vshrl.u32 %v7440_v20, 16  ;;  %v2891_v37 = vshll.u32 %v7447_v28, 16  ;;  %v7452_v39 = vld [vmem:[#allocation2 + $0x1c] sm:$0xf]  ;;  %v7456_v50 = vld [vmem:[#allocation2 + $0x20] sm:$0x1] }
  0x3d   : > { %v2877_v40 = vrot.slane %v2875_v31, 5  ;;  %v2883_v41 = vrot.slane %v2881_v33, 5  ;;  %v3618_v42 = vrot.slane %v7440_v20, 5  ;;  %v3621_v44 = vrot.slane %v7447_v28, 5  ;;  %v1008_v1 = vld [vmem:[#allocation2 + $0x18] sm:$0xf] }
  0x3e   : > { %v1089_v45 = vrot.slane %v1088_v34, 4  ;;  %v1099_v46 = vrot.slane %v1098_v35, 4  ;;  %v2887_v47 = vrot.slane %v2885_v36, 4  ;;  %v2893_v48 = vrot.slane %v2891_v37, 5  ;;  %v1009_v18 = vld [vmem:[#allocation2 + $0x1c] sm:$0xf] }
  0x3f   : > { %v2878_v49 = vor.u32 %v2877_v40, %v2874_v30  ;;  %v2896_v51 = vshrl.u32 %v2826_v38, 16  ;;  %v2899_v52 = vshll.u32 %v2826_v38, 16  ;;  %v2905_v53 = vshll.u32 %v7452_v39, 16  ;;  %v1040_v25 = vld [vmem:[#allocation2 + $0x20] sm:$0x1] }
  0x40   : > { %v1094_v54 = vsel %vm7363_vm8, %v1089_v45, %v1093_v26  ;;  %v1104_v55 = vsel %vm7363_vm8, %v1099_v46, %v1103_v29  ;;  %v2888_v56 = vor.u32 %v2887_v47, %v2883_v41  ;;  %v2909_v57 = vshrl.u32 %v7452_v39, 16  ;;  %v1010_v27 = vld [vmem:[#allocation2 + $0x24] sm:$0xf]  ;;  %v1011_v34 = vld [vmem:[#allocation2 + $0x28] sm:$0xf] }
  0x41   : > { %v5926_v58 = vcombine.low %v1094_v54, %v1104_v55  ;;  %v2879_v59 = vrot.slane %v2878_v49, 4  ;;  %v2898_v60 = vrot.slane %v2896_v51, 4  ;;  %v2901_v61 = vrot.slane %v2899_v52, 5  ;;  %v1041_v40 = vld [vmem:[#allocation2 + $0x2c] sm:$0x1] }
  0x42   : > { %v2889_v2 = vrot.slane %v2888_v56, 4  ;;  %v2907_v6 = vrot.slane %v2905_v53, 5  ;;  %v2911_v7 = vrot.slane %v2909_v57, 4  ;;  %v2915_v8 = vshll.u32 %v7456_v50, 16  ;;  %v2829_v47 = vld [vmem:[#allocation2 + $0x24] sm:$0xf] }
  0x43   : > { %6541 = vmatmul.mubr.msk.bf16.vlgmr.msra.gmra.mrb[0].mxu1 %vm1497_vm4, %v5926_v58  ;;  %v2884_v12 = vsel %vm7363_vm8, %v2879_v59, %v2883_v41  ;;  %v2902_v14 = vor.u32 %v2901_v61, %v2898_v60  ;;  %v3625_v15 = vrot.slane %v7452_v39, 5  ;;  %v3628_v16 = vrot.slane %v7456_v50, 5  ;;  %v7115_v53 = vld [vmem:[%s9212_s3 + $0x30] sm:$0xff]   ;;  %v7485_v58 = vld [vmem:[#allocation2 + $0x28] sm:$0xf] }
  0x44   : > { %v2894_v19 = vsel %vm7363_vm8, %v2889_v2, %v2893_v48  ;;  %6573 = vmatpush3.bf16.msra.mxu1 %v7331_v3  ;;  %v2912_v21 = vor.u32 %v2911_v7, %v2907_v6  ;;  %v2917_v24 = vrot.slane %v2915_v8, 5  ;;  %v1106_v26 = vshrl.u32 %v1008_v1, 16  ;;  %v7488_v7 = vld [vmem:[#allocation2 + $0x2c] sm:$0x1] }
  0x45   : > { %v6073_v29 = vcombine.low %v2884_v12, %v2894_v19  ;;  %v2903_v30 = vrot.slane %v2902_v14, 4  ;;  %v7475_v31 = vrot.slane %v3625_v15, 4  ;;  %v1109_v33 = vshll.u32 %v1008_v1, 16 }
  0x46   : > { %v2913_v35 = vrot.slane %v2912_v21, 4  ;;  %v1108_v36 = vrot.slane %v1106_v26, 4  ;;  %v1115_v37 = vshll.u32 %v1009_v18, 16  ;;  %v1119_v38 = vshrl.u32 %v1009_v18, 16 }
  0x47   : > { %6676 = vmatprep.mubr.msk.bf16.mxu0 %vm1497_vm4, %v6073_v29  ;;  %v2908_v3 = vsel %vm7363_vm8, %v2903_v30, %v2907_v6  ;;  %v1111_v41 = vrot.slane %v1109_v33, 5  ;;  %v1125_v45 = vshll.u32 %v1040_v25, 16  ;;  %v1130_v46 = vshrl.u32 %v1010_v27, 16 }
  0x48   : > { %v2918_v48 = vsel %vm7363_vm8, %v2913_v35, %v2917_v24  ;;  %v1117_v49 = vrot.slane %v1115_v37, 5  ;;  %v1121_v51 = vrot.slane %v1119_v38, 4  ;;  %v1133_v52 = vshll.u32 %v1010_v27, 16 }
  0x49   : > { %v6074_v54 = vcombine.low %v2908_v3, %v2918_v48  ;;  %v1112_v55 = vor.u32 %v1111_v41, %v1108_v36  ;;  %v1127_v56 = vrot.slane %v1125_v45, 5  ;;  %v1132_v57 = vrot.slane %v1130_v46, 4 }
  0x4a   : > { %v1122_v59 = vor.u32 %v1121_v51, %v1117_v49  ;;  %v1135_v60 = vrot.slane %v1133_v52, 5  ;;  %v1139_v61 = vshll.u32 %v1011_v34, 16  ;;  %v1143_v1 = vshrl.u32 %v1011_v34, 16 }
  0x4b   : > { %6677 = vmatmul.mubr.msk.bf16.vlgmr.msra.gmra.mrb[0].mxu0 %vm1497_vm4, %v6074_v54  ;;  %v1113_v2 = vrot.slane %v1112_v55, 4  ;;  %v1149_v6 = vshll.u32 %v1041_v40, 16  ;;  %v2920_v8 = vshrl.u32 %v2829_v47, 16  ;;  %v2923_v12 = vshll.u32 %v2829_v47, 16 }
  0x4c   : > { %6709 = vmatpush3.bf16.msra.mxu0 %v7337_v4  ;;  %v1123_v14 = vrot.slane %v1122_v59, 4  ;;  %v1136_v18 = vor.u32 %v1135_v60, %v1132_v57  ;;  %v1141_v19 = vrot.slane %v1139_v61, 5  ;;  %v1145_v21 = vrot.slane %v1143_v1, 4  ;;  %v913_v57 = vld [vmem:[#allocation2 + $0x30] sm:$0xf] }
  0x4d   : > { %v1118_v24 = vsel %vm7363_vm8, %v1113_v2, %v1117_v49  ;;  %v1151_v25 = vrot.slane %v1149_v6, 5  ;;  %v2922_v26 = vrot.slane %v2920_v8, 4  ;;  %v2925_v27 = vrot.slane %v2923_v12, 5  ;;  %6742 = vmatprep.subr.bf16.mxu0 %v7115_v53 }
  0x4e   : > { %v1128_v29 = vsel %vm7363_vm8, %v1123_v14, %v1127_v56  ;;  %v1137_v30 = vrot.slane %v1136_v18, 4  ;;  %v1146_v33 = vor.u32 %v1145_v21, %v1141_v19  ;;  %v2929_v34 = vshll.u32 %v7485_v58, 16 }
  0x4f   : > { %v5927_v35 = vcombine.low %v1118_v24, %v1128_v29  ;;  %v2926_v4 = vor.u32 %v2925_v27, %v2922_v26  ;;  %v2933_v36 = vshrl.u32 %v7485_v58, 16  ;;  %v2939_v37 = vshll.u32 %v7488_v7, 16 }
  0x50   : > { %v1142_v38 = vsel %vm7363_vm8, %v1137_v30, %v1141_v19  ;;  %v1147_v40 = vrot.slane %v1146_v33, 4  ;;  %v2931_v3 = vrot.slane %v2929_v34, 5  ;;  %v618_v41 = vshrl.u32 %v7426_v63, 16 }
  0x51   : > { %6544 = vmatprep.mubr.msk.bf16.mxu1 %vm1497_vm4, %v5927_v35  ;;  %v2927_v45 = vrot.slane %v2926_v4, 4  ;;  %v2935_v46 = vrot.slane %v2933_v36, 4  ;;  %v2941_v47 = vrot.slane %v2939_v37, 5  ;;  %v621_v48 = vshll.u32 %v7426_v63, 16  ;;  %v7531_v35 = vld [vmem:[%s7342_s6 + $0x38] sm:$0xff]  }
  0x52   : > { %v1152_v49 = vsel %vm7363_vm8, %v1147_v40, %v1151_v25  ;;  %v620_v51 = vrot.slane %v618_v41, 7  ;;  %v626_v52 = vshrl.u32 %v7442_v22, 16  ;;  %v629_v53 = vshll.u32 %v7442_v22, 16  ;;  %v917_v22 = vld [vmem:[#allocation2 + $0x38] sm:$0x1] }
  0x53   : > { %v5928_v54 = vcombine.low %v1142_v38, %v1152_v49  ;;  %v2932_v55 = vsel %vm7363_vm8, %v2927_v45, %v2931_v3  ;;  %v2936_v56 = vor.u32 %v2935_v46, %v2931_v3  ;;  %v355_v59 = vadd.f32 %v7355_v17, %v7429_v0 }
  0x54   : > { %v623_v60 = vor.u32 %v621_v48, %v620_v51  ;;  %v624_v61 = vrot.slane %v620_v51, 4  ;;  %v628_v63 = vrot.slane %v626_v52, 7  ;;  %v356_v1 = vadd.f32 %v7355_v17, %v7436_v9 }
  0x55   : > { %6545 = vmatmul.mubr.msk.bf16.gmra.mrb[4].mxu1 %vm1497_vm4, %v5928_v54  ;;  %v2937_v2 = vrot.slane %v2936_v56, 4  ;;  %v387_v6 = vmax.f32 %v355_v59, 0.0  ;;  %v319_v8 = vmul.f32 %v6329_v11, %v7347_v5  ;;  %v357_v12 = vadd.f32 %v7355_v17, %v7445_v23  ;;  %v924_v54 = vld [vmem:[#allocation2 + $0x44] sm:$0x1] }
  0x56   : > { %v631_v0 = vor.u32 %v629_v53, %v628_v63  ;;  %v633_v14 = vrot.slane %v628_v63, 4  ;;  %v914_v18 = vsel %vm7391_vm10, %v623_v60, %v913_v57  ;;  %v388_v19 = vmax.f32 %v356_v1, 0.0 }
  0x57   : > { %v2942_v9 = vsel %vm7363_vm8, %v2937_v2, %v2941_v47  ;;  %915 = vst [vmem:[#allocation2 + $0x30] sm:$0xf] %v914_v18  ;;  %v6282_v21 = vpack.c.bf16 %v387_v6, %v387_v6  ;;  %v358_v24 = vadd.f32 %v7355_v17, %v319_v8  ;;  %v389_v25 = vmax.f32 %v357_v12, 0.0  ;;  %v920_v47 = vld [vmem:[#allocation2 + $0x3c] sm:$0xf] }
  0x58   : > { %v6075_v11 = vcombine.low %v2932_v55, %v2942_v9  ;;  %v632_v23 = vsel %vm7385_vm9, %v624_v61, %v631_v0  ;;  %v918_v26 = vsel %vm7398_vm11, %v633_v14, %v917_v22  ;;  %v6283_v27 = vpack.c.bf16 %v388_v19, %v388_v19 }
  0x59   : > { %916 = vst.msk [vmem:[#allocation2 + $0x34] sm:$0xf] %vm411_vm0, %v632_v23  ;;  %919 = vst [vmem:[#allocation2 + $0x38] sm:$0x1] %v918_v26  ;;  %v635_v29 = vshrl.u32 %v6282_v21, 16  ;;  %v638_v30 = vshll.u32 %v6282_v21, 16  ;;  %v6284_v34 = vpack.c.bf16 %v389_v25, %v389_v25  ;;  %v6332_v37 = vunpack.c.l.bf16 %v6375_v43 }
  0x5a   : > { %v390_v33 = vmax.f32 %v358_v24, 0.0  ;;  %6680 = vmatprep.mubr.msk.bf16.mxu0 %vm1497_vm4, %v6075_v11  ;;  %v643_v4 = vshrl.u32 %v6283_v27, 16  ;;  %v646_v36 = vshll.u32 %v6283_v27, 16  ;;  %v6333_v38 = vunpack.c.h.bf16 %v6375_v43 }
  0x5b   : > { %v637_v40 = vrot.slane %v635_v29, 7  ;;  %v652_v41 = vshrl.u32 %v6284_v34, 16  ;;  %v655_v45 = vshll.u32 %v6284_v34, 16  ;;  %v320_v48 = vmul.f32 %v6332_v37, %v7347_v5  ;;  %v927_v37 = vld [vmem:[#allocation2 + $0x48] sm:$0xf] }
  0x5c   : > { %v7534_v3 = vpack.c.bf16 %v390_v33, %v390_v33  ;;  %v645_v46 = vrot.slane %v643_v4, 7  ;;  %v321_v49 = vmul.f32 %v6333_v38, %v7347_v5  ;;  %v6336_v51 = vunpack.c.l.bf16 %v7531_v35 }
  0x5d   : > { %v640_v52 = vor.u32 %v638_v30, %v637_v40  ;;  %v641_v53 = vrot.slane %v637_v40, 4  ;;  %v7539_v55 = vrot.slane %v652_v41, 7  ;;  %v7544_v1 = vadd.f32 %v7355_v17, %v320_v48 }
  0x5e   : > { %v660_v56 = vshrl.u32 %v7534_v3, 16  ;;  %v2832_v57 = vld [vmem:[#allocation2 + $0x30] sm:$0xf]  ;;  %v648_v60 = vor.u32 %v646_v36, %v645_v46  ;;  %v650_v61 = vrot.slane %v645_v46, 4  ;;  %v663_v63 = vshll.u32 %v7534_v3, 16 }
  0x5f   : > { %v1012_v59 = vld [vmem:[#allocation2 + $0x30] sm:$0xf]  ;;  %v2944_v2 = vshrl.u32 %v2832_v57, 16  ;;  %v2947_v22 = vshll.u32 %v2832_v57, 16  ;;  %v921_v19 = vsel %vm7391_vm10, %v640_v52, %v920_v47  ;;  %v657_v21 = vor.u32 %v655_v45, %v7539_v55 }
  0x60   : > { %v1154_v6 = vshrl.u32 %v1012_v59, 16  ;;  %v1157_v8 = vshll.u32 %v1012_v59, 16  ;;  %v7546_v12 = vld [vmem:[#allocation2 + $0x34] sm:$0xf]  ;;  %v7548_v0 = vld [vmem:[#allocation2 + $0x38] sm:$0x1]  ;;  %v649_v18 = vsel %vm7385_vm9, %v641_v53, %v648_v60  ;;  %v925_v9 = vsel %vm7398_vm11, %v650_v61, %v924_v54 }
  0x61   : > { %v1013_v14 = vld [vmem:[#allocation2 + $0x34] sm:$0xf]  ;;  %v2946_v24 = vrot.slane %v2944_v2, 4  ;;  %v2949_v25 = vrot.slane %v2947_v22, 5  ;;  %v2953_v43 = vshll.u32 %v7546_v12, 16  ;;  %v2957_v11 = vshrl.u32 %v7546_v12, 16 }
  0x62   : > { %v1042_v23 = vld [vmem:[#allocation2 + $0x38] sm:$0x1]  ;;  %922 = vst [vmem:[#allocation2 + $0x3c] sm:$0xf] %v921_v19  ;;  %923 = vst.msk [vmem:[#allocation2 + $0x40] sm:$0xf] %vm411_vm0, %v649_v18  ;;  %v928_v57 = vsel %vm7391_vm10, %v657_v21, %v927_v37  ;;  %v7567_v2 = vadd.f32 %v7355_v17, %v321_v49  ;;  %v7575_v18 = vmul.f32 %v6336_v51, %v7347_v5 }
  0x63   : > { %926 = vst [vmem:[#allocation2 + $0x44] sm:$0x1] %v925_v9  ;;  %v2963_v26 = vshll.u32 %v7548_v0, 16  ;;  %v1156_v27 = vrot.slane %v1154_v6, 4  ;;  %v1159_v29 = vrot.slane %v1157_v8, 5  ;;  %v1163_v30 = vshll.u32 %v1013_v14, 16 }
  0x64   : > { %v2950_v33 = vor.u32 %v2949_v25, %v2946_v24  ;;  %v2955_v34 = vrot.slane %v2953_v43, 5  ;;  %v2959_v4 = vrot.slane %v2957_v11, 4  ;;  %v1167_v36 = vshrl.u32 %v1013_v14, 16  ;;  %929 = vst [vmem:[#allocation2 + $0x48] sm:$0xf] %v928_v57 }
  0x65   : > { %v2965_v38 = vrot.slane %v2963_v26, 5  ;;  %v1160_v40 = vor.u32 %v1159_v29, %v1156_v27  ;;  %v1165_v3 = vrot.slane %v1163_v30, 5  ;;  %v1173_v41 = vshll.u32 %v1042_v23, 16 }
  0x66   : > { %v2951_v45 = vrot.slane %v2950_v33, 4  ;;  %v2960_v46 = vor.u32 %v2959_v4, %v2955_v34  ;;  %v1169_v47 = vrot.slane %v1167_v36, 4  ;;  %v658_v48 = vrot.slane %v7539_v55, 4 }
  0x67   : > { %v1161_v52 = vrot.slane %v1160_v40, 4  ;;  %v1175_v53 = vrot.slane %v1173_v41, 5  ;;  %v662_v54 = vrot.slane %v660_v56, 7  ;;  %v6337_v56 = vunpack.c.h.bf16 %v7531_v35 }
  0x68   : > { %v2956_v59 = vsel %vm7363_vm8, %v2951_v45, %v2955_v34  ;;  %v2961_v60 = vrot.slane %v2960_v46, 4  ;;  %v1170_v61 = vor.u32 %v1169_v47, %v1165_v3 }
  0x69   : > { %v1166_v22 = vsel %vm7363_vm8, %v1161_v52, %v1165_v3  ;;  %v1014_v6 = vld [vmem:[#allocation2 + $0x3c] sm:$0xf]  ;;  %v1015_v55 = vld [vmem:[#allocation2 + $0x40] sm:$0xf]  ;;  %v665_v14 = vor.u32 %v663_v63, %v662_v54  ;;  %v931_v52 = vld [vmem:[#allocation2 + $0x50] sm:$0x1] }
  0x6a   : > { %v1043_v8 = vld [vmem:[#allocation2 + $0x44] sm:$0x1]  ;;  %v2966_v19 = vsel %vm7363_vm8, %v2961_v60, %v2965_v38  ;;  %v1171_v9 = vrot.slane %v1170_v61, 4  ;;  %v1178_v49 = vshrl.u32 %v1014_v6, 16  ;;  %v1181_v21 = vshll.u32 %v1014_v6, 16 }
  0x6b   : > { %v2835_v24 = vld [vmem:[#allocation2 + $0x3c] sm:$0xf]  ;;  %v6076_v25 = vcombine.low %v2956_v59, %v2966_v19  ;;  %v1187_v43 = vshll.u32 %v1015_v55, 16  ;;  %v1191_v11 = vshrl.u32 %v1015_v55, 16  ;;  %v1197_v23 = vshll.u32 %v1043_v8, 16 }
  0x6c   : > { %v7579_v26 = vld [vmem:[#allocation2 + $0x40] sm:$0xf]  ;;  %v1176_v63 = vsel %vm7363_vm8, %v1171_v9, %v1175_v53  ;;  %v1180_v27 = vrot.slane %v1178_v49, 4  ;;  %v1183_v29 = vrot.slane %v1181_v21, 5  ;;  %v7583_v51 = vld [vmem:[#allocation2 + $0x44] sm:$0x1]  ;;  %v666_v47 = vsel %vm7385_vm9, %v658_v48, %v665_v14 }
  0x6d   : > { %v2968_v30 = vshrl.u32 %v2835_v24, 16  ;;  %6681 = vmatmul.mubr.msk.bf16.gmra.mrb[4].mxu0 %vm1497_vm4, %v6076_v25  ;;  %v5929_v33 = vcombine.low %v1166_v22, %v1176_v63  ;;  %v1189_v34 = vrot.slane %v1187_v43, 5  ;;  %v1193_v4 = vrot.slane %v1191_v11, 4  ;;  %v2838_v53 = vld [vmem:[#allocation2 + $0x48] sm:$0xf] }
  0x6e   : > { %v1199_v36 = vrot.slane %v1197_v23, 5  ;;  %v1184_v37 = vor.u32 %v1183_v29, %v1180_v27  ;;  %v2971_v40 = vshll.u32 %v2835_v24, 16  ;;  %v2977_v3 = vshll.u32 %v7579_v26, 16  ;;  %930 = vst.msk [vmem:[#allocation2 + $0x4c] sm:$0xf] %vm411_vm0, %v666_v47 }
  0x6f   : > { %v2970_v38 = vrot.slane %v2968_v30, 4  ;;  %6548 = vmatprep.mubr.msk.bf16.mxu1 %vm1497_vm4, %v5929_v33  ;;  %v1194_v41 = vor.u32 %v1193_v4, %v1189_v34  ;;  %v2981_v45 = vshrl.u32 %v7579_v26, 16  ;;  %v2987_v46 = vshll.u32 %v7583_v51, 16  ;;  %v1016_v22 = vld [vmem:[#allocation2 + $0x48] sm:$0xf] }
  0x70   : > { %v1185_v57 = vrot.slane %v1184_v37, 4  ;;  %v2973_v59 = vrot.slane %v2971_v40, 5  ;;  %v2979_v60 = vrot.slane %v2977_v3, 5  ;;  %v667_v61 = vrot.slane %v662_v54, 4 }
  0x71   : > { %v1195_v6 = vrot.slane %v1194_v41, 4  ;;  %v2983_v55 = vrot.slane %v2981_v45, 4  ;;  %v2989_v8 = vrot.slane %v2987_v46, 5  ;;  %v2992_v19 = vshrl.u32 %v2838_v53, 16 }
  0x72   : > { %v1190_v9 = vsel %vm7363_vm8, %v1185_v57, %v1189_v34  ;;  %v2974_v49 = vor.u32 %v2973_v59, %v2970_v38  ;;  %v932_v48 = vsel %vm7398_vm11, %v667_v61, %v931_v52  ;;  %v2995_v14 = vshll.u32 %v2838_v53, 16  ;;  %v7608_v38 = vld [vmem:[%s7342_s6 + $0x40] sm:$0xff]  }
  0x73   : > { %v1200_v21 = vsel %vm7363_vm8, %v1195_v6, %v1199_v36  ;;  %v2984_v24 = vor.u32 %v2983_v55, %v2979_v60  ;;  %933 = vst [vmem:[#allocation2 + $0x50] sm:$0x1] %v932_v48  ;;  %v2994_v54 = vrot.slane %v2992_v19, 4  ;;  %v1202_v25 = vshrl.u32 %v1016_v22, 16 }
  0x74   : > { %v5930_v43 = vcombine.low %v1190_v9, %v1200_v21  ;;  %v2975_v11 = vrot.slane %v2974_v49, 4  ;;  %v2997_v23 = vrot.slane %v2995_v14, 5  ;;  %v1205_v63 = vshll.u32 %v1016_v22, 16 }
  0x75   : > { %v2985_v27 = vrot.slane %v2984_v24, 4  ;;  %v1204_v29 = vrot.slane %v1202_v25, 4  ;;  %v391_v30 = vmax.f32 %v7544_v1, 0.0  ;;  %v392_v33 = vmax.f32 %v7567_v2, 0.0  ;;  %v7612_v3 = vld [vmem:[#allocation2 + $0x4c] sm:$0xf] }
  0x76   : > { %6549 = vmatmul.mubr.msk.bf16.gmra.mrb[8].mxu1 %vm1497_vm4, %v5930_v43  ;;  %v2980_v34 = vsel %vm7363_vm8, %v2975_v11, %v2979_v60  ;;  %v2998_v4 = vor.u32 %v2997_v23, %v2994_v54  ;;  %v1207_v36 = vrot.slane %v1205_v63, 5  ;;  %v323_v37 = vmul.f32 %v6337_v56, %v7347_v5  ;;  %v1017_v1 = vld [vmem:[#allocation2 + $0x4c] sm:$0xf] }
  0x77   : > { %v2990_v40 = vsel %vm7363_vm8, %v2985_v27, %v2989_v8  ;;  %v6286_v2 = vpack.c.bf16 %v391_v30, %v391_v30  ;;  %v6287_v41 = vpack.c.bf16 %v392_v33, %v392_v33  ;;  %v361_v45 = vadd.f32 %v7355_v17, %v7575_v18 }
  0x78   : > { %v6077_v46 = vcombine.low %v2980_v34, %v2990_v40  ;;  %v2999_v47 = vrot.slane %v2998_v4, 4  ;;  %v3001_v52 = vshll.u32 %v7612_v3, 16  ;;  %v3005_v35 = vshrl.u32 %v7612_v3, 16 }
  0x79   : > { %v1208_v5 = vor.u32 %v1207_v36, %v1204_v29  ;;  %v1211_v56 = vshll.u32 %v1017_v1, 16  ;;  %v1215_v53 = vshrl.u32 %v1017_v1, 16  ;;  %v669_v57 = vshrl.u32 %v6286_v2, 16  ;;  %v7116_v29 = vld [vmem:[%s9212_s3 + $0x10] sm:$0xff]  }
  0x7a   : > { %6684 = vmatprep.mubr.msk.bf16.mxu0 %vm1497_vm4, %v6077_v46  ;;  %v7619_v59 = vld [vmem:[#allocation2 + $0x50] sm:$0x1]  ;;  %v3003_v60 = vrot.slane %v3001_v52, 5  ;;  %v3007_v61 = vrot.slane %v3005_v35, 4  ;;  %v362_v6 = vadd.f32 %v7355_v17, %v323_v37  ;;  %v6340_v18 = vunpack.c.l.bf16 %v7608_v38  ;;  %v934_v17 = vld [vmem:[#allocation2 + $0x54] sm:$0xf]  ;;  %6606 = vmatprep.subr.bf16.mxu1 %v7116_v29 }
  0x7b   : > { %v1044_v22 = vld [vmem:[#allocation2 + $0x50] sm:$0x1]  ;;  %v3011_v55 = vshll.u32 %v7619_v59, 16  ;;  %v1209_v8 = vrot.slane %v1208_v5, 4  ;;  %v1213_v19 = vrot.slane %v1211_v56, 5  ;;  %v1217_v9 = vrot.slane %v1215_v53, 4 }
  0x7c   : > { %v3004_v49 = vsel %vm7363_vm8, %v2999_v47, %v3003_v60  ;;  %v3008_v48 = vor.u32 %v3007_v61, %v3003_v60  ;;  %v1221_v14 = vshll.u32 %v1044_v22, 16  ;;  %v671_v21 = vrot.slane %v669_v57, 7  ;;  %v938_v52 = vld [vmem:[#allocation2 + $0x5c] sm:$0x1]  ;;  %v3552_v22 = vld [vmem:[#allocation2 + $0xc] sm:$0xe] }
  0x7d   : > { %v3013_v24 = vrot.slane %v3011_v55, 5  ;;  %v1214_v54 = vsel %vm7363_vm8, %v1209_v8, %v1213_v19  ;;  %v1218_v25 = vor.u32 %v1217_v9, %v1213_v19  ;;  %v672_v43 = vshll.u32 %v6286_v2, 16  ;;  %v945_v29 = vld [vmem:[#allocation2 + $0x68] sm:$0x1] }
  0x7e   : > { %v3009_v11 = vrot.slane %v3008_v48, 4  ;;  %v1223_v23 = vrot.slane %v1221_v14, 5  ;;  %v675_v63 = vrot.slane %v671_v21, 4  ;;  %v677_v27 = vshrl.u32 %v6287_v41, 16 }
  0x7f   : > { %v1219_v30 = vrot.slane %v1218_v25, 4  ;;  %v674_v33 = vor.u32 %v672_v43, %v671_v21  ;;  %v680_v34 = vshll.u32 %v6287_v41, 16  ;;  %v393_v4 = vmax.f32 %v361_v45, 0.0  ;;  %v941_v21 = vld [vmem:[#allocation2 + $0x60] sm:$0xf] }
  0x80   : > { %v3014_v36 = vsel %vm7363_vm8, %v3009_v11, %v3013_v24  ;;  %v679_v37 = vrot.slane %v677_v27, 7  ;;  %v394_v40 = vmax.f32 %v362_v6, 0.0  ;;  %v6341_v1 = vunpack.c.h.bf16 %v7608_v38  ;;  %v7642_v38 = vld [vmem:[%s9210_s1] ss:$0 sm:$0xff] }
  0x81   : > { %v6078_v2 = vcombine.low %v3004_v49, %v3014_v36  ;;  %v1224_v46 = vsel %vm7363_vm8, %v1219_v30, %v1223_v23  ;;  %v935_v47 = vsel %vm7391_vm10, %v674_v33, %v934_v17  ;;  %v6288_v35 = vpack.c.bf16 %v393_v4, %v393_v4 }
  0x82   : > { %v5931_v5 = vcombine.low %v1214_v54, %v1224_v46  ;;  %v682_v41 = vor.u32 %v680_v34, %v679_v37  ;;  %v684_v45 = vrot.slane %v679_v37, 4  ;;  %936 = vst [vmem:[#allocation2 + $0x54] sm:$0xf] %v935_v47  ;;  %v6289_v56 = vpack.c.bf16 %v394_v40, %v394_v40 }
  0x83   : > { %6685 = vmatmul.mubr.msk.bf16.gmra.mrb[8].mxu0 %vm1497_vm4, %v6078_v2  ;;  %v686_v53 = vshrl.u32 %v6288_v35, 16  ;;  %v689_v57 = vshll.u32 %v6288_v35, 16  ;;  %v324_v60 = vmul.f32 %v7642_v38, %v6340_v18  ;;  %v325_v61 = vmul.f32 %v7642_v38, %v6341_v1  ;;  %v7655_v18 = vld [vmem:[%s9211_s2] ss:$0 sm:$0xff]  ;;  %v7684_v1 = vld [vmem:[%s7342_s6 + $0x48] sm:$0xff]  }
  0x84   : > { %6552 = vmatprep.mubr.msk.bf16.mxu1 %vm1497_vm4, %v5931_v5  ;;  %v683_v6 = vsel %vm7385_vm9, %v675_v63, %v682_v41  ;;  %v939_v55 = vsel %vm7398_vm11, %v684_v45, %v938_v52  ;;  %v694_v8 = vshrl.u32 %v6289_v56, 16  ;;  %v697_v19 = vshll.u32 %v6289_v56, 16 }
  0x85   : > { %937 = vst.msk [vmem:[#allocation2 + $0x58] sm:$0xf] %vm411_vm0, %v683_v6  ;;  %940 = vst [vmem:[#allocation2 + $0x5c] sm:$0x1] %v939_v55  ;;  %v688_v9 = vrot.slane %v686_v53, 7  ;;  %v363_v49 = vadd.f32 %v7655_v18, %v324_v60  ;;  %v364_v48 = vadd.f32 %v7655_v18, %v325_v61  ;;  %v6106_v24 = vrot.slane %v3552_v22, 9 }
  0x86   : > { %v696_v14 = vrot.slane %v694_v8, 7  ;;  %v3620_v54 = vrot.slane %v3618_v42, 4  ;;  %v7696_v53 = vsel %vm7661_vm14, %v7475_v31, %v3628_v16 }
  0x87   : > { %v691_v25 = vor.u32 %v689_v57, %v688_v9  ;;  %v692_v43 = vrot.slane %v688_v9, 4  ;;  %v395_v17 = vmax.f32 %v363_v49, 0.0  ;;  %v396_v11 = vmax.f32 %v364_v48, 0.0 }
  0x88   : > { %v699_v63 = vor.u32 %v697_v19, %v696_v14  ;;  %v701_v27 = vrot.slane %v696_v14, 4  ;;  %v7669_v30 = vsel %vm7661_vm14, %v6106_v24, %v3618_v42  ;;  %v7675_v33 = vsel %vm7661_vm14, %v3620_v54, %v3621_v44 }
  0x89   : > { %v1018_v34 = vld [vmem:[#allocation2 + $0x54] sm:$0xf]  ;;  %v942_v36 = vsel %vm7391_vm10, %v691_v25, %v941_v21  ;;  %v6290_v37 = vpack.c.bf16 %v395_v17, %v395_v17  ;;  %v7679_v40 = vpack.c.bf16 %v396_v11, %v396_v11  ;;  %v6122_v20 = vcombine.low %v7669_v30, %v7675_v33 }
  0x8a   : > { %v2841_v4 = vld [vmem:[#allocation2 + $0x54] sm:$0xf]  ;;  %v1226_v42 = vshrl.u32 %v1018_v34, 16  ;;  %v1229_v2 = vshll.u32 %v1018_v34, 16  ;;  %943 = vst [vmem:[#allocation2 + $0x60] sm:$0xf] %v942_v36  ;;  %v700_v44 = vsel %vm7385_vm9, %v692_v43, %v699_v63  ;;  %v946_v47 = vsel %vm7398_vm11, %v701_v27, %v945_v29 }
  0x8b   : > { %v3016_v28 = vshrl.u32 %v2841_v4, 16  ;;  %v3019_v46 = vshll.u32 %v2841_v4, 16  ;;  %v703_v52 = vshrl.u32 %v6290_v37, 16  ;;  %v706_v35 = vshll.u32 %v6290_v37, 16  ;;  %944 = vst.msk [vmem:[#allocation2 + $0x64] sm:$0xf] %vm411_vm0, %v700_v44 }
  0x8c   : > { %v1019_v5 = vld [vmem:[#allocation2 + $0x58] sm:$0xf]  ;;  %v1045_v41 = vld [vmem:[#allocation2 + $0x5c] sm:$0x1]  ;;  %v1228_v45 = vrot.slane %v1226_v42, 4  ;;  %v1231_v56 = vrot.slane %v1229_v2, 5  ;;  %v6344_v57 = vunpack.c.l.bf16 %v7684_v1  ;;  %v6345_v27 = vunpack.c.h.bf16 %v7684_v1 }
  0x8d   : > { %947 = vst [vmem:[#allocation2 + $0x68] sm:$0x1] %v946_v47  ;;  %v1235_v60 = vshll.u32 %v1019_v5, 16  ;;  %v1239_v61 = vshrl.u32 %v1019_v5, 16  ;;  %v1245_v22 = vshll.u32 %v1045_v41, 16  ;;  %v3018_v55 = vrot.slane %v3016_v28, 4 }
  0x8e   : > { %v7699_v6 = vld [vmem:[#allocation2 + $0x58] sm:$0xf]  ;;  %v1232_v8 = vor.u32 %v1231_v56, %v1228_v45  ;;  %v7701_v19 = vld [vmem:[#allocation2 + $0x5c] sm:$0x1]  ;;  %v3021_v9 = vrot.slane %v3019_v46, 5  ;;  %v7706_v63 = vrot.slane %v703_v52, 7  ;;  %v326_v47 = vmul.f32 %v7642_v38, %v6344_v57 }
  0x8f   : > { %v3025_v49 = vshll.u32 %v7699_v6, 16  ;;  %v3029_v50 = vshrl.u32 %v7699_v6, 16  ;;  %v1237_v48 = vrot.slane %v1235_v60, 5  ;;  %v1241_v14 = vrot.slane %v1239_v61, 4 }
  0x90   : > { %v1247_v16 = vrot.slane %v1245_v22, 5  ;;  %v3035_v31 = vshll.u32 %v7701_v19, 16  ;;  %v1233_v21 = vrot.slane %v1232_v8, 4  ;;  %v3022_v24 = vor.u32 %v3021_v9, %v3018_v55 }
  0x91   : > { %v3027_v54 = vrot.slane %v3025_v49, 5  ;;  %v3031_v25 = vrot.slane %v3029_v50, 4  ;;  %v1242_v43 = vor.u32 %v1241_v14, %v1237_v48  ;;  %v2844_v11 = vld [vmem:[#allocation2 + $0x60] sm:$0xf]  ;;  %v708_v44 = vor.u32 %v706_v35, %v7706_v63 }
  0x92   : > { %v3037_v17 = vrot.slane %v3035_v31, 5  ;;  %v1238_v29 = vsel %vm7363_vm8, %v1233_v21, %v1237_v48  ;;  %v3023_v34 = vrot.slane %v3022_v24, 4  ;;  %v3040_v36 = vshrl.u32 %v2844_v11, 16  ;;  %v1020_v37 = vld [vmem:[#allocation2 + $0x60] sm:$0xf] }
  0x93   : > { %v3032_v4 = vor.u32 %v3031_v25, %v3027_v54  ;;  %v1243_v42 = vrot.slane %v1242_v43, 4  ;;  %v7711_v2 = vld [vmem:[#allocation2 + $0x64] sm:$0xf]  ;;  %v3043_v46 = vshll.u32 %v2844_v11, 16  ;;  %v1250_v9 = vshrl.u32 %v1020_v37, 16 }
  0x94   : > { %v7713_v28 = vld [vmem:[#allocation2 + $0x68] sm:$0x1]  ;;  %v3028_v1 = vsel %vm7363_vm8, %v3023_v34, %v3027_v54  ;;  %v3042_v5 = vrot.slane %v3040_v36, 4  ;;  %v3049_v41 = vshll.u32 %v7711_v2, 16  ;;  %v1021_v45 = vld [vmem:[#allocation2 + $0x64] sm:$0xf] }
  0x95   : > { %v3033_v52 = vrot.slane %v3032_v4, 4  ;;  %v1248_v56 = vsel %vm7363_vm8, %v1243_v42, %v1247_v16  ;;  %v3045_v60 = vrot.slane %v3043_v46, 5  ;;  %v3053_v61 = vshrl.u32 %v7711_v2, 16  ;;  %v1046_v55 = vld [vmem:[#allocation2 + $0x68] sm:$0x1] }
  0x96   : > { %v3059_v22 = vshll.u32 %v7713_v28, 16  ;;  %v5932_v35 = vcombine.low %v1238_v29, %v1248_v56  ;;  %v3051_v8 = vrot.slane %v3049_v41, 5  ;;  %v1252_v31 = vrot.slane %v1250_v9, 4  ;;  %v3553_v42 = vld [vmem:[#allocation2 + $0x18] sm:$0xe] }
  0x97   : > { %v3038_v57 = vsel %vm7363_vm8, %v3033_v52, %v3037_v17  ;;  %v3046_v50 = vor.u32 %v3045_v60, %v3042_v5  ;;  %v3055_v48 = vrot.slane %v3053_v61, 4  ;;  %v1253_v16 = vshll.u32 %v1020_v37, 16  ;;  %v948_v17 = vld [vmem:[#allocation2 + $0x6c] sm:$0xf] }
  0x98   : > { %v6079_v49 = vcombine.low %v3028_v1, %v3038_v57  ;;  %v3061_v14 = vrot.slane %v3059_v22, 5  ;;  %6553 = vmatmul.mubr.msk.bf16.gmra.mrb[12].mxu1 %vm1497_vm4, %v5932_v35  ;;  %v1259_v21 = vshll.u32 %v1021_v45, 16  ;;  %v1263_v24 = vshrl.u32 %v1021_v45, 16 }
  0x99   : > { %v3047_v54 = vrot.slane %v3046_v50, 4  ;;  %v3056_v25 = vor.u32 %v3055_v48, %v3051_v8  ;;  %v1269_v43 = vshll.u32 %v1046_v55, 16  ;;  %v709_v11 = vrot.slane %v7706_v63, 4  ;;  %v6379_v48 = vld [vmem:[%s7342_s6 + $0x50] sm:$0xff]  }
  0x9a   : > { %6688 = vmatprep.mubr.msk.bf16.mxu0 %vm1497_vm4, %v6079_v49  ;;  %v1255_v29 = vrot.slane %v1253_v16, 5  ;;  %v1261_v34 = vrot.slane %v1259_v21, 5  ;;  %v1265_v4 = vrot.slane %v1263_v24, 4  ;;  %v711_v36 = vshrl.u32 %v7679_v40, 16 }
  0x9b   : > { %v3052_v46 = vsel %vm7363_vm8, %v3047_v54, %v3051_v8  ;;  %v3057_v37 = vrot.slane %v3056_v25, 4  ;;  %v1271_v1 = vrot.slane %v1269_v43, 5  ;;  %v714_v52 = vshll.u32 %v7679_v40, 16  ;;  %v952_v8 = vld [vmem:[#allocation2 + $0x74] sm:$0x1] }
  0x9c   : > { %v1256_v5 = vor.u32 %v1255_v29, %v1252_v31  ;;  %v1266_v41 = vor.u32 %v1265_v4, %v1261_v34  ;;  %v713_v45 = vrot.slane %v711_v36, 7  ;;  %v949_v63 = vsel %vm7391_vm10, %v708_v44, %v948_v17 }
  0x9d   : > { %v3062_v56 = vsel %vm7363_vm8, %v3057_v37, %v3061_v14  ;;  %950 = vst [vmem:[#allocation2 + $0x6c] sm:$0xf] %v949_v63  ;;  %v6107_v60 = vrot.slane %v3553_v42, 9  ;;  %v327_v61 = vmul.f32 %v7642_v38, %v6345_v27  ;;  %v365_v22 = vadd.f32 %v7655_v18, %v326_v47  ;;  %v3554_v14 = vld [vmem:[#allocation2 + $0x24] sm:$0xe] }
  0x9e   : > { %v6080_v55 = vcombine.low %v3052_v46, %v3062_v56  ;;  %v1257_v35 = vrot.slane %v1256_v5, 4  ;;  %v1267_v57 = vrot.slane %v1266_v41, 4  ;;  %v716_v40 = vor.u32 %v714_v52, %v713_v45  ;;  %v955_v52 = vld [vmem:[#allocation2 + $0x78] sm:$0xf] }
  0x9f   : > { %v718_v9 = vrot.slane %v713_v45, 4  ;;  %v3626_v44 = vsel %vm7661_vm14, %v6107_v60, %v3625_v15  ;;  %v366_v49 = vadd.f32 %v7655_v18, %v327_v61  ;;  %v397_v50 = vmax.f32 %v365_v22, 0.0  ;;  %v7118_v45 = vld [vmem:[%s9212_s3 + $0x38] sm:$0xff]  }
  0xa0   : > { %6689 = vmatmul.mubr.msk.bf16.gmra.mrb[12].mxu0 %vm1497_vm4, %v6080_v55  ;;  %v1262_v27 = vsel %vm7363_vm8, %v1257_v35, %v1261_v34  ;;  %v1272_v47 = vsel %vm7363_vm8, %v1267_v57, %v1271_v1  ;;  %v717_v31 = vsel %vm7385_vm9, %v709_v11, %v716_v40  ;;  %v6123_v39 = vcombine.low %v3626_v44, %v7696_v53 }
  0xa1   : > { %v5933_v16 = vcombine.low %v1262_v27, %v1272_v47  ;;  %951 = vst.msk [vmem:[#allocation2 + $0x70] sm:$0xf] %vm411_vm0, %v717_v31  ;;  %v953_v15 = vsel %vm7398_vm11, %v718_v9, %v952_v8  ;;  %6710 = vmatprep.mubr.msk.bf16.mxu0 %vm1497_vm4, %v6122_v20  ;;  %v398_v21 = vmax.f32 %v366_v49, 0.0  ;;  %v6292_v24 = vpack.c.bf16 %v397_v50, %v397_v50  ;;  %v7154_v50 = vld [vmem:[%s9212_s3 + $0x30] sm:$0xff]  }
  0xa2   : > { %954 = vst [vmem:[#allocation2 + $0x74] sm:$0x1] %v953_v15  ;;  %v6348_v54 = vunpack.c.l.bf16 %v6379_v48  ;;  %v6349_v25 = vunpack.c.h.bf16 %v6379_v48  ;;  %v6108_v43 = vrot.slane %v3554_v14, 9  ;;  %v3632_v11 = vrot.slane %v7485_v58, 5  ;;  %v959_v14 = vld [vmem:[#allocation2 + $0x80] sm:$0x1] }
  0xa3   : > { %6556 = vmatprep.mubr.msk.bf16.mxu1 %vm1497_vm4, %v5933_v16  ;;  %v6293_v53 = vpack.c.bf16 %v398_v21, %v398_v21  ;;  %v720_v17 = vshrl.u32 %v6292_v24, 16  ;;  %v723_v29 = vshll.u32 %v6292_v24, 16  ;;  %v3635_v34 = vrot.slane %v7488_v7, 5  ;;  %v3555_v16 = vld [vmem:[#allocation2 + $0x30] sm:$0xe] }
  0xa4   : > { %v1022_v4 = vld [vmem:[#allocation2 + $0x6c] sm:$0xf]  ;;  %v328_v30 = vmul.f32 %v7642_v38, %v6348_v54  ;;  %v329_v33 = vmul.f32 %v7642_v38, %v6349_v25  ;;  %v3633_v20 = vsel %vm7661_vm14, %v6108_v43, %v3632_v11  ;;  %v3634_v36 = vrot.slane %v3632_v11, 4 }
  0xa5   : > { %v1274_v42 = vshrl.u32 %v1022_v4, 16  ;;  %v1277_v46 = vshll.u32 %v1022_v4, 16  ;;  %v722_v37 = vrot.slane %v720_v17, 7  ;;  %v728_v58 = vshrl.u32 %v6293_v53, 16  ;;  %v6380_v17 = vld [vmem:[%s7342_s6 + $0x58] sm:$0xff]  }
  0xa6   : > { %v731_v1 = vshll.u32 %v6293_v53, 16  ;;  %v367_v5 = vadd.f32 %v7655_v18, %v328_v30  ;;  %v368_v41 = vadd.f32 %v7655_v18, %v329_v33  ;;  %v3636_v7 = vsel %vm7661_vm14, %v3634_v36, %v3635_v34 }
  0xa7   : > { %v1276_v63 = vrot.slane %v1274_v42, 4  ;;  %v1279_v56 = vrot.slane %v1277_v46, 5  ;;  %v725_v60 = vor.u32 %v723_v29, %v722_v37  ;;  %v726_v61 = vrot.slane %v722_v37, 4 }
  0xa8   : > { %v1023_v22 = vld [vmem:[#allocation2 + $0x70] sm:$0xf]  ;;  %6711 = vmatmul.mubr.msk.bf16.vlgmr.msra.gmra.mrb[0].mxu0 %vm1497_vm4, %v6123_v39  ;;  %v730_v55 = vrot.slane %v728_v58, 7  ;;  %v399_v35 = vmax.f32 %v367_v5, 0.0  ;;  %v400_v57 = vmax.f32 %v368_v41, 0.0  ;;  %v6124_v40 = vcombine.low %v3633_v20, %v3636_v7 }
  0xa9   : > { %v1047_v8 = vld [vmem:[#allocation2 + $0x74] sm:$0x1]  ;;  %v1280_v9 = vor.u32 %v1279_v56, %v1276_v63  ;;  %v1283_v44 = vshll.u32 %v1023_v22, 16  ;;  %v1287_v49 = vshrl.u32 %v1023_v22, 16  ;;  %6743 = vmatpush3.bf16.msra.mxu0 %v7154_v50  ;;  %v956_v48 = vsel %vm7391_vm10, %v725_v60, %v955_v52  ;;  %v962_v58 = vld [vmem:[#allocation2 + $0x84] sm:$0xf] }
  0xaa   : > { %v1293_v27 = vshll.u32 %v1047_v8, 16  ;;  %v733_v47 = vor.u32 %v731_v1, %v730_v55  ;;  %v735_v31 = vrot.slane %v730_v55, 4  ;;  %957 = vst [vmem:[#allocation2 + $0x78] sm:$0xf] %v956_v48  ;;  %v6294_v39 = vpack.c.bf16 %v399_v35, %v399_v35  ;;  %6714 = vmatprep.mubr.msk.bf16.mxu0 %vm1497_vm4, %v6124_v40  ;;  %6776 = vmatprep.subr.bf16.mxu0 %v7118_v45  ;;  %v966_v7 = vld [vmem:[#allocation2 + $0x8c] sm:$0x1] }
  0xab   : > { %v1281_v15 = vrot.slane %v1280_v9, 4  ;;  %v1285_v21 = vrot.slane %v1283_v44, 5  ;;  %v1289_v24 = vrot.slane %v1287_v49, 4  ;;  %v6295_v54 = vpack.c.bf16 %v400_v57, %v400_v57  ;;  %v6381_v49 = vld [vmem:[%s7342_s6 + $0x60] sm:$0xff]  }
  0xac   : > { %v1295_v25 = vrot.slane %v1293_v27, 5  ;;  %v734_v43 = vsel %vm7385_vm9, %v726_v61, %v733_v47  ;;  %v960_v11 = vsel %vm7398_vm11, %v735_v31, %v959_v14  ;;  %v737_v53 = vshrl.u32 %v6294_v39, 16 }
  0xad   : > { %v1286_v29 = vsel %vm7363_vm8, %v1281_v15, %v1285_v21  ;;  %v1290_v34 = vor.u32 %v1289_v24, %v1285_v21  ;;  %958 = vst.msk [vmem:[#allocation2 + $0x7c] sm:$0xf] %vm411_vm0, %v734_v43  ;;  %961 = vst [vmem:[#allocation2 + $0x80] sm:$0x1] %v960_v11  ;;  %v740_v4 = vshll.u32 %v6294_v39, 16  ;;  %v745_v30 = vshrl.u32 %v6295_v54, 16 }
  0xae   : > { %v739_v33 = vrot.slane %v737_v53, 7  ;;  %v748_v20 = vshll.u32 %v6295_v54, 16  ;;  %v6109_v36 = vrot.slane %v3555_v16, 9  ;;  %v3639_v42 = vrot.slane %v7546_v12, 5  ;;  %v3556_v11 = vld [vmem:[#allocation2 + $0x3c] sm:$0xe] }
  0xaf   : > { %v1291_v46 = vrot.slane %v1290_v34, 4  ;;  %v747_v37 = vrot.slane %v745_v30, 7  ;;  %v3642_v1 = vrot.slane %v7548_v0, 5  ;;  %v6352_v52 = vunpack.c.l.bf16 %v6380_v17 }
  0xb0   : > { %v742_v5 = vor.u32 %v740_v4, %v739_v33  ;;  %v743_v41 = vrot.slane %v739_v33, 4  ;;  %v3640_v45 = vsel %vm7661_vm14, %v6109_v36, %v3639_v42  ;;  %v3641_v63 = vrot.slane %v3639_v42, 4  ;;  %v7822_v36 = vld [vmem:[%s7342_s6 + $0x68] sm:$0xff]  }
  0xb1   : > { %v1296_v56 = vsel %vm7363_vm8, %v1291_v46, %v1295_v25  ;;  %v7795_v60 = vld [vmem:[#allocation2 + $0x78] sm:$0xf]  ;;  %v750_v12 = vor.u32 %v748_v20, %v747_v37  ;;  %v752_v61 = vrot.slane %v747_v37, 4  ;;  %v6353_v22 = vunpack.c.h.bf16 %v6380_v17 }
  0xb2   : > { %v5934_v55 = vcombine.low %v1286_v29, %v1296_v56  ;;  %v1298_v0 = vshrl.u32 %v7795_v60, 16  ;;  %v1301_v35 = vshll.u32 %v7795_v60, 16  ;;  %v963_v57 = vsel %vm7391_vm10, %v742_v5, %v962_v58 }
  0xb3   : > { %v751_v40 = vsel %vm7385_vm9, %v743_v41, %v750_v12  ;;  %964 = vst [vmem:[#allocation2 + $0x84] sm:$0xf] %v963_v57  ;;  %v967_v8 = vsel %vm7398_vm11, %v752_v61, %v966_v7  ;;  %v3643_v9 = vsel %vm7661_vm14, %v3641_v63, %v3642_v1  ;;  %v330_v44 = vmul.f32 %v7642_v38, %v6352_v52 }
  0xb4   : > { %6557 = vmatmul.mubr.msk.bf16.gmra.mrb[16].mxu1 %vm1497_vm4, %v5934_v55  ;;  %v7810_v50 = vld [vmem:[#allocation2 + $0x7c] sm:$0xf]  ;;  %v1048_v48 = vld [vmem:[#allocation2 + $0x80] sm:$0x1]  ;;  %v1300_v14 = vrot.slane %v1298_v0, 4  ;;  %v1303_v27 = vrot.slane %v1301_v35, 5  ;;  %v6125_v47 = vcombine.low %v3640_v45, %v3643_v9  ;;  %v331_v31 = vmul.f32 %v7642_v38, %v6353_v22 }
  0xb5   : > { %965 = vst.msk [vmem:[#allocation2 + $0x88] sm:$0xf] %vm411_vm0, %v751_v40  ;;  %968 = vst [vmem:[#allocation2 + $0x8c] sm:$0x1] %v967_v8  ;;  %v1307_v39 = vshll.u32 %v7810_v50, 16  ;;  %v1311_v16 = vshrl.u32 %v7810_v50, 16  ;;  %v369_v21 = vadd.f32 %v7655_v18, %v330_v44  ;;  %v6356_v25 = vunpack.c.l.bf16 %v6381_v49 }
  0xb6   : > { %v1317_v15 = vshll.u32 %v1048_v48, 16  ;;  %v1304_v24 = vor.u32 %v1303_v27, %v1300_v14  ;;  %6715 = vmatmul.mubr.msk.bf16.gmra.mrb[4].mxu0 %vm1497_vm4, %v6125_v47  ;;  %v370_v54 = vadd.f32 %v7655_v18, %v331_v31  ;;  %v6357_v43 = vunpack.c.h.bf16 %v6381_v49 }
  0xb7   : > { %v1309_v53 = vrot.slane %v1307_v39, 5  ;;  %v1313_v17 = vrot.slane %v1311_v16, 4  ;;  %v401_v34 = vmax.f32 %v369_v21, 0.0  ;;  %v332_v33 = vmul.f32 %v7642_v38, %v6356_v25  ;;  %v969_v21 = vld [vmem:[#allocation2 + $0x90] sm:$0xf] }
  0xb8   : > { %v1319_v29 = vrot.slane %v1317_v15, 5  ;;  %v1305_v4 = vrot.slane %v1304_v24, 4  ;;  %v402_v30 = vmax.f32 %v370_v54, 0.0  ;;  %v333_v20 = vmul.f32 %v7642_v38, %v6357_v43 }
  0xb9   : > { %v1314_v42 = vor.u32 %v1313_v17, %v1309_v53  ;;  %v6296_v46 = vpack.c.bf16 %v401_v34, %v401_v34  ;;  %v6110_v37 = vrot.slane %v3556_v11, 9  ;;  %v3646_v58 = vrot.slane %v7579_v26, 5  ;;  %v973_v34 = vld [vmem:[#allocation2 + $0x98] sm:$0x1] }
  0xba   : > { %v1310_v1 = vsel %vm7363_vm8, %v1305_v4, %v1309_v53  ;;  %v7827_v52 = vld [vmem:[#allocation2 + $0x84] sm:$0xf]  ;;  %v6297_v5 = vpack.c.bf16 %v402_v30, %v402_v30  ;;  %v371_v41 = vadd.f32 %v7655_v18, %v332_v33  ;;  %v372_v7 = vadd.f32 %v7655_v18, %v333_v20 }
  0xbb   : > { %v1315_v45 = vrot.slane %v1314_v42, 4  ;;  %v1322_v12 = vshrl.u32 %v7827_v52, 16  ;;  %v7836_v61 = vsel %vm7661_vm14, %v6110_v37, %v3646_v58  ;;  %v6360_v26 = vunpack.c.l.bf16 %v7822_v36  ;;  %v3557_v37 = vld [vmem:[#allocation2 + $0x48] sm:$0xe] }
  0xbc   : > { %v7831_v63 = vld [vmem:[#allocation2 + $0x88] sm:$0xf]  ;;  %v1049_v56 = vld [vmem:[#allocation2 + $0x8c] sm:$0x1]  ;;  %v1325_v22 = vshll.u32 %v7827_v52, 16  ;;  %v754_v8 = vshrl.u32 %v6296_v46, 16 }
  0xbd   : > { %v1331_v55 = vshll.u32 %v7831_v63, 16  ;;  %v1335_v0 = vshrl.u32 %v7831_v63, 16  ;;  %v1341_v35 = vshll.u32 %v1049_v56, 16  ;;  %v1320_v57 = vsel %vm7363_vm8, %v1315_v45, %v1319_v29 }
  0xbe   : > { %v1324_v40 = vrot.slane %v1322_v12, 4  ;;  %v757_v9 = vshll.u32 %v6296_v46, 16  ;;  %v5935_v44 = vcombine.low %v1310_v1, %v1320_v57  ;;  %v1327_v49 = vrot.slane %v1325_v22, 5  ;;  %v976_v57 = vld [vmem:[#allocation2 + $0x9c] sm:$0xf] }
  0xbf   : > { %v1333_v48 = vrot.slane %v1331_v55, 5  ;;  %v1337_v14 = vrot.slane %v1335_v0, 4  ;;  %v1343_v27 = vrot.slane %v1341_v35, 5  ;;  %v756_v47 = vrot.slane %v754_v8, 7 }
  0xc0   : > { %v762_v31 = vshrl.u32 %v6297_v5, 16  ;;  %v765_v39 = vshll.u32 %v6297_v5, 16  ;;  %6560 = vmatprep.mubr.msk.bf16.mxu1 %vm1497_vm4, %v5935_v44  ;;  %v1328_v16 = vor.u32 %v1327_v49, %v1324_v40  ;;  %v403_v24 = vmax.f32 %v371_v41, 0.0  ;;  %v6383_v44 = vld [vmem:[%s7342_s6 + $0x70] sm:$0xff]  }
  0xc1   : > { %v1338_v15 = vor.u32 %v1337_v14, %v1333_v48  ;;  %v404_v54 = vmax.f32 %v372_v7, 0.0  ;;  %v759_v25 = vor.u32 %v757_v9, %v756_v47  ;;  %v760_v43 = vrot.slane %v756_v47, 4  ;;  %v980_v14 = vld [vmem:[#allocation2 + $0xa4] sm:$0x1] }
  0xc2   : > { %v764_v11 = vrot.slane %v762_v31, 7  ;;  %v3648_v53 = vrot.slane %v3646_v58, 4  ;;  %v1329_v17 = vrot.slane %v1328_v16, 4  ;;  %v6298_v4 = vpack.c.bf16 %v403_v24, %v403_v24  ;;  %v7875_v24 = vld [vmem:[#allocation2 + $0x54] sm:$0xe] }
  0xc3   : > { %v1339_v29 = vrot.slane %v1338_v15, 4  ;;  %v6299_v30 = vpack.c.bf16 %v404_v54, %v404_v54  ;;  %v970_v42 = vsel %vm7391_vm10, %v759_v25, %v969_v21  ;;  %v3649_v46 = vrot.slane %v7583_v51, 5 }
  0xc4   : > { %v767_v33 = vor.u32 %v765_v39, %v764_v11  ;;  %v769_v20 = vrot.slane %v764_v11, 4  ;;  %v1334_v1 = vsel %vm7363_vm8, %v1329_v17, %v1333_v48  ;;  %971 = vst [vmem:[#allocation2 + $0x90] sm:$0xf] %v970_v42  ;;  %v771_v58 = vshrl.u32 %v6298_v4, 16 }
  0xc5   : > { %v1344_v5 = vsel %vm7363_vm8, %v1339_v29, %v1343_v27  ;;  %v774_v41 = vshll.u32 %v6298_v4, 16  ;;  %v779_v12 = vshrl.u32 %v6299_v30, 16  ;;  %v782_v22 = vshll.u32 %v6299_v30, 16 }
  0xc6   : > { %v5936_v7 = vcombine.low %v1334_v1, %v1344_v5  ;;  %v768_v45 = vsel %vm7385_vm9, %v760_v43, %v767_v33  ;;  %v974_v56 = vsel %vm7398_vm11, %v769_v20, %v973_v34  ;;  %v773_v51 = vrot.slane %v771_v58, 7 }
  0xc7   : > { %972 = vst.msk [vmem:[#allocation2 + $0x94] sm:$0xf] %vm411_vm0, %v768_v45  ;;  %975 = vst [vmem:[#allocation2 + $0x98] sm:$0x1] %v974_v56  ;;  %v3650_v55 = vsel %vm7661_vm14, %v3648_v53, %v3649_v46  ;;  %v6111_v0 = vrot.slane %v3557_v37, 9  ;;  %v781_v35 = vrot.slane %v779_v12, 7  ;;  %v6361_v27 = vunpack.c.h.bf16 %v7822_v36 }
  0xc8   : > { %6561 = vmatmul.mubr.msk.bf16.gmra.mrb[20].mxu1 %vm1497_vm4, %v5936_v7  ;;  %v6126_v40 = vcombine.low %v7836_v61, %v3650_v55  ;;  %v3653_v8 = vrot.slane %v7612_v3, 5  ;;  %v3656_v9 = vrot.slane %v7619_v59, 5  ;;  %v776_v49 = vor.u32 %v774_v41, %v773_v51 }
  0xc9   : > { %v777_v48 = vrot.slane %v773_v51, 4  ;;  %v334_v47 = vmul.f32 %v7642_v38, %v6360_v26  ;;  %v784_v31 = vor.u32 %v782_v22, %v781_v35  ;;  %v786_v39 = vrot.slane %v781_v35, 4 }
  0xca   : > { %6718 = vmatprep.mubr.msk.bf16.mxu0 %vm1497_vm4, %v6126_v40  ;;  %v3654_v61 = vsel %vm7661_vm14, %v6111_v0, %v3653_v8  ;;  %v3655_v3 = vrot.slane %v3653_v8, 4  ;;  %v977_v59 = vsel %vm7391_vm10, %v776_v49, %v976_v57  ;;  %v335_v16 = vmul.f32 %v7642_v38, %v6361_v27 }
  0xcb   : > { %v373_v15 = vadd.f32 %v7655_v18, %v334_v47  ;;  %v6364_v21 = vunpack.c.l.bf16 %v6383_v44  ;;  %v7877_v36 = vld [vmem:[#allocation2 + $0x90] sm:$0xf]  ;;  %v785_v26 = vsel %vm7385_vm9, %v777_v48, %v784_v31  ;;  %978 = vst [vmem:[#allocation2 + $0x9c] sm:$0xf] %v977_v59  ;;  %v981_v54 = vsel %vm7398_vm11, %v786_v39, %v980_v14 }
  0xcc   : > { %v3657_v25 = vsel %vm7661_vm14, %v3655_v3, %v3656_v9  ;;  %v6365_v43 = vunpack.c.h.bf16 %v6383_v44  ;;  %v1346_v11 = vshrl.u32 %v7877_v36, 16  ;;  %v1349_v53 = vshll.u32 %v7877_v36, 16  ;;  %979 = vst.msk [vmem:[#allocation2 + $0xa0] sm:$0xf] %vm411_vm0, %v785_v26  ;;  %982 = vst [vmem:[#allocation2 + $0xa4] sm:$0x1] %v981_v54 }
  0xcd   : > { %v6127_v17 = vcombine.low %v3654_v61, %v3657_v25  ;;  %v374_v29 = vadd.f32 %v7655_v18, %v335_v16  ;;  %v405_v30 = vmax.f32 %v373_v15, 0.0  ;;  %v336_v33 = vmul.f32 %v7642_v38, %v6364_v21  ;;  %v983_v25 = vld [vmem:[#allocation2 + $0xa8] sm:$0xf] }
  0xce   : > { %v7889_v34 = vld [vmem:[#allocation2 + $0x94] sm:$0xf]  ;;  %v1050_v4 = vld [vmem:[#allocation2 + $0x98] sm:$0x1]  ;;  %v337_v20 = vmul.f32 %v7642_v38, %v6365_v43  ;;  %v6112_v42 = vrot.slane %v7875_v24, 9  ;;  %v1348_v46 = vrot.slane %v1346_v11, 4 }
  0xcf   : > { %v1351_v37 = vrot.slane %v1349_v53, 5  ;;  %v1355_v1 = vshll.u32 %v7889_v34, 16  ;;  %v1359_v5 = vshrl.u32 %v7889_v34, 16  ;;  %6719 = vmatmul.mubr.msk.bf16.gmra.mrb[8].mxu0 %vm1497_vm4, %v6127_v17  ;;  %v1365_v58 = vshll.u32 %v1050_v4, 16 }
  0xd0   : > { %v406_v41 = vmax.f32 %v374_v29, 0.0  ;;  %v6300_v7 = vpack.c.bf16 %v405_v30, %v405_v30  ;;  %v375_v45 = vadd.f32 %v7655_v18, %v336_v33  ;;  %v376_v38 = vadd.f32 %v7655_v18, %v337_v20 }
  0xd1   : > { %v1352_v56 = vor.u32 %v1351_v37, %v1348_v46  ;;  %v1357_v12 = vrot.slane %v1355_v1, 5  ;;  %v1361_v51 = vrot.slane %v1359_v5, 4  ;;  %v1367_v22 = vrot.slane %v1365_v58, 5  ;;  %v987_v37 = vld [vmem:[#allocation2 + $0xb0] sm:$0x1] }
  0xd2   : > { %v6301_v55 = vpack.c.bf16 %v406_v41, %v406_v41  ;;  %v788_v0 = vshrl.u32 %v6300_v7, 16  ;;  %v791_v35 = vshll.u32 %v6300_v7, 16  ;;  %v7899_v8 = vld [vmem:[#allocation2 + $0x9c] sm:$0xf]  ;;  %v407_v9 = vmax.f32 %v375_v45, 0.0 }
  0xd3   : > { %v1353_v57 = vrot.slane %v1352_v56, 4  ;;  %v1362_v40 = vor.u32 %v1361_v51, %v1357_v12  ;;  %v408_v44 = vmax.f32 %v376_v38, 0.0  ;;  %v7901_v49 = vld [vmem:[#allocation2 + $0xa0] sm:$0xf]  ;;  %v1051_v48 = vld [vmem:[#allocation2 + $0xa4] sm:$0x1] }
  0xd4   : > { %v1370_v14 = vshrl.u32 %v7899_v8, 16  ;;  %v1373_v27 = vshll.u32 %v7899_v8, 16  ;;  %v1379_v31 = vshll.u32 %v7901_v49, 16  ;;  %v1383_v39 = vshrl.u32 %v7901_v49, 16 }
  0xd5   : > { %v1358_v18 = vsel %vm7363_vm8, %v1353_v57, %v1357_v12  ;;  %v1363_v47 = vrot.slane %v1362_v40, 4  ;;  %v1389_v59 = vshll.u32 %v1051_v48, 16  ;;  %v790_v16 = vrot.slane %v788_v0, 7 }
  0xd6   : > { %v1372_v61 = vrot.slane %v1370_v14, 4  ;;  %v1375_v3 = vrot.slane %v1373_v27, 5  ;;  %v1381_v21 = vrot.slane %v1379_v31, 5  ;;  %v1385_v26 = vrot.slane %v1383_v39, 4  ;;  %v994_v14 = vld [vmem:[#allocation2 + $0xbc] sm:$0x1] }
  0xd7   : > { %v1368_v15 = vsel %vm7363_vm8, %v1363_v47, %v1367_v22  ;;  %v796_v54 = vshrl.u32 %v6301_v55, 16  ;;  %v1391_v53 = vrot.slane %v1389_v59, 5  ;;  %v793_v17 = vor.u32 %v791_v35, %v790_v16  ;;  %v3559_v22 = vld [vmem:[#allocation2 + $0x60] sm:$0xe] }
  0xd8   : > { %v5937_v43 = vcombine.low %v1358_v18, %v1368_v15  ;;  %v1376_v11 = vor.u32 %v1375_v3, %v1372_v61  ;;  %v1386_v29 = vor.u32 %v1385_v26, %v1381_v21  ;;  %v794_v4 = vrot.slane %v790_v16, 4  ;;  %v3560_v16 = vld [vmem:[#allocation2 + $0x6c] sm:$0xe]  ;;  %v2849_v26 = vld [vmem:[#allocation2 + $0x74] sm:$0x1] }
  0xd9   : > { %v798_v30 = vrot.slane %v796_v54, 7  ;;  %v799_v33 = vshll.u32 %v6301_v55, 16  ;;  %v984_v46 = vsel %vm7391_vm10, %v793_v17, %v983_v25  ;;  %v6302_v1 = vpack.c.bf16 %v407_v9, %v407_v9 }
  0xda   : > { %6564 = vmatprep.mubr.msk.bf16.mxu1 %vm1497_vm4, %v5937_v43  ;;  %v1377_v20 = vrot.slane %v1376_v11, 4  ;;  %v6303_v5 = vpack.c.bf16 %v408_v44, %v408_v44  ;;  %v1387_v58 = vrot.slane %v1386_v29, 4  ;;  %985 = vst [vmem:[#allocation2 + $0xa8] sm:$0xf] %v984_v46  ;;  %v3660_v45 = vrot.slane %v7699_v6, 5 }
  0xdb   : > { %v801_v41 = vor.u32 %v799_v33, %v798_v30  ;;  %v803_v7 = vrot.slane %v798_v30, 4  ;;  %v805_v12 = vshrl.u32 %v6302_v1, 16  ;;  %v808_v51 = vshll.u32 %v6302_v1, 16  ;;  %v990_v44 = vld [vmem:[#allocation2 + $0xb4] sm:$0xf] }
  0xdc   : > { %v1382_v56 = vsel %vm7363_vm8, %v1377_v20, %v1381_v21  ;;  %v813_v38 = vshrl.u32 %v6303_v5, 16  ;;  %v1392_v55 = vsel %vm7363_vm8, %v1387_v58, %v1391_v53  ;;  %v816_v57 = vshll.u32 %v6303_v5, 16 }
  0xdd   : > { %v802_v0 = vsel %vm7385_vm9, %v794_v4, %v801_v41  ;;  %v988_v35 = vsel %vm7398_vm11, %v803_v7, %v987_v37  ;;  %v5938_v40 = vcombine.low %v1382_v56, %v1392_v55  ;;  %v807_v6 = vrot.slane %v805_v12, 7 }
  0xde   : > { %986 = vst.msk [vmem:[#allocation2 + $0xac] sm:$0xf] %vm411_vm0, %v802_v0  ;;  %989 = vst [vmem:[#allocation2 + $0xb0] sm:$0x1] %v988_v35  ;;  %v815_v9 = vrot.slane %v813_v38, 7  ;;  %v3661_v48 = vsel %vm7661_vm14, %v6112_v42, %v3660_v45  ;;  %v3662_v27 = vrot.slane %v3660_v45, 4 }
  0xdf   : > { %v3663_v18 = vrot.slane %v7701_v19, 5  ;;  %v6113_v47 = vrot.slane %v3559_v22, 9  ;;  %v3667_v31 = vrot.slane %v7711_v2, 5  ;;  %6565 = vmatmul.mubr.msk.bf16.gmra.mrb[24].mxu1 %vm1497_vm4, %v5938_v40  ;;  %v810_v39 = vor.u32 %v808_v51, %v807_v6  ;;  %v2848_v19 = vld [vmem:[#allocation2 + $0x70] sm:$0xf] }
  0xe0   : > { %v811_v61 = vrot.slane %v807_v6, 4  ;;  %v818_v3 = vor.u32 %v816_v57, %v815_v9  ;;  %v820_v59 = vrot.slane %v815_v9, 4  ;;  %v3670_v21 = vrot.slane %v7713_v28, 5  ;;  %v3561_v0 = vld [vmem:[#allocation2 + $0x78] sm:$0xe] }
  0xe1   : > { %v3664_v24 = vsel %vm7661_vm14, %v3662_v27, %v3663_v18  ;;  %v3668_v42 = vsel %vm7661_vm14, %v6113_v47, %v3667_v31  ;;  %v3669_v15 = vrot.slane %v3667_v31, 4  ;;  %v7936_v54 = vld [vmem:[#allocation2 + $0xa8] sm:$0xf]  ;;  %v991_v25 = vsel %vm7391_vm10, %v810_v39, %v990_v44  ;;  %v7968_v44 = vld [vmem:[#allocation2 + $0x7c] sm:$0xf] }
  0xe2   : > { %v819_v2 = vsel %vm7385_vm9, %v811_v61, %v818_v3  ;;  %v995_v43 = vsel %vm7398_vm11, %v820_v59, %v994_v14  ;;  %v6128_v11 = vcombine.low %v3661_v48, %v3664_v24  ;;  %v1394_v53 = vshrl.u32 %v7936_v54, 16  ;;  %992 = vst [vmem:[#allocation2 + $0xb4] sm:$0xf] %v991_v25  ;;  %v7970_v48 = vld [vmem:[#allocation2 + $0x80] sm:$0x1] }
  0xe3   : > { %v1397_v17 = vshll.u32 %v7936_v54, 16  ;;  %993 = vst.msk [vmem:[#allocation2 + $0xb8] sm:$0xf] %vm411_vm0, %v819_v2  ;;  %996 = vst [vmem:[#allocation2 + $0xbc] sm:$0x1] %v995_v43  ;;  %v3671_v28 = vsel %vm7661_vm14, %v3669_v15, %v3670_v21  ;;  %v6114_v29 = vrot.slane %v3560_v16, 9 }
  0xe4   : > { %6722 = vmatprep.mubr.msk.bf16.mxu0 %vm1497_vm4, %v6128_v11  ;;  %v6129_v4 = vcombine.low %v3668_v42, %v3671_v28  ;;  %v3674_v30 = vrot.slane %v2848_v19, 5  ;;  %v3677_v33 = vrot.slane %v2849_v26, 5  ;;  %v1396_v37 = vrot.slane %v1394_v53, 4  ;;  %v3562_v47 = vld [vmem:[#allocation2 + $0x84] sm:$0xe] }
  0xe5   : > { %v7950_v20 = vld [vmem:[#allocation2 + $0xac] sm:$0xf]  ;;  %v7952_v46 = vld [vmem:[#allocation2 + $0xb0] sm:$0x1]  ;;  %v1399_v1 = vrot.slane %v1397_v17, 5  ;;  %v6115_v15 = vrot.slane %v3561_v0, 9 }
  0xe6   : > { %v1403_v5 = vshll.u32 %v7950_v20, 16  ;;  %v1407_v58 = vshrl.u32 %v7950_v20, 16  ;;  %v1413_v41 = vshll.u32 %v7952_v46, 16  ;;  %6723 = vmatmul.mubr.msk.bf16.gmra.mrb[12].mxu0 %vm1497_vm4, %v6129_v4  ;;  %v3675_v45 = vsel %vm7661_vm14, %v6114_v29, %v3674_v30  ;;  %v2854_v59 = vld [vmem:[#allocation2 + $0x88] sm:$0xf] }
  0xe7   : > { %v1400_v7 = vor.u32 %v1399_v1, %v1396_v37  ;;  %v3676_v56 = vrot.slane %v3674_v30, 4  ;;  %v2855_v21 = vld [vmem:[#allocation2 + $0x8c] sm:$0x1]  ;;  %v3563_v25 = vld [vmem:[#allocation2 + $0x90] sm:$0xe]  ;;  %v3681_v53 = vrot.slane %v7968_v44, 5 }
  0xe8   : > { %v1405_v12 = vrot.slane %v1403_v5, 5  ;;  %v1409_v51 = vrot.slane %v1407_v58, 4  ;;  %v1415_v22 = vrot.slane %v1413_v41, 5  ;;  %v3684_v17 = vrot.slane %v7970_v48, 5  ;;  %v2857_v28 = vld [vmem:[#allocation2 + $0x94] sm:$0xf] }
  0xe9   : > { %v1401_v38 = vrot.slane %v1400_v7, 4  ;;  %v3678_v55 = vsel %vm7661_vm14, %v3676_v56, %v3677_v33  ;;  %v7962_v57 = vld [vmem:[#allocation2 + $0xb4] sm:$0xf]  ;;  %v6116_v4 = vrot.slane %v3562_v47, 9  ;;  %v3688_v30 = vrot.slane %v2854_v59, 5 }
  0xea   : > { %v1410_v35 = vor.u32 %v1409_v51, %v1405_v12  ;;  %v7964_v40 = vld [vmem:[#allocation2 + $0xb8] sm:$0xf]  ;;  %v7966_v6 = vld [vmem:[#allocation2 + $0xbc] sm:$0x1]  ;;  %v6130_v9 = vcombine.low %v3675_v45, %v3678_v55  ;;  %v1418_v14 = vshrl.u32 %v7962_v57, 16  ;;  %v1421_v27 = vshll.u32 %v7962_v57, 16 }
  0xeb   : > { %v1427_v18 = vshll.u32 %v7964_v40, 16  ;;  %v1406_v31 = vsel %vm7363_vm8, %v1401_v38, %v1405_v12  ;;  %v1431_v61 = vshrl.u32 %v7964_v40, 16  ;;  %v1437_v3 = vshll.u32 %v7966_v6, 16  ;;  %v2858_v37 = vld [vmem:[#allocation2 + $0x98] sm:$0x1] }
  0xec   : > { %v1411_v39 = vrot.slane %v1410_v35, 4  ;;  %6726 = vmatprep.mubr.msk.bf16.mxu0 %vm1497_vm4, %v6130_v9  ;;  %v1420_v16 = vrot.slane %v1418_v14, 4  ;;  %v1423_v24 = vrot.slane %v1421_v27, 5  ;;  %v3691_v33 = vrot.slane %v2855_v21, 5  ;;  %v7155_v5 = vld [vmem:[#allocation2] sm:$0xf] }
  0xed   : > { %v1429_v42 = vrot.slane %v1427_v18, 5  ;;  %v1433_v26 = vrot.slane %v1431_v61, 4  ;;  %v1439_v2 = vrot.slane %v1437_v3, 5  ;;  %v7985_v58 = vld [vmem:[#allocation2 + $0x4] sm:$0xf]  ;;  %v3682_v7 = vsel %vm7661_vm14, %v6115_v15, %v3681_v53 }
  0xee   : > { %v1416_v19 = vsel %vm7363_vm8, %v1411_v39, %v1415_v22  ;;  %v1424_v11 = vor.u32 %v1423_v24, %v1420_v16  ;;  %v5958_v41 = vcombine.low %v7155_v5, %v7985_v58  ;;  %v3683_v45 = vrot.slane %v3681_v53, 4  ;;  %v3564_v56 = vld [vmem:[#allocation2 + $0x9c] sm:$0xe]  ;;  %v2860_v55 = vld [vmem:[#allocation2 + $0xa0] sm:$0xf] }
  0xef   : > { %v5939_v43 = vcombine.low %v1406_v31, %v1416_v19  ;;  %v1434_v29 = vor.u32 %v1433_v26, %v1429_v42  ;;  %v3689_v51 = vsel %vm7661_vm14, %v6116_v4, %v3688_v30  ;;  %v3690_v38 = vrot.slane %v3688_v30, 4  ;;  %v2861_v27 = vld [vmem:[#allocation2 + $0xa4] sm:$0x1]  ;;  %v2863_v61 = vld [vmem:[#allocation2 + $0xac] sm:$0xf] }
  0xf0   : > { %v1425_v1 = vrot.slane %v1424_v11, 4  ;;  %v3695_v22 = vrot.slane %v2857_v28, 5  ;;  %v3685_v35 = vsel %vm7661_vm14, %v3683_v45, %v3684_v17  ;;  %v6117_v9 = vrot.slane %v3563_v25, 9  ;;  %v2866_v15 = vld [vmem:[#allocation2 + $0xb8] sm:$0xf] }
  0xf1   : > { %6568 = vmatprep.mubr.msk.bf16.mxu1 %vm1497_vm4, %v5939_v43  ;;  %v1435_v12 = vrot.slane %v1434_v29, 4  ;;  %v3698_v14 = vrot.slane %v2858_v37, 5  ;;  %v6131_v47 = vcombine.low %v3682_v7, %v3685_v35  ;;  %v3692_v31 = vsel %vm7661_vm14, %v3690_v38, %v3691_v33  ;;  %v6384_v43 = vld [vmem:[%s7342_s6 + $0x78] sm:$0xff]   ;;  %v2864_v53 = vld [vmem:[#allocation2 + $0xb0] sm:$0x1] }
  0xf2   : > { %v1430_v0 = vsel %vm7363_vm8, %v1425_v1, %v1429_v42  ;;  %v6118_v39 = vrot.slane %v3564_v56, 9  ;;  %v6132_v59 = vcombine.low %v3689_v51, %v3692_v31  ;;  %v3697_v16 = vrot.slane %v3695_v22, 4  ;;  %v3566_v17 = vld [vmem:[#allocation2 + $0xb4] sm:$0xe]  ;;  %v7157_v28 = vld [vmem:[#allocation2 + $0xc] sm:$0xf] }
  0xf3   : > { %v1440_v18 = vsel %vm7363_vm8, %v1435_v12, %v1439_v2  ;;  %v3702_v24 = vrot.slane %v2860_v55, 5  ;;  %6727 = vmatmul.mubr.msk.bf16.gmra.mrb[16].mxu0 %vm1497_vm4, %v6131_v47  ;;  %v3705_v42 = vrot.slane %v2861_v27, 5  ;;  %v3696_v21 = vsel %vm7661_vm14, %v6117_v9, %v3695_v22  ;;  %v3565_v2 = vld [vmem:[#allocation2 + $0xa8] sm:$0xe]  ;;  %v8011_v29 = vld [vmem:[#allocation2 + $0x10] sm:$0xf] }
  0xf4   : > { %v5940_v3 = vcombine.low %v1430_v0, %v1440_v18  ;;  %6730 = vmatprep.mubr.msk.bf16.mxu0 %vm1497_vm4, %v6132_v59  ;;  %v3699_v19 = vsel %vm7661_vm14, %v3697_v16, %v3698_v14  ;;  %v3709_v25 = vrot.slane %v2863_v61, 5  ;;  %v5959_v4 = vcombine.low %v7157_v28, %v8011_v29  ;;  %v7159_v30 = vld [vmem:[#allocation2 + $0x18] sm:$0xf]  ;;  %v8014_v33 = vld [vmem:[#allocation2 + $0x1c] sm:$0xf]  ;;  %v7163_v59 = vld [vmem:[%s9212_s3 + $0x10] sm:$0xff]  }
  0xf5   : > { %v3704_v26 = vrot.slane %v3702_v24, 4  ;;  %v3703_v11 = vsel %vm7661_vm14, %v6118_v39, %v3702_v24  ;;  %v5960_v37 = vcombine.low %v7159_v30, %v8014_v33  ;;  %v2867_v5 = vld [vmem:[#allocation2 + $0xbc] sm:$0x1]  ;;  %v6133_v7 = vcombine.low %v3696_v21, %v3699_v19  ;;  %v7161_v9 = vld [vmem:[%s9210_s1] ss:$0 sm:$0xff] }
  0xf6   : > { %6569 = vmatmul.mubr.msk.bf16.gmra.mrb[28].mxu1 %vm1497_vm4, %v5940_v3  ;;  %v6119_v45 = vrot.slane %v3565_v2, 9  ;;  %v6368_v56 = vunpack.c.l.bf16 %v6384_v43  ;;  %v6369_v12 = vunpack.c.h.bf16 %v6384_v43  ;;  %v3711_v38 = vrot.slane %v3709_v25, 4  ;;  %v8025_v18 = vld [vmem:[%s9212_s3 + $0x18] sm:$0xff]   ;;  %v7162_v47 = vld [vmem:[%s9211_s2] ss:$0 sm:$0xff] }
  0xf7   : > { %6574 = vmatprep.mubr.msk.bf16.mxu1 %vm1497_vm4, %v5958_v41  ;;  %v3706_v1 = vsel %vm7661_vm14, %v3704_v26, %v3705_v42  ;;  %v3716_v41 = vrot.slane %v2866_v15, 5  ;;  %v3712_v22 = vrot.slane %v2864_v53, 5  ;;  %v6120_v55 = vrot.slane %v3566_v17, 9  ;;  %v7164_v2 = vld [vmem:[#allocation2 + $0x24] sm:$0xf] }
  0xf8   : > { %v6134_v51 = vcombine.low %v3703_v11, %v3706_v1  ;;  %v3719_v35 = vrot.slane %v2867_v5, 5  ;;  %v338_v14 = vmul.f32 %v7161_v9, %v6368_v56  ;;  %v339_v27 = vmul.f32 %v7161_v9, %v6369_v12  ;;  %v7166_v11 = vld [vmem:[#allocation2 + $0x30] sm:$0xf]  ;;  %v8049_v53 = vld [vmem:[#allocation2 + $0x34] sm:$0xf] }
  0xf9   : > { %v3718_v0 = vrot.slane %v3716_v41, 4  ;;  %v3710_v61 = vsel %vm7661_vm14, %v6119_v45, %v3709_v25  ;;  %v3713_v3 = vsel %vm7661_vm14, %v3711_v38, %v3712_v22  ;;  %v3717_v16 = vsel %vm7661_vm14, %v6120_v55, %v3716_v41  ;;  %v8046_v25 = vld [vmem:[#allocation2 + $0x28] sm:$0xf]  ;;  %v8062_v9 = vld [vmem:[#allocation2 + $0x40] sm:$0xf] }
  0xfa   : > { %v377_v31 = vadd.f32 %v7162_v47, %v338_v14  ;;  %v378_v39 = vadd.f32 %v7162_v47, %v339_v27  ;;  %v6135_v21 = vcombine.low %v3710_v61, %v3713_v3  ;;  %v5961_v43 = vcombine.low %v7164_v2, %v8046_v25  ;;  %v1001_v45 = vld [vmem:[#allocation2 + $0xc8] sm:$0x1]  ;;  %v8066_v47 = vld [vmem:[#allocation2 + $0x4c] sm:$0xf]  ;;  %v7172_v3 = vld [vmem:[#allocation2 + $0x54] sm:$0xf] }
  0xfb   : > { %6731 = vmatmul.mubr.msk.bf16.gmra.mrb[20].mxu0 %vm1497_vm4, %v6133_v7  ;;  %v3720_v24 = vsel %vm7661_vm14, %v3718_v0, %v3719_v35  ;;  %v5962_v17 = vcombine.low %v7166_v11, %v8049_v53  ;;  %v997_v7 = vld [vmem:[#allocation2 + $0xc0] sm:$0xf]  ;;  %v7168_v35 = vld [vmem:[#allocation2 + $0x3c] sm:$0xf]  ;;  %v7170_v27 = vld [vmem:[#allocation2 + $0x48] sm:$0xf] }
  0xfc   : > { %6734 = vmatprep.mubr.msk.bf16.mxu0 %vm1497_vm4, %v6134_v51  ;;  %v409_v42 = vmax.f32 %v377_v31, 0.0  ;;  %v410_v15 = vmax.f32 %v378_v39, 0.0  ;;  %v6136_v28 = vcombine.low %v3717_v16, %v3720_v24  ;;  %v5963_v14 = vcombine.low %v7168_v35, %v8062_v9  ;;  %v2005_v35 = vld [vmem:[#allocation2 + $0x24] sm:$0xe] }
  0xfd   : > { %v5964_v62 = vcombine.low %v7170_v27, %v8066_v47  ;;  %v3097_v10 = vshll.u32 %v7968_v44, 16  ;;  %v3101_v13 = vshrl.u32 %v7968_v44, 16 }
  0xfe   : > { %6575 = vmatmul.mubr.msk.bf16.vlgmr.msra.gmra.mrb[0].mxu1 %vm1497_vm4, %v5959_v4  ;;  %v6304_v19 = vpack.c.bf16 %v409_v42, %v409_v42  ;;  %v6305_v26 = vpack.c.bf16 %v410_v15, %v410_v15 }
  0xff   : > { %6607 = vmatpush3.bf16.msra.mxu1 %v7163_v59  ;;  %6578 = vmatprep.mubr.msk.bf16.mxu1 %vm1497_vm4, %v5960_v37  ;;  %v8073_v59 = vld [vmem:[#allocation2 + $0x58] sm:$0xf]  ;;  %v3103_v11 = vrot.slane %v3101_v13, 4  ;;  %v7180_v13 = vld [vmem:[#allocation2 + $0x20] sm:$0x1] }
 0x100   : > { %6640 = vmatprep.subr.bf16.mxu1 %v8025_v18  ;;  %v822_v4 = vshrl.u32 %v6304_v19, 16  ;;  %v825_v30 = vshll.u32 %v6304_v19, 16  ;;  %v830_v37 = vshrl.u32 %v6305_v26, 16  ;;  %v833_v1 = vshll.u32 %v6305_v26, 16  ;;  %v8076_v19 = vld [vmem:[#allocation2 + $0x64] sm:$0xf] }
 0x101   : > { %v5965_v16 = vcombine.low %v7172_v3, %v8073_v59 }
 0x102   : > { %v824_v5 = vrot.slane %v822_v4, 7  ;;  %v832_v41 = vrot.slane %v830_v37, 7  ;;  %v2062_v4 = vrot.slane %v8011_v29, 5  ;;  %v2002_v37 = vld [vmem:[#allocation2] sm:$0xe] }
 0x103   : > { %6735 = vmatmul.mubr.msk.bf16.gmra.mrb[24].mxu0 %vm1497_vm4, %v6135_v21  ;;  %v7174_v21 = vld [vmem:[#allocation2 + $0x60] sm:$0xf] }
 0x104   : > { %6738 = vmatprep.mubr.msk.bf16.mxu0 %vm1497_vm4, %v6136_v28  ;;  %v827_v56 = vor.u32 %v825_v30, %v824_v5  ;;  %v828_v12 = vrot.slane %v824_v5, 4  ;;  %v835_v51 = vor.u32 %v833_v1, %v832_v41  ;;  %v837_v38 = vrot.slane %v832_v41, 4  ;;  %v7117_v28 = vld [vmem:[#allocation2 + $0x18] sm:$0xff]   ;;  %v2003_v5 = vld [vmem:[#allocation2 + $0xc] sm:$0xe] }
 0x105   : > { %v5966_v26 = vcombine.low %v7174_v21, %v8076_v19  ;;  %v2055_v1 = vrot.slane %v7985_v58, 5  ;;  %v2069_v41 = vrot.slane %v8014_v33, 5  ;;  %v5991_v33 = vrot.slane %v2002_v37, 9 }
 0x106   : > { %6579 = vmatmul.mubr.msk.bf16.gmra.mrb[4].mxu1 %vm1497_vm4, %v5961_v43  ;;  %v836_v22 = vsel %vm7385_vm9, %v828_v12, %v835_v51  ;;  %v998_v55 = vsel %vm7391_vm10, %v827_v56, %v997_v7  ;;  %v1002_v0 = vsel %vm7398_vm11, %v837_v38, %v1001_v45  ;;  %v8081_v43 = vrot.slane %v3097_v10, 5  ;;  %v7176_v7 = vld [vmem:[#allocation2 + $0x8] sm:$0x1]  ;;  %v2004_v12 = vld [vmem:[#allocation2 + $0x18] sm:$0xe] }
 0x107   : > { %6582 = vmatprep.mubr.msk.bf16.mxu1 %vm1497_vm4, %v5962_v17  ;;  %999 = vst [vmem:[#allocation2 + $0xc0] sm:$0xf] %v998_v55  ;;  %1000 = vst.msk [vmem:[#allocation2 + $0xc4] sm:$0xf] %vm411_vm0, %v836_v22  ;;  %v2058_v45 = vrot.slane %v7176_v7, 5  ;;  %v3107_v56 = vshll.u32 %v7970_v48, 16  ;;  %v5968_v48 = vcombine.low %v7795_v60, %v7810_v50  ;;  %v5969_v60 = vcombine.low %v7827_v52, %v7831_v63 }
 0x108   : > { %1003 = vst [vmem:[#allocation2 + $0xc8] sm:$0x1] %v1002_v0  ;;  %9240 = vst [vmem:[#allocation3_spill] sm:$0xff] %v8081_v43  ;;  %v2076_v51 = vrot.slane %v8046_v25, 5  ;;  %v7177_v38 = vld [vmem:[#allocation2 + $0x14] sm:$0x1]  ;;  %v3104_v22 = vor.u32 %v3103_v11, %v8081_v43 }
 0x109   : > { %v2065_v29 = vrot.slane %v7177_v38, 5  ;;  %v7178_v55 = vld [vmem:[#allocation2 + $0x6c] sm:$0xf]  ;;  %v8094_v0 = vld [vmem:[#allocation2 + $0x70] sm:$0xf]  ;;  %v5992_v27 = vrot.slane %v2003_v5, 9 }
 0x10a   : > { %v5967_v58 = vcombine.low %v7178_v55, %v8094_v0  ;;  %v5993_v25 = vrot.slane %v2004_v12, 9  ;;  %v2071_v10 = vrot.slane %v2069_v41, 4  ;;  %v8101_v3 = vrot.slane %v3107_v56, 5  ;;  %v7120_v50 = vld [vmem:[#allocation2 + $0x30] sm:$0xff]   ;;  %v7183_v56 = vld [vmem:[%s9212_s3 + $0x38] sm:$0xff]  }
 0x10b   : > { %v5972_v12 = vcombine.low %v7936_v54, %v7950_v20  ;;  %v7188_v38 = vld [vmem:[#allocation2 + $0x74] sm:$0x1]  ;;  %vm5761_vm0 = vcmask 123904  }
 0x10c   : > { %9241 = vst [vmem:[#allocation4_spill] sm:$0xff] %v8101_v3  ;;  %v2121_v55 = vrot.slane %v7188_v38, 5  ;;  %v7130_v3 = vld [vmem:[#allocation2 + $0x9c] sm:$0xff]  }
 0x10e   : > { %6583 = vmatmul.mubr.msk.bf16.gmra.mrb[8].mxu1 %vm1497_vm4, %v5963_v14  ;;  %v2869_v31 = vld [vmem:[#allocation2 + $0xc4] sm:$0xf]  ;;  %v3567_v61 = vld [vmem:[#allocation2 + $0xc0] sm:$0xe]  ;;  %v2057_v14 = vrot.slane %v2055_v1, 4 }
 0x10f   : > { %6586 = vmatprep.mubr.msk.bf16.mxu1 %vm1497_vm4, %v5964_v62  ;;  %v2870_v39 = vld [vmem:[#allocation2 + $0xc8] sm:$0x1]  ;;  %v6121_v24 = vrot.slane %v3567_v61, 9  ;;  %v3723_v42 = vrot.slane %v2869_v31, 5  ;;  %v2064_v62 = vrot.slane %v2062_v4, 4  ;;  %v2072_v31 = vrot.slane %v7180_v13, 5 }
 0x110   : > { %v3726_v15 = vrot.slane %v2870_v39, 5  ;;  %v2006_v39 = vld [vmem:[#allocation2 + $0x30] sm:$0xe]  ;;  %v2083_v61 = vrot.slane %v8049_v53, 5  ;;  %v8112_v53 = vsel %vm7661_vm14, %v5991_v33, %v2055_v1  ;;  %v8117_v11 = vsel %vm7661_vm14, %v2057_v14, %v2058_v45  ;;  %v2008_v45 = vld [vmem:[#allocation2 + $0x48] sm:$0xe] }
 0x111   : > { %v3724_v2 = vsel %vm7661_vm14, %v6121_v24, %v3723_v42  ;;  %v3725_v44 = vrot.slane %v3723_v42, 4  ;;  %v5994_v24 = vrot.slane %v2005_v35, 9  ;;  %v2078_v42 = vrot.slane %v2076_v51, 4  ;;  %v4388_v14 = vld [vmem:[#allocation2 + $0x1c] sm:$0xf] }
 0x112   : > { %v8125_v52 = vsel %vm7661_vm14, %v2064_v62, %v2065_v29  ;;  %v5995_v63 = vrot.slane %v2006_v39, 9  ;;  %v5971_v1 = vcombine.low %v7899_v8, %v7901_v49  ;;  %v2090_v29 = vrot.slane %v8062_v9, 5  ;;  %v7184_v62 = vld [vmem:[#allocation2 + $0x44] sm:$0x1]  ;;  %v7122_v39 = vld [vmem:[#allocation2 + $0x48] sm:$0xff]  }
 0x113   : > { %v3727_v17 = vsel %vm7661_vm14, %v3725_v44, %v3726_v15  ;;  %v7181_v15 = vld [vmem:[#allocation2 + $0x2c] sm:$0x1]  ;;  %v2007_v44 = vld [vmem:[#allocation2 + $0x3c] sm:$0xe]  ;;  %v8145_v5 = vsel %vm7661_vm14, %v5994_v24, %v2076_v51  ;;  %v5973_v51 = vcombine.low %v7962_v57, %v7964_v40  ;;  %v2097_v35 = vrot.slane %v8066_v47, 5 }
 0x114   : > { %v6137_v30 = vcombine.low %v3724_v2, %v3727_v17  ;;  %v2079_v21 = vrot.slane %v7181_v15, 5  ;;  %v5970_v2 = vcombine.low %v7877_v36, %v7889_v34  ;;  %v8121_v17 = vsel %vm7661_vm14, %v5992_v27, %v2062_v4  ;;  %v8130_v36 = vld [vmem:[%s9212_s3 + $0x40] sm:$0xff]  }
 0x115   : > { %v8134_v34 = vsel %vm7661_vm14, %v5993_v25, %v2069_v41  ;;  %v2085_v4 = vrot.slane %v2083_v61, 4  ;;  %v5996_v7 = vrot.slane %v2007_v44, 9  ;;  %v8168_v33 = vsel %vm7661_vm14, %v5995_v63, %v2083_v61  ;;  %v4390_v13 = vld [vmem:[#allocation2 + $0x24] sm:$0xf]  ;;  %v7185_v61 = vld [vmem:[#allocation2 + $0x50] sm:$0x1] }
 0x116   : > { %6587 = vmatmul.mubr.msk.bf16.gmra.mrb[12].mxu1 %vm1497_vm4, %v5965_v16  ;;  %6739 = vmatmul.mubr.msk.bf16.gmra.mrb[28].mxu0 %vm1497_vm4, %v6137_v30  ;;  %v7119_v16 = vld [vmem:[#allocation2 + $0x24] sm:$0xff]   ;;  %v7182_v30 = vld [vmem:[#allocation2 + $0x38] sm:$0x1]  ;;  %v8149_v41 = vsel %vm7661_vm14, %v2078_v42, %v2079_v21  ;;  %v2093_v25 = vrot.slane %v7184_v62, 5  ;;  %v2092_v15 = vrot.slane %v2090_v29, 4  ;;  %v4449_v44 = vshrl.u32 %v4388_v14, 16 }
 0x117   : > { %6590 = vmatprep.mubr.msk.bf16.mxu1 %vm1497_vm4, %v5966_v26  ;;  %6744 = vmatprep.mubr.msk.bf16.mxu0 %vm1497_vm4, %v7117_v28  ;;  %v8103_v26 = vrot.slane %v3104_v22, 4  ;;  %v8138_v28 = vsel %vm7661_vm14, %v2071_v10, %v2072_v31  ;;  %v2086_v37 = vrot.slane %v7182_v30, 5  ;;  %v4387_v22 = vld [vmem:[#allocation2 + $0x18] sm:$0xf]  ;;  %v5997_v10 = vrot.slane %v2008_v45, 9  ;;  %v7121_v31 = vld [vmem:[#allocation2 + $0x3c] sm:$0xff]  }
 0x118   : > { %v8182_v47 = vsel %vm7661_vm14, %v5996_v7, %v2090_v29  ;;  %v4436_v24 = vshrl.u32 %v4387_v22, 16  ;;  %v4439_v42 = vshll.u32 %v4387_v22, 16  ;;  %v4391_v63 = vld [vmem:[#allocation2 + $0x28] sm:$0xf]  ;;  %v2104_v30 = vrot.slane %v8073_v59, 5 }
 0x119   : > { %9242 = vst [vmem:[#allocation5_spill] sm:$0xff] %v8103_v26  ;;  %v8178_v27 = vsel %vm7661_vm14, %v2085_v4, %v2086_v37  ;;  %v2099_v4 = vrot.slane %v2097_v35, 4  ;;  %v2010_v37 = vld [vmem:[#allocation2 + $0x60] sm:$0xe]  ;;  %v4460_v7 = vshrl.u32 %v4390_v13, 16  ;;  %v4463_v45 = vshll.u32 %v4390_v13, 16 }
 0x11a   : > { %v7186_v22 = vld [vmem:[#allocation2 + $0x5c] sm:$0x1]  ;;  %v2111_v29 = vrot.slane %v8076_v19, 5  ;;  %v4441_v62 = vrot.slane %v4439_v42, 5  ;;  %v4473_v59 = vshrl.u32 %v4391_v63, 16  ;;  %v8198_v13 = vsel %vm7661_vm14, %v2092_v15, %v2093_v25  ;;  %v7123_v25 = vld [vmem:[#allocation2 + $0x54] sm:$0xff]  }
 0x11b   : > { %v4465_v42 = vrot.slane %v4463_v45, 5  ;;  %v7196_v26 = vld [vmem:[#allocation2 + $0xa4] sm:$0x1] }
 0x11c   : > { %v2113_v9 = vrot.slane %v2111_v29, 4 }
 0x11e   : > { %6591 = vmatmul.mubr.msk.bf16.gmra.mrb[16].mxu1 %vm1497_vm4, %v5967_v58  ;;  %6745 = vmatmul.mubr.msk.bf16.vlgmr.msra.gmra.mrb[0].mxu0 %vm1497_vm4, %v7119_v16  ;;  %v2100_v16 = vrot.slane %v7185_v61, 5  ;;  %v4469_v61 = vshll.u32 %v4391_v63, 16  ;;  %v7187_v63 = vld [vmem:[#allocation2 + $0x68] sm:$0x1] }
 0x11f   : > { %6594 = vmatprep.mubr.msk.bf16.mxu1 %vm1497_vm4, %v5968_v48  ;;  %6777 = vmatpush3.bf16.msra.mxu0 %v7183_v56  ;;  %v8171_v48 = vld [vmem:[#allocation2 + $0x54] sm:$0xe]  ;;  %v8190_v56 = vsel %vm7661_vm14, %v5997_v10, %v2097_v35  ;;  %v5999_v35 = vrot.slane %v2010_v37, 9  ;;  %v2114_v58 = vrot.slane %v7187_v63, 5 }
 0x120   : > { %6748 = vmatprep.mubr.msk.bf16.mxu0 %vm1497_vm4, %v7120_v50  ;;  %6810 = vmatprep.subr.bf16.mxu0 %v8130_v36  ;;  %v5998_v21 = vrot.slane %v8171_v48, 9  ;;  %v4445_v50 = vshll.u32 %v4388_v14, 16  ;;  %v2118_v48 = vrot.slane %v8094_v0, 5  ;;  %v2011_v14 = vld [vmem:[#allocation2 + $0x6c] sm:$0xe]  ;;  %v8204_v19 = vsel %vm7661_vm14, %v2099_v4, %v2100_v16  ;;  %v7124_v16 = vld [vmem:[#allocation2 + $0x60] sm:$0xff]  }
 0x121   : > { %v2106_v0 = vrot.slane %v2104_v30, 4  ;;  %v8237_v54 = vsel %vm7661_vm14, %v2113_v9, %v2114_v58 }
 0x122   : > { %v8200_v10 = vrot.slane %v4445_v50, 5  ;;  %v2120_v15 = vrot.slane %v2118_v48, 4  ;;  %v8206_v50 = vrot.slane %v4469_v61, 5  ;;  %v7189_v61 = vld [vmem:[#allocation2 + $0x7c] sm:$0xf] }
 0x126   : > { %6595 = vmatmul.mubr.msk.bf16.gmra.mrb[20].mxu1 %vm1497_vm4, %v5969_v60  ;;  %v2107_v60 = vrot.slane %v7186_v22, 5  ;;  %6749 = vmatmul.mubr.msk.bf16.gmra.mrb[4].mxu0 %vm1497_vm4, %v7121_v31  ;;  %v4451_v22 = vrot.slane %v4449_v44, 4  ;;  %v4389_v31 = vld [vmem:[#allocation2 + $0x20] sm:$0x1]  ;;  %v4475_v44 = vrot.slane %v4473_v59, 4  ;;  %v8233_v59 = vsel %vm7661_vm14, %v5999_v35, %v2111_v29 }
 0x127   : > { %6598 = vmatprep.mubr.msk.bf16.mxu1 %vm1497_vm4, %v5970_v2  ;;  %v4438_v2 = vrot.slane %v4436_v24, 4  ;;  %6752 = vmatprep.mubr.msk.bf16.mxu0 %vm1497_vm4, %v7122_v39  ;;  %v4462_v24 = vrot.slane %v4460_v7, 4  ;;  %v6000_v39 = vrot.slane %v2011_v14, 9  ;;  %v8216_v7 = vsel %vm7661_vm14, %v5998_v21, %v2104_v30  ;;  %v4392_v14 = vld [vmem:[#allocation2 + $0x2c] sm:$0x1] }
 0x128   : > { %v4452_v38 = vor.u32 %v4451_v22, %v8200_v10  ;;  %v4455_v45 = vshll.u32 %v4389_v31, 16  ;;  %v2125_v21 = vrot.slane %v7189_v61, 5  ;;  %v8229_v30 = vsel %vm7661_vm14, %v2106_v0, %v2107_v60  ;;  %v4393_v35 = vld [vmem:[#allocation2 + $0x30] sm:$0xf] }
 0x129   : > { %v4442_v37 = vor.u32 %v4441_v62, %v4438_v2  ;;  %v4466_v2 = vor.u32 %v4465_v42, %v4462_v24  ;;  %v2012_v62 = vld [vmem:[#allocation2 + $0x78] sm:$0xe]  ;;  %v8246_v22 = vsel %vm7661_vm14, %v2120_v15, %v2121_v55  ;;  %v4476_v0 = vor.u32 %v4475_v44, %v8206_v50  ;;  %v2013_v24 = vld [vmem:[#allocation2 + $0x84] sm:$0xe] }
 0x12a   : > { %v4479_v29 = vshll.u32 %v4392_v14, 16  ;;  %v4453_v58 = vrot.slane %v4452_v38, 4  ;;  %v4457_v9 = vrot.slane %v4455_v45, 5  ;;  %v6001_v31 = vrot.slane %v2012_v62, 9  ;;  %v7125_v14 = vld [vmem:[#allocation2 + $0x6c] sm:$0xff]   ;;  %v7127_v44 = vld [vmem:[#allocation2 + $0x78] sm:$0xff]  }
 0x12b   : > { %v8248_v60 = vrot.slane %v4442_v37, 4  ;;  %v2127_v55 = vrot.slane %v2125_v21, 4  ;;  %v4484_v38 = vshrl.u32 %v4393_v35, 16  ;;  %v4487_v45 = vshll.u32 %v4393_v35, 16 }
 0x12c   : > { %v4481_v61 = vrot.slane %v4479_v29, 5  ;;  %v4458_v37 = vsel %vm7363_vm8, %v4453_v58, %v4457_v9  ;;  %v8272_v35 = vsel %vm7661_vm14, %v6001_v31, %v2125_v21  ;;  %v8287_v21 = vld [vmem:[#allocation2 + $0x38] sm:$0x1]  ;;  %v4399_v58 = vld [vmem:[#allocation2 + $0x48] sm:$0xf] }
 0x12d   : > { %v4448_v62 = vsel %vm7363_vm8, %v8248_v60, %v8200_v10  ;;  %v8274_v60 = vld [vmem:[#allocation2 + $0x40] sm:$0xf]  ;;  %9246 = vst [vmem:[#allocation8_spill] sm:$0xff] %v8287_v21  ;;  %v4486_v9 = vrot.slane %v4484_v38, 4  ;;  %v4489_v31 = vrot.slane %v4487_v45, 5  ;;  %v4503_v45 = vshll.u32 %v8287_v21, 16 }
 0x12e   : > { %6599 = vmatmul.mubr.msk.bf16.gmra.mrb[24].mxu1 %vm1497_vm4, %v5971_v1  ;;  %6753 = vmatmul.mubr.msk.bf16.gmra.mrb[8].mxu0 %vm1497_vm4, %v7123_v25  ;;  %v7191_v25 = vld [vmem:[#allocation2 + $0x80] sm:$0x1]  ;;  %v7192_v1 = vld [vmem:[#allocation2 + $0x8c] sm:$0x1]  ;;  %9244 = vst [vmem:[#allocation7_spill] sm:$0xff] %v8274_v60  ;;  %v8314_v8 = vcombine.low %v4448_v62, %v4458_v37  ;;  %v7129_v37 = vld [vmem:[#allocation2 + $0x90] sm:$0xff]  }
 0x12f   : > { %6602 = vmatprep.mubr.msk.bf16.mxu1 %vm1497_vm4, %v5972_v12  ;;  %v8241_v12 = vsel %vm7661_vm14, %v6000_v39, %v2118_v48  ;;  %6756 = vmatprep.mubr.msk.bf16.mxu0 %vm1497_vm4, %v7124_v16  ;;  %v7190_v48 = vld [vmem:[#allocation2 + $0x88] sm:$0xf]  ;;  %v4467_v39 = vrot.slane %v4466_v2, 4  ;;  %v2128_v15 = vrot.slane %v7191_v25, 5  ;;  %v8258_v16 = vld [vmem:[#allocation2 + $0x34] sm:$0xf] }
 0x130   : > { %v2132_v42 = vrot.slane %v7190_v48, 5  ;;  %9243 = vst [vmem:[#allocation6_spill] sm:$0xff] %v8258_v16  ;;  %v4477_v2 = vrot.slane %v4476_v0, 4  ;;  %v6002_v48 = vrot.slane %v2013_v24, 9  ;;  %v4396_v25 = vld [vmem:[#allocation2 + $0x3c] sm:$0xf]  ;;  %v9245_v0 = vcombine.low %v8112_v53, %v8117_v11 }
 0x131   : > { %v2135_v10 = vrot.slane %v7192_v1, 5  ;;  %v4472_v57 = vsel %vm7363_vm8, %v4467_v39, %v8206_v50  ;;  %v4493_v29 = vshll.u32 %v8258_v16, 16  ;;  %v4497_v1 = vshrl.u32 %v8258_v16, 16  ;;  %v8291_v24 = vld [vmem:[#allocation2 + $0x4c] sm:$0xf] }
 0x132   : > { %v2134_v63 = vrot.slane %v2132_v42, 4  ;;  %v4508_v53 = vshrl.u32 %v4396_v25, 16  ;;  %v4511_v11 = vshll.u32 %v4396_v25, 16  ;;  %v4482_v50 = vsel %vm7363_vm8, %v4477_v2, %v4481_v61  ;;  %v8310_v61 = vld [vmem:[#allocation2 + $0x44] sm:$0x1] }
 0x133   : > { %v8298_v39 = vsel %vm7661_vm14, %v6002_v48, %v2132_v42  ;;  %v4535_v25 = vshll.u32 %v4399_v58, 16  ;;  %v4499_v2 = vrot.slane %v4497_v1, 4  ;;  %9247 = vst [vmem:[#allocation9_spill] sm:$0xff] %v8310_v61  ;;  %v4541_v42 = vshll.u32 %v8291_v24, 16  ;;  %v2014_v21 = vld [vmem:[#allocation2 + $0x90] sm:$0xe] }
 0x134   : > { %v8305_v38 = vsel %vm7661_vm14, %v2134_v63, %v2135_v10  ;;  %v4545_v48 = vshrl.u32 %v8291_v24, 16  ;;  %v4510_v4 = vrot.slane %v4508_v53, 4  ;;  %v7128_v63 = vld [vmem:[#allocation2 + $0x84] sm:$0xff]   ;;  %v8316_v10 = vcombine.low %v4472_v57, %v4482_v50  ;;  %v4402_v53 = vld [vmem:[#allocation2 + $0x54] sm:$0xf] }
 0x135   : > { %v9248_v16 = vcombine.low %v8121_v17, %v8125_v52  ;;  %v8335_v52 = vrot.slane %v4503_v45, 5  ;;  %v7193_v62 = vld [vmem:[#allocation2 + $0x94] sm:$0xf]  ;;  %v2015_v45 = vld [vmem:[#allocation2 + $0x9c] sm:$0xe] }
 0x136   : > { %6603 = vmatmul.mubr.msk.bf16.gmra.mrb[28].mxu1 %vm1497_vm4, %v5973_v51  ;;  %v8285_v51 = vsel %vm7661_vm14, %v2127_v55, %v2128_v15  ;;  %6757 = vmatmul.mubr.msk.bf16.gmra.mrb[12].mxu0 %vm1497_vm4, %v7125_v14  ;;  %v4517_v55 = vshll.u32 %v8274_v60, 16  ;;  %v4521_v15 = vshrl.u32 %v8274_v60, 16  ;;  %v4532_v14 = vshrl.u32 %v4399_v58, 16  ;;  %v8343_v58 = vld [vmem:[#allocation2 + $0x50] sm:$0x1] }
 0x137   : > { %6608 = vmatprep.mubr.msk.bf16.mxu1 %vm1497_vm4, %v9245_v0  ;;  %6760 = vmatprep.mubr.msk.bf16.mxu0 %vm1497_vm4, %v7127_v44  ;;  %v8308_v0 = vrot.slane %v4493_v29, 5  ;;  %v4490_v44 = vor.u32 %v4489_v31, %v4486_v9  ;;  %v4513_v60 = vrot.slane %v4511_v11, 5  ;;  %v4527_v9 = vshll.u32 %v8310_v61, 16 }
 0x138   : > { %v8320_v29 = vrot.slane %v4517_v55, 5  ;;  %v4523_v1 = vrot.slane %v4521_v15, 4  ;;  %v4534_v57 = vrot.slane %v4532_v14, 4  ;;  %v4537_v31 = vrot.slane %v4535_v25, 5  ;;  %v8339_v55 = vld [vmem:[#allocation2 + $0x58] sm:$0xf] }
 0x139   : > { %v9249_v11 = vcombine.low %v8134_v34, %v8138_v28  ;;  %v4500_v17 = vor.u32 %v4499_v2, %v8308_v0  ;;  %v4547_v50 = vrot.slane %v4545_v48, 4  ;;  %9250 = vst [vmem:[#allocation10_spill] sm:$0xff] %v8339_v55  ;;  %v8341_v15 = vrot.slane %v4490_v44, 4  ;;  %v8348_v34 = vld [vmem:[%s9212_s3 + $0x20] sm:$0xff]  }
 0x13a   : > { %v4514_v14 = vor.u32 %v4513_v60, %v4510_v4  ;;  %v6003_v25 = vrot.slane %v2014_v21, 9  ;;  %9251 = vst [vmem:[#allocation11_spill] sm:$0xff] %v8348_v34  ;;  %v4524_v28 = vor.u32 %v4523_v1, %v8320_v29  ;;  %v2146_v2 = vrot.slane %v7901_v49, 5 }
 0x13b   : > { %v4556_v4 = vshrl.u32 %v4402_v53, 16  ;;  %v4559_v60 = vshll.u32 %v4402_v53, 16  ;;  %v4529_v21 = vrot.slane %v4527_v9, 5  ;;  %v4565_v48 = vshll.u32 %v8339_v55, 16 }
 0x13c   : > { %v4569_v44 = vshrl.u32 %v8339_v55, 16  ;;  %v4551_v1 = vshll.u32 %v8343_v58, 16  ;;  %v6004_v49 = vrot.slane %v2015_v45, 9  ;;  %v2149_v53 = vrot.slane %v7196_v26, 5  ;;  %v8367_v45 = vld [vmem:[#allocation2 + $0x5c] sm:$0x1] }
 0x13d   : > { %v2148_v9 = vrot.slane %v2146_v2, 4  ;;  %v9252_v55 = vcombine.low %v8145_v5, %v8149_v41  ;;  %v8369_v26 = vrot.slane %v4565_v48, 5 }
 0x13e   : > { %6609 = vmatmul.mubr.msk.bf16.vlgmr.msra.gmra.mrb[0].mxu1 %vm1497_vm4, %v9248_v16  ;;  %v8337_v16 = vrot.slane %v4541_v42, 5  ;;  %6761 = vmatmul.mubr.msk.bf16.gmra.mrb[16].mxu0 %vm1497_vm4, %v7128_v63  ;;  %v4538_v42 = vor.u32 %v4537_v31, %v4534_v57  ;;  %v4558_v57 = vrot.slane %v4556_v4, 4  ;;  %v4561_v31 = vrot.slane %v4559_v60, 5  ;;  %v2016_v60 = vld [vmem:[#allocation2 + $0xa8] sm:$0xe] }
 0x13f   : > { %6641 = vmatpush3.bf16.msra.mxu1 %v8025_v18  ;;  %6612 = vmatprep.mubr.msk.bf16.mxu1 %vm1497_vm4, %v9249_v11  ;;  %v2139_v18 = vrot.slane %v7193_v62, 5  ;;  %v4501_v62 = vrot.slane %v4500_v17, 4  ;;  %v7195_v11 = vld [vmem:[#allocation2 + $0x98] sm:$0x1]  ;;  %v7131_v17 = vld [vmem:[#allocation2 + $0xa8] sm:$0xff]   ;;  %v9253_v4 = vcombine.low %v8168_v33, %v8178_v27  ;;  %v8392_v27 = vsel %vm7661_vm14, %v6004_v49, %v2146_v2 }
 0x140   : > { %6844 = vmatprep.subr.bf16.mxu1 %v8348_v34  ;;  %6764 = vmatprep.mubr.msk.bf16.mxu0 %vm1497_vm4, %v7129_v37  ;;  %v2142_v61 = vrot.slane %v7195_v11, 5  ;;  %v4548_v63 = vor.u32 %v4547_v50, %v8337_v16  ;;  %v4515_v34 = vrot.slane %v4514_v14, 4  ;;  %v4525_v37 = vrot.slane %v4524_v28, 4  ;;  %v2017_v2 = vld [vmem:[#allocation2 + $0xb4] sm:$0xe] }
 0x141   : > { %v2141_v43 = vrot.slane %v2139_v18, 4  ;;  %v4496_v50 = vsel %vm7363_vm8, %v8341_v15, %v8308_v0  ;;  %v4539_v14 = vrot.slane %v4538_v42, 4  ;;  %v4571_v28 = vrot.slane %v4569_v44, 4  ;;  %v8419_v49 = vld [vmem:[#allocation2 + $0x68] sm:$0x1] }
 0x142   : > { %v8377_v5 = vsel %vm7661_vm14, %v6003_v25, %v2139_v18  ;;  %v4549_v41 = vrot.slane %v4548_v63, 4  ;;  %v2153_v0 = vrot.slane %v7950_v20, 5  ;;  %v4506_v15 = vsel %vm7363_vm8, %v4501_v62, %v8335_v52  ;;  %v4405_v25 = vld [vmem:[#allocation2 + $0x60] sm:$0xf]  ;;  %v8411_v62 = vld [vmem:[#allocation2 + $0x64] sm:$0xf] }
 0x143   : > { %v4520_v42 = vsel %vm7363_vm8, %v4515_v34, %v8320_v29  ;;  %v8388_v33 = vsel %vm7661_vm14, %v2141_v43, %v2142_v61  ;;  %v4530_v20 = vsel %vm7363_vm8, %v4525_v37, %v4529_v21  ;;  %v8399_v52 = vsel %vm7661_vm14, %v2148_v9, %v2149_v53  ;;  %9255 = vst [vmem:[#allocation13_spill] sm:$0xff] %v8419_v49  ;;  %v4408_v53 = vld [vmem:[#allocation2 + $0x6c] sm:$0xf]  ;;  %v7132_v37 = vld [vmem:[#allocation2 + $0xb4] sm:$0xff]  }
 0x144   : > { %9254 = vst [vmem:[#allocation12_spill] sm:$0xff] %v8399_v52  ;;  %v4562_v18 = vor.u32 %v4561_v31, %v4558_v57  ;;  %v4575_v29 = vshll.u32 %v8367_v45, 16  ;;  %v4544_v43 = vsel %vm7363_vm8, %v4539_v14, %v8337_v16  ;;  %v4572_v61 = vor.u32 %v4571_v28, %v8369_v26  ;;  %v7133_v14 = vld [vmem:[#allocation2 + $0xc0] sm:$0xff]  }
 0x145   : > { %v6005_v34 = vrot.slane %v2016_v60, 9  ;;  %v2155_v48 = vrot.slane %v2153_v0, 4  ;;  %v2160_v44 = vrot.slane %v7964_v40, 5  ;;  %v4580_v11 = vshrl.u32 %v4405_v25, 16  ;;  %v4411_v60 = vld [vmem:[#allocation2 + $0x78] sm:$0xf] }
 0x146   : > { %6613 = vmatmul.mubr.msk.bf16.gmra.mrb[4].mxu1 %vm1497_vm4, %v9252_v55  ;;  %v4553_v55 = vrot.slane %v4551_v1, 5  ;;  %6765 = vmatmul.mubr.msk.bf16.gmra.mrb[20].mxu0 %vm1497_vm4, %v7130_v3  ;;  %v2156_v3 = vrot.slane %v7952_v46, 5  ;;  %v8413_v63 = vcombine.low %v4496_v50, %v4506_v15  ;;  %v8415_v1 = vcombine.low %v4520_v42, %v4530_v20  ;;  %v8451_v20 = vld [vmem:[#allocation2 + $0x7c] sm:$0xf] }
 0x147   : > { %6616 = vmatprep.mubr.msk.bf16.mxu1 %vm1497_vm4, %v9253_v4  ;;  %6768 = vmatprep.mubr.msk.bf16.mxu0 %vm1497_vm4, %v7131_v17  ;;  %v4583_v46 = vshll.u32 %v4405_v25, 16  ;;  %v8423_v57 = vrot.slane %v4562_v18, 4  ;;  %v8425_v40 = vrot.slane %v4575_v29, 5  ;;  %v6006_v31 = vrot.slane %v2017_v2, 9  ;;  %v8427_v17 = vld [vmem:[#allocation2 + $0x70] sm:$0xf] }
 0x148   : > { %v4554_v21 = vsel %vm7363_vm8, %v4549_v41, %v4553_v55  ;;  %9256 = vst [vmem:[#allocation14_spill] sm:$0xff] %v8427_v17  ;;  %v9257_v50 = vcombine.low %v8182_v47, %v8198_v13  ;;  %v8435_v4 = vrot.slane %v4572_v61, 4  ;;  %v8439_v41 = vsel %vm7661_vm14, %v6005_v34, %v2153_v0  ;;  %9259 = vst [vmem:[#allocation15_spill] sm:$0xff] %v8451_v20  ;;  %v8463_v34 = vld [vmem:[#allocation2 + $0x74] sm:$0x1] }
 0x149   : > { %v8433_v28 = vcombine.low %v4544_v43, %v4554_v21  ;;  %v2163_v55 = vrot.slane %v7966_v6, 5  ;;  %v9258_v15 = vcombine.low %v8190_v56, %v8204_v19  ;;  %v8448_v47 = vsel %vm7661_vm14, %v2155_v48, %v2156_v3  ;;  %9260 = vst [vmem:[#allocation16_spill] sm:$0xff] %v8463_v34 }
 0x14a   : > { %v2162_v13 = vrot.slane %v2160_v44, 4  ;;  %v4582_v42 = vrot.slane %v4580_v11, 4  ;;  %v4589_v25 = vshll.u32 %v8411_v62, 16  ;;  %v4585_v0 = vrot.slane %v4583_v46, 5  ;;  %v4417_v11 = vld [vmem:[#allocation2 + $0x90] sm:$0xf] }
 0x14b   : > { %v4593_v18 = vshrl.u32 %v8411_v62, 16  ;;  %v4599_v6 = vshll.u32 %v8419_v49, 16  ;;  %v4604_v29 = vshrl.u32 %v4408_v53, 16  ;;  %v4607_v19 = vshll.u32 %v4408_v53, 16 }
 0x14c   : > { %v4613_v43 = vshll.u32 %v8427_v17, 16  ;;  %v4617_v61 = vshrl.u32 %v8427_v17, 16  ;;  %v4628_v3 = vshrl.u32 %v4411_v60, 16  ;;  %v4631_v2 = vshll.u32 %v4411_v60, 16  ;;  %v7134_v60 = vld [vmem:[#allocation2 + $0xcc] sm:$0xff]  }
 0x14d   : > { %v4637_v21 = vshll.u32 %v8451_v20, 16  ;;  %v4641_v48 = vshrl.u32 %v8451_v20, 16  ;;  %v8473_v46 = vsel %vm7661_vm14, %v6006_v31, %v2160_v44  ;;  %v8477_v53 = vsel %vm7661_vm14, %v2162_v13, %v2163_v55  ;;  %v8488_v55 = vld [vmem:[#allocation2 + $0x94] sm:$0xf] }
 0x14e   : > { %6617 = vmatmul.mubr.msk.bf16.gmra.mrb[8].mxu1 %vm1497_vm4, %v9257_v50  ;;  %6769 = vmatmul.mubr.msk.bf16.gmra.mrb[24].mxu0 %vm1497_vm4, %v7132_v37  ;;  %v8479_v37 = vrot.slane %v4589_v25, 5  ;;  %v4414_v50 = vld [vmem:[#allocation2 + $0x84] sm:$0xf]  ;;  %v4595_v9 = vrot.slane %v4593_v18, 4  ;;  %v8483_v16 = vrot.slane %v4599_v6, 5  ;;  %v4606_v56 = vrot.slane %v4604_v29, 4 }
 0x14f   : > { %6620 = vmatprep.mubr.msk.bf16.mxu1 %vm1497_vm4, %v9258_v15  ;;  %6772 = vmatprep.mubr.msk.bf16.mxu0 %vm1497_vm4, %v7133_v14  ;;  %v8481_v14 = vld [vmem:[#allocation2 + $0x88] sm:$0xf]  ;;  %v4586_v15 = vor.u32 %v4585_v0, %v4582_v42  ;;  %v4609_v20 = vrot.slane %v4607_v19, 5  ;;  %v8485_v17 = vrot.slane %v4613_v43, 5  ;;  %v4619_v44 = vrot.slane %v4617_v61, 4  ;;  %9262 = vst [vmem:[#allocation18_spill] sm:$0xff] %v8488_v55 }
 0x150   : > { %9261 = vst [vmem:[#allocation17_spill] sm:$0xff] %v8481_v14  ;;  %v4623_v31 = vshll.u32 %v8463_v34, 16  ;;  %v9263_v13 = vcombine.low %v8216_v7, %v8229_v30  ;;  %v4630_v25 = vrot.slane %v4628_v3, 4  ;;  %v4633_v42 = vrot.slane %v4631_v2, 5  ;;  %v8500_v29 = vld [vmem:[#allocation2 + $0x80] sm:$0x1] }
 0x151   : > { %v8494_v0 = vrot.slane %v4637_v21, 5  ;;  %v4643_v18 = vrot.slane %v4641_v48, 4  ;;  %v9264_v6 = vcombine.low %v8233_v59, %v8237_v54  ;;  %9265 = vst [vmem:[#allocation19_spill] sm:$0xff] %v8500_v29  ;;  %v4652_v19 = vshrl.u32 %v4414_v50, 16 }
 0x152   : > { %v4655_v43 = vshll.u32 %v4414_v50, 16  ;;  %v4661_v61 = vshll.u32 %v8481_v14, 16  ;;  %v4665_v7 = vshrl.u32 %v8481_v14, 16  ;;  %v4676_v30 = vshrl.u32 %v4417_v11, 16 }
 0x153   : > { %v4685_v3 = vshll.u32 %v8488_v55, 16  ;;  %v4689_v2 = vshrl.u32 %v8488_v55, 16  ;;  %v8507_v21 = vrot.slane %v4586_v15, 4  ;;  %v4596_v59 = vor.u32 %v4595_v9, %v8479_v37  ;;  %v4420_v55 = vld [vmem:[#allocation2 + $0x9c] sm:$0xf] }
 0x154   : > { %v4610_v54 = vor.u32 %v4609_v20, %v4606_v56  ;;  %v8510_v48 = vrot.slane %v4623_v31, 5  ;;  %v4620_v50 = vor.u32 %v4619_v44, %v8485_v17  ;;  %v4647_v14 = vshll.u32 %v8500_v29, 16  ;;  %v8519_v9 = vld [vmem:[#allocation2 + $0xa0] sm:$0xf]  ;;  %v8521_v20 = vld [vmem:[#allocation2 + $0x8c] sm:$0x1] }
 0x155   : > { %v4654_v34 = vrot.slane %v4652_v19, 4  ;;  %v8517_v15 = vrot.slane %v4661_v61, 5  ;;  %v4667_v49 = vrot.slane %v4665_v7, 4  ;;  %v4678_v56 = vrot.slane %v4676_v30, 4 }
 0x156   : > { %6621 = vmatmul.mubr.msk.bf16.gmra.mrb[12].mxu1 %vm1497_vm4, %v9263_v13  ;;  %v4679_v13 = vshll.u32 %v4417_v11, 16  ;;  %6773 = vmatmul.mubr.msk.bf16.gmra.mrb[28].mxu0 %vm1497_vm4, %v7134_v60  ;;  %v4644_v11 = vor.u32 %v4643_v18, %v8494_v0  ;;  %v4657_v60 = vrot.slane %v4655_v43, 5  ;;  %v4691_v44 = vrot.slane %v4689_v2, 4  ;;  %v8525_v18 = vld [vmem:[#allocation2 + $0x98] sm:$0x1] }
 0x157   : > { %6624 = vmatprep.mubr.msk.bf16.mxu1 %vm1497_vm4, %v9264_v6  ;;  %6778 = vmatprep.mubr.msk.bf16.mxu0 %vm1497_vm4, %v8314_v8  ;;  %v4634_v6 = vor.u32 %v4633_v42, %v4630_v25  ;;  %v8523_v8 = vrot.slane %v4685_v3, 5  ;;  %v4597_v25 = vrot.slane %v4596_v59, 4  ;;  %v4611_v42 = vrot.slane %v4610_v54, 4 }
 0x158   : > { %v4681_v31 = vrot.slane %v4679_v13, 5  ;;  %v4700_v29 = vshrl.u32 %v4420_v55, 16  ;;  %v4703_v52 = vshll.u32 %v4420_v55, 16  ;;  %v9266_v19 = vcombine.low %v8241_v12, %v8246_v22 }
 0x159   : > { %v4621_v43 = vrot.slane %v4620_v50, 4  ;;  %v4649_v61 = vrot.slane %v4647_v14, 5  ;;  %v4709_v7 = vshll.u32 %v8519_v9, 16  ;;  %v4713_v30 = vshrl.u32 %v8519_v9, 16 }
 0x15a   : > { %v9267_v13 = vcombine.low %v8272_v35, %v8285_v51  ;;  %v4635_v3 = vrot.slane %v4634_v6, 4  ;;  %v4645_v2 = vrot.slane %v4644_v11, 4  ;;  %v4658_v59 = vor.u32 %v4657_v60, %v4654_v34  ;;  %v8572_v6 = vld [vmem:[#allocation2 + $0xac] sm:$0xf] }
 0x15b   : > { %v4671_v55 = vshll.u32 %v8521_v20, 16  ;;  %v4668_v12 = vor.u32 %v4667_v49, %v8517_v15  ;;  %v4682_v22 = vor.u32 %v4681_v31, %v4678_v56  ;;  %v4692_v54 = vor.u32 %v4691_v44, %v8523_v8 }
 0x15c   : > { %v4695_v14 = vshll.u32 %v8525_v18, 16  ;;  %v4592_v35 = vsel %vm7363_vm8, %v8507_v21, %v8479_v37  ;;  %v4602_v51 = vsel %vm7363_vm8, %v4597_v25, %v8483_v16  ;;  %v4702_v34 = vrot.slane %v4700_v29, 4  ;;  %v8559_v37 = vld [vmem:[#allocation2 + $0xa4] sm:$0x1]  ;;  %v4423_v29 = vld [vmem:[#allocation2 + $0xa8] sm:$0xf] }
 0x15d   : > { %v4705_v50 = vrot.slane %v4703_v52, 5  ;;  %v4626_v49 = vsel %vm7363_vm8, %v4621_v43, %v8510_v48  ;;  %v8561_v21 = vrot.slane %v4709_v7, 5  ;;  %v4715_v16 = vrot.slane %v4713_v30, 4  ;;  %v5120_v30 = vld [vmem:[#allocation2 + $0x48] sm:$0xe] }
 0x15e   : > { %6625 = vmatmul.mubr.msk.bf16.gmra.mrb[16].mxu1 %vm1497_vm4, %v9266_v19  ;;  %6779 = vmatmul.mubr.msk.bf16.vlgmr.msra.gmra.mrb[0].mxu0 %vm1497_vm4, %v8316_v10  ;;  %v4616_v10 = vsel %vm7363_vm8, %v4611_v42, %v8485_v17  ;;  %v4650_v52 = vsel %vm7363_vm8, %v4645_v2, %v4649_v61  ;;  %v8570_v17 = vrot.slane %v4671_v55, 5  ;;  %v8574_v48 = vrot.slane %v4668_v12, 4  ;;  %v5121_v2 = vld [vmem:[#allocation2 + $0x54] sm:$0xe] }
 0x15f   : > { %6628 = vmatprep.mubr.msk.bf16.mxu1 %vm1497_vm4, %v9267_v13  ;;  %6811 = vmatpush3.bf16.msra.mxu0 %v8130_v36  ;;  %v4640_v36 = vsel %vm7363_vm8, %v4635_v3, %v8494_v0  ;;  %v8576_v11 = vrot.slane %v4682_v22, 4  ;;  %v8578_v60 = vrot.slane %v4692_v54, 4  ;;  %v8580_v56 = vrot.slane %v4695_v14, 5  ;;  %v8627_v3 = vld [vmem:[#allocation2 + $0xb0] sm:$0x1] }
 0x160   : > { %6782 = vmatprep.mubr.msk.bf16.mxu0 %vm1497_vm4, %v8413_v63  ;;  %v8568_v63 = vrot.slane %v4658_v59, 4  ;;  %v6021_v0 = vcombine.low %v8439_v41, %v8448_v47  ;;  %v4706_v31 = vor.u32 %v4705_v50, %v4702_v34  ;;  %v4719_v44 = vshll.u32 %v8559_v37, 16  ;;  %v5122_v54 = vld [vmem:[#allocation2 + $0x60] sm:$0xe]  ;;  %v4426_v50 = vld [vmem:[#allocation2 + $0xb4] sm:$0xf] }
 0x161   : > { %v4724_v25 = vshrl.u32 %v4423_v29, 16  ;;  %v9268_v42 = vcombine.low %v8298_v39, %v8305_v38  ;;  %v9269_v19 = vsel %vm7363_vm8, %v8435_v4, %v8425_v40  ;;  %v9270_v43 = vsel %vm7363_vm8, %v8423_v57, %v8369_v26 }
 0x162   : > { %v6193_v41 = vcombine.low %v9270_v43, %v9269_v19  ;;  %v4716_v47 = vor.u32 %v4715_v16, %v8561_v21  ;;  %v4727_v61 = vshll.u32 %v4423_v29, 16  ;;  %v4733_v7 = vshll.u32 %v8572_v6, 16  ;;  %v9272_v16 = vld [vmem:[#allocation10_spill] sm:$0xff] }
 0x163   : > { %v9271_v39 = vcombine.low %v8377_v5, %v8388_v33  ;;  %v6022_v38 = vcombine.low %v8473_v46, %v8477_v53  ;;  %v6194_v40 = vcombine.low %v4592_v35, %v4602_v51  ;;  %v8607_v4 = vcombine.low %v4616_v10, %v4626_v49 }
 0x164   : > { %v8609_v13 = vcombine.low %v4640_v36, %v4650_v52  ;;  %v4664_v26 = vsel %vm7363_vm8, %v8568_v63, %v8517_v15  ;;  %v4674_v5 = vsel %vm7363_vm8, %v8574_v48, %v8570_v17  ;;  %v4688_v33 = vsel %vm7363_vm8, %v8576_v11, %v8523_v8  ;;  %v4432_v63 = vld [vmem:[#allocation2 + $0xcc] sm:$0xf] }
 0x165   : > { %v4698_v57 = vsel %vm7363_vm8, %v8578_v60, %v8580_v56  ;;  %v8631_v59 = vrot.slane %v4706_v31, 4  ;;  %v8633_v55 = vrot.slane %v4719_v44, 5  ;;  %v4726_v12 = vrot.slane %v4724_v25, 4  ;;  %v5123_v44 = vld [vmem:[#allocation2 + $0x6c] sm:$0xe] }
 0x166   : > { %6629 = vmatmul.mubr.msk.bf16.gmra.mrb[20].mxu1 %vm1497_vm4, %v9268_v42  ;;  %6783 = vmatmul.mubr.msk.bf16.gmra.mrb[4].mxu0 %vm1497_vm4, %v8415_v1  ;;  %v6225_v22 = vrot.slane %v5120_v30, 9  ;;  %v8637_v14 = vrot.slane %v4716_v47, 4  ;;  %v4729_v35 = vrot.slane %v4727_v61, 5  ;;  %v8639_v51 = vrot.slane %v4733_v7, 5  ;;  %v9275_v61 = vld [vmem:[#allocation13_spill] sm:$0xff] }
 0x167   : > { %6632 = vmatprep.mubr.msk.bf16.mxu1 %vm1497_vm4, %v9271_v39  ;;  %6786 = vmatprep.mubr.msk.bf16.mxu0 %vm1497_vm4, %v8433_v28  ;;  %v4737_v34 = vshrl.u32 %v8572_v6, 16  ;;  %v5210_v1 = vrot.slane %v8291_v24, 5  ;;  %v5213_v10 = vrot.slane %v8343_v58, 5  ;;  %v6226_v49 = vrot.slane %v5121_v2, 9  ;;  %v9273_v58 = vld [vmem:[#allocation12_spill] sm:$0xff] }
 0x168   : > { %v5217_v29 = vrot.slane %v9272_v16, 5  ;;  %v4743_v36 = vshll.u32 %v8627_v3, 16  ;;  %v5220_v52 = vrot.slane %v8367_v45, 5  ;;  %v6227_v28 = vrot.slane %v5122_v54, 9  ;;  %v8666_v30 = vld [vmem:[#allocation2 + $0xb8] sm:$0xf] }
 0x169   : > { %v5224_v31 = vrot.slane %v8411_v62, 5  ;;  %v4748_v25 = vshrl.u32 %v4426_v50, 16  ;;  %v8650_v42 = vsel %vm7661_vm14, %v6225_v22, %v5210_v1  ;;  %v5212_v19 = vrot.slane %v5210_v1, 4  ;;  %v9277_v54 = vld [vmem:[#allocation16_spill] sm:$0xff] }
 0x16a   : > { %v8654_v24 = vsel %vm7661_vm14, %v6226_v49, %v5217_v29  ;;  %v9274_v43 = vcombine.low %v8392_v27, %v9273_v58  ;;  %v5219_v45 = vrot.slane %v5217_v29, 4  ;;  %v5227_v7 = vrot.slane %v9275_v61, 5  ;;  %v9276_v27 = vld [vmem:[#allocation14_spill] sm:$0xff]  ;;  %v5124_v61 = vld [vmem:[#allocation2 + $0x78] sm:$0xe] }
 0x16b   : > { %v8662_v62 = vsel %vm7661_vm14, %v6227_v28, %v5224_v31  ;;  %v5226_v47 = vrot.slane %v5224_v31, 4  ;;  %v8670_v39 = vsel %vm7661_vm14, %v5212_v19, %v5213_v10  ;;  %v6228_v2 = vrot.slane %v5123_v44, 9  ;;  %v2850_v28 = vld [vmem:[#allocation2 + $0x78] sm:$0xf]  ;;  %v7136_v58 = vld [vmem:[#allocation2 + $0xc] sm:$0xff]  }
 0x16c   : > { %v5231_v22 = vrot.slane %v9276_v27, 5  ;;  %v5234_v1 = vrot.slane %v9277_v54, 5  ;;  %v4730_v49 = vor.u32 %v4729_v35, %v4726_v12  ;;  %v6241_v16 = vcombine.low %v8650_v42, %v8670_v39  ;;  %v9278_v27 = vld [vmem:[#allocation4_spill] sm:$0xff]  ;;  %v7205_v42 = vld [vmem:[#allocation2 + $0x94] sm:$0xf] }
 0x16d   : > { %v8678_v29 = vsel %vm7661_vm14, %v5219_v45, %v5220_v52  ;;  %v4712_v52 = vsel %vm7363_vm8, %v8631_v59, %v8561_v21  ;;  %v4739_v44 = vrot.slane %v4737_v34, 4  ;;  %v4757_v19 = vshll.u32 %v8666_v30, 16  ;;  %v9281_v34 = vld [vmem:[#allocation19_spill] sm:$0xff] }
 0x16e   : > { %6633 = vmatmul.mubr.msk.bf16.gmra.mrb[24].mxu1 %vm1497_vm4, %v9274_v43  ;;  %6787 = vmatmul.mubr.msk.bf16.gmra.mrb[8].mxu0 %vm1497_vm4, %v6193_v41  ;;  %v8691_v35 = vsel %vm7661_vm14, %v6228_v2, %v5231_v22  ;;  %v5233_v31 = vrot.slane %v5231_v22, 4  ;;  %v4751_v41 = vshll.u32 %v4426_v50, 16  ;;  %v4722_v43 = vsel %vm7363_vm8, %v8637_v14, %v8633_v55  ;;  %v5125_v50 = vld [vmem:[#allocation2 + $0x84] sm:$0xe]  ;;  %v9279_v22 = vld [vmem:[#allocation5_spill] sm:$0xff] }
 0x16f   : > { %6636 = vmatprep.mubr.msk.bf16.mxu1 %vm1497_vm4, %v6021_v0  ;;  %v8682_v0 = vsel %vm7661_vm14, %v5226_v47, %v5227_v7  ;;  %6790 = vmatprep.mubr.msk.bf16.mxu0 %vm1497_vm4, %v6194_v40  ;;  %v3088_v40 = vshrl.u32 %v2850_v28, 16  ;;  %v3091_v47 = vshll.u32 %v2850_v28, 16  ;;  %v8707_v7 = vrot.slane %v4743_v36, 5 }
 0x170   : > { %v8705_v45 = vsel %vm7661_vm14, %v5233_v31, %v5234_v1  ;;  %v8709_v21 = vrot.slane %v4748_v25, 4  ;;  %v4761_v59 = vshrl.u32 %v8666_v30, 16  ;;  %v8714_v2 = vrot.slane %v4730_v49, 4  ;;  %v4429_v1 = vld [vmem:[#allocation2 + $0xc0] sm:$0xf]  ;;  %v9280_v31 = vld [vmem:[#allocation15_spill] sm:$0xff] }
 0x171   : > { %v3090_v55 = vrot.slane %v3088_v40, 4  ;;  %v3093_v14 = vrot.slane %v3091_v47, 5  ;;  %v3110_v54 = vsel %vm7363_vm8, %v9279_v22, %v9278_v27  ;;  %v4740_v36 = vor.u32 %v4739_v44, %v8639_v51  ;;  %v8727_v40 = vld [vmem:[#allocation2 + $0xc4] sm:$0xf]  ;;  %v9282_v22 = vld [vmem:[#allocation17_spill] sm:$0xff] }
 0x172   : > { %v4753_v25 = vrot.slane %v4751_v41, 5  ;;  %v6229_v28 = vrot.slane %v5124_v61, 9  ;;  %v5238_v49 = vrot.slane %v9280_v31, 5  ;;  %v5241_v12 = vrot.slane %v9281_v34, 5  ;;  %v8739_v41 = vld [vmem:[#allocation2 + $0xbc] sm:$0x1] }
 0x173   : > { %v3094_v47 = vor.u32 %v3093_v14, %v3090_v55  ;;  %v6230_v27 = vrot.slane %v5125_v50, 9  ;;  %v5245_v10 = vrot.slane %v9282_v22, 5  ;;  %v8731_v46 = vrot.slane %v4757_v19, 5  ;;  %v7137_v50 = vld [vmem:[#allocation2 + $0x18] sm:$0xff]  }
 0x174   : > { %v4763_v53 = vrot.slane %v4761_v59, 4  ;;  %v5240_v44 = vrot.slane %v5238_v49, 4  ;;  %v5248_v19 = vrot.slane %v8521_v20, 5  ;;  %v4772_v59 = vshrl.u32 %v4429_v1, 16 }
 0x175   : > { %v8743_v61 = vsel %vm7661_vm14, %v6230_v27, %v5245_v10  ;;  %v5247_v34 = vrot.slane %v5245_v10, 4  ;;  %v4775_v55 = vshll.u32 %v4429_v1, 16  ;;  %v4781_v14 = vshll.u32 %v8727_v40, 16 }
 0x176   : > { %6637 = vmatmul.mubr.msk.bf16.gmra.mrb[28].mxu1 %vm1497_vm4, %v6022_v38  ;;  %v8735_v38 = vsel %vm7661_vm14, %v6229_v28, %v5238_v49  ;;  %6791 = vmatmul.mubr.msk.bf16.gmra.mrb[12].mxu0 %vm1497_vm4, %v8607_v4  ;;  %v8751_v4 = vsel %vm7661_vm14, %v5240_v44, %v5241_v12  ;;  %v7138_v28 = vld [vmem:[#allocation2 + $0x24] sm:$0xff]   ;;  %v4785_v31 = vshrl.u32 %v8727_v40, 16  ;;  %v9283_v49 = vld [vmem:[#allocation3_spill] sm:$0xff]  ;;  %v4741_v1 = vrot.slane %v4740_v36, 4 }
 0x177   : > { %6642 = vmatprep.mubr.msk.bf16.mxu1 %vm1497_vm4, %v7136_v58  ;;  %v3095_v58 = vrot.slane %v3094_v47, 4  ;;  %6794 = vmatprep.mubr.msk.bf16.mxu0 %vm1497_vm4, %v8609_v13  ;;  %v6245_v20 = vcombine.low %v8735_v38, %v8751_v4  ;;  %v8761_v13 = vsel %vm7661_vm14, %v5247_v34, %v5248_v19  ;;  %v4767_v47 = vshll.u32 %v8739_v41, 16  ;;  %v8779_v44 = vld [vmem:[#allocation2 + $0xc8] sm:$0x1]  ;;  %v5127_v34 = vld [vmem:[#allocation2 + $0x9c] sm:$0xe] }
 0x178   : > { %v6246_v12 = vcombine.low %v8743_v61, %v8761_v13  ;;  %v6197_v22 = vcombine.low %v4664_v26, %v4674_v5  ;;  %v4754_v36 = vor.u32 %v4753_v25, %v8709_v21  ;;  %v6198_v17 = vcombine.low %v4688_v33, %v4698_v57  ;;  %v5126_v26 = vld [vmem:[#allocation2 + $0x90] sm:$0xe]  ;;  %v9284_v5 = vld [vmem:[#allocation11_spill] sm:$0xff]  ;;  %v7211_v38 = vld [vmem:[#allocation2 + $0xb0] sm:$0x1] }
 0x179   : > { %v3100_v10 = vsel %vm7363_vm8, %v3095_v58, %v9283_v49  ;;  %v6199_v48 = vcombine.low %v4712_v52, %v4722_v43  ;;  %v4736_v15 = vsel %vm7363_vm8, %v8714_v2, %v8639_v51  ;;  %v4774_v21 = vrot.slane %v4772_v59, 4  ;;  %v8800_v25 = vld [vmem:[#allocation2 + $0xd0] sm:$0xf] }
 0x17a   : > { %v8764_v27 = vcombine.low %v3100_v10, %v3110_v54  ;;  %v4777_v60 = vrot.slane %v4775_v55, 5  ;;  %v8798_v56 = vrot.slane %v4781_v14, 5  ;;  %v4787_v54 = vrot.slane %v4785_v31, 4  ;;  %v9285_v2 = vld [vmem:[#allocation18_spill] sm:$0xff]  ;;  %v7140_v55 = vld [vmem:[#allocation2 + $0x3c] sm:$0xff]  }
 0x17b   : > { %v4746_v8 = vsel %vm7363_vm8, %v4741_v1, %v8707_v7  ;;  %v4764_v11 = vor.u32 %v4763_v53, %v8731_v46  ;;  %v4769_v33 = vrot.slane %v4767_v47, 5  ;;  %v4791_v57 = vshll.u32 %v8779_v44, 16  ;;  %v7139_v19 = vld [vmem:[#allocation2 + $0x30] sm:$0xff]  }
 0x17c   : > { %v4755_v51 = vrot.slane %v4754_v36, 4  ;;  %v4796_v52 = vshrl.u32 %v4432_v63, 16  ;;  %v6231_v43 = vrot.slane %v5126_v26, 9  ;;  %v5252_v58 = vrot.slane %v9285_v2, 5  ;;  %v8825_v26 = vld [vmem:[#allocation2 + $0xd4] sm:$0x1] }
 0x17d   : > { %v4805_v59 = vshll.u32 %v8800_v25, 16  ;;  %v4809_v7 = vshrl.u32 %v8800_v25, 16  ;;  %v5255_v53 = vrot.slane %v8525_v18, 5  ;;  %v4778_v14 = vor.u32 %v4777_v60, %v4774_v21  ;;  %v7141_v2 = vld [vmem:[#allocation2 + $0x48] sm:$0xff]  }
 0x17e   : > { %6643 = vmatmul.mubr.msk.bf16.vlgmr.msra.gmra.mrb[0].mxu1 %vm1497_vm4, %v7137_v50  ;;  %6795 = vmatmul.mubr.msk.bf16.gmra.mrb[16].mxu0 %vm1497_vm4, %v6197_v22  ;;  %v4799_v50 = vshll.u32 %v4432_v63, 16  ;;  %v8816_v31 = vsel %vm7661_vm14, %v6231_v43, %v5252_v58  ;;  %v5254_v49 = vrot.slane %v5252_v58, 4  ;;  %v6200_v10 = vcombine.low %v4736_v15, %v4746_v8 }
 0x17f   : > { %6845 = vmatpush3.bf16.msra.mxu1 %v9284_v5  ;;  %6646 = vmatprep.mubr.msk.bf16.mxu1 %vm1497_vm4, %v7138_v28  ;;  %v4788_v28 = vor.u32 %v4787_v54, %v8798_v56  ;;  %v4765_v1 = vrot.slane %v4764_v11, 4  ;;  %v4793_v47 = vrot.slane %v4791_v57, 5  ;;  %v6232_v22 = vrot.slane %v5127_v34, 9 }
 0x180   : > { %6798 = vmatprep.mubr.msk.bf16.mxu0 %vm1497_vm4, %v6198_v17  ;;  %v4798_v36 = vrot.slane %v4796_v52, 4  ;;  %v8820_v17 = vsel %vm7661_vm14, %v5254_v49, %v5255_v53  ;;  %v5259_v18 = vrot.slane %v8519_v9, 5  ;;  %v5262_v63 = vrot.slane %v8559_v37, 5 }
 0x181   : > { %v4801_v5 = vrot.slane %v4799_v50, 5  ;;  %v8827_v21 = vrot.slane %v4805_v59, 5  ;;  %v4811_v15 = vrot.slane %v4809_v7, 4  ;;  %v6247_v60 = vcombine.low %v8816_v31, %v8820_v17  ;;  %v7197_v59 = vld [vmem:[#allocation2 + $0x1c] sm:$0xf] }
 0x182   : > { %v4779_v54 = vrot.slane %v4778_v14, 4  ;;  %v4789_v8 = vrot.slane %v4788_v28, 4  ;;  %v8834_v9 = vsel %vm7661_vm14, %v6232_v22, %v5259_v18  ;;  %v5261_v37 = vrot.slane %v5259_v18, 4  ;;  %v7198_v18 = vld [vmem:[#allocation2 + $0x20] sm:$0x1] }
 0x183   : > { %v4760_v11 = vsel %vm7363_vm8, %v4755_v51, %v8731_v46  ;;  %v4770_v57 = vsel %vm7363_vm8, %v4765_v1, %v4769_v33  ;;  %v4815_v52 = vshll.u32 %v8825_v26, 16  ;;  %v4802_v58 = vor.u32 %v4801_v5, %v4798_v36  ;;  %v5128_v46 = vld [vmem:[#allocation2 + $0xa8] sm:$0xe]  ;;  %v7142_v51 = vld [vmem:[#allocation2 + $0x54] sm:$0xff]   ;;  %v7214_v17 = vld [vmem:[#allocation2 + $0xc8] sm:$0x1] }
 0x184   : > { %v8845_v43 = vsel %vm7661_vm14, %v5261_v37, %v5262_v63  ;;  %v4812_v34 = vor.u32 %v4811_v15, %v8827_v21  ;;  %v4784_v33 = vsel %vm7363_vm8, %v4779_v54, %v8798_v56  ;;  %v4794_v50 = vsel %vm7363_vm8, %v4789_v8, %v4793_v47  ;;  %v7199_v54 = vld [vmem:[#allocation2 + $0x28] sm:$0xf]  ;;  %v5117_v37 = vld [vmem:[#allocation2 + $0x24] sm:$0xe] }
 0x185   : > { %v5182_v7 = vrot.slane %v7197_v59, 5  ;;  %v6201_v53 = vcombine.low %v4760_v11, %v4770_v57  ;;  %v6233_v28 = vrot.slane %v5128_v46, 9  ;;  %v5266_v49 = vrot.slane %v8572_v6, 5  ;;  %v9286_v11 = vld [vmem:[#allocation6_spill] sm:$0xff] }
 0x186   : > { %6647 = vmatmul.mubr.msk.bf16.gmra.mrb[4].mxu1 %vm1497_vm4, %v7139_v19  ;;  %6799 = vmatmul.mubr.msk.bf16.gmra.mrb[20].mxu0 %vm1497_vm4, %v6199_v48  ;;  %v5116_v48 = vld [vmem:[#allocation2 + $0x18] sm:$0xe]  ;;  %v6248_v19 = vcombine.low %v8834_v9, %v8845_v43  ;;  %v6202_v1 = vcombine.low %v4784_v33, %v4794_v50  ;;  %v4803_v22 = vrot.slane %v4802_v58, 4  ;;  %v4813_v36 = vrot.slane %v4812_v34, 4  ;;  %v7143_v58 = vld [vmem:[#allocation2 + $0x60] sm:$0xff]   ;;  %v7144_v33 = vld [vmem:[#allocation2 + $0x6c] sm:$0xff]  }
 0x187   : > { %6650 = vmatprep.mubr.msk.bf16.mxu1 %vm1497_vm4, %v7140_v55  ;;  %6802 = vmatprep.mubr.msk.bf16.mxu0 %vm1497_vm4, %v6200_v10  ;;  %v4817_v55 = vrot.slane %v4815_v52, 5  ;;  %v6221_v14 = vrot.slane %v5116_v48, 9  ;;  %v5129_v10 = vld [vmem:[#allocation2 + $0xb4] sm:$0xe]  ;;  %v5185_v63 = vrot.slane %v7198_v18, 5  ;;  %v5184_v56 = vrot.slane %v5182_v7, 4 }
 0x188   : > { %v8861_v47 = vsel %vm7661_vm14, %v6233_v28, %v5266_v49  ;;  %v5268_v5 = vrot.slane %v5266_v49, 4  ;;  %v5269_v15 = vrot.slane %v8627_v3, 5  ;;  %v5189_v6 = vrot.slane %v7199_v54, 5  ;;  %v5118_v48 = vld [vmem:[#allocation2 + $0x30] sm:$0xe] }
 0x189   : > { %v6234_v8 = vrot.slane %v5129_v10, 9  ;;  %v5196_v57 = vrot.slane %v9286_v11, 5  ;;  %v4808_v3 = vsel %vm7363_vm8, %v4803_v22, %v8827_v21  ;;  %v4818_v34 = vsel %vm7363_vm8, %v4813_v36, %v4817_v55  ;;  %v7200_v28 = vld [vmem:[#allocation2 + $0x2c] sm:$0x1]  ;;  %v5130_v22 = vld [vmem:[#allocation2 + $0xc0] sm:$0xe] }
 0x18a   : > { %v8868_v52 = vsel %vm7661_vm14, %v5268_v5, %v5269_v15  ;;  %v5186_v50 = vsel %vm7661_vm14, %v5184_v56, %v5185_v63  ;;  %v5191_v55 = vrot.slane %v5189_v6, 4  ;;  %v5192_v49 = vrot.slane %v7200_v28, 5  ;;  %v9287_v36 = vld [vmem:[#allocation8_spill] sm:$0xff]  ;;  %v5119_v63 = vld [vmem:[#allocation2 + $0x3c] sm:$0xe] }
 0x18b   : > { %v6249_v46 = vcombine.low %v8861_v47, %v8868_v52  ;;  %v6203_v10 = vcombine.low %v4808_v3, %v4818_v34  ;;  %v5199_v18 = vrot.slane %v9287_v36, 5  ;;  %v2847_v54 = vld [vmem:[#allocation2 + $0x6c] sm:$0xf]  ;;  %v9288_v34 = vld [vmem:[#allocation7_spill] sm:$0xff]  ;;  %v3145_v39 = vshll.u32 %v7205_v42, 16 }
 0x18c   : > { %v5193_v15 = vsel %vm7661_vm14, %v5191_v55, %v5192_v49  ;;  %v3203_v4 = vshll.u32 %v7211_v38, 16 }
 0x18e   : > { %6651 = vmatmul.mubr.msk.bf16.gmra.mrb[8].mxu1 %vm1497_vm4, %v7141_v2  ;;  %6803 = vmatmul.mubr.msk.bf16.gmra.mrb[24].mxu0 %vm1497_vm4, %v6201_v53  ;;  %v5273_v2 = vrot.slane %v8666_v30, 5  ;;  %v5183_v30 = vsel %vm7661_vm14, %v6221_v14, %v5182_v7  ;;  %v6222_v53 = vrot.slane %v5117_v37, 9  ;;  %v5198_v14 = vrot.slane %v5196_v57, 4  ;;  %v5131_v37 = vld [vmem:[#allocation2 + $0xcc] sm:$0xe] }
 0x18f   : > { %6654 = vmatprep.mubr.msk.bf16.mxu1 %vm1497_vm4, %v7142_v51  ;;  %6806 = vmatprep.mubr.msk.bf16.mxu0 %vm1497_vm4, %v6202_v1  ;;  %v5276_v51 = vrot.slane %v8739_v41, 5  ;;  %v6223_v1 = vrot.slane %v5118_v48, 9  ;;  %v6237_v7 = vcombine.low %v5183_v30, %v5186_v50  ;;  %v5280_v48 = vrot.slane %v8727_v40, 5  ;;  %v7146_v30 = vld [vmem:[#allocation2 + $0x84] sm:$0xff]  }
 0x190   : > { %v8886_v59 = vsel %vm7661_vm14, %v6234_v8, %v5273_v2  ;;  %v5275_v21 = vrot.slane %v5273_v2, 4  ;;  %v5190_v5 = vsel %vm7661_vm14, %v6222_v53, %v5189_v6  ;;  %v6235_v8 = vrot.slane %v5130_v22, 9  ;;  %v9289_v50 = vld [vmem:[#allocation9_spill] sm:$0xff]  ;;  %v7201_v22 = vld [vmem:[#allocation2 + $0x70] sm:$0xf] }
 0x191   : > { %v5197_v11 = vsel %vm7661_vm14, %v6223_v1, %v5196_v57  ;;  %v6224_v2 = vrot.slane %v5119_v63, 9  ;;  %v5200_v3 = vsel %vm7661_vm14, %v5198_v14, %v5199_v18  ;;  %v5203_v6 = vrot.slane %v9288_v34, 5  ;;  %v7148_v34 = vld [vmem:[#allocation2 + $0x9c] sm:$0xff]  }
 0x192   : > { %v8890_v41 = vsel %vm7661_vm14, %v5275_v21, %v5276_v51  ;;  %v5283_v51 = vrot.slane %v8779_v44, 5  ;;  %v5206_v21 = vrot.slane %v9289_v50, 5  ;;  %v3064_v53 = vshrl.u32 %v2847_v54, 16 }
 0x193   : > { %v6250_v56 = vcombine.low %v8886_v59, %v8890_v41  ;;  %v6236_v55 = vrot.slane %v5131_v37, 9  ;;  %v3067_v57 = vshll.u32 %v2847_v54, 16  ;;  %v8913_v28 = vsel %vm7661_vm14, %v6235_v8, %v5280_v48 }
 0x194   : > { %v5282_v49 = vrot.slane %v5280_v48, 4  ;;  %v6239_v1 = vcombine.low %v5197_v11, %v5200_v3  ;;  %v3077_v40 = vshrl.u32 %v7201_v22, 16  ;;  %v5290_v44 = vrot.slane %v8825_v26, 5  ;;  %v7147_v11 = vld [vmem:[#allocation2 + $0x90] sm:$0xff]   ;;  %v2853_v48 = vld [vmem:[#allocation2 + $0x84] sm:$0xf] }
 0x195   : > { %v5205_v14 = vrot.slane %v5203_v6, 4 }
 0x196   : > { %6655 = vmatmul.mubr.msk.bf16.gmra.mrb[12].mxu1 %vm1497_vm4, %v7143_v58  ;;  %6807 = vmatmul.mubr.msk.bf16.gmra.mrb[28].mxu0 %vm1497_vm4, %v6203_v10  ;;  %v7145_v58 = vld [vmem:[#allocation2 + $0x78] sm:$0xff]   ;;  %v5287_v10 = vrot.slane %v8800_v25, 5  ;;  %v8920_v36 = vsel %vm7661_vm14, %v5282_v49, %v5283_v51  ;;  %v3079_v8 = vrot.slane %v3077_v40, 4  ;;  %v7203_v49 = vld [vmem:[#allocation2 + $0x88] sm:$0xf] }
 0x197   : > { %6658 = vmatprep.mubr.msk.bf16.mxu1 %vm1497_vm4, %v7144_v33  ;;  %6812 = vmatprep.mubr.msk.bf16.mxu0 %vm1497_vm4, %v6237_v7  ;;  %v6238_v33 = vcombine.low %v5190_v5, %v5193_v15  ;;  %v3073_v7 = vshll.u32 %v7201_v22, 16  ;;  %v6251_v25 = vcombine.low %v8913_v28, %v8920_v36  ;;  %v3066_v5 = vrot.slane %v3064_v53, 4  ;;  %v7149_v22 = vld [vmem:[#allocation2 + $0xa8] sm:$0xff]  }
 0x198   : > { %v8924_v18 = vsel %vm7661_vm14, %v6236_v55, %v5287_v10  ;;  %v5289_v63 = vrot.slane %v5287_v10, 4  ;;  %v3069_v15 = vrot.slane %v3067_v57, 5  ;;  %v5207_v3 = vsel %vm7661_vm14, %v5205_v14, %v5206_v21 }
 0x199   : > { %v3075_v54 = vrot.slane %v3073_v7, 5  ;;  %v3112_v55 = vshrl.u32 %v2853_v48, 16  ;;  %v3115_v57 = vshll.u32 %v2853_v48, 16  ;;  %v3121_v10 = vshll.u32 %v7203_v49, 16  ;;  %v7150_v7 = vld [vmem:[#allocation2 + $0xb4] sm:$0xff]  }
 0x19a   : > { %v8931_v26 = vsel %vm7661_vm14, %v5289_v63, %v5290_v44  ;;  %v3070_v51 = vor.u32 %v3069_v15, %v3066_v5 }
 0x19b   : > { %v6252_v37 = vcombine.low %v8924_v18, %v8931_v26  ;;  %v3080_v50 = vor.u32 %v3079_v8, %v3075_v54  ;;  %v3114_v40 = vrot.slane %v3112_v55, 4  ;;  %v3117_v14 = vrot.slane %v3115_v57, 5  ;;  %v2859_v8 = vld [vmem:[#allocation2 + $0x9c] sm:$0xf] }
 0x19c   : > { %v8948_v63 = vrot.slane %v3121_v10, 5  ;;  %v3160_v48 = vshrl.u32 %v2859_v8, 16  ;;  %v7151_v10 = vld [vmem:[#allocation2 + $0xc0] sm:$0xff]  }
 0x19d   : > { %v3081_v23 = vrot.slane %v3080_v50, 4 }
 0x19e   : > { %6659 = vmatmul.mubr.msk.bf16.gmra.mrb[16].mxu1 %vm1497_vm4, %v7145_v58  ;;  %6813 = vmatmul.mubr.msk.bf16.vlgmr.msra.gmra.mrb[0].mxu0 %vm1497_vm4, %v6238_v33  ;;  %v5204_v58 = vsel %vm7661_vm14, %v6224_v2, %v5203_v6  ;;  %v7202_v33 = vld [vmem:[#allocation2 + $0x74] sm:$0x1]  ;;  %v2856_v2 = vld [vmem:[#allocation2 + $0x90] sm:$0xf]  ;;  %v3071_v6 = vrot.slane %v3070_v51, 4  ;;  %v3163_v51 = vshll.u32 %v2859_v8, 16 }
 0x19f   : > { %6662 = vmatprep.mubr.msk.bf16.mxu1 %vm1497_vm4, %v7146_v30  ;;  %6816 = vmatprep.mubr.msk.bf16.mxu0 %vm1497_vm4, %v6239_v1  ;;  %v6240_v30 = vcombine.low %v5204_v58, %v5207_v3  ;;  %v3083_v53 = vshll.u32 %v7202_v33, 16  ;;  %v3125_v1 = vshrl.u32 %v7203_v49, 16  ;;  %v3136_v44 = vshrl.u32 %v2856_v2, 16  ;;  %v7204_v3 = vld [vmem:[#allocation2 + $0x8c] sm:$0x1] }
 0x1a0   : > { %v3139_v15 = vshll.u32 %v2856_v2, 16  ;;  %v9290_v49 = vcombine.low %v8654_v24, %v8678_v29 }
 0x1a1   : > { %v3085_v21 = vrot.slane %v3083_v53, 5  ;;  %v3127_v5 = vrot.slane %v3125_v1, 4  ;;  %v3118_v53 = vor.u32 %v3117_v14, %v3114_v40  ;;  %v3138_v55 = vrot.slane %v3136_v44, 4  ;;  %v2862_v14 = vld [vmem:[#allocation2 + $0xa8] sm:$0xf] }
 0x1a2   : > { %v3141_v57 = vrot.slane %v3139_v15, 5  ;;  %v7207_v15 = vld [vmem:[#allocation2 + $0x98] sm:$0x1] }
 0x1a3   : > { %v3086_v58 = vsel %vm7363_vm8, %v3081_v23, %v3085_v21  ;;  %v9291_v21 = vcombine.low %v8662_v62, %v8682_v0  ;;  %v3119_v24 = vrot.slane %v3118_v53, 4  ;;  %v3155_v8 = vshll.u32 %v7207_v15, 16  ;;  %v2865_v62 = vld [vmem:[#allocation2 + $0xb4] sm:$0xf] }
 0x1a5   : > { %v3157_v53 = vrot.slane %v3155_v8, 5 }
 0x1a6   : > { %6663 = vmatmul.mubr.msk.bf16.gmra.mrb[20].mxu1 %vm1497_vm4, %v7147_v11  ;;  %6817 = vmatmul.mubr.msk.bf16.gmra.mrb[4].mxu0 %vm1497_vm4, %v6240_v30  ;;  %v3076_v11 = vsel %vm7363_vm8, %v3071_v6, %v3075_v54  ;;  %v7206_v30 = vld [vmem:[#allocation2 + $0xa0] sm:$0xf]  ;;  %v3128_v54 = vor.u32 %v3127_v5, %v8948_v63  ;;  %v8961_v6 = vrot.slane %v3145_v39, 5  ;;  %v3142_v5 = vor.u32 %v3141_v57, %v3138_v55  ;;  %v7210_v57 = vld [vmem:[#allocation2 + $0xb8] sm:$0xf] }
 0x1a7   : > { %6666 = vmatprep.mubr.msk.bf16.mxu1 %vm1497_vm4, %v7148_v34  ;;  %6820 = vmatprep.mubr.msk.bf16.mxu0 %vm1497_vm4, %v6241_v16  ;;  %v3131_v34 = vshll.u32 %v7204_v3, 16  ;;  %v3149_v16 = vshrl.u32 %v7205_v42, 16  ;;  %v3169_v50 = vshll.u32 %v7206_v30, 16  ;;  %v3173_v33 = vshrl.u32 %v7206_v30, 16 }
 0x1a8   : > { %v6081_v1 = vcombine.low %v3076_v11, %v3086_v58  ;;  %v3129_v29 = vrot.slane %v3128_v54, 4  ;;  %v7208_v58 = vld [vmem:[#allocation2 + $0xa4] sm:$0x1]  ;;  %v3187_v42 = vshll.u32 %v2862_v14, 16  ;;  %v3124_v30 = vsel %vm7363_vm8, %v3119_v24, %v8948_v63 }
 0x1a9   : > { %v3133_v2 = vrot.slane %v3131_v34, 5  ;;  %v3151_v23 = vrot.slane %v3149_v16, 4  ;;  %v8967_v40 = vrot.slane %v3169_v50, 5  ;;  %v3175_v44 = vrot.slane %v3173_v33, 4  ;;  %v7209_v16 = vld [vmem:[#allocation2 + $0xac] sm:$0xf] }
 0x1aa   : > { %v3179_v3 = vshll.u32 %v7208_v58, 16  ;;  %v3184_v34 = vshrl.u32 %v2862_v14, 16  ;;  %v3143_v33 = vrot.slane %v3142_v5, 4  ;;  %v3208_v54 = vshrl.u32 %v2865_v62, 16 }
 0x1ab   : > { %v3152_v11 = vor.u32 %v3151_v23, %v8961_v6  ;;  %v3176_v39 = vor.u32 %v3175_v44, %v8967_v40  ;;  %v3134_v50 = vsel %vm7363_vm8, %v3129_v29, %v3133_v2  ;;  %v3211_v55 = vshll.u32 %v2865_v62, 16  ;;  %v7212_v62 = vld [vmem:[#allocation2 + $0xc4] sm:$0xf] }
 0x1ac   : > { %v9292_v23 = vcombine.low %v8691_v35, %v8705_v45  ;;  %v6083_v24 = vcombine.low %v3124_v30, %v3134_v50  ;;  %v3210_v29 = vrot.slane %v3208_v54, 4  ;;  %v2868_v45 = vld [vmem:[#allocation2 + $0xc0] sm:$0xf]  ;;  %v3148_v8 = vsel %vm7363_vm8, %v3143_v33, %v8961_v6 }
 0x1ad   : > { %v3177_v2 = vrot.slane %v3176_v39, 4  ;;  %v3213_v5 = vrot.slane %v3211_v55, 5  ;;  %v3232_v6 = vshrl.u32 %v2868_v45, 16  ;;  %v3245_v39 = vshrl.u32 %v7212_v62, 16 }
 0x1ae   : > { %6667 = vmatmul.mubr.msk.bf16.gmra.mrb[24].mxu1 %vm1497_vm4, %v7149_v22  ;;  %6821 = vmatmul.mubr.msk.bf16.gmra.mrb[8].mxu0 %vm1497_vm4, %v9290_v49  ;;  %v3162_v22 = vrot.slane %v3160_v48, 4  ;;  %v3193_v48 = vshll.u32 %v7209_v16, 16  ;;  %v3217_v49 = vshll.u32 %v7210_v57, 16 }
 0x1af   : > { %6670 = vmatprep.mubr.msk.bf16.mxu1 %vm1497_vm4, %v7150_v7  ;;  %6824 = vmatprep.mubr.msk.bf16.mxu0 %vm1497_vm4, %v9291_v21  ;;  %v3165_v7 = vrot.slane %v3163_v51, 5  ;;  %v3197_v51 = vshrl.u32 %v7209_v16, 16  ;;  %v3181_v21 = vrot.slane %v3179_v3, 5  ;;  %v3214_v16 = vor.u32 %v3213_v5, %v3210_v29 }
 0x1b0   : > { %v3195_v44 = vrot.slane %v3193_v48, 5  ;;  %v3219_v15 = vrot.slane %v3217_v49, 5  ;;  %v3234_v54 = vrot.slane %v3232_v6, 4  ;;  %v3247_v49 = vrot.slane %v3245_v39, 4 }
 0x1b1   : > { %v3166_v0 = vor.u32 %v3165_v7, %v3162_v22  ;;  %v3186_v22 = vrot.slane %v3184_v34, 4  ;;  %v3189_v7 = vrot.slane %v3187_v42, 5  ;;  %v3199_v14 = vrot.slane %v3197_v51, 4  ;;  %v7213_v51 = vld [vmem:[#allocation2 + $0xbc] sm:$0x1] }
 0x1b2   : > { %v3182_v58 = vsel %vm7363_vm8, %v3177_v2, %v3181_v21  ;;  %v3235_v42 = vshll.u32 %v2868_v45, 16 }
 0x1b3   : > { %v3167_v63 = vrot.slane %v3166_v0, 4  ;;  %v3190_v3 = vor.u32 %v3189_v7, %v3186_v22  ;;  %v3200_v34 = vor.u32 %v3199_v14, %v3195_v44  ;;  %v3241_v0 = vshll.u32 %v7212_v62, 16 }
 0x1b4   : > { %v3237_v55 = vrot.slane %v3235_v42, 5 }
 0x1b5   : > { %v3191_v50 = vrot.slane %v3190_v3, 4  ;;  %v3201_v33 = vrot.slane %v3200_v34, 4 }
 0x1b6   : > { %6671 = vmatmul.mubr.msk.bf16.gmra.mrb[28].mxu1 %vm1497_vm4, %v7151_v10  ;;  %v3221_v10 = vshrl.u32 %v7210_v57, 16  ;;  %6825 = vmatmul.mubr.msk.bf16.gmra.mrb[12].mxu0 %vm1497_vm4, %v9292_v23  ;;  %v3243_v57 = vrot.slane %v3241_v0, 5 }
 0x1b7   : > { %6692 = vmatprep.mubr.msk.bf16.mxu1 %vm1497_vm4, %v6081_v1  ;;  %v3153_v1 = vrot.slane %v3152_v11, 4  ;;  %6828 = vmatprep.mubr.msk.bf16.mxu0 %vm1497_vm4, %v6245_v20  ;;  %v3172_v20 = vsel %vm7363_vm8, %v3167_v63, %v8967_v40  ;;  %v3196_v61 = vsel %vm7363_vm8, %v3191_v50, %v3195_v44 }
 0x1b8   : > { %v3223_v35 = vrot.slane %v3221_v10, 4  ;;  %v6085_v30 = vcombine.low %v3172_v20, %v3182_v58  ;;  %v3215_v10 = vrot.slane %v3214_v16, 4  ;;  %v3248_v31 = vor.u32 %v3247_v49, %v3243_v57 }
 0x1b9   : > { %v3158_v11 = vsel %vm7363_vm8, %v3153_v1, %v3157_v53  ;;  %v3205_v53 = vrot.slane %v3203_v4, 5 }
 0x1ba   : > { %v3224_v48 = vor.u32 %v3223_v35, %v3219_v15  ;;  %v6084_v40 = vcombine.low %v3148_v8, %v3158_v11  ;;  %v3220_v21 = vsel %vm7363_vm8, %v3215_v10, %v3219_v15  ;;  %v3249_v44 = vrot.slane %v3248_v31, 4 }
 0x1bb   : > { %v3206_v13 = vsel %vm7363_vm8, %v3201_v33, %v3205_v53 }
 0x1bc   : > { %v3225_v23 = vrot.slane %v3224_v48, 4  ;;  %v6086_v7 = vcombine.low %v3196_v61, %v3206_v13 }
 0x1be   : > { %6693 = vmatmul.mubr.msk.bf16.vlgmr.msra.gmra.mrb[16].mxu1 %vm1497_vm4, %v8764_v27  ;;  %v3227_v27 = vshll.u32 %v7213_v51, 16  ;;  %6829 = vmatmul.mubr.msk.bf16.gmra.mrb[16].mxu0 %vm1497_vm4, %v6246_v12  ;;  %v3238_v12 = vor.u32 %v3237_v55, %v3234_v54 }
 0x1bf   : > { %6696 = vmatprep.mubr.msk.bf16.mxu1 %vm1497_vm4, %v6083_v24  ;;  %6832 = vmatprep.mubr.msk.bf16.mxu0 %vm1497_vm4, %v6247_v60  ;;  %v3251_v60 = vshll.u32 %v7214_v17, 16 }
 0x1c0   : > { %v3229_v1 = vrot.slane %v3227_v27, 5  ;;  %v3239_v2 = vrot.slane %v3238_v12, 4 }
 0x1c1   : > { %v3253_v14 = vrot.slane %v3251_v60, 5 }
 0x1c2   : > { %v3230_v22 = vsel %vm7363_vm8, %v3225_v23, %v3229_v1  ;;  %v3244_v24 = vsel %vm7363_vm8, %v3239_v2, %v3243_v57 }
 0x1c3   : > { %v6087_v63 = vcombine.low %v3220_v21, %v3230_v22  ;;  %v3254_v9 = vsel %vm7363_vm8, %v3249_v44, %v3253_v14 }
 0x1c4   : > { %v6088_v43 = vcombine.low %v3244_v24, %v3254_v9 }
 0x1c6   : > { %6697 = vmatmul.mubr.msk.bf16.gmra.mrb[20].mxu1 %vm1497_vm4, %v6084_v40  ;;  %6833 = vmatmul.mubr.msk.bf16.gmra.mrb[20].mxu0 %vm1497_vm4, %v6248_v19 }
 0x1c7   : > { %6700 = vmatprep.mubr.msk.bf16.mxu1 %vm1497_vm4, %v6085_v30  ;;  %6836 = vmatprep.mubr.msk.bf16.mxu0 %vm1497_vm4, %v6249_v46 }
 0x1ce   : > { %6701 = vmatmul.mubr.msk.bf16.gmra.mrb[24].mxu1 %vm1497_vm4, %v6086_v7  ;;  %6837 = vmatmul.mubr.msk.bf16.gmra.mrb[24].mxu0 %vm1497_vm4, %v6250_v56 }
 0x1cf   : > { %6704 = vmatprep.mubr.msk.bf16.mxu1 %vm1497_vm4, %v6087_v63  ;;  %6840 = vmatprep.mubr.msk.bf16.mxu0 %vm1497_vm4, %v6251_v25 }
 0x1d6   : > { %6705 = vmatmul.mubr.msk.bf16.gmra.mrb[28].mxu1 %vm1497_vm4, %v6088_v43  ;;  %6841 = vmatmul.mubr.msk.bf16.gmra.mrb[28].mxu0 %vm1497_vm4, %v6252_v37 }
 0x251   : > { %v6644_v32 = vpop.f32.mrb[0].mxu1 }
 0x252   : > { %v2664_v19 = vpop.f32.mrb[1].mxu1 }
 0x253   : > { %v6645_v47 = vpop.f32.mrb[2].mxu1 }
 0x254   : > { %v2667_v52 = vpop.f32.mrb[3].mxu1 }
 0x259   : > { %v6648_v46 = vpop.f32.mrb[4].mxu1 }
 0x25a   : > { %v2680_v59 = vpop.f32.mrb[5].mxu1 }
 0x25b   : > { %v6649_v41 = vpop.f32.mrb[6].mxu1 }
 0x25c   : > { %v2683_v56 = vpop.f32.mrb[7].mxu1 }
 0x261   : > { %v9044_v29 = vpop.f32.mrb[8].mxu1 }
 0x262   : > { %v9046_v28 = vpop.f32.mrb[9].mxu1 }
 0x263   : > { %v9048_v36 = vpop.f32.mrb[10].mxu1 }
 0x264   : > { %v9050_v25 = vpop.f32.mrb[11].mxu1 }
 0x269   : > { %v9052_v18 = vpop.f32.mrb[12].mxu1 }
 0x26a   : > { %v9054_v26 = vpop.f32.mrb[13].mxu1 }
 0x26b   : > { %v9056_v37 = vpop.f32.mrb[14].mxu1 }
 0x26c   : > { %v9058_v5 = vpop.f32.mrb[15].mxu1 }
 0x271   : > { %v6814_v15 = vpop.f32.mrb[0].mxu0 }
 0x272   : > { %v6846_v35 = vadd.f32 %v6814_v15, %v6644_v32  ;;  %v5430_v45 = vpop.f32.mrb[1].mxu0 }
 0x273   : > { %v6847_v8 = vadd.f32 %v5430_v45, %v2664_v19  ;;  %v6815_v11 = vpop.f32.mrb[2].mxu0 }
 0x274   : > { %5765 = vst.msk [vmem:[%s9064_s17 + $0x10] sm:$0xff] %vm1497_vm4, %v6846_v35  ;;  %v6848_v38 = vadd.f32 %v6815_v11, %v6645_v47  ;;  %v5433_v4 = vpop.f32.mrb[3].mxu0  ;;  %v5660_v3 = vmul.f32 %v6846_v35, %v6846_v35  ;;  %v5592_v39 = vsel %vm1497_vm4, %v6846_v35, 0.0 }
 0x275   : > { %v5658_v20 = vmul.f32 %v6847_v8, %v6847_v8  ;;  %5763 = vst.msk [vmem:[%s9064_s17] sm:$0xff] %vm1497_vm4, %v6847_v8  ;;  %v6849_v58 = vadd.f32 %v5433_v4, %v2667_v52  ;;  %v5589_v34 = vsel %vm1497_vm4, %v6847_v8, 0.0 }
 0x276   : > { %5766 = vst.msk [vmem:[%s9064_s17 + $0x18] sm:$0xff] %vm1497_vm4, %v6848_v38  ;;  %v5661_v62 = vmul.f32 %v6848_v38, %v6848_v38  ;;  %v5693_v33 = vsel %vm1497_vm4, %v5660_v3, 0.0  ;;  %v5594_v53 = vsel %vm1497_vm4, %v6848_v38, 0.0 }
 0x277   : > { %v5590_v6 = vsel %vm1497_vm4, %v6849_v58, 0.0  ;;  %v5659_v42 = vmul.f32 %v6849_v58, %v6849_v58  ;;  %5764 = vst.msk [vmem:[%s9064_s17 + $0x8] sm:$0xff] %vm1497_vm4, %v6849_v58  ;;  %v5690_v16 = vsel %vm1497_vm4, %v5658_v20, 0.0 }
 0x278   : > { %v5591_v0 = vadd.f32 %v5590_v6, %v5589_v34  ;;  %v5695_v57 = vsel %vm1497_vm4, %v5661_v62, 0.0 }
 0x279   : > { %v5691_v48 = vsel %vm1497_vm4, %v5659_v42, 0.0  ;;  %v6818_v51 = vpop.f32.mrb[4].mxu0 }
 0x27a   : > { %v5593_v27 = vadd.f32 %v5592_v39, %v5591_v0  ;;  %v5692_v40 = vadd.f32 %v5691_v48, %v5690_v16  ;;  %v6850_v30 = vadd.f32 %v6818_v51, %v6648_v46  ;;  %v5446_v50 = vpop.f32.mrb[5].mxu0 }
 0x27b   : > { %v6851_v54 = vadd.f32 %v5446_v50, %v2680_v59  ;;  %v6819_v55 = vpop.f32.mrb[6].mxu0 }
 0x27c   : > { %v5694_v49 = vadd.f32 %v5693_v33, %v5692_v40  ;;  %5769 = vst.msk [vmem:[%s9064_s17 + $0x30] sm:$0xff] %vm1497_vm4, %v6850_v30  ;;  %v5595_v10 = vadd.f32 %v5594_v53, %v5593_v27  ;;  %v5449_v23 = vpop.f32.mrb[7].mxu0  ;;  %v6852_v13 = vadd.f32 %v6819_v55, %v6649_v41  ;;  %v5664_v22 = vmul.f32 %v6850_v30, %v6850_v30 }
 0x27d   : > { %v5596_v1 = vsel %vm1497_vm4, %v6851_v54, 0.0  ;;  %v5662_v61 = vmul.f32 %v6851_v54, %v6851_v54  ;;  %5767 = vst.msk [vmem:[%s9064_s17 + $0x20] sm:$0xff] %vm1497_vm4, %v6851_v54  ;;  %v6853_v12 = vadd.f32 %v5449_v23, %v2683_v56  ;;  %v5600_v44 = vsel %vm1497_vm4, %v6850_v30, 0.0 }
 0x27e   : > { %v5597_v31 = vadd.f32 %v5596_v1, %v5595_v10  ;;  %v5696_v17 = vadd.f32 %v5695_v57, %v5694_v49  ;;  %5770 = vst.msk [vmem:[%s9064_s17 + $0x38] sm:$0xff] %vm1497_vm4, %v6852_v13  ;;  %v5665_v24 = vmul.f32 %v6852_v13, %v6852_v13  ;;  %v5602_v47 = vsel %vm1497_vm4, %v6852_v13, 0.0 }
 0x27f   : > { %v5697_v60 = vsel %vm1497_vm4, %v5662_v61, 0.0  ;;  %v5598_v21 = vsel %vm1497_vm4, %v6853_v12, 0.0  ;;  %5768 = vst.msk [vmem:[%s9064_s17 + $0x28] sm:$0xff] %vm1497_vm4, %v6853_v12  ;;  %v5663_v2 = vmul.f32 %v6853_v12, %v6853_v12  ;;  %v5701_v41 = vsel %vm1497_vm4, %v5664_v22, 0.0 }
 0x280   : > { %v5698_v7 = vadd.f32 %v5697_v60, %v5696_v17  ;;  %v5599_v63 = vadd.f32 %v5598_v21, %v5597_v31 }
 0x281   : > { %v6822_v14 = vpop.f32.mrb[8].mxu0  ;;  %v5699_v43 = vsel %vm1497_vm4, %v5663_v2, 0.0 }
 0x282   : > { %v5601_v9 = vadd.f32 %v5600_v44, %v5599_v63  ;;  %v6854_v32 = vadd.f32 %v6822_v14, %v9044_v29  ;;  %v5462_v19 = vpop.f32.mrb[9].mxu0  ;;  %v5700_v52 = vadd.f32 %v5699_v43, %v5698_v7 }
 0x283   : > { %v6855_v46 = vadd.f32 %v5462_v19, %v9046_v28  ;;  %v6823_v59 = vpop.f32.mrb[10].mxu0  ;;  %v5703_v28 = vsel %vm1497_vm4, %v5665_v24, 0.0 }
 0x284   : > { %5773 = vst.msk [vmem:[%s9064_s17 + $0x50] sm:$0xff] %vm1497_vm4, %v6854_v32  ;;  %v5603_v56 = vadd.f32 %v5602_v47, %v5601_v9  ;;  %v6856_v15 = vadd.f32 %v6823_v59, %v9048_v36  ;;  %v5465_v35 = vpop.f32.mrb[11].mxu0  ;;  %v5702_v45 = vadd.f32 %v5701_v41, %v5700_v52  ;;  %v5668_v3 = vmul.f32 %v6854_v32, %v6854_v32 }
 0x285   : > { %v5604_v29 = vsel %vm1497_vm4, %v6855_v46, 0.0  ;;  %v5666_v8 = vmul.f32 %v6855_v46, %v6855_v46  ;;  %5771 = vst.msk [vmem:[%s9064_s17 + $0x40] sm:$0xff] %vm1497_vm4, %v6855_v46  ;;  %v6857_v11 = vadd.f32 %v5465_v35, %v9050_v25  ;;  %v5608_v6 = vsel %vm1497_vm4, %v6854_v32, 0.0 }
 0x286   : > { %v5605_v38 = vadd.f32 %v5604_v29, %v5603_v56  ;;  %5774 = vst.msk [vmem:[%s9064_s17 + $0x58] sm:$0xff] %vm1497_vm4, %v6856_v15  ;;  %v5704_v4 = vadd.f32 %v5703_v28, %v5702_v45  ;;  %v5669_v0 = vmul.f32 %v6856_v15, %v6856_v15  ;;  %v5610_v51 = vsel %vm1497_vm4, %v6856_v15, 0.0 }
 0x287   : > { %v5705_v20 = vsel %vm1497_vm4, %v5666_v8, 0.0  ;;  %v5606_v58 = vsel %vm1497_vm4, %v6857_v11, 0.0  ;;  %v5667_v36 = vmul.f32 %v6857_v11, %v6857_v11  ;;  %5772 = vst.msk [vmem:[%s9064_s17 + $0x48] sm:$0xff] %vm1497_vm4, %v6857_v11  ;;  %v5709_v50 = vsel %vm1497_vm4, %v5668_v3, 0.0 }
 0x288   : > { %v5607_v34 = vadd.f32 %v5606_v58, %v5605_v38  ;;  %v5706_v42 = vadd.f32 %v5705_v20, %v5704_v4 }
 0x289   : > { %v5707_v25 = vsel %vm1497_vm4, %v5667_v36, 0.0  ;;  %v6826_v62 = vpop.f32.mrb[12].mxu0 }
 0x28a   : > { %v5609_v39 = vadd.f32 %v5608_v6, %v5607_v34  ;;  %v6858_v16 = vadd.f32 %v6826_v62, %v9052_v18  ;;  %v5478_v48 = vpop.f32.mrb[13].mxu0  ;;  %v5708_v27 = vadd.f32 %v5707_v25, %v5706_v42 }
 0x28b   : > { %v6859_v40 = vadd.f32 %v5478_v48, %v9054_v26  ;;  %v6827_v30 = vpop.f32.mrb[14].mxu0  ;;  %v5711_v26 = vsel %vm1497_vm4, %v5669_v0, 0.0 }
 0x28c   : > { %5777 = vst.msk [vmem:[%s9064_s17 + $0x70] sm:$0xff] %vm1497_vm4, %v6858_v16  ;;  %v5611_v33 = vadd.f32 %v5610_v51, %v5609_v39  ;;  %v6860_v53 = vadd.f32 %v6827_v30, %v9056_v37  ;;  %v5481_v54 = vpop.f32.mrb[15].mxu0  ;;  %v5710_v55 = vadd.f32 %v5709_v50, %v5708_v27  ;;  %v5672_v31 = vmul.f32 %v6858_v16, %v6858_v16 }
 0x28d   : > { %v5612_v18 = vsel %vm1497_vm4, %v6859_v40, 0.0  ;;  %v5670_v57 = vmul.f32 %v6859_v40, %v6859_v40  ;;  %5775 = vst.msk [vmem:[%s9064_s17 + $0x60] sm:$0xff] %vm1497_vm4, %v6859_v40  ;;  %v6861_v49 = vadd.f32 %v5481_v54, %v9058_v5  ;;  %v5616_v5 = vsel %vm1497_vm4, %v6858_v16, 0.0 }
 0x28e   : > { %v5613_v10 = vadd.f32 %v5612_v18, %v5611_v33  ;;  %5778 = vst.msk [vmem:[%s9064_s17 + $0x78] sm:$0xff] %vm1497_vm4, %v6860_v53  ;;  %v5712_v1 = vadd.f32 %v5711_v26, %v5710_v55  ;;  %v5673_v2 = vmul.f32 %v6860_v53, %v6860_v53  ;;  %v5618_v9 = vsel %vm1497_vm4, %v6860_v53, 0.0 }
 0x28f   : > { %v5713_v61 = vsel %vm1497_vm4, %v5670_v57, 0.0  ;;  %v5614_v37 = vsel %vm1497_vm4, %v6861_v49, 0.0  ;;  %v5671_v13 = vmul.f32 %v6861_v49, %v6861_v49  ;;  %5776 = vst.msk [vmem:[%s9064_s17 + $0x68] sm:$0xff] %vm1497_vm4, %v6861_v49  ;;  %v5717_v47 = vsel %vm1497_vm4, %v5672_v31, 0.0 }
 0x290   : > { %v5615_v17 = vadd.f32 %v5614_v37, %v5613_v10  ;;  %v5714_v21 = vadd.f32 %v5713_v61, %v5712_v1  ;;  %v5719_v45 = vsel %vm1497_vm4, %v5673_v2, 0.0 }
 0x291   : > { %v6694_v23 = vpop.f32.mrb[16].mxu1  ;;  %v5715_v22 = vsel %vm1497_vm4, %v5671_v13, 0.0  ;;  %v6830_v7 = vpop.f32.mrb[16].mxu0 }
 0x292   : > { %v3457_v12 = vpop.f32.mrb[17].mxu1  ;;  %v5617_v44 = vadd.f32 %v5616_v5, %v5615_v17  ;;  %v6862_v14 = vadd.f32 %v6830_v7, %v6694_v23  ;;  %v5494_v24 = vpop.f32.mrb[17].mxu0  ;;  %v5716_v43 = vadd.f32 %v5715_v22, %v5714_v21 }
 0x293   : > { %v6695_v60 = vpop.f32.mrb[18].mxu1  ;;  %v6863_v32 = vadd.f32 %v5494_v24, %v3457_v12  ;;  %v6831_v19 = vpop.f32.mrb[18].mxu0 }
 0x294   : > { %v3460_v63 = vpop.f32.mrb[19].mxu1  ;;  %5781 = vst.msk [vmem:[%s9064_s17 + $0x90] sm:$0xff] %vm1497_vm4, %v6862_v14  ;;  %v5619_v52 = vadd.f32 %v5618_v9, %v5617_v44  ;;  %v6864_v46 = vadd.f32 %v6831_v19, %v6695_v60  ;;  %v5497_v59 = vpop.f32.mrb[19].mxu0  ;;  %v5718_v41 = vadd.f32 %v5717_v47, %v5716_v43  ;;  %v5676_v58 = vmul.f32 %v6862_v14, %v6862_v14 }
 0x295   : > { %v5620_v56 = vsel %vm1497_vm4, %v6863_v32, 0.0  ;;  %v5674_v15 = vmul.f32 %v6863_v32, %v6863_v32  ;;  %5779 = vst.msk [vmem:[%s9064_s17 + $0x80] sm:$0xff] %vm1497_vm4, %v6863_v32  ;;  %v6865_v35 = vadd.f32 %v5497_v59, %v3460_v63  ;;  %v5624_v34 = vsel %vm1497_vm4, %v6862_v14, 0.0 }
 0x296   : > { %v5621_v29 = vadd.f32 %v5620_v56, %v5619_v52  ;;  %5782 = vst.msk [vmem:[%s9064_s17 + $0x98] sm:$0xff] %vm1497_vm4, %v6864_v46  ;;  %v5720_v11 = vadd.f32 %v5719_v45, %v5718_v41  ;;  %v5677_v0 = vmul.f32 %v6864_v46, %v6864_v46  ;;  %v5626_v51 = vsel %vm1497_vm4, %v6864_v46, 0.0 }
 0x297   : > { %v5721_v28 = vsel %vm1497_vm4, %v5674_v15, 0.0  ;;  %v5622_v38 = vsel %vm1497_vm4, %v6865_v35, 0.0  ;;  %v5675_v4 = vmul.f32 %v6865_v35, %v6865_v35  ;;  %5780 = vst.msk [vmem:[%s9064_s17 + $0x88] sm:$0xff] %vm1497_vm4, %v6865_v35  ;;  %v5725_v50 = vsel %vm1497_vm4, %v5676_v58, 0.0 }
 0x298   : > { %v5623_v36 = vadd.f32 %v5622_v38, %v5621_v29  ;;  %v5722_v6 = vadd.f32 %v5721_v28, %v5720_v11  ;;  %v5727_v26 = vsel %vm1497_vm4, %v5677_v0, 0.0 }
 0x299   : > { %v6698_v8 = vpop.f32.mrb[20].mxu1  ;;  %v5723_v42 = vsel %vm1497_vm4, %v5675_v4, 0.0  ;;  %v6834_v25 = vpop.f32.mrb[20].mxu0 }
 0x29a   : > { %v3473_v20 = vpop.f32.mrb[21].mxu1  ;;  %v5625_v39 = vadd.f32 %v5624_v34, %v5623_v36  ;;  %v6866_v16 = vadd.f32 %v6834_v25, %v6698_v8  ;;  %v5510_v48 = vpop.f32.mrb[21].mxu0  ;;  %v5724_v27 = vadd.f32 %v5723_v42, %v5722_v6 }
 0x29b   : > { %v6699_v3 = vpop.f32.mrb[22].mxu1  ;;  %v6867_v40 = vadd.f32 %v5510_v48, %v3473_v20  ;;  %v6835_v30 = vpop.f32.mrb[22].mxu0 }
 0x29c   : > { %v3476_v62 = vpop.f32.mrb[23].mxu1  ;;  %5785 = vst.msk [vmem:[%s9064_s17 + $0xb0] sm:$0xff] %vm1497_vm4, %v6866_v16  ;;  %v5627_v33 = vadd.f32 %v5626_v51, %v5625_v39  ;;  %v6868_v53 = vadd.f32 %v6835_v30, %v6699_v3  ;;  %v5513_v54 = vpop.f32.mrb[23].mxu0  ;;  %v5726_v55 = vadd.f32 %v5725_v50, %v5724_v27  ;;  %v5680_v31 = vmul.f32 %v6866_v16, %v6866_v16 }
 0x29d   : > { %v5628_v18 = vsel %vm1497_vm4, %v6867_v40, 0.0  ;;  %v5678_v57 = vmul.f32 %v6867_v40, %v6867_v40  ;;  %5783 = vst.msk [vmem:[%s9064_s17 + $0xa0] sm:$0xff] %vm1497_vm4, %v6867_v40  ;;  %v6869_v49 = vadd.f32 %v5513_v54, %v3476_v62  ;;  %v5632_v5 = vsel %vm1497_vm4, %v6866_v16, 0.0 }
 0x29e   : > { %v5629_v10 = vadd.f32 %v5628_v18, %v5627_v33  ;;  %5786 = vst.msk [vmem:[%s9064_s17 + $0xb8] sm:$0xff] %vm1497_vm4, %v6868_v53  ;;  %v5728_v1 = vadd.f32 %v5727_v26, %v5726_v55  ;;  %v5681_v2 = vmul.f32 %v6868_v53, %v6868_v53  ;;  %v5634_v9 = vsel %vm1497_vm4, %v6868_v53, 0.0 }
 0x29f   : > { %v5729_v61 = vsel %vm1497_vm4, %v5678_v57, 0.0  ;;  %v5630_v37 = vsel %vm1497_vm4, %v6869_v49, 0.0  ;;  %v5679_v13 = vmul.f32 %v6869_v49, %v6869_v49  ;;  %5784 = vst.msk [vmem:[%s9064_s17 + $0xa8] sm:$0xff] %vm1497_vm4, %v6869_v49  ;;  %v5733_v47 = vsel %vm1497_vm4, %v5680_v31, 0.0 }
 0x2a0   : > { %v5631_v17 = vadd.f32 %v5630_v37, %v5629_v10  ;;  %v5730_v21 = vadd.f32 %v5729_v61, %v5728_v1  ;;  %v5735_v45 = vsel %vm1497_vm4, %v5681_v2, 0.0 }
 0x2a1   : > { %v6702_v23 = vpop.f32.mrb[24].mxu1  ;;  %v5731_v22 = vsel %vm1497_vm4, %v5679_v13, 0.0  ;;  %v6838_v7 = vpop.f32.mrb[24].mxu0 }
 0x2a2   : > { %v3489_v12 = vpop.f32.mrb[25].mxu1  ;;  %v5633_v44 = vadd.f32 %v5632_v5, %v5631_v17  ;;  %v6870_v14 = vadd.f32 %v6838_v7, %v6702_v23  ;;  %v5526_v24 = vpop.f32.mrb[25].mxu0  ;;  %v5732_v43 = vadd.f32 %v5731_v22, %v5730_v21 }
 0x2a3   : > { %v6703_v60 = vpop.f32.mrb[26].mxu1  ;;  %v6871_v32 = vadd.f32 %v5526_v24, %v3489_v12  ;;  %v6839_v19 = vpop.f32.mrb[26].mxu0 }
 0x2a4   : > { %v3492_v63 = vpop.f32.mrb[27].mxu1  ;;  %5789 = vst.msk [vmem:[%s9064_s17 + $0xd0] sm:$0xff] %vm1497_vm4, %v6870_v14  ;;  %v5635_v52 = vadd.f32 %v5634_v9, %v5633_v44  ;;  %v6872_v46 = vadd.f32 %v6839_v19, %v6703_v60  ;;  %v5529_v59 = vpop.f32.mrb[27].mxu0  ;;  %v5734_v41 = vadd.f32 %v5733_v47, %v5732_v43  ;;  %v5684_v58 = vmul.f32 %v6870_v14, %v6870_v14 }
 0x2a5   : > { %v5636_v56 = vsel %vm1497_vm4, %v6871_v32, 0.0  ;;  %v5682_v15 = vmul.f32 %v6871_v32, %v6871_v32  ;;  %5787 = vst.msk [vmem:[%s9064_s17 + $0xc0] sm:$0xff] %vm1497_vm4, %v6871_v32  ;;  %v6873_v35 = vadd.f32 %v5529_v59, %v3492_v63  ;;  %v5640_v34 = vsel %vm1497_vm4, %v6870_v14, 0.0 }
 0x2a6   : > { %v5637_v29 = vadd.f32 %v5636_v56, %v5635_v52  ;;  %5790 = vst.msk [vmem:[%s9064_s17 + $0xd8] sm:$0xff] %vm1497_vm4, %v6872_v46  ;;  %v5736_v11 = vadd.f32 %v5735_v45, %v5734_v41  ;;  %v5685_v0 = vmul.f32 %v6872_v46, %v6872_v46  ;;  %v5642_v51 = vsel %vm1497_vm4, %v6872_v46, 0.0 }
 0x2a7   : > { %v5737_v28 = vsel %vm1497_vm4, %v5682_v15, 0.0  ;;  %v5638_v38 = vsel %vm1497_vm4, %v6873_v35, 0.0  ;;  %v5683_v4 = vmul.f32 %v6873_v35, %v6873_v35  ;;  %5788 = vst.msk [vmem:[%s9064_s17 + $0xc8] sm:$0xff] %vm1497_vm4, %v6873_v35  ;;  %v5741_v50 = vsel %vm1497_vm4, %v5684_v58, 0.0 }
 0x2a8   : > { %v5639_v36 = vadd.f32 %v5638_v38, %v5637_v29  ;;  %v5738_v6 = vadd.f32 %v5737_v28, %v5736_v11  ;;  %v5743_v26 = vsel %vm1497_vm4, %v5685_v0, 0.0 }
 0x2a9   : > { %v6706_v8 = vpop.f32.mrb[28].mxu1  ;;  %v5739_v42 = vsel %vm1497_vm4, %v5683_v4, 0.0  ;;  %v6842_v25 = vpop.f32.mrb[28].mxu0 }
 0x2aa   : > { %v3505_v20 = vpop.f32.mrb[29].mxu1  ;;  %v5641_v39 = vadd.f32 %v5640_v34, %v5639_v36  ;;  %v6874_v16 = vadd.f32 %v6842_v25, %v6706_v8  ;;  %v5542_v48 = vpop.f32.mrb[29].mxu0  ;;  %v5740_v27 = vadd.f32 %v5739_v42, %v5738_v6 }
 0x2ab   : > { %v6707_v3 = vpop.f32.mrb[30].mxu1  ;;  %v6875_v40 = vadd.f32 %v5542_v48, %v3505_v20  ;;  %v6843_v30 = vpop.f32.mrb[30].mxu0 }
 0x2ac   : > { %v3508_v62 = vpop.f32.mrb[31].mxu1  ;;  %5793 = vst.msk [vmem:[%s9064_s17 + $0xf0] sm:$0xff] %vm1497_vm4, %v6874_v16  ;;  %v5643_v33 = vadd.f32 %v5642_v51, %v5641_v39  ;;  %v6876_v53 = vadd.f32 %v6843_v30, %v6707_v3  ;;  %v5545_v54 = vpop.f32.mrb[31].mxu0  ;;  %v5742_v55 = vadd.f32 %v5741_v50, %v5740_v27  ;;  %v5688_v13 = vmul.f32 %v6874_v16, %v6874_v16 }
 0x2ad   : > { %v5644_v18 = vsel %vm1497_vm4, %v6875_v40, 0.0  ;;  %v5686_v57 = vmul.f32 %v6875_v40, %v6875_v40  ;;  %5791 = vst.msk [vmem:[%s9064_s17 + $0xe0] sm:$0xff] %vm1497_vm4, %v6875_v40  ;;  %v6877_v49 = vadd.f32 %v5545_v54, %v3508_v62  ;;  %v5648_v31 = vsel %vm1497_vm4, %v6874_v16, 0.0 }
 0x2ae   : > { %v5645_v10 = vadd.f32 %v5644_v18, %v5643_v33  ;;  %5794 = vst.msk [vmem:[%s9064_s17 + $0xf8] sm:$0xff] %vm1497_vm4, %v6876_v53  ;;  %v5744_v23 = vadd.f32 %v5743_v26, %v5742_v55  ;;  %v5689_v5 = vmul.f32 %v6876_v53, %v6876_v53  ;;  %v5650_v22 = vsel %vm1497_vm4, %v6876_v53, 0.0 }
 0x2af   : > { %v5745_v1 = vsel %vm1497_vm4, %v5686_v57, 0.0  ;;  %v5646_v61 = vsel %vm1497_vm4, %v6877_v49, 0.0  ;;  %v5687_v37 = vmul.f32 %v6877_v49, %v6877_v49  ;;  %5792 = vst.msk [vmem:[%s9064_s17 + $0xe8] sm:$0xff] %vm1497_vm4, %v6877_v49  ;;  %v5749_v63 = vsel %vm1497_vm4, %v5688_v13, 0.0 }
 0x2b0   : > { %v5647_v12 = vadd.f32 %v5646_v61, %v5645_v10  ;;  %v5746_v17 = vadd.f32 %v5745_v1, %v5744_v23  ;;  %v5751_v14 = vsel %vm1497_vm4, %v5689_v5, 0.0 }
 0x2b1   : > { %v5747_v60 = vsel %vm1497_vm4, %v5687_v37, 0.0 }
 0x2b2   : > { %v5649_v21 = vadd.f32 %v5648_v31, %v5647_v12  ;;  %v5748_v7 = vadd.f32 %v5747_v60, %v5746_v17 }
 0x2b4   : > { %v5651_v2 = vadd.f32 %v5650_v22, %v5649_v21  ;;  %v5750_v44 = vadd.f32 %v5749_v63, %v5748_v7 }
 0x2b6   : > { %v5652_v24 = vrot.slane %v5651_v2, 4  ;;  %v5752_v9 = vadd.f32 %v5751_v14, %v5750_v44 }
 0x2b8   : > { %v5653_v43 = vadd.f32 %v5652_v24, %v5651_v2  ;;  %v5753_v32 = vrot.slane %v5752_v9, 4 }
 0x2ba   : > { %v5654_v19 = vrot.slane %v5653_v43, 2  ;;  %v5754_v47 = vadd.f32 %v5753_v32, %v5752_v9 }
 0x2bc   : > { %v5655_v52 = vadd.f32 %v5654_v19, %v5653_v43  ;;  %v5755_v46 = vrot.slane %v5754_v47, 2 }
 0x2be   : > { %v5656_v59 = vrot.slane %v5655_v52, 1  ;;  %v5756_v41 = vadd.f32 %v5755_v46, %v5754_v47 }
 0x2c0   : > { %v5757_v56 = vrot.slane %v5756_v41, 1  ;;  %v5657_v15 = vadd.f32 %v5656_v59, %v5655_v52 }
 0x2c2   : > { %v5758_v35 = vadd.f32 %v5757_v56, %v5756_v41 }
 0x2c4   : > { %v5760_v45 = vsel %vm5759_vm15, %v5657_v15, %v5758_v35 }
 0x2c5   : > { %5762 = vst.msk [vmem:[%s235_s23] sm:$0x3] %vm5761_vm0, %v5760_v45 }
 0x2c6 PF: > { %s16_s18 = sadd.s32 1, %s7221_s18  }
 0x2c7   : > { %p13_p4 = scmp.ge.s32.totalorder %s16_s18, 4  }
 0x2c9   :  { %15 = sbr.rel (!%p13_p4) target bundleno = 1 (0x1), region = 80 }

</bundles_post_ra>
